<compile_context>
chip_gen: v5e
topology: v5e:2x2
jax: 0.10.0
libtpu: 0.0.40
codegen_flags: <defaults>
</compile_context>

<pallas_src>
import functools

import jax
import jax.numpy as jnp
from jax.experimental import pallas as pl
from jax.experimental.pallas import tpu as pltpu

BN_EPS = 1e-5


def _round_up(c, m=128):
    return ((c + m - 1) // m) * m


# ---------------------------------------------------------------------------
# Fused SingleConv kernel:
#   [optional 1x2x2 max-pool] + [optional previous BN scale/shift + ReLU]
#   + spatial zero-pad (into VMEM scratch, once per sample), then per depth
#   slice one im2col MXU matmul, plus running per-channel sum / sumsq.
# ---------------------------------------------------------------------------
def _conv_bn_stats_kernel(x_ref, w_ref, scale_ref, shift_ref,   # inputs
                          y_ref, stats_ref,                      # outputs
                          xpad_ref,                              # VMEM scratch
                          *, pool, fuse_act, mxu_dtype):
    # x_ref     : (1, D, Hin, Win, Cx)    whole input sample (resident across d)
    # w_ref     : (27*Cin, Cpad)          weight slab, (kd,kh,kw) major, ci minor
    # scale_ref : (1, Cin)                fused input-side BN scale (iff fuse_act)
    # shift_ref : (1, Cin)                fused input-side BN shift (iff fuse_act)
    # y_ref     : (1, 1, Hp, Wp, Cpad)    conv output (pre-BN) for depth d
    # stats_ref : (1, 2, Cpad)            running [sum, sum_sq] over (d, h, w)
    # xpad_ref  : (D+2, Hp+2, Wp+2, Cin)  zero-padded pooled/activated sample
    d = pl.program_id(1)
    depth = x_ref.shape[1]
    hin = x_ref.shape[2]
    _, _, hp, wp, cpad = y_ref.shape
    cin = w_ref.shape[0] // 27

    # ---- once per sample: build the padded (pooled / activated) input -------
    @pl.when(d == 0)
    def _fill():
        xpad_ref[...] = jnp.zeros_like(xpad_ref)
        xin = x_ref[0, :, :, :, :cin]                      # (D, Hin, Win, Cin)
        if pool:
            a = xin.reshape(depth, hin, wp, 2, cin)        # pool along W
            xin = jnp.maximum(a[:, :, :, 0, :], a[:, :, :, 1, :])
            b = xin.reshape(depth, hp, 2, wp, cin)         # pool along H
            xin = jnp.maximum(b[:, :, 0, :, :], b[:, :, 1, :, :])
        if fuse_act:                                       # previous BN + ReLU
            xin = jnp.maximum(xin * scale_ref[...] + shift_ref[...], 0.0)
        xpad_ref[1:depth + 1, 1:hp + 1, 1:wp + 1, :] = xin.astype(xpad_ref.dtype)

    # ---- per depth slice: im2col + ONE MXU matmul ----------------------------
    vol = xpad_ref[pl.ds(d, 3), :, :, :]                   # (3, Hp+2, Wp+2, Cin)
    pieces = []
    for kd in range(3):
        plane = vol[kd]
        for kh in range(3):
            for kw in range(3):
                pieces.append(plane[kh:kh + hp, kw:kw + wp, :])
    patch = jnp.concatenate(pieces, axis=-1).reshape(hp * wp, 27 * cin)

    acc = jnp.dot(patch.astype(mxu_dtype), w_ref[...].astype(mxu_dtype),
                  preferred_element_type=jnp.float32)      # (Hp*Wp, Cpad) f32

    y_ref[0, 0] = acc.reshape(hp, wp, cpad).astype(y_ref.dtype)

    # ---- running BatchNorm statistics (reduced over d in-kernel) ------------
    stat = jnp.concatenate([jnp.sum(acc, axis=0, keepdims=True),
                            jnp.sum(acc * acc, axis=0, keepdims=True)], axis=0)

    @pl.when(d == 0)
    def _init_stats():
        stats_ref[0] = stat

    @pl.when(d != 0)
    def _acc_stats():
        stats_ref[0] = stats_ref[0] + stat


def _fused_single_conv(x, w_slab, scale, shift, *, pool, fuse_act, hp, wp,
                       out_dtype, mxu_dtype):
    n, depth, hin, win, cx = x.shape
    k, cpad = w_slab.shape
    cin = k // 27
    kernel = functools.partial(_conv_bn_stats_kernel, pool=pool,
                               fuse_act=fuse_act, mxu_dtype=mxu_dtype)
    return pl.pallas_call(
        kernel,
        out_shape=(jax.ShapeDtypeStruct((n, depth, hp, wp, cpad), out_dtype),
                   jax.ShapeDtypeStruct((n, 2, cpad), jnp.float32)),
        grid=(n, depth),
        in_specs=[
            pl.BlockSpec((1, depth, hin, win, cx), lambda i, j: (i, 0, 0, 0, 0)),
            pl.BlockSpec((k, cpad), lambda i, j: (0, 0)),
            pl.BlockSpec((1, cin), lambda i, j: (0, 0)),
            pl.BlockSpec((1, cin), lambda i, j: (0, 0)),
        ],
        out_specs=(
            pl.BlockSpec((1, 1, hp, wp, cpad), lambda i, j: (i, j, 0, 0, 0)),
            pl.BlockSpec((1, 2, cpad), lambda i, j: (i, 0, 0)),
        ),
        scratch_shapes=[pltpu.VMEM((depth + 2, hp + 2, wp + 2, cin), jnp.float32)],
        compiler_params=pltpu.CompilerParams(
            dimension_semantics=("parallel", "arbitrary"),
            vmem_limit_bytes=40 * 1024 * 1024),
    )(x, w_slab, scale, shift)


# ---------------------------------------------------------------------------
# Final BatchNorm + ReLU (and drop the channel padding).
# ---------------------------------------------------------------------------
def _bn_relu_kernel(y_ref, scale_ref, shift_ref, o_ref):
    cout = o_ref.shape[-1]
    y = y_ref[...].astype(jnp.float32)
    z = jnp.maximum(y * scale_ref[...] + shift_ref[...], 0.0)
    o_ref[...] = z[..., :cout].astype(o_ref.dtype)


def _bn_relu(y, scale, shift, cout):
    n, depth, hp, wp, cpad = y.shape
    return pl.pallas_call(
        _bn_relu_kernel,
        out_shape=jax.ShapeDtypeStruct((n, depth, hp, wp, cout), jnp.float32),
        grid=(n,),
        in_specs=[pl.BlockSpec((1, depth, hp, wp, cpad), lambda i: (i, 0, 0, 0, 0)),
                  pl.BlockSpec((1, cpad), lambda i: (0, 0)),
                  pl.BlockSpec((1, cpad), lambda i: (0, 0))],
        out_specs=pl.BlockSpec((1, depth, hp, wp, cout), lambda i: (i, 0, 0, 0, 0)),
        compiler_params=pltpu.CompilerParams(dimension_semantics=("parallel",)),
    )(y, scale, shift)


# ---------------------------------------------------------------------------
# Plain-JAX glue: weight slab packing, BN affine from the kernel's stats.
# ---------------------------------------------------------------------------
def _weight_slab(w):
    # PyTorch OIDHW (Cout, Cin, 3,3,3) -> (27*Cin, Cpad), (kd,kh,kw) major, ci minor.
    cout, cin = w.shape[0], w.shape[1]
    cpad = _round_up(cout)
    slab = jnp.transpose(w, (2, 3, 4, 1, 0)).reshape(27 * cin, cout)
    return jnp.pad(slab, ((0, 0), (0, cpad - cout)))


def _bn_affine(stats, gamma, beta, count):
    # stats: (N, 2, Cpad) with [sum, sum_sq].  Training-mode biased variance.
    cpad = stats.shape[-1]
    s = jnp.sum(stats, axis=0)
    mean = s[0] / count
    var = jnp.maximum(s[1] / count - mean * mean, 0.0)
    g = jnp.pad(gamma, (0, cpad - gamma.shape[0]))   # padded channels: scale=0
    b = jnp.pad(beta, (0, cpad - beta.shape[0]))     # padded channels: shift=0
    scale = g * jax.lax.rsqrt(var + BN_EPS)
    shift = b - mean * scale
    return scale.reshape(1, cpad), shift.reshape(1, cpad)


# ---------------------------------------------------------------------------
# Encode forward: pool -> conv1(BN,ReLU) -> conv2(BN,ReLU)
# BN uses training-mode batch statistics (biased var, eps=1e-5); running-stat
# (momentum) updates are not modeled (forward-only).
# ---------------------------------------------------------------------------
@functools.partial(jax.jit, static_argnames=("pooling", "use_bf16"))
def encode_forward(x_ncdhw, params, pooling=True, use_bf16=False):
    x = jnp.transpose(x_ncdhw, (0, 2, 3, 4, 1))            # NCDHW -> NDHWC (glue)
    n, depth, h, w, cin = x.shape
    if pooling:
        assert h % 2 == 0 and w % 2 == 0, "MaxPool3d(1,2,2) needs even H and W"
        hp, wp = h // 2, w // 2
    else:
        hp, wp = h, w

    mxu_dtype = jnp.bfloat16 if use_bf16 else jnp.float32
    act_dtype = jnp.bfloat16 if use_bf16 else jnp.float32

    w1s = _weight_slab(params["w1"])
    w2s = _weight_slab(params["w2"])
    c1 = params["w1"].shape[0]
    c2 = params["w2"].shape[0]
    count = n * depth * hp * wp

    # conv1: fused max-pool, no input-side activation.
    dummy = jnp.zeros((1, cin), jnp.float32)
    y1, st1 = _fused_single_conv(x, w1s, dummy, dummy, pool=pooling,
                                 fuse_act=False, hp=hp, wp=wp,
                                 out_dtype=act_dtype, mxu_dtype=mxu_dtype)
    scale1, shift1 = _bn_affine(st1, params["g1"], params["b1"], count)

    # conv2: BN1 + ReLU fused into the conv kernel's input fill.
    y2, st2 = _fused_single_conv(y1, w2s, scale1[:, :c1], shift1[:, :c1],
                                 pool=False, fuse_act=True, hp=hp, wp=wp,
                                 out_dtype=act_dtype, mxu_dtype=mxu_dtype)
    scale2, shift2 = _bn_affine(st2, params["g2"], params["b2"], count)

    out = _bn_relu(y2, scale2, shift2, cout=c2)            # final BN2 + ReLU
    return jnp.transpose(out, (0, 4, 1, 2, 3))             # NDHWC -> NCDHW (glue)


def init_params(key, in_channels, out_channels):
    # DoubleConv(encoder=True): conv1: Cin -> max(Cout//2, Cin); conv2: -> Cout
    c1_out = out_channels // 2
    if c1_out < in_channels:
        c1_out = in_channels
    k1, k2 = jax.random.split(key)

    def conv_w(k, co, ci):
        bound = 1.0 / jnp.sqrt(ci * 27.0)
        return jax.random.uniform(k, (co, ci, 3, 3, 3), jnp.float32, -bound, bound)

    return dict(
        w1=conv_w(k1, c1_out, in_channels),
        g1=jnp.ones((c1_out,), jnp.float32), b1=jnp.zeros((c1_out,), jnp.float32),
        w2=conv_w(k2, out_channels, c1_out),
        g2=jnp.ones((out_channels,), jnp.float32),
        b2=jnp.zeros((out_channels,), jnp.float32),
    )


# ---------------------------------------------------------------------------
# Pure-JAX reference (mirrors PyTorch semantics) for validation.
# ---------------------------------------------------------------------------
def reference_forward(x, params, pooling=True, eps=BN_EPS):
    if pooling:
        n, c, d, h, w = x.shape
        x = x.reshape(n, c, d, h // 2, 2, w // 2, 2).max(axis=(4, 6))

    def single_conv(x, w, gamma, beta):
        y = jax.lax.conv_general_dilated(
            x, w, window_strides=(1, 1, 1),
            padding=((1, 1), (1, 1), (1, 1)),
            dimension_numbers=("NCDHW", "OIDHW", "NCDHW"),
            precision=jax.lax.Precision.HIGHEST)
        mean = y.mean(axis=(0, 2, 3, 4), keepdims=True)
        var = y.var(axis=(0, 2, 3, 4), keepdims=True)
        y = (y - mean) / jnp.sqrt(var + eps)
        y = y * gamma.reshape(1, -1, 1, 1, 1) + beta.reshape(1, -1, 1, 1, 1)
        return jnp.maximum(y, 0.0)

    x = single_conv(x, params["w1"], params["g1"], params["b1"])
    x = single_conv(x, params["w2"], params["g2"], params["b2"])
    return x


if __name__ == "__main__":
    key = jax.random.PRNGKey(0)
    kx, kp = jax.random.split(key)

    N, Cin, Cout, D, H, W = 2, 4, 8, 4, 16, 16
    x = jax.random.normal(kx, (N, Cin, D, H, W), jnp.float32)
    params = init_params(kp, Cin, Cout)

    ref = reference_forward(x, params, pooling=True)

    # f32 path (accuracy check).
    out = jax.block_until_ready(encode_forward(x, params, pooling=True))
    assert out.shape == (N, Cout, D, H // 2, W // 2), out.shape
    err = float(jnp.max(jnp.abs(out - ref)))
    assert err < 1e-2, err

    # bf16 MXU operands + bf16 inter-layer activations (perf review); looser tol.
    out_bf16 = jax.block_until_ready(
        encode_forward(x, params, pooling=True, use_bf16=True))
    err_bf16 = float(jnp.max(jnp.abs(out_bf16 - ref)))
    assert err_bf16 < 1e-1, err_bf16

    print("KERNEL_OK")
</pallas_src>

<mosaic_0001>
module attributes {stable_mosaic.version = 11 : i64} {
  func.func @_conv_bn_stats_kernel(%arg0: i32, %arg1: i32, %arg2: memref<1x4x16x16x4xf32, #tpu.memory_space<vmem>>, %arg3: memref<108x128xf32, #tpu.memory_space<vmem>>, %arg4: memref<1x4xf32, #tpu.memory_space<vmem>>, %arg5: memref<1x4xf32, #tpu.memory_space<vmem>>, %arg6: memref<1x1x8x8x128xf32, #tpu.memory_space<vmem>>, %arg7: memref<1x2x128xf32, #tpu.memory_space<vmem>>, %arg8: memref<6x10x10x4xf32, #tpu.memory_space<vmem>>) attributes {dimension_semantics = [#tpu.dimension_semantics<parallel>, #tpu.dimension_semantics<arbitrary>], iteration_bounds = array<i64: 2, 4>, scalar_prefetch = 0 : i64, scratch_operands = 1 : i64, tpu.core_type = #tpu.core_type<tc>, window_params = [{transform_indices = @transform_0, window_bounds = array<i64: 1, 4, 16, 16, 4>}, {pipeline_mode = #tpu.pipeline_mode<synchronous>, transform_indices = @transform_1, window_bounds = array<i64: 108, 128>}, {pipeline_mode = #tpu.pipeline_mode<synchronous>, transform_indices = @transform_2, window_bounds = array<i64: 1, 4>}, {pipeline_mode = #tpu.pipeline_mode<synchronous>, transform_indices = @transform_3, window_bounds = array<i64: 1, 4>}, {transform_indices = @transform_4, window_bounds = array<i64: 1, 1, 8, 8, 128>}, {transform_indices = @transform_5, window_bounds = array<i64: 1, 2, 128>}]} {
    %c0_i32 = arith.constant 0 : i32
    %0 = arith.cmpi eq, %arg1, %c0_i32 : i32
    %1 = arith.extui %0 : i1 to i32
    %c0_i32_0 = arith.constant 0 : i32
    %2 = arith.cmpi ne, %1, %c0_i32_0 : i32
    scf.if %2 {
      %cst_16 = arith.constant 0.000000e+00 : f32
      %60 = vector.broadcast %cst_16 : f32 to vector<6x10x10x4xf32>
      %c0_17 = arith.constant 0 : index
      %c0_18 = arith.constant 0 : index
      %c0_19 = arith.constant 0 : index
      %c0_20 = arith.constant 0 : index
      %61 = vector.load %arg8[%c0_17, %c0_18, %c0_19, %c0_20] : memref<6x10x10x4xf32, #tpu.memory_space<vmem>>, vector<6x10x10x4xf32>
      tpu.vector_store %arg8[%c0_17, %c0_18, %c0_19, %c0_20], %60 {strides = array<i32>} : memref<6x10x10x4xf32, #tpu.memory_space<vmem>>, vector<6x10x10x4xf32>,
      %c0_21 = arith.constant 0 : index
      %c0_22 = arith.constant 0 : index
      %c0_23 = arith.constant 0 : index
      %c0_24 = arith.constant 0 : index
      %c0_25 = arith.constant 0 : index
      %62 = vector.load %arg2[%c0_21, %c0_22, %c0_23, %c0_24, %c0_25] : memref<1x4x16x16x4xf32, #tpu.memory_space<vmem>>, vector<1x4x16x16x4xf32>
      %63 = vector.shape_cast %62 : vector<1x4x16x16x4xf32> to vector<4x16x16x4xf32>
      %64 = vector.shape_cast %63 : vector<4x16x16x4xf32> to vector<4x16x8x2x4xf32>
      %65 = vector.extract_strided_slice %64 {offsets = [0, 0, 0, 0, 0], sizes = [4, 16, 8, 1, 4], strides = [1, 1, 1, 1, 1]} : vector<4x16x8x2x4xf32> to vector<4x16x8x1x4xf32>
      %66 = vector.shape_cast %65 : vector<4x16x8x1x4xf32> to vector<4x16x8x4xf32>
      %67 = vector.extract_strided_slice %64 {offsets = [0, 0, 0, 1, 0], sizes = [4, 16, 8, 1, 4], strides = [1, 1, 1, 1, 1]} : vector<4x16x8x2x4xf32> to vector<4x16x8x1x4xf32>
      %68 = vector.shape_cast %67 : vector<4x16x8x1x4xf32> to vector<4x16x8x4xf32>
      %69 = arith.maximumf %66, %68 : vector<4x16x8x4xf32>
      %70 = vector.shape_cast %69 : vector<4x16x8x4xf32> to vector<4x8x2x8x4xf32>
      %71 = vector.extract_strided_slice %70 {offsets = [0, 0, 0, 0, 0], sizes = [4, 8, 1, 8, 4], strides = [1, 1, 1, 1, 1]} : vector<4x8x2x8x4xf32> to vector<4x8x1x8x4xf32>
      %72 = vector.shape_cast %71 : vector<4x8x1x8x4xf32> to vector<4x8x8x4xf32>
      %73 = vector.extract_strided_slice %70 {offsets = [0, 0, 1, 0, 0], sizes = [4, 8, 1, 8, 4], strides = [1, 1, 1, 1, 1]} : vector<4x8x2x8x4xf32> to vector<4x8x1x8x4xf32>
      %74 = vector.shape_cast %73 : vector<4x8x1x8x4xf32> to vector<4x8x8x4xf32>
      %75 = arith.maximumf %72, %74 : vector<4x8x8x4xf32>
      %c1 = arith.constant 1 : index
      %c1_26 = arith.constant 1 : index
      %c1_27 = arith.constant 1 : index
      %c0_28 = arith.constant 0 : index
      %76 = vector.load %arg8[%c1, %c1_26, %c1_27, %c0_28] : memref<6x10x10x4xf32, #tpu.memory_space<vmem>>, vector<4x8x8x4xf32>
      tpu.vector_store %arg8[%c1, %c1_26, %c1_27, %c0_28], %75 {strides = array<i32>} : memref<6x10x10x4xf32, #tpu.memory_space<vmem>>, vector<4x8x8x4xf32>,
    } else {
    }
    %3 = arith.index_cast %arg1 : i32 to index
    %c0 = arith.constant 0 : index
    %c0_1 = arith.constant 0 : index
    %c0_2 = arith.constant 0 : index
    %4 = vector.load %arg8[%3, %c0, %c0_1, %c0_2] : memref<6x10x10x4xf32, #tpu.memory_space<vmem>>, vector<3x10x10x4xf32>
    %5 = vector.extract_strided_slice %4 {offsets = [0, 0, 0, 0], sizes = [1, 10, 10, 4], strides = [1, 1, 1, 1]} : vector<3x10x10x4xf32> to vector<1x10x10x4xf32>
    %6 = vector.shape_cast %5 : vector<1x10x10x4xf32> to vector<10x10x4xf32>
    %7 = vector.extract_strided_slice %6 {offsets = [0, 0, 0], sizes = [8, 8, 4], strides = [1, 1, 1]} : vector<10x10x4xf32> to vector<8x8x4xf32>
    %8 = vector.extract_strided_slice %6 {offsets = [0, 1, 0], sizes = [8, 8, 4], strides = [1, 1, 1]} : vector<10x10x4xf32> to vector<8x8x4xf32>
    %9 = vector.extract_strided_slice %6 {offsets = [0, 2, 0], sizes = [8, 8, 4], strides = [1, 1, 1]} : vector<10x10x4xf32> to vector<8x8x4xf32>
    %10 = vector.extract_strided_slice %6 {offsets = [1, 0, 0], sizes = [8, 8, 4], strides = [1, 1, 1]} : vector<10x10x4xf32> to vector<8x8x4xf32>
    %11 = vector.extract_strided_slice %6 {offsets = [1, 1, 0], sizes = [8, 8, 4], strides = [1, 1, 1]} : vector<10x10x4xf32> to vector<8x8x4xf32>
    %12 = vector.extract_strided_slice %6 {offsets = [1, 2, 0], sizes = [8, 8, 4], strides = [1, 1, 1]} : vector<10x10x4xf32> to vector<8x8x4xf32>
    %13 = vector.extract_strided_slice %6 {offsets = [2, 0, 0], sizes = [8, 8, 4], strides = [1, 1, 1]} : vector<10x10x4xf32> to vector<8x8x4xf32>
    %14 = vector.extract_strided_slice %6 {offsets = [2, 1, 0], sizes = [8, 8, 4], strides = [1, 1, 1]} : vector<10x10x4xf32> to vector<8x8x4xf32>
    %15 = vector.extract_strided_slice %6 {offsets = [2, 2, 0], sizes = [8, 8, 4], strides = [1, 1, 1]} : vector<10x10x4xf32> to vector<8x8x4xf32>
    %16 = vector.extract_strided_slice %4 {offsets = [1, 0, 0, 0], sizes = [1, 10, 10, 4], strides = [1, 1, 1, 1]} : vector<3x10x10x4xf32> to vector<1x10x10x4xf32>
    %17 = vector.shape_cast %16 : vector<1x10x10x4xf32> to vector<10x10x4xf32>
    %18 = vector.extract_strided_slice %17 {offsets = [0, 0, 0], sizes = [8, 8, 4], strides = [1, 1, 1]} : vector<10x10x4xf32> to vector<8x8x4xf32>
    %19 = vector.extract_strided_slice %17 {offsets = [0, 1, 0], sizes = [8, 8, 4], strides = [1, 1, 1]} : vector<10x10x4xf32> to vector<8x8x4xf32>
    %20 = vector.extract_strided_slice %17 {offsets = [0, 2, 0], sizes = [8, 8, 4], strides = [1, 1, 1]} : vector<10x10x4xf32> to vector<8x8x4xf32>
    %21 = vector.extract_strided_slice %17 {offsets = [1, 0, 0], sizes = [8, 8, 4], strides = [1, 1, 1]} : vector<10x10x4xf32> to vector<8x8x4xf32>
    %22 = vector.extract_strided_slice %17 {offsets = [1, 1, 0], sizes = [8, 8, 4], strides = [1, 1, 1]} : vector<10x10x4xf32> to vector<8x8x4xf32>
    %23 = vector.extract_strided_slice %17 {offsets = [1, 2, 0], sizes = [8, 8, 4], strides = [1, 1, 1]} : vector<10x10x4xf32> to vector<8x8x4xf32>
    %24 = vector.extract_strided_slice %17 {offsets = [2, 0, 0], sizes = [8, 8, 4], strides = [1, 1, 1]} : vector<10x10x4xf32> to vector<8x8x4xf32>
    %25 = vector.extract_strided_slice %17 {offsets = [2, 1, 0], sizes = [8, 8, 4], strides = [1, 1, 1]} : vector<10x10x4xf32> to vector<8x8x4xf32>
    %26 = vector.extract_strided_slice %17 {offsets = [2, 2, 0], sizes = [8, 8, 4], strides = [1, 1, 1]} : vector<10x10x4xf32> to vector<8x8x4xf32>
    %27 = vector.extract_strided_slice %4 {offsets = [2, 0, 0, 0], sizes = [1, 10, 10, 4], strides = [1, 1, 1, 1]} : vector<3x10x10x4xf32> to vector<1x10x10x4xf32>
    %28 = vector.shape_cast %27 : vector<1x10x10x4xf32> to vector<10x10x4xf32>
    %29 = vector.extract_strided_slice %28 {offsets = [0, 0, 0], sizes = [8, 8, 4], strides = [1, 1, 1]} : vector<10x10x4xf32> to vector<8x8x4xf32>
    %30 = vector.extract_strided_slice %28 {offsets = [0, 1, 0], sizes = [8, 8, 4], strides = [1, 1, 1]} : vector<10x10x4xf32> to vector<8x8x4xf32>
    %31 = vector.extract_strided_slice %28 {offsets = [0, 2, 0], sizes = [8, 8, 4], strides = [1, 1, 1]} : vector<10x10x4xf32> to vector<8x8x4xf32>
    %32 = vector.extract_strided_slice %28 {offsets = [1, 0, 0], sizes = [8, 8, 4], strides = [1, 1, 1]} : vector<10x10x4xf32> to vector<8x8x4xf32>
    %33 = vector.extract_strided_slice %28 {offsets = [1, 1, 0], sizes = [8, 8, 4], strides = [1, 1, 1]} : vector<10x10x4xf32> to vector<8x8x4xf32>
    %34 = vector.extract_strided_slice %28 {offsets = [1, 2, 0], sizes = [8, 8, 4], strides = [1, 1, 1]} : vector<10x10x4xf32> to vector<8x8x4xf32>
    %35 = vector.extract_strided_slice %28 {offsets = [2, 0, 0], sizes = [8, 8, 4], strides = [1, 1, 1]} : vector<10x10x4xf32> to vector<8x8x4xf32>
    %36 = vector.extract_strided_slice %28 {offsets = [2, 1, 0], sizes = [8, 8, 4], strides = [1, 1, 1]} : vector<10x10x4xf32> to vector<8x8x4xf32>
    %37 = vector.extract_strided_slice %28 {offsets = [2, 2, 0], sizes = [8, 8, 4], strides = [1, 1, 1]} : vector<10x10x4xf32> to vector<8x8x4xf32>
    %38 = tpu.concatenate %7, %8, %9, %10, %11, %12, %13, %14, %15, %18, %19, %20, %21, %22, %23, %24 in 2 : vector<8x8x4xf32>, vector<8x8x4xf32>, vector<8x8x4xf32>, vector<8x8x4xf32>, vector<8x8x4xf32>, vector<8x8x4xf32>, vector<8x8x4xf32>, vector<8x8x4xf32>, vector<8x8x4xf32>, vector<8x8x4xf32>, vector<8x8x4xf32>, vector<8x8x4xf32>, vector<8x8x4xf32>, vector<8x8x4xf32>, vector<8x8x4xf32>, vector<8x8x4xf32> -> vector<8x8x64xf32>
    %39 = tpu.concatenate %25, %26, %29, %30, %31, %32, %33, %34, %35, %36, %37 in 2 : vector<8x8x4xf32>, vector<8x8x4xf32>, vector<8x8x4xf32>, vector<8x8x4xf32>, vector<8x8x4xf32>, vector<8x8x4xf32>, vector<8x8x4xf32>, vector<8x8x4xf32>, vector<8x8x4xf32>, vector<8x8x4xf32>, vector<8x8x4xf32> -> vector<8x8x44xf32>
    %40 = tpu.concatenate %38, %39 in 2 : vector<8x8x64xf32>, vector<8x8x44xf32> -> vector<8x8x108xf32>
    %41 = vector.shape_cast %40 : vector<8x8x108xf32> to vector<64x108xf32>
    %c0_3 = arith.constant 0 : index
    %c0_4 = arith.constant 0 : index
    %42 = vector.load %arg3[%c0_3, %c0_4] : memref<108x128xf32, #tpu.memory_space<vmem>>, vector<108x128xf32>
    %cst = arith.constant dense<0.000000e+00> : vector<64x128xf32>
    %43 = tpu.matmul %41, %42, %cst {dimension_numbers = #tpu.dot_dimension_numbers<[1], [0], [0], [1], [0, 0, 1, 1], [], []>} : vector<64x108xf32>, vector<108x128xf32>, vector<64x128xf32> -> vector<64x128xf32>
    %44 = vector.shape_cast %43 : vector<64x128xf32> to vector<8x8x128xf32>
    %c0_5 = arith.constant 0 : index
    %c0_6 = arith.constant 0 : index
    %c0_7 = arith.constant 0 : index
    %c0_8 = arith.constant 0 : index
    %c0_9 = arith.constant 0 : index
    %45 = vector.load %arg6[%c0_5, %c0_6, %c0_7, %c0_8, %c0_9] : memref<1x1x8x8x128xf32, #tpu.memory_space<vmem>>, vector<1x1x8x8x128xf32>
    %46 = vector.shape_cast %45 : vector<1x1x8x8x128xf32> to vector<8x8x128xf32>
    %47 = vector.shape_cast %44 : vector<8x8x128xf32> to vector<1x1x8x8x128xf32>
    tpu.vector_store %arg6[%c0_5, %c0_6, %c0_7, %c0_8, %c0_9], %47 {strides = array<i32>} : memref<1x1x8x8x128xf32, #tpu.memory_space<vmem>>, vector<1x1x8x8x128xf32>,
    %cst_10 = arith.constant dense<0.000000e+00> : vector<128xf32>
    %48 = vector.multi_reduction <add>, %43, %cst_10 [0] : vector<64x128xf32> to vector<128xf32>
    %49 = vector.shape_cast %48 : vector<128xf32> to vector<1x128xf32>
    %50 = arith.mulf %43, %43 : vector<64x128xf32>
    %cst_11 = arith.constant dense<0.000000e+00> : vector<128xf32>
    %51 = vector.multi_reduction <add>, %50, %cst_11 [0] : vector<64x128xf32> to vector<128xf32>
    %52 = vector.shape_cast %51 : vector<128xf32> to vector<1x128xf32>
    %53 = tpu.concatenate %49, %52 in 0 : vector<1x128xf32>, vector<1x128xf32> -> vector<2x128xf32>
    %c0_i32_12 = arith.constant 0 : i32
    %54 = arith.cmpi eq, %arg1, %c0_i32_12 : i32
    %55 = arith.extui %54 : i1 to i32
    %c0_i32_13 = arith.constant 0 : i32
    %56 = arith.cmpi ne, %55, %c0_i32_13 : i32
    scf.if %56 {
      %c0_16 = arith.constant 0 : index
      %c0_17 = arith.constant 0 : index
      %c0_18 = arith.constant 0 : index
      %60 = vector.load %arg7[%c0_16, %c0_17, %c0_18] : memref<1x2x128xf32, #tpu.memory_space<vmem>>, vector<1x2x128xf32>
      %61 = vector.shape_cast %60 : vector<1x2x128xf32> to vector<2x128xf32>
      %62 = vector.shape_cast %53 : vector<2x128xf32> to vector<1x2x128xf32>
      tpu.vector_store %arg7[%c0_16, %c0_17, %c0_18], %62 {strides = array<i32>} : memref<1x2x128xf32, #tpu.memory_space<vmem>>, vector<1x2x128xf32>,
    } else {
    }
    %c0_i32_14 = arith.constant 0 : i32
    %57 = arith.cmpi ne, %arg1, %c0_i32_14 : i32
    %58 = arith.extui %57 : i1 to i32
    %c0_i32_15 = arith.constant 0 : i32
    %59 = arith.cmpi ne, %58, %c0_i32_15 : i32
    scf.if %59 {
      %c0_16 = arith.constant 0 : index
      %c0_17 = arith.constant 0 : index
      %c0_18 = arith.constant 0 : index
      %60 = vector.load %arg7[%c0_16, %c0_17, %c0_18] : memref<1x2x128xf32, #tpu.memory_space<vmem>>, vector<1x2x128xf32>
      %61 = vector.shape_cast %60 : vector<1x2x128xf32> to vector<2x128xf32>
      %62 = arith.addf %61, %53 : vector<2x128xf32>
      %c0_19 = arith.constant 0 : index
      %c0_20 = arith.constant 0 : index
      %c0_21 = arith.constant 0 : index
      %63 = vector.load %arg7[%c0_19, %c0_20, %c0_21] : memref<1x2x128xf32, #tpu.memory_space<vmem>>, vector<1x2x128xf32>
      %64 = vector.shape_cast %63 : vector<1x2x128xf32> to vector<2x128xf32>
      %65 = vector.shape_cast %62 : vector<2x128xf32> to vector<1x2x128xf32>
      tpu.vector_store %arg7[%c0_19, %c0_20, %c0_21], %65 {strides = array<i32>} : memref<1x2x128xf32, #tpu.memory_space<vmem>>, vector<1x2x128xf32>,
    } else {
    }
    return
  }
  func.func @transform_0(%arg0: i32, %arg1: i32) -> (i32, i32, i32, i32, i32) {
    %c0_i32 = arith.constant 0 : i32
    %c0_i32_0 = arith.constant 0 : i32
    %c0_i32_1 = arith.constant 0 : i32
    %c0_i32_2 = arith.constant 0 : i32
    %c0_i32_3 = arith.constant 0 : i32
    return %arg0, %c0_i32, %c0_i32_0, %c0_i32_1, %c0_i32_2 : i32, i32, i32, i32, i32
  }
  func.func @transform_1(%arg0: i32, %arg1: i32) -> (i32, i32) {
    %c0_i32 = arith.constant 0 : i32
    %c0_i32_0 = arith.constant 0 : i32
    %c0_i32_1 = arith.constant 0 : i32
    return %c0_i32, %c0_i32_0 : i32, i32
  }
  func.func @transform_2(%arg0: i32, %arg1: i32) -> (i32, i32) {
    %c0_i32 = arith.constant 0 : i32
    %c0_i32_0 = arith.constant 0 : i32
    %c0_i32_1 = arith.constant 0 : i32
    return %c0_i32, %c0_i32_0 : i32, i32
  }
  func.func @transform_3(%arg0: i32, %arg1: i32) -> (i32, i32) {
    %c0_i32 = arith.constant 0 : i32
    %c0_i32_0 = arith.constant 0 : i32
    %c0_i32_1 = arith.constant 0 : i32
    return %c0_i32, %c0_i32_0 : i32, i32
  }
  func.func @transform_4(%arg0: i32, %arg1: i32) -> (i32, i32, i32, i32, i32) {
    %c0_i32 = arith.constant 0 : i32
    %c0_i32_0 = arith.constant 0 : i32
    %c0_i32_1 = arith.constant 0 : i32
    %c0_i32_2 = arith.constant 0 : i32
    return %arg0, %arg1, %c0_i32, %c0_i32_0, %c0_i32_1 : i32, i32, i32, i32, i32
  }
  func.func @transform_5(%arg0: i32, %arg1: i32) -> (i32, i32, i32) {
    %c0_i32 = arith.constant 0 : i32
    %c0_i32_0 = arith.constant 0 : i32
    %c0_i32_1 = arith.constant 0 : i32
    return %arg0, %c0_i32, %c0_i32_0 : i32, i32, i32
  }
}

module attributes {stable_mosaic.version = 11 : i64} {
  func.func @_conv_bn_stats_kernel(%arg0: i32, %arg1: i32, %arg2: memref<1x4x8x8x128xf32, #tpu.memory_space<vmem>>, %arg3: memref<108x128xf32, #tpu.memory_space<vmem>>, %arg4: memref<1x4xf32, #tpu.memory_space<vmem>>, %arg5: memref<1x4xf32, #tpu.memory_space<vmem>>, %arg6: memref<1x1x8x8x128xf32, #tpu.memory_space<vmem>>, %arg7: memref<1x2x128xf32, #tpu.memory_space<vmem>>, %arg8: memref<6x10x10x4xf32, #tpu.memory_space<vmem>>) attributes {dimension_semantics = [#tpu.dimension_semantics<parallel>, #tpu.dimension_semantics<arbitrary>], iteration_bounds = array<i64: 2, 4>, scalar_prefetch = 0 : i64, scratch_operands = 1 : i64, tpu.core_type = #tpu.core_type<tc>, window_params = [{transform_indices = @transform_0, window_bounds = array<i64: 1, 4, 8, 8, 128>}, {pipeline_mode = #tpu.pipeline_mode<synchronous>, transform_indices = @transform_1, window_bounds = array<i64: 108, 128>}, {pipeline_mode = #tpu.pipeline_mode<synchronous>, transform_indices = @transform_2, window_bounds = array<i64: 1, 4>}, {pipeline_mode = #tpu.pipeline_mode<synchronous>, transform_indices = @transform_3, window_bounds = array<i64: 1, 4>}, {transform_indices = @transform_4, window_bounds = array<i64: 1, 1, 8, 8, 128>}, {transform_indices = @transform_5, window_bounds = array<i64: 1, 2, 128>}]} {
    %c0_i32 = arith.constant 0 : i32
    %0 = arith.cmpi eq, %arg1, %c0_i32 : i32
    %1 = arith.extui %0 : i1 to i32
    %c0_i32_0 = arith.constant 0 : i32
    %2 = arith.cmpi ne, %1, %c0_i32_0 : i32
    scf.if %2 {
      %cst_16 = arith.constant 0.000000e+00 : f32
      %60 = vector.broadcast %cst_16 : f32 to vector<6x10x10x4xf32>
      %c0_17 = arith.constant 0 : index
      %c0_18 = arith.constant 0 : index
      %c0_19 = arith.constant 0 : index
      %c0_20 = arith.constant 0 : index
      %61 = vector.load %arg8[%c0_17, %c0_18, %c0_19, %c0_20] : memref<6x10x10x4xf32, #tpu.memory_space<vmem>>, vector<6x10x10x4xf32>
      tpu.vector_store %arg8[%c0_17, %c0_18, %c0_19, %c0_20], %60 {strides = array<i32>} : memref<6x10x10x4xf32, #tpu.memory_space<vmem>>, vector<6x10x10x4xf32>,
      %c0_21 = arith.constant 0 : index
      %c0_22 = arith.constant 0 : index
      %c0_23 = arith.constant 0 : index
      %c0_24 = arith.constant 0 : index
      %c0_25 = arith.constant 0 : index
      %62 = vector.load %arg2[%c0_21, %c0_22, %c0_23, %c0_24, %c0_25] : memref<1x4x8x8x128xf32, #tpu.memory_space<vmem>>, vector<1x4x8x8x4xf32>
      %63 = vector.shape_cast %62 : vector<1x4x8x8x4xf32> to vector<4x8x8x4xf32>
      %c0_26 = arith.constant 0 : index
      %c0_27 = arith.constant 0 : index
      %64 = vector.load %arg4[%c0_26, %c0_27] : memref<1x4xf32, #tpu.memory_space<vmem>>, vector<1x4xf32>
      %65 = vector.shape_cast %64 : vector<1x4xf32> to vector<1x1x1x4xf32>
      %66 = vector.broadcast %65 : vector<1x1x1x4xf32> to vector<4x8x8x4xf32>
      %67 = arith.mulf %63, %66 : vector<4x8x8x4xf32>
      %c0_28 = arith.constant 0 : index
      %c0_29 = arith.constant 0 : index
      %68 = vector.load %arg5[%c0_28, %c0_29] : memref<1x4xf32, #tpu.memory_space<vmem>>, vector<1x4xf32>
      %69 = vector.shape_cast %68 : vector<1x4xf32> to vector<1x1x1x4xf32>
      %70 = vector.broadcast %69 : vector<1x1x1x4xf32> to vector<4x8x8x4xf32>
      %71 = arith.addf %67, %70 : vector<4x8x8x4xf32>
      %cst_30 = arith.constant 0.000000e+00 : f32
      %72 = vector.broadcast %cst_30 : f32 to vector<4x8x8x4xf32>
      %73 = arith.maximumf %71, %72 : vector<4x8x8x4xf32>
      %c1 = arith.constant 1 : index
      %c1_31 = arith.constant 1 : index
      %c1_32 = arith.constant 1 : index
      %c0_33 = arith.constant 0 : index
      %74 = vector.load %arg8[%c1, %c1_31, %c1_32, %c0_33] : memref<6x10x10x4xf32, #tpu.memory_space<vmem>>, vector<4x8x8x4xf32>
      tpu.vector_store %arg8[%c1, %c1_31, %c1_32, %c0_33], %73 {strides = array<i32>} : memref<6x10x10x4xf32, #tpu.memory_space<vmem>>, vector<4x8x8x4xf32>,
    } else {
    }
    %3 = arith.index_cast %arg1 : i32 to index
    %c0 = arith.constant 0 : index
    %c0_1 = arith.constant 0 : index
    %c0_2 = arith.constant 0 : index
    %4 = vector.load %arg8[%3, %c0, %c0_1, %c0_2] : memref<6x10x10x4xf32, #tpu.memory_space<vmem>>, vector<3x10x10x4xf32>
    %5 = vector.extract_strided_slice %4 {offsets = [0, 0, 0, 0], sizes = [1, 10, 10, 4], strides = [1, 1, 1, 1]} : vector<3x10x10x4xf32> to vector<1x10x10x4xf32>
    %6 = vector.shape_cast %5 : vector<1x10x10x4xf32> to vector<10x10x4xf32>
    %7 = vector.extract_strided_slice %6 {offsets = [0, 0, 0], sizes = [8, 8, 4], strides = [1, 1, 1]} : vector<10x10x4xf32> to vector<8x8x4xf32>
    %8 = vector.extract_strided_slice %6 {offsets = [0, 1, 0], sizes = [8, 8, 4], strides = [1, 1, 1]} : vector<10x10x4xf32> to vector<8x8x4xf32>
    %9 = vector.extract_strided_slice %6 {offsets = [0, 2, 0], sizes = [8, 8, 4], strides = [1, 1, 1]} : vector<10x10x4xf32> to vector<8x8x4xf32>
    %10 = vector.extract_strided_slice %6 {offsets = [1, 0, 0], sizes = [8, 8, 4], strides = [1, 1, 1]} : vector<10x10x4xf32> to vector<8x8x4xf32>
    %11 = vector.extract_strided_slice %6 {offsets = [1, 1, 0], sizes = [8, 8, 4], strides = [1, 1, 1]} : vector<10x10x4xf32> to vector<8x8x4xf32>
    %12 = vector.extract_strided_slice %6 {offsets = [1, 2, 0], sizes = [8, 8, 4], strides = [1, 1, 1]} : vector<10x10x4xf32> to vector<8x8x4xf32>
    %13 = vector.extract_strided_slice %6 {offsets = [2, 0, 0], sizes = [8, 8, 4], strides = [1, 1, 1]} : vector<10x10x4xf32> to vector<8x8x4xf32>
    %14 = vector.extract_strided_slice %6 {offsets = [2, 1, 0], sizes = [8, 8, 4], strides = [1, 1, 1]} : vector<10x10x4xf32> to vector<8x8x4xf32>
    %15 = vector.extract_strided_slice %6 {offsets = [2, 2, 0], sizes = [8, 8, 4], strides = [1, 1, 1]} : vector<10x10x4xf32> to vector<8x8x4xf32>
    %16 = vector.extract_strided_slice %4 {offsets = [1, 0, 0, 0], sizes = [1, 10, 10, 4], strides = [1, 1, 1, 1]} : vector<3x10x10x4xf32> to vector<1x10x10x4xf32>
    %17 = vector.shape_cast %16 : vector<1x10x10x4xf32> to vector<10x10x4xf32>
    %18 = vector.extract_strided_slice %17 {offsets = [0, 0, 0], sizes = [8, 8, 4], strides = [1, 1, 1]} : vector<10x10x4xf32> to vector<8x8x4xf32>
    %19 = vector.extract_strided_slice %17 {offsets = [0, 1, 0], sizes = [8, 8, 4], strides = [1, 1, 1]} : vector<10x10x4xf32> to vector<8x8x4xf32>
    %20 = vector.extract_strided_slice %17 {offsets = [0, 2, 0], sizes = [8, 8, 4], strides = [1, 1, 1]} : vector<10x10x4xf32> to vector<8x8x4xf32>
    %21 = vector.extract_strided_slice %17 {offsets = [1, 0, 0], sizes = [8, 8, 4], strides = [1, 1, 1]} : vector<10x10x4xf32> to vector<8x8x4xf32>
    %22 = vector.extract_strided_slice %17 {offsets = [1, 1, 0], sizes = [8, 8, 4], strides = [1, 1, 1]} : vector<10x10x4xf32> to vector<8x8x4xf32>
    %23 = vector.extract_strided_slice %17 {offsets = [1, 2, 0], sizes = [8, 8, 4], strides = [1, 1, 1]} : vector<10x10x4xf32> to vector<8x8x4xf32>
    %24 = vector.extract_strided_slice %17 {offsets = [2, 0, 0], sizes = [8, 8, 4], strides = [1, 1, 1]} : vector<10x10x4xf32> to vector<8x8x4xf32>
    %25 = vector.extract_strided_slice %17 {offsets = [2, 1, 0], sizes = [8, 8, 4], strides = [1, 1, 1]} : vector<10x10x4xf32> to vector<8x8x4xf32>
    %26 = vector.extract_strided_slice %17 {offsets = [2, 2, 0], sizes = [8, 8, 4], strides = [1, 1, 1]} : vector<10x10x4xf32> to vector<8x8x4xf32>
    %27 = vector.extract_strided_slice %4 {offsets = [2, 0, 0, 0], sizes = [1, 10, 10, 4], strides = [1, 1, 1, 1]} : vector<3x10x10x4xf32> to vector<1x10x10x4xf32>
    %28 = vector.shape_cast %27 : vector<1x10x10x4xf32> to vector<10x10x4xf32>
    %29 = vector.extract_strided_slice %28 {offsets = [0, 0, 0], sizes = [8, 8, 4], strides = [1, 1, 1]} : vector<10x10x4xf32> to vector<8x8x4xf32>
    %30 = vector.extract_strided_slice %28 {offsets = [0, 1, 0], sizes = [8, 8, 4], strides = [1, 1, 1]} : vector<10x10x4xf32> to vector<8x8x4xf32>
    %31 = vector.extract_strided_slice %28 {offsets = [0, 2, 0], sizes = [8, 8, 4], strides = [1, 1, 1]} : vector<10x10x4xf32> to vector<8x8x4xf32>
    %32 = vector.extract_strided_slice %28 {offsets = [1, 0, 0], sizes = [8, 8, 4], strides = [1, 1, 1]} : vector<10x10x4xf32> to vector<8x8x4xf32>
    %33 = vector.extract_strided_slice %28 {offsets = [1, 1, 0], sizes = [8, 8, 4], strides = [1, 1, 1]} : vector<10x10x4xf32> to vector<8x8x4xf32>
    %34 = vector.extract_strided_slice %28 {offsets = [1, 2, 0], sizes = [8, 8, 4], strides = [1, 1, 1]} : vector<10x10x4xf32> to vector<8x8x4xf32>
    %35 = vector.extract_strided_slice %28 {offsets = [2, 0, 0], sizes = [8, 8, 4], strides = [1, 1, 1]} : vector<10x10x4xf32> to vector<8x8x4xf32>
    %36 = vector.extract_strided_slice %28 {offsets = [2, 1, 0], sizes = [8, 8, 4], strides = [1, 1, 1]} : vector<10x10x4xf32> to vector<8x8x4xf32>
    %37 = vector.extract_strided_slice %28 {offsets = [2, 2, 0], sizes = [8, 8, 4], strides = [1, 1, 1]} : vector<10x10x4xf32> to vector<8x8x4xf32>
    %38 = tpu.concatenate %7, %8, %9, %10, %11, %12, %13, %14, %15, %18, %19, %20, %21, %22, %23, %24 in 2 : vector<8x8x4xf32>, vector<8x8x4xf32>, vector<8x8x4xf32>, vector<8x8x4xf32>, vector<8x8x4xf32>, vector<8x8x4xf32>, vector<8x8x4xf32>, vector<8x8x4xf32>, vector<8x8x4xf32>, vector<8x8x4xf32>, vector<8x8x4xf32>, vector<8x8x4xf32>, vector<8x8x4xf32>, vector<8x8x4xf32>, vector<8x8x4xf32>, vector<8x8x4xf32> -> vector<8x8x64xf32>
    %39 = tpu.concatenate %25, %26, %29, %30, %31, %32, %33, %34, %35, %36, %37 in 2 : vector<8x8x4xf32>, vector<8x8x4xf32>, vector<8x8x4xf32>, vector<8x8x4xf32>, vector<8x8x4xf32>, vector<8x8x4xf32>, vector<8x8x4xf32>, vector<8x8x4xf32>, vector<8x8x4xf32>, vector<8x8x4xf32>, vector<8x8x4xf32> -> vector<8x8x44xf32>
    %40 = tpu.concatenate %38, %39 in 2 : vector<8x8x64xf32>, vector<8x8x44xf32> -> vector<8x8x108xf32>
    %41 = vector.shape_cast %40 : vector<8x8x108xf32> to vector<64x108xf32>
    %c0_3 = arith.constant 0 : index
    %c0_4 = arith.constant 0 : index
    %42 = vector.load %arg3[%c0_3, %c0_4] : memref<108x128xf32, #tpu.memory_space<vmem>>, vector<108x128xf32>
    %cst = arith.constant dense<0.000000e+00> : vector<64x128xf32>
    %43 = tpu.matmul %41, %42, %cst {dimension_numbers = #tpu.dot_dimension_numbers<[1], [0], [0], [1], [0, 0, 1, 1], [], []>} : vector<64x108xf32>, vector<108x128xf32>, vector<64x128xf32> -> vector<64x128xf32>
    %44 = vector.shape_cast %43 : vector<64x128xf32> to vector<8x8x128xf32>
    %c0_5 = arith.constant 0 : index
    %c0_6 = arith.constant 0 : index
    %c0_7 = arith.constant 0 : index
    %c0_8 = arith.constant 0 : index
    %c0_9 = arith.constant 0 : index
    %45 = vector.load %arg6[%c0_5, %c0_6, %c0_7, %c0_8, %c0_9] : memref<1x1x8x8x128xf32, #tpu.memory_space<vmem>>, vector<1x1x8x8x128xf32>
    %46 = vector.shape_cast %45 : vector<1x1x8x8x128xf32> to vector<8x8x128xf32>
    %47 = vector.shape_cast %44 : vector<8x8x128xf32> to vector<1x1x8x8x128xf32>
    tpu.vector_store %arg6[%c0_5, %c0_6, %c0_7, %c0_8, %c0_9], %47 {strides = array<i32>} : memref<1x1x8x8x128xf32, #tpu.memory_space<vmem>>, vector<1x1x8x8x128xf32>,
    %cst_10 = arith.constant dense<0.000000e+00> : vector<128xf32>
    %48 = vector.multi_reduction <add>, %43, %cst_10 [0] : vector<64x128xf32> to vector<128xf32>
    %49 = vector.shape_cast %48 : vector<128xf32> to vector<1x128xf32>
    %50 = arith.mulf %43, %43 : vector<64x128xf32>
    %cst_11 = arith.constant dense<0.000000e+00> : vector<128xf32>
    %51 = vector.multi_reduction <add>, %50, %cst_11 [0] : vector<64x128xf32> to vector<128xf32>
    %52 = vector.shape_cast %51 : vector<128xf32> to vector<1x128xf32>
    %53 = tpu.concatenate %49, %52 in 0 : vector<1x128xf32>, vector<1x128xf32> -> vector<2x128xf32>
    %c0_i32_12 = arith.constant 0 : i32
    %54 = arith.cmpi eq, %arg1, %c0_i32_12 : i32
    %55 = arith.extui %54 : i1 to i32
    %c0_i32_13 = arith.constant 0 : i32
    %56 = arith.cmpi ne, %55, %c0_i32_13 : i32
    scf.if %56 {
      %c0_16 = arith.constant 0 : index
      %c0_17 = arith.constant 0 : index
      %c0_18 = arith.constant 0 : index
      %60 = vector.load %arg7[%c0_16, %c0_17, %c0_18] : memref<1x2x128xf32, #tpu.memory_space<vmem>>, vector<1x2x128xf32>
      %61 = vector.shape_cast %60 : vector<1x2x128xf32> to vector<2x128xf32>
      %62 = vector.shape_cast %53 : vector<2x128xf32> to vector<1x2x128xf32>
      tpu.vector_store %arg7[%c0_16, %c0_17, %c0_18], %62 {strides = array<i32>} : memref<1x2x128xf32, #tpu.memory_space<vmem>>, vector<1x2x128xf32>,
    } else {
    }
    %c0_i32_14 = arith.constant 0 : i32
    %57 = arith.cmpi ne, %arg1, %c0_i32_14 : i32
    %58 = arith.extui %57 : i1 to i32
    %c0_i32_15 = arith.constant 0 : i32
    %59 = arith.cmpi ne, %58, %c0_i32_15 : i32
    scf.if %59 {
      %c0_16 = arith.constant 0 : index
      %c0_17 = arith.constant 0 : index
      %c0_18 = arith.constant 0 : index
      %60 = vector.load %arg7[%c0_16, %c0_17, %c0_18] : memref<1x2x128xf32, #tpu.memory_space<vmem>>, vector<1x2x128xf32>
      %61 = vector.shape_cast %60 : vector<1x2x128xf32> to vector<2x128xf32>
      %62 = arith.addf %61, %53 : vector<2x128xf32>
      %c0_19 = arith.constant 0 : index
      %c0_20 = arith.constant 0 : index
      %c0_21 = arith.constant 0 : index
      %63 = vector.load %arg7[%c0_19, %c0_20, %c0_21] : memref<1x2x128xf32, #tpu.memory_space<vmem>>, vector<1x2x128xf32>
      %64 = vector.shape_cast %63 : vector<1x2x128xf32> to vector<2x128xf32>
      %65 = vector.shape_cast %62 : vector<2x128xf32> to vector<1x2x128xf32>
      tpu.vector_store %arg7[%c0_19, %c0_20, %c0_21], %65 {strides = array<i32>} : memref<1x2x128xf32, #tpu.memory_space<vmem>>, vector<1x2x128xf32>,
    } else {
    }
    return
  }
  func.func @transform_0(%arg0: i32, %arg1: i32) -> (i32, i32, i32, i32, i32) {
    %c0_i32 = arith.constant 0 : i32
    %c0_i32_0 = arith.constant 0 : i32
    %c0_i32_1 = arith.constant 0 : i32
    %c0_i32_2 = arith.constant 0 : i32
    %c0_i32_3 = arith.constant 0 : i32
    return %arg0, %c0_i32, %c0_i32_0, %c0_i32_1, %c0_i32_2 : i32, i32, i32, i32, i32
  }
  func.func @transform_1(%arg0: i32, %arg1: i32) -> (i32, i32) {
    %c0_i32 = arith.constant 0 : i32
    %c0_i32_0 = arith.constant 0 : i32
    %c0_i32_1 = arith.constant 0 : i32
    return %c0_i32, %c0_i32_0 : i32, i32
  }
  func.func @transform_2(%arg0: i32, %arg1: i32) -> (i32, i32) {
    %c0_i32 = arith.constant 0 : i32
    %c0_i32_0 = arith.constant 0 : i32
    %c0_i32_1 = arith.constant 0 : i32
    return %c0_i32, %c0_i32_0 : i32, i32
  }
  func.func @transform_3(%arg0: i32, %arg1: i32) -> (i32, i32) {
    %c0_i32 = arith.constant 0 : i32
    %c0_i32_0 = arith.constant 0 : i32
    %c0_i32_1 = arith.constant 0 : i32
    return %c0_i32, %c0_i32_0 : i32, i32
  }
  func.func @transform_4(%arg0: i32, %arg1: i32) -> (i32, i32, i32, i32, i32) {
    %c0_i32 = arith.constant 0 : i32
    %c0_i32_0 = arith.constant 0 : i32
    %c0_i32_1 = arith.constant 0 : i32
    %c0_i32_2 = arith.constant 0 : i32
    return %arg0, %arg1, %c0_i32, %c0_i32_0, %c0_i32_1 : i32, i32, i32, i32, i32
  }
  func.func @transform_5(%arg0: i32, %arg1: i32) -> (i32, i32, i32) {
    %c0_i32 = arith.constant 0 : i32
    %c0_i32_0 = arith.constant 0 : i32
    %c0_i32_1 = arith.constant 0 : i32
    return %arg0, %c0_i32, %c0_i32_0 : i32, i32, i32
  }
}

module attributes {stable_mosaic.version = 11 : i64} {
  func.func @_bn_relu_kernel(%arg0: i32, %arg1: memref<1x4x8x8x128xf32, #tpu.memory_space<vmem>>, %arg2: memref<1x128xf32, #tpu.memory_space<vmem>>, %arg3: memref<1x128xf32, #tpu.memory_space<vmem>>, %arg4: memref<1x4x8x8x8xf32, #tpu.memory_space<vmem>>) attributes {dimension_semantics = [#tpu.dimension_semantics<parallel>], iteration_bounds = array<i64: 2>, scalar_prefetch = 0 : i64, scratch_operands = 0 : i64, tpu.core_type = #tpu.core_type<tc>, window_params = [{transform_indices = @transform_0, window_bounds = array<i64: 1, 4, 8, 8, 128>}, {pipeline_mode = #tpu.pipeline_mode<synchronous>, transform_indices = @transform_1, window_bounds = array<i64: 1, 128>}, {pipeline_mode = #tpu.pipeline_mode<synchronous>, transform_indices = @transform_2, window_bounds = array<i64: 1, 128>}, {transform_indices = @transform_3, window_bounds = array<i64: 1, 4, 8, 8, 8>}]} {
    %c0 = arith.constant 0 : index
    %c0_0 = arith.constant 0 : index
    %c0_1 = arith.constant 0 : index
    %c0_2 = arith.constant 0 : index
    %c0_3 = arith.constant 0 : index
    %0 = vector.load %arg1[%c0, %c0_0, %c0_1, %c0_2, %c0_3] : memref<1x4x8x8x128xf32, #tpu.memory_space<vmem>>, vector<1x4x8x8x128xf32>
    %c0_4 = arith.constant 0 : index
    %c0_5 = arith.constant 0 : index
    %1 = vector.load %arg2[%c0_4, %c0_5] : memref<1x128xf32, #tpu.memory_space<vmem>>, vector<1x128xf32>
    %2 = vector.shape_cast %1 : vector<1x128xf32> to vector<1x1x1x1x128xf32>
    %3 = vector.broadcast %2 : vector<1x1x1x1x128xf32> to vector<1x4x8x8x128xf32>
    %4 = arith.mulf %0, %3 : vector<1x4x8x8x128xf32>
    %c0_6 = arith.constant 0 : index
    %c0_7 = arith.constant 0 : index
    %5 = vector.load %arg3[%c0_6, %c0_7] : memref<1x128xf32, #tpu.memory_space<vmem>>, vector<1x128xf32>
    %6 = vector.shape_cast %5 : vector<1x128xf32> to vector<1x1x1x1x128xf32>
    %7 = vector.broadcast %6 : vector<1x1x1x1x128xf32> to vector<1x4x8x8x128xf32>
    %8 = arith.addf %4, %7 : vector<1x4x8x8x128xf32>
    %cst = arith.constant 0.000000e+00 : f32
    %9 = vector.broadcast %cst : f32 to vector<1x4x8x8x128xf32>
    %10 = arith.maximumf %8, %9 : vector<1x4x8x8x128xf32>
    %11 = vector.extract_strided_slice %10 {offsets = [0, 0, 0, 0, 0], sizes = [1, 4, 8, 8, 8], strides = [1, 1, 1, 1, 1]} : vector<1x4x8x8x128xf32> to vector<1x4x8x8x8xf32>
    %c0_8 = arith.constant 0 : index
    %c0_9 = arith.constant 0 : index
    %c0_10 = arith.constant 0 : index
    %c0_11 = arith.constant 0 : index
    %c0_12 = arith.constant 0 : index
    %12 = vector.load %arg4[%c0_8, %c0_9, %c0_10, %c0_11, %c0_12] : memref<1x4x8x8x8xf32, #tpu.memory_space<vmem>>, vector<1x4x8x8x8xf32>
    tpu.vector_store %arg4[%c0_8, %c0_9, %c0_10, %c0_11, %c0_12], %11 {strides = array<i32>} : memref<1x4x8x8x8xf32, #tpu.memory_space<vmem>>, vector<1x4x8x8x8xf32>,
    return
  }
  func.func @transform_0(%arg0: i32) -> (i32, i32, i32, i32, i32) {
    %c0_i32 = arith.constant 0 : i32
    %c0_i32_0 = arith.constant 0 : i32
    %c0_i32_1 = arith.constant 0 : i32
    %c0_i32_2 = arith.constant 0 : i32
    %c0_i32_3 = arith.constant 0 : i32
    return %arg0, %c0_i32, %c0_i32_0, %c0_i32_1, %c0_i32_2 : i32, i32, i32, i32, i32
  }
  func.func @transform_1(%arg0: i32) -> (i32, i32) {
    %c0_i32 = arith.constant 0 : i32
    %c0_i32_0 = arith.constant 0 : i32
    %c0_i32_1 = arith.constant 0 : i32
    return %c0_i32, %c0_i32_0 : i32, i32
  }
  func.func @transform_2(%arg0: i32) -> (i32, i32) {
    %c0_i32 = arith.constant 0 : i32
    %c0_i32_0 = arith.constant 0 : i32
    %c0_i32_1 = arith.constant 0 : i32
    return %c0_i32, %c0_i32_0 : i32, i32
  }
  func.func @transform_3(%arg0: i32) -> (i32, i32, i32, i32, i32) {
    %c0_i32 = arith.constant 0 : i32
    %c0_i32_0 = arith.constant 0 : i32
    %c0_i32_1 = arith.constant 0 : i32
    %c0_i32_2 = arith.constant 0 : i32
    %c0_i32_3 = arith.constant 0 : i32
    return %arg0, %c0_i32, %c0_i32_0, %c0_i32_1, %c0_i32_2 : i32, i32, i32, i32, i32
  }
}

</mosaic_0001>

<bundles_post_ra>
// kernel: encode_forward.5
= control target key start
LH: loop header
LB: loop body
LE: loop exit
PB: predicated region body
PF: predicated region fallthrough
CT: control target
= control target key end

     0   :  { %s446_s12 = smov 0   ;;  %s637_s0 = inlined_call_operand.vmem [shape: f32[2,4,8,8,128], index: 0, kind: input, shape index: {}]   ;;  %s638_s1 = inlined_call_operand.vmem [shape: f32[1,128], index: 1, kind: input, shape index: {}]   ;;  %s639_s2 = inlined_call_operand.vmem [shape: f32[1,128], index: 2, kind: input, shape index: {}]   ;;  %s640_s3 = inlined_call_operand.vmem [shape: f32[2,4,8,8,8], index: 3, kind: output, shape index: {}]  }
   0x1 LB: > { %s395_s13 = sadd.s32 4294967295, %s424_s12   ;;  %p399_p0 = scmp.ge.s32.totalorder %s424_s12, 1  ;;  %s424_s12 = sphi %s446_s12, %s13_s12  }
   0x2   : > { %p137_p1 = scmp.lt.s32.totalorder %s424_s12, 3 }
   0x4   : > { %p138_p2 = pnand %p399_p0, %p137_p1 }
   0x5   : > { %p161_p3 = scmp.lt.s32.totalorder (!%p138_p2), %s395_s13, 1 }
   0x6   : > { %141 = sbr.rel (%p138_p2) target bundleno = 53 (0x35), region = 32 }
   0xb   : > { %s642_s13 = smov (!%p161_p3, %s395_s13), 1  ;;  %v457_v0 = vld [vmem:[%s638_s1] ss:$0 sm:$0xff]  ;;  %vm307_vm0 = vcmask 64512  }
   0xc   : > { %s406_s16 = sshll.u32 %s642_s13, 8  ;;  %v467_v1 = vld [vmem:[%s639_s2] ss:$0 sm:$0xff] }
   0xd   : > { %s462_s19 = scalar_lea.vmem %s637_s0, %s406_s16  ;;  %s490_s24 = scalar_lea.vmem %s640_s3, %s406_s16 }
   0xe   : > { %v171_v2 = vld [vmem:[%s462_s19] sm:$0xff]  ;;  %v172_v3 = vld [vmem:[%s462_s19 + $0x8] sm:$0xff]  ;;  %v173_v4 = vld [vmem:[%s462_s19 + $0x10] sm:$0xff] }
   0xf   : > { %v207_v5 = vmul.f32 %v457_v0, %v171_v2  ;;  %v208_v6 = vmul.f32 %v457_v0, %v172_v3  ;;  %v209_v7 = vmul.f32 %v457_v0, %v173_v4  ;;  %v174_v8 = vld [vmem:[%s462_s19 + $0x18] sm:$0xff]  ;;  %v175_v9 = vld [vmem:[%s462_s19 + $0x20] sm:$0xff]  ;;  %v176_v10 = vld [vmem:[%s462_s19 + $0x28] sm:$0xff] }
  0x10   : > { %v210_v11 = vmul.f32 %v457_v0, %v174_v8  ;;  %v211_v12 = vmul.f32 %v457_v0, %v175_v9  ;;  %v212_v13 = vmul.f32 %v457_v0, %v176_v10  ;;  %v177_v14 = vld [vmem:[%s462_s19 + $0x30] sm:$0xff]  ;;  %v178_v15 = vld [vmem:[%s462_s19 + $0x38] sm:$0xff]  ;;  %v179_v24 = vld [vmem:[%s462_s19 + $0x40] sm:$0xff] }
  0x11   : > { %v243_v16 = vadd.f32 %v467_v1, %v207_v5  ;;  %v244_v17 = vadd.f32 %v467_v1, %v208_v6  ;;  %v245_v18 = vadd.f32 %v467_v1, %v209_v7  ;;  %v213_v19 = vmul.f32 %v457_v0, %v177_v14  ;;  %v180_v25 = vld [vmem:[%s462_s19 + $0x48] sm:$0xff]  ;;  %v181_v26 = vld [vmem:[%s462_s19 + $0x50] sm:$0xff]  ;;  %v182_v31 = vld [vmem:[%s462_s19 + $0x58] sm:$0xff] }
  0x12   : > { %v246_v20 = vadd.f32 %v467_v1, %v210_v11  ;;  %v247_v21 = vadd.f32 %v467_v1, %v211_v12  ;;  %v248_v22 = vadd.f32 %v467_v1, %v212_v13  ;;  %v214_v23 = vmul.f32 %v457_v0, %v178_v15  ;;  %v183_v32 = vld [vmem:[%s462_s19 + $0x60] sm:$0xff]  ;;  %v184_v33 = vld [vmem:[%s462_s19 + $0x68] sm:$0xff]  ;;  %v185_v37 = vld [vmem:[%s462_s19 + $0x70] sm:$0xff] }
  0x13   : > { %v275_v27 = vmax.f32 %v243_v16, 0.0  ;;  %v276_v28 = vmax.f32 %v244_v17, 0.0  ;;  %v277_v29 = vmax.f32 %v245_v18, 0.0  ;;  %v249_v30 = vadd.f32 %v467_v1, %v213_v19  ;;  %v186_v42 = vld [vmem:[%s462_s19 + $0x78] sm:$0xff]  ;;  %v187_v54 = vld [vmem:[%s462_s19 + $0x80] sm:$0xff]  ;;  %v188_v55 = vld [vmem:[%s462_s19 + $0x88] sm:$0xff] }
  0x14   : > { %v278_v34 = vmax.f32 %v246_v20, 0.0  ;;  %v279_v35 = vmax.f32 %v247_v21, 0.0  ;;  %v250_v36 = vadd.f32 %v467_v1, %v214_v23  ;;  %v280_v38 = vmax.f32 %v248_v22, 0.0  ;;  %v189_v56 = vld [vmem:[%s462_s19 + $0x90] sm:$0xff]  ;;  %v190_v59 = vld [vmem:[%s462_s19 + $0x98] sm:$0xff]  ;;  %v191_v63 = vld [vmem:[%s462_s19 + $0xa0] sm:$0xff] }
  0x15   : > { %308 = vst.msk [vmem:[%s490_s24] sm:$0xff] %vm307_vm0, %v275_v27  ;;  %v215_v39 = vmul.f32 %v457_v0, %v179_v24  ;;  %v216_v40 = vmul.f32 %v457_v0, %v180_v25  ;;  %v217_v41 = vmul.f32 %v457_v0, %v181_v26  ;;  %v281_v43 = vmax.f32 %v249_v30, 0.0  ;;  %v192_v6 = vld [vmem:[%s462_s19 + $0xa8] sm:$0xff]  ;;  %v193_v10 = vld [vmem:[%s462_s19 + $0xb0] sm:$0xff]  ;;  %v194_v14 = vld [vmem:[%s462_s19 + $0xb8] sm:$0xff] }
  0x16   : > { %309 = vst.msk [vmem:[%s490_s24 + $0x8] sm:$0xff] %vm307_vm0, %v276_v28  ;;  %v218_v44 = vmul.f32 %v457_v0, %v182_v31  ;;  %v219_v45 = vmul.f32 %v457_v0, %v183_v32  ;;  %v220_v46 = vmul.f32 %v457_v0, %v184_v33  ;;  %v221_v50 = vmul.f32 %v457_v0, %v185_v37  ;;  %v195_v18 = vld [vmem:[%s462_s19 + $0xc0] sm:$0xff]  ;;  %v196_v22 = vld [vmem:[%s462_s19 + $0xc8] sm:$0xff]  ;;  %v197_v26 = vld [vmem:[%s462_s19 + $0xd0] sm:$0xff] }
  0x17   : > { %310 = vst.msk [vmem:[%s490_s24 + $0x10] sm:$0xff] %vm307_vm0, %v277_v29  ;;  %v251_v47 = vadd.f32 %v467_v1, %v215_v39  ;;  %v252_v48 = vadd.f32 %v467_v1, %v216_v40  ;;  %v253_v49 = vadd.f32 %v467_v1, %v217_v41  ;;  %v282_v51 = vmax.f32 %v250_v36, 0.0  ;;  %v198_v30 = vld [vmem:[%s462_s19 + $0xd8] sm:$0xff] }
  0x18   : > { %311 = vst.msk [vmem:[%s490_s24 + $0x18] sm:$0xff] %vm307_vm0, %v278_v34  ;;  %v254_v52 = vadd.f32 %v467_v1, %v218_v44  ;;  %v222_v53 = vmul.f32 %v457_v0, %v186_v42  ;;  %v255_v58 = vadd.f32 %v467_v1, %v219_v45  ;;  %v256_v62 = vadd.f32 %v467_v1, %v220_v46  ;;  %v199_v34 = vld [vmem:[%s462_s19 + $0xe0] sm:$0xff]  ;;  %v201_v42 = vld [vmem:[%s462_s19 + $0xf0] sm:$0xff]  ;;  %v202_v46 = vld [vmem:[%s462_s19 + $0xf8] sm:$0xff] }
  0x19   : > { %312 = vst.msk [vmem:[%s490_s24 + $0x20] sm:$0xff] %vm307_vm0, %v279_v35  ;;  %v283_v57 = vmax.f32 %v251_v47, 0.0  ;;  %v284_v60 = vmax.f32 %v252_v48, 0.0  ;;  %v285_v61 = vmax.f32 %v253_v49, 0.0  ;;  %v257_v2 = vadd.f32 %v467_v1, %v221_v50 }
  0x1a   : > { %313 = vst.msk [vmem:[%s490_s24 + $0x28] sm:$0xff] %vm307_vm0, %v280_v38  ;;  %v223_v3 = vmul.f32 %v457_v0, %v187_v54  ;;  %v224_v4 = vmul.f32 %v457_v0, %v188_v55  ;;  %v225_v5 = vmul.f32 %v457_v0, %v189_v56  ;;  %v286_v7 = vmax.f32 %v254_v52, 0.0  ;;  %v200_v38 = vld [vmem:[%s462_s19 + $0xe8] sm:$0xff] }
  0x1b   : > { %314 = vst.msk [vmem:[%s490_s24 + $0x30] sm:$0xff] %vm307_vm0, %v281_v43  ;;  %v258_v8 = vadd.f32 %v467_v1, %v222_v53  ;;  %v226_v9 = vmul.f32 %v457_v0, %v190_v59  ;;  %v287_v11 = vmax.f32 %v255_v58, 0.0  ;;  %v227_v13 = vmul.f32 %v457_v0, %v191_v63 }
  0x1c   : > { %315 = vst.msk [vmem:[%s490_s24 + $0x38] sm:$0xff] %vm307_vm0, %v282_v51  ;;  %v259_v12 = vadd.f32 %v467_v1, %v223_v3  ;;  %v288_v15 = vmax.f32 %v256_v62, 0.0  ;;  %v260_v16 = vadd.f32 %v467_v1, %v224_v4  ;;  %v228_v17 = vmul.f32 %v457_v0, %v192_v6 }
  0x1d   : > { %316 = vst.msk [vmem:[%s490_s24 + $0x40] sm:$0xff] %vm307_vm0, %v283_v57  ;;  %v289_v19 = vmax.f32 %v257_v2, 0.0  ;;  %v261_v20 = vadd.f32 %v467_v1, %v225_v5  ;;  %v229_v21 = vmul.f32 %v457_v0, %v193_v10  ;;  %v290_v23 = vmax.f32 %v258_v8, 0.0 }
  0x1e   : > { %317 = vst.msk [vmem:[%s490_s24 + $0x48] sm:$0xff] %vm307_vm0, %v284_v60  ;;  %v262_v24 = vadd.f32 %v467_v1, %v226_v9  ;;  %v230_v25 = vmul.f32 %v457_v0, %v194_v14  ;;  %v291_v27 = vmax.f32 %v259_v12, 0.0  ;;  %v263_v28 = vadd.f32 %v467_v1, %v227_v13 }
  0x1f   : > { %318 = vst.msk [vmem:[%s490_s24 + $0x50] sm:$0xff] %vm307_vm0, %v285_v61  ;;  %v231_v29 = vmul.f32 %v457_v0, %v195_v18  ;;  %v292_v31 = vmax.f32 %v260_v16, 0.0  ;;  %v264_v32 = vadd.f32 %v467_v1, %v228_v17  ;;  %v232_v33 = vmul.f32 %v457_v0, %v196_v22 }
  0x20   : > { %319 = vst.msk [vmem:[%s490_s24 + $0x58] sm:$0xff] %vm307_vm0, %v286_v7  ;;  %v293_v35 = vmax.f32 %v261_v20, 0.0  ;;  %v265_v36 = vadd.f32 %v467_v1, %v229_v21  ;;  %v233_v37 = vmul.f32 %v457_v0, %v197_v26  ;;  %v294_v39 = vmax.f32 %v262_v24, 0.0 }
  0x21   : > { %320 = vst.msk [vmem:[%s490_s24 + $0x60] sm:$0xff] %vm307_vm0, %v287_v11  ;;  %v266_v40 = vadd.f32 %v467_v1, %v230_v25  ;;  %v234_v41 = vmul.f32 %v457_v0, %v198_v30  ;;  %v295_v43 = vmax.f32 %v263_v28, 0.0  ;;  %v267_v44 = vadd.f32 %v467_v1, %v231_v29 }
  0x22   : > { %321 = vst.msk [vmem:[%s490_s24 + $0x68] sm:$0xff] %vm307_vm0, %v288_v15  ;;  %v235_v45 = vmul.f32 %v457_v0, %v199_v34  ;;  %v296_v47 = vmax.f32 %v264_v32, 0.0  ;;  %v268_v48 = vadd.f32 %v467_v1, %v232_v33  ;;  %v236_v49 = vmul.f32 %v457_v0, %v200_v38 }
  0x23   : > { %322 = vst.msk [vmem:[%s490_s24 + $0x70] sm:$0xff] %vm307_vm0, %v289_v19  ;;  %v297_v50 = vmax.f32 %v265_v36, 0.0  ;;  %v269_v51 = vadd.f32 %v467_v1, %v233_v37  ;;  %v237_v52 = vmul.f32 %v457_v0, %v201_v42  ;;  %v298_v53 = vmax.f32 %v266_v40, 0.0 }
  0x24   : > { %323 = vst.msk [vmem:[%s490_s24 + $0x78] sm:$0xff] %vm307_vm0, %v290_v23  ;;  %v270_v54 = vadd.f32 %v467_v1, %v234_v41  ;;  %v238_v55 = vmul.f32 %v457_v0, %v202_v46  ;;  %v299_v56 = vmax.f32 %v267_v44, 0.0  ;;  %v271_v57 = vadd.f32 %v467_v1, %v235_v45 }
  0x25   : > { %324 = vst.msk [vmem:[%s490_s24 + $0x80] sm:$0xff] %vm307_vm0, %v291_v27  ;;  %v300_v58 = vmax.f32 %v268_v48, 0.0  ;;  %v272_v59 = vadd.f32 %v467_v1, %v236_v49  ;;  %v301_v60 = vmax.f32 %v269_v51, 0.0  ;;  %v273_v0 = vadd.f32 %v467_v1, %v237_v52 }
  0x26   : > { %325 = vst.msk [vmem:[%s490_s24 + $0x88] sm:$0xff] %vm307_vm0, %v292_v31  ;;  %v302_v61 = vmax.f32 %v270_v54, 0.0  ;;  %v274_v62 = vadd.f32 %v467_v1, %v238_v55  ;;  %v303_v63 = vmax.f32 %v271_v57, 0.0 }
  0x27   : > { %326 = vst.msk [vmem:[%s490_s24 + $0x90] sm:$0xff] %vm307_vm0, %v293_v35  ;;  %v304_v2 = vmax.f32 %v272_v59, 0.0  ;;  %v305_v3 = vmax.f32 %v273_v0, 0.0 }
  0x28   : > { %327 = vst.msk [vmem:[%s490_s24 + $0x98] sm:$0xff] %vm307_vm0, %v294_v39  ;;  %v306_v4 = vmax.f32 %v274_v62, 0.0 }
  0x29   : > { %328 = vst.msk [vmem:[%s490_s24 + $0xa0] sm:$0xff] %vm307_vm0, %v295_v43 }
  0x2a   : > { %329 = vst.msk [vmem:[%s490_s24 + $0xa8] sm:$0xff] %vm307_vm0, %v296_v47 }
  0x2b   : > { %330 = vst.msk [vmem:[%s490_s24 + $0xb0] sm:$0xff] %vm307_vm0, %v297_v50 }
  0x2c   : > { %331 = vst.msk [vmem:[%s490_s24 + $0xb8] sm:$0xff] %vm307_vm0, %v298_v53 }
  0x2d   : > { %332 = vst.msk [vmem:[%s490_s24 + $0xc0] sm:$0xff] %vm307_vm0, %v299_v56 }
  0x2e   : > { %333 = vst.msk [vmem:[%s490_s24 + $0xc8] sm:$0xff] %vm307_vm0, %v300_v58 }
  0x2f   : > { %334 = vst.msk [vmem:[%s490_s24 + $0xd0] sm:$0xff] %vm307_vm0, %v301_v60 }
  0x30   : > { %335 = vst.msk [vmem:[%s490_s24 + $0xd8] sm:$0xff] %vm307_vm0, %v302_v61 }
  0x31   : > { %336 = vst.msk [vmem:[%s490_s24 + $0xe0] sm:$0xff] %vm307_vm0, %v303_v63 }
  0x32   : > { %337 = vst.msk [vmem:[%s490_s24 + $0xe8] sm:$0xff] %vm307_vm0, %v304_v2 }
  0x33   : > { %338 = vst.msk [vmem:[%s490_s24 + $0xf0] sm:$0xff] %vm307_vm0, %v305_v3 }
  0x34   : > { %339 = vst.msk [vmem:[%s490_s24 + $0xf8] sm:$0xff] %vm307_vm0, %v306_v4 }
  0x35 PF: > { %s13_s12 = sadd.s32 1, %s424_s12  }
  0x36   : > { %p10_p4 = scmp.ge.s32.totalorder %s13_s12, 4  }
  0x38   :  { %12 = sbr.rel (!%p10_p4) target bundleno = 1 (0x1), region = 62 }

// kernel: encode_forward.4
= control target key start
LH: loop header
LB: loop body
LE: loop exit
PB: predicated region body
PF: predicated region fallthrough
CT: control target
= control target key end

     0   :  { %s2445_s18 = smov 0   ;;  %s2447_s19 = smov 0   ;;  %s4574_s0 = inlined_call_operand.vmem [shape: f32[2,4,8,8,128], index: 0, kind: input, shape index: {}]   ;;  %s4575_s1 = inlined_call_operand.vmem [shape: f32[108,128], index: 1, kind: input, shape index: {}]   ;;  %s4576_s2 = inlined_call_operand.vmem [shape: f32[1,4], index: 2, kind: input, shape index: {}]   ;;  %s4577_s3 = inlined_call_operand.vmem [shape: f32[1,4], index: 3, kind: input, shape index: {}]   ;;  %s4578_s4 = inlined_call_operand.vmem [shape: f32[2,4,8,8,128], index: 4, kind: output, shape index: {0}]   ;;  %s4579_s5 = inlined_call_operand.vmem [shape: f32[2,2,128], index: 5, kind: output, shape index: {1}]  }
   0x1   :  { %s2449_s20 = smov 0   ;;  %s2451_s21 = smov 0  }
   0x2   :  { %s2453_s22 = smov 0  }
   0x3 LB: > { %s25_s23 = sadd.s32 1, %s2388_s20  ;;  %s28_s24 = sadd.s32 1, %s2392_s21  ;;  %s2396_s22 = sphi %s2453_s22, %s16_s22   ;;  %s2392_s21 = sphi %s2451_s21, %s4764_s21   ;;  %s2388_s20 = sphi %s2449_s20, %s4763_s20   ;;  %s2384_s19 = sphi %s2447_s19, %s4762_s19   ;;  %s2380_s18 = sphi %s2445_s18, %s4761_s18  }
   0x4   : > { %p26_p0 = scmp.ge.s32.totalorder %s25_s23, 4  ;;  %p2232_p1 = scmp.ge.s32.totalorder %s2396_s22, 1 }
   0x5   : > { %p204_p2 = scmp.lt.s32.totalorder %s2396_s22, 9 }
   0x6   : > { %s4766_s23 = smov (%p26_p0, %s25_s23), 0  ;;  %s4768_s24 = smov (!%p26_p0, %s28_s24), %s2392_s21 }
   0x7   : > { %p205_p3 = pnand %p2232_p1, %p204_p2  ;;  %p30_p4 = scmp.ge.s32.totalorder %s4768_s24, 2 }
   0x9   : > { %s4770_s24 = smov (%p30_p4, %s4768_s24), 0  ;;  %208 = sbr.rel (%p205_p3) target bundleno = 1253 (0x4e5), region = 36 }
   0xe   : > { %p240_p5 = scmp.lt.s32.totalorder %s2384_s19, 1  ;;  %p247_p6 = scmp.lt.s32.totalorder %s2380_s18, 3 }
   0xf   : > { %p2239_p7 = scmp.ne.s32.totalorder %s2380_s18, 0 }
  0x10   : > { %s4772_s19 = smov (!%p240_p5, %s2384_s19), 1 }
  0x11   : > { %s248_s25 = scalar_select %p247_p6, %s2380_s18, 3 }
  0x12   : > { %s2253_s26 = sshll.u32 %s4772_s19, 8  ;;  %s2236_s27 = sshll.u32 %s4772_s19, 5 }
  0x13   : > { %s2482_s30 = scalar_lea.vmem %s4574_s0, %s2253_s26  ;;  %s2235_s6 = sshll.u32 %s248_s25, 3 }
  0x14   : > { %s251_s7 = sadd.s32 %s2236_s27, %s2235_s6  ;;  %s2238_s8 = sshll.u32 %s4772_s19, 1 }
  0x15   : > { %s2237_s9 = sshll.u32 %s251_s7, 3  ;;  %s2487_s12 = scalar_lea.vmem %s4579_s5, %s2238_s8 }
  0x16   : > { %s2492_s15 = scalar_lea.vmem %s4578_s4, %s2237_s9  ;;  %261 = sbr.rel (%p2239_p7) target bundleno = 180 (0xb4), region = 40 }
  0x1b   : > { %vm262_vm0 = vcmask 31744   ;;  %v2398_v0 = vmov 0.0   ;;  %vm264_vm1 = vcmask 25600   ;;  %v2710_v1 = vld [vmem:[%s4576_s2] ss:$0 sm:$0xff]  ;;  %v385_v3 = vld [vmem:[%s2482_s30 + $0x8] sm:$0xff] }
  0x1c   : > { %286 = vst.msk [vmem:[#allocation2 + $0xb0] sm:$0xff] %vm262_vm0, %v2398_v0  ;;  %v384_v2 = vld [vmem:[%s2482_s30] sm:$0xff]  ;;  %v386_v4 = vld [vmem:[%s2482_s30 + $0x10] sm:$0xff]  ;;  %v387_v7 = vld [vmem:[%s2482_s30 + $0x18] sm:$0xff]  ;;  %v421_v8 = vmul.f32 %v2710_v1, %v385_v3 }
  0x1d   : > { %263 = vst.msk [vmem:[#allocation2] sm:$0xff] %vm262_vm0, %v2398_v0  ;;  %v420_v5 = vmul.f32 %v2710_v1, %v384_v2  ;;  %v2727_v6 = vld [vmem:[%s4577_s3] ss:$0 sm:$0xff]  ;;  %v422_v10 = vmul.f32 %v2710_v1, %v386_v4  ;;  %v389_v11 = vld [vmem:[%s2482_s30 + $0x28] sm:$0xff]  ;;  %v423_v12 = vmul.f32 %v2710_v1, %v387_v7  ;;  %v390_v13 = vld [vmem:[%s2482_s30 + $0x30] sm:$0xff] }
  0x1e   : > { %266 = vst.msk [vmem:[#allocation2 + $0x10] sm:$0xff] %vm262_vm0, %v2398_v0  ;;  %v388_v9 = vld [vmem:[%s2482_s30 + $0x20] sm:$0xff]  ;;  %v391_v16 = vld [vmem:[%s2482_s30 + $0x38] sm:$0xff]  ;;  %v457_v17 = vadd.f32 %v2727_v6, %v421_v8  ;;  %v425_v18 = vmul.f32 %v2710_v1, %v389_v11  ;;  %v426_v21 = vmul.f32 %v2710_v1, %v390_v13  ;;  %v393_v22 = vld [vmem:[%s2482_s30 + $0x48] sm:$0xff] }
  0x1f   : > { %268 = vst.msk [vmem:[#allocation2 + $0x20] sm:$0xff] %vm262_vm0, %v2398_v0  ;;  %v456_v14 = vadd.f32 %v2727_v6, %v420_v5  ;;  %v424_v15 = vmul.f32 %v2710_v1, %v388_v9  ;;  %v392_v19 = vld [vmem:[%s2482_s30 + $0x40] sm:$0xff]  ;;  %v458_v20 = vadd.f32 %v2727_v6, %v422_v10  ;;  %v459_v23 = vadd.f32 %v2727_v6, %v423_v12  ;;  %v394_v25 = vld [vmem:[%s2482_s30 + $0x50] sm:$0xff]  ;;  %v395_v29 = vld [vmem:[%s2482_s30 + $0x58] sm:$0xff] }
  0x20   : > { %270 = vst.msk [vmem:[#allocation2 + $0x30] sm:$0xff] %vm262_vm0, %v2398_v0  ;;  %v427_v24 = vmul.f32 %v2710_v1, %v391_v16  ;;  %v428_v28 = vmul.f32 %v2710_v1, %v392_v19  ;;  %v489_v30 = vmax.f32 %v457_v17, 0.0  ;;  %v461_v31 = vadd.f32 %v2727_v6, %v425_v18  ;;  %v396_v33 = vld [vmem:[%s2482_s30 + $0x60] sm:$0xff]  ;;  %v397_v37 = vld [vmem:[%s2482_s30 + $0x68] sm:$0xff]  ;;  %v398_v41 = vld [vmem:[%s2482_s30 + $0x70] sm:$0xff] }
  0x21   : > { %272 = vst.msk [vmem:[#allocation2 + $0x40] sm:$0xff] %vm262_vm0, %v2398_v0  ;;  %v488_v26 = vmax.f32 %v456_v14, 0.0  ;;  %v460_v27 = vadd.f32 %v2727_v6, %v424_v15  ;;  %v429_v32 = vmul.f32 %v2710_v1, %v393_v22  ;;  %v490_v34 = vmax.f32 %v458_v20, 0.0  ;;  %v399_v45 = vld [vmem:[%s2482_s30 + $0x78] sm:$0xff]  ;;  %v400_v49 = vld [vmem:[%s2482_s30 + $0x80] sm:$0xff]  ;;  %v401_v53 = vld [vmem:[%s2482_s30 + $0x88] sm:$0xff] }
  0x22   : > { %274 = vst.msk [vmem:[#allocation2 + $0x50] sm:$0xff] %vm262_vm0, %v2398_v0  ;;  %v462_v35 = vadd.f32 %v2727_v6, %v426_v21  ;;  %v430_v36 = vmul.f32 %v2710_v1, %v394_v25  ;;  %v491_v38 = vmax.f32 %v459_v23, 0.0  ;;  %v463_v39 = vadd.f32 %v2727_v6, %v427_v24  ;;  %v402_v57 = vld [vmem:[%s2482_s30 + $0x90] sm:$0xff]  ;;  %v403_v61 = vld [vmem:[%s2482_s30 + $0x98] sm:$0xff]  ;;  %v404_v2 = vld [vmem:[%s2482_s30 + $0xa0] sm:$0xff] }
  0x23   : > { %276 = vst.msk [vmem:[#allocation2 + $0x60] sm:$0xff] %vm262_vm0, %v2398_v0  ;;  %v431_v40 = vmul.f32 %v2710_v1, %v395_v29  ;;  %v492_v42 = vmax.f32 %v460_v27, 0.0  ;;  %v464_v43 = vadd.f32 %v2727_v6, %v428_v28  ;;  %v432_v44 = vmul.f32 %v2710_v1, %v396_v33  ;;  %v405_v7 = vld [vmem:[%s2482_s30 + $0xa8] sm:$0xff]  ;;  %v406_v11 = vld [vmem:[%s2482_s30 + $0xb0] sm:$0xff]  ;;  %v407_v15 = vld [vmem:[%s2482_s30 + $0xb8] sm:$0xff] }
  0x24   : > { %278 = vst.msk [vmem:[#allocation2 + $0x70] sm:$0xff] %vm262_vm0, %v2398_v0  ;;  %v493_v46 = vmax.f32 %v461_v31, 0.0  ;;  %v465_v47 = vadd.f32 %v2727_v6, %v429_v32  ;;  %v433_v48 = vmul.f32 %v2710_v1, %v397_v37  ;;  %v494_v50 = vmax.f32 %v462_v35, 0.0  ;;  %v408_v19 = vld [vmem:[%s2482_s30 + $0xc0] sm:$0xff]  ;;  %v409_v23 = vld [vmem:[%s2482_s30 + $0xc8] sm:$0xff]  ;;  %v410_v27 = vld [vmem:[%s2482_s30 + $0xd0] sm:$0xff] }
  0x25   : > { %280 = vst.msk [vmem:[#allocation2 + $0x80] sm:$0xff] %vm262_vm0, %v2398_v0  ;;  %v466_v51 = vadd.f32 %v2727_v6, %v430_v36  ;;  %v434_v52 = vmul.f32 %v2710_v1, %v398_v41  ;;  %v495_v54 = vmax.f32 %v463_v39, 0.0  ;;  %v467_v55 = vadd.f32 %v2727_v6, %v431_v40  ;;  %v411_v31 = vld [vmem:[%s2482_s30 + $0xd8] sm:$0xff]  ;;  %v412_v35 = vld [vmem:[%s2482_s30 + $0xe0] sm:$0xff]  ;;  %v413_v39 = vld [vmem:[%s2482_s30 + $0xe8] sm:$0xff] }
  0x26   : > { %282 = vst.msk [vmem:[#allocation2 + $0x90] sm:$0xff] %vm262_vm0, %v2398_v0  ;;  %v435_v56 = vmul.f32 %v2710_v1, %v399_v45  ;;  %v496_v58 = vmax.f32 %v464_v43, 0.0  ;;  %v468_v59 = vadd.f32 %v2727_v6, %v432_v44  ;;  %v436_v60 = vmul.f32 %v2710_v1, %v400_v49  ;;  %v414_v43 = vld [vmem:[%s2482_s30 + $0xf0] sm:$0xff] }
  0x27   : > { %284 = vst.msk [vmem:[#allocation2 + $0xa0] sm:$0xff] %vm262_vm0, %v2398_v0  ;;  %v497_v62 = vmax.f32 %v465_v47, 0.0  ;;  %v469_v63 = vadd.f32 %v2727_v6, %v433_v48  ;;  %v498_v3 = vmax.f32 %v466_v51, 0.0  ;;  %v470_v4 = vadd.f32 %v2727_v6, %v434_v52  ;;  %v415_v47 = vld [vmem:[%s2482_s30 + $0xf8] sm:$0xff] }
  0x28   : > { %288 = vst.msk [vmem:[#allocation2 + $0xc0] sm:$0xff] %vm262_vm0, %v2398_v0  ;;  %v438_v5 = vmul.f32 %v2710_v1, %v402_v57  ;;  %v499_v8 = vmax.f32 %v467_v55, 0.0  ;;  %v471_v9 = vadd.f32 %v2727_v6, %v435_v56  ;;  %v439_v10 = vmul.f32 %v2710_v1, %v403_v61 }
  0x29   : > { %290 = vst.msk [vmem:[#allocation2 + $0xd0] sm:$0xff] %vm262_vm0, %v2398_v0  ;;  %v500_v12 = vmax.f32 %v468_v59, 0.0  ;;  %v472_v13 = vadd.f32 %v2727_v6, %v436_v60  ;;  %v440_v14 = vmul.f32 %v2710_v1, %v404_v2  ;;  %v501_v16 = vmax.f32 %v469_v63, 0.0 }
  0x2a   : > { %292 = vst.msk [vmem:[#allocation2 + $0xe0] sm:$0xff] %vm262_vm0, %v2398_v0  ;;  %v441_v18 = vmul.f32 %v2710_v1, %v405_v7  ;;  %v502_v20 = vmax.f32 %v470_v4, 0.0  ;;  %v474_v21 = vadd.f32 %v2727_v6, %v438_v5  ;;  %v442_v22 = vmul.f32 %v2710_v1, %v406_v11 }
  0x2b   : > { %294 = vst.msk [vmem:[#allocation2 + $0xf0] sm:$0xff] %vm262_vm0, %v2398_v0  ;;  %v503_v24 = vmax.f32 %v471_v9, 0.0  ;;  %v475_v25 = vadd.f32 %v2727_v6, %v439_v10  ;;  %v504_v28 = vmax.f32 %v472_v13, 0.0  ;;  %v476_v29 = vadd.f32 %v2727_v6, %v440_v14 }
  0x2c   : > { %296 = vst.msk [vmem:[#allocation2 + $0x100] sm:$0xff] %vm262_vm0, %v2398_v0  ;;  %v477_v33 = vadd.f32 %v2727_v6, %v441_v18  ;;  %v506_v36 = vmax.f32 %v474_v21, 0.0  ;;  %v478_v37 = vadd.f32 %v2727_v6, %v442_v22  ;;  %v451_v56 = vmul.f32 %v2710_v1, %v415_v47 }
  0x2d   : > { %298 = vst.msk [vmem:[#allocation2 + $0x110] sm:$0xff] %vm262_vm0, %v2398_v0  ;;  %v507_v40 = vmax.f32 %v475_v25, 0.0  ;;  %v508_v44 = vmax.f32 %v476_v29, 0.0 }
  0x2e   : > { %300 = vst.msk [vmem:[#allocation2 + $0x120] sm:$0xff] %vm262_vm0, %v2398_v0  ;;  %v509_v48 = vmax.f32 %v477_v33, 0.0  ;;  %v510_v51 = vmax.f32 %v478_v37, 0.0 }
  0x2f   : > { %302 = vst.msk [vmem:[#allocation2 + $0x130] sm:$0xff] %vm262_vm0, %v2398_v0 }
  0x30   : > { %304 = vst.msk [vmem:[#allocation2 + $0x140] sm:$0xff] %vm262_vm0, %v2398_v0 }
  0x31   : > { %306 = vst.msk [vmem:[#allocation2 + $0x150] sm:$0xff] %vm262_vm0, %v2398_v0 }
  0x32   : > { %308 = vst.msk [vmem:[#allocation2 + $0x160] sm:$0xff] %vm262_vm0, %v2398_v0 }
  0x33   : > { %310 = vst.msk [vmem:[#allocation2 + $0x170] sm:$0xff] %vm262_vm0, %v2398_v0 }
  0x34   : > { %312 = vst.msk [vmem:[#allocation2 + $0x180] sm:$0xff] %vm262_vm0, %v2398_v0 }
  0x35   : > { %314 = vst.msk [vmem:[#allocation2 + $0x190] sm:$0xff] %vm262_vm0, %v2398_v0 }
  0x36   : > { %316 = vst.msk [vmem:[#allocation2 + $0x1a0] sm:$0xff] %vm262_vm0, %v2398_v0 }
  0x37   : > { %318 = vst.msk [vmem:[#allocation2 + $0x1b0] sm:$0xff] %vm262_vm0, %v2398_v0 }
  0x38   : > { %320 = vst.msk [vmem:[#allocation2 + $0x1c0] sm:$0xff] %vm262_vm0, %v2398_v0 }
  0x39   : > { %322 = vst.msk [vmem:[#allocation2 + $0x1d0] sm:$0xff] %vm262_vm0, %v2398_v0 }
  0x3a   : > { %324 = vst.msk [vmem:[#allocation2 + $0x1e0] sm:$0xff] %vm262_vm0, %v2398_v0 }
  0x3b   : > { %326 = vst.msk [vmem:[#allocation2 + $0x1f0] sm:$0xff] %vm262_vm0, %v2398_v0 }
  0x3c   : > { %328 = vst.msk [vmem:[#allocation2 + $0x200] sm:$0xff] %vm262_vm0, %v2398_v0 }
  0x3d   : > { %330 = vst.msk [vmem:[#allocation2 + $0x210] sm:$0xff] %vm262_vm0, %v2398_v0 }
  0x3e   : > { %332 = vst.msk [vmem:[#allocation2 + $0x220] sm:$0xff] %vm262_vm0, %v2398_v0 }
  0x3f   : > { %334 = vst.msk [vmem:[#allocation2 + $0x230] sm:$0xff] %vm262_vm0, %v2398_v0 }
  0x40   : > { %336 = vst.msk [vmem:[#allocation2 + $0x240] sm:$0xff] %vm262_vm0, %v2398_v0 }
  0x41   : > { %338 = vst.msk [vmem:[#allocation2 + $0x250] sm:$0xff] %vm262_vm0, %v2398_v0 }
  0x42   : > { %340 = vst.msk [vmem:[#allocation2 + $0x260] sm:$0xff] %vm262_vm0, %v2398_v0 }
  0x43   : > { %342 = vst.msk [vmem:[#allocation2 + $0x270] sm:$0xff] %vm262_vm0, %v2398_v0 }
  0x44   : > { %344 = vst.msk [vmem:[#allocation2 + $0x280] sm:$0xff] %vm262_vm0, %v2398_v0 }
  0x45   : > { %346 = vst.msk [vmem:[#allocation2 + $0x290] sm:$0xff] %vm262_vm0, %v2398_v0 }
  0x46   : > { %348 = vst.msk [vmem:[#allocation2 + $0x2a0] sm:$0xff] %vm262_vm0, %v2398_v0 }
  0x47   : > { %350 = vst.msk [vmem:[#allocation2 + $0x2b0] sm:$0xff] %vm262_vm0, %v2398_v0 }
  0x48   : > { %352 = vst.msk [vmem:[#allocation2 + $0x2c0] sm:$0xff] %vm262_vm0, %v2398_v0 }
  0x49   : > { %354 = vst.msk [vmem:[#allocation2 + $0x2d0] sm:$0xff] %vm262_vm0, %v2398_v0 }
  0x4a   : > { %356 = vst.msk [vmem:[#allocation2 + $0x2e0] sm:$0xff] %vm262_vm0, %v2398_v0 }
  0x4b   : > { %358 = vst.msk [vmem:[#allocation2 + $0x2f0] sm:$0xff] %vm262_vm0, %v2398_v0 }
  0x4c   : > { %360 = vst.msk [vmem:[#allocation2 + $0x300] sm:$0xff] %vm262_vm0, %v2398_v0 }
  0x4d   : > { %362 = vst.msk [vmem:[#allocation2 + $0x310] sm:$0xff] %vm262_vm0, %v2398_v0 }
  0x4e   : > { %364 = vst.msk [vmem:[#allocation2 + $0x320] sm:$0xff] %vm262_vm0, %v2398_v0 }
  0x4f   : > { %366 = vst.msk [vmem:[#allocation2 + $0x330] sm:$0xff] %vm262_vm0, %v2398_v0 }
  0x50   : > { %368 = vst.msk [vmem:[#allocation2 + $0x340] sm:$0xff] %vm262_vm0, %v2398_v0 }
  0x51   : > { %370 = vst.msk [vmem:[#allocation2 + $0x350] sm:$0xff] %vm262_vm0, %v2398_v0 }
  0x52   : > { %372 = vst.msk [vmem:[#allocation2 + $0x360] sm:$0xff] %vm262_vm0, %v2398_v0 }
  0x53   : > { %374 = vst.msk [vmem:[#allocation2 + $0x370] sm:$0xff] %vm262_vm0, %v2398_v0 }
  0x54   : > { %376 = vst.msk [vmem:[#allocation2 + $0x380] sm:$0xff] %vm262_vm0, %v2398_v0 }
  0x55   : > { %378 = vst.msk [vmem:[#allocation2 + $0x390] sm:$0xff] %vm262_vm0, %v2398_v0 }
  0x56   : > { %380 = vst.msk [vmem:[#allocation2 + $0x3a0] sm:$0xff] %vm262_vm0, %v2398_v0 }
  0x57   : > { %382 = vst.msk [vmem:[#allocation2 + $0x3b0] sm:$0xff] %vm262_vm0, %v2398_v0 }
  0x58   : > { %287 = vst.msk [vmem:[#allocation2 + $0xb8] sm:$0x3] %vm264_vm1, %v2398_v0 }
  0x59   : > { %265 = vst.msk [vmem:[#allocation2 + $0x8] sm:$0x3] %vm264_vm1, %v2398_v0 }
  0x5a   : > { %267 = vst.msk [vmem:[#allocation2 + $0x18] sm:$0x3] %vm264_vm1, %v2398_v0 }
  0x5b   : > { %269 = vst.msk [vmem:[#allocation2 + $0x28] sm:$0x3] %vm264_vm1, %v2398_v0 }
  0x5c   : > { %271 = vst.msk [vmem:[#allocation2 + $0x38] sm:$0x3] %vm264_vm1, %v2398_v0 }
  0x5d   : > { %273 = vst.msk [vmem:[#allocation2 + $0x48] sm:$0x3] %vm264_vm1, %v2398_v0 }
  0x5e   : > { %275 = vst.msk [vmem:[#allocation2 + $0x58] sm:$0x3] %vm264_vm1, %v2398_v0 }
  0x5f   : > { %277 = vst.msk [vmem:[#allocation2 + $0x68] sm:$0x3] %vm264_vm1, %v2398_v0 }
  0x60   : > { %279 = vst.msk [vmem:[#allocation2 + $0x78] sm:$0x3] %vm264_vm1, %v2398_v0 }
  0x61   : > { %281 = vst.msk [vmem:[#allocation2 + $0x88] sm:$0x3] %vm264_vm1, %v2398_v0 }
  0x62   : > { %283 = vst.msk [vmem:[#allocation2 + $0x98] sm:$0x3] %vm264_vm1, %v2398_v0 }
  0x63   : > { %285 = vst.msk [vmem:[#allocation2 + $0xa8] sm:$0x3] %vm264_vm1, %v2398_v0 }
  0x64   : > { %289 = vst.msk [vmem:[#allocation2 + $0xc8] sm:$0x3] %vm264_vm1, %v2398_v0 }
  0x65   : > { %291 = vst.msk [vmem:[#allocation2 + $0xd8] sm:$0x3] %vm264_vm1, %v2398_v0 }
  0x66   : > { %293 = vst.msk [vmem:[#allocation2 + $0xe8] sm:$0x3] %vm264_vm1, %v2398_v0 }
  0x67   : > { %295 = vst.msk [vmem:[#allocation2 + $0xf8] sm:$0x3] %vm264_vm1, %v2398_v0 }
  0x68   : > { %297 = vst.msk [vmem:[#allocation2 + $0x108] sm:$0x3] %vm264_vm1, %v2398_v0 }
  0x69   : > { %299 = vst.msk [vmem:[#allocation2 + $0x118] sm:$0x3] %vm264_vm1, %v2398_v0 }
  0x6a   : > { %301 = vst.msk [vmem:[#allocation2 + $0x128] sm:$0x3] %vm264_vm1, %v2398_v0 }
  0x6b   : > { %303 = vst.msk [vmem:[#allocation2 + $0x138] sm:$0x3] %vm264_vm1, %v2398_v0 }
  0x6c   : > { %305 = vst.msk [vmem:[#allocation2 + $0x148] sm:$0x3] %vm264_vm1, %v2398_v0 }
  0x6d   : > { %307 = vst.msk [vmem:[#allocation2 + $0x158] sm:$0x3] %vm264_vm1, %v2398_v0 }
  0x6e   : > { %309 = vst.msk [vmem:[#allocation2 + $0x168] sm:$0x3] %vm264_vm1, %v2398_v0 }
  0x6f   : > { %311 = vst.msk [vmem:[#allocation2 + $0x178] sm:$0x3] %vm264_vm1, %v2398_v0 }
  0x70   : > { %313 = vst.msk [vmem:[#allocation2 + $0x188] sm:$0x3] %vm264_vm1, %v2398_v0 }
  0x71   : > { %315 = vst.msk [vmem:[#allocation2 + $0x198] sm:$0x3] %vm264_vm1, %v2398_v0 }
  0x72   : > { %317 = vst.msk [vmem:[#allocation2 + $0x1a8] sm:$0x3] %vm264_vm1, %v2398_v0 }
  0x73   : > { %319 = vst.msk [vmem:[#allocation2 + $0x1b8] sm:$0x3] %vm264_vm1, %v2398_v0 }
  0x74   : > { %321 = vst.msk [vmem:[#allocation2 + $0x1c8] sm:$0x3] %vm264_vm1, %v2398_v0 }
  0x75   : > { %323 = vst.msk [vmem:[#allocation2 + $0x1d8] sm:$0x3] %vm264_vm1, %v2398_v0 }
  0x76   : > { %325 = vst.msk [vmem:[#allocation2 + $0x1e8] sm:$0x3] %vm264_vm1, %v2398_v0 }
  0x77   : > { %327 = vst.msk [vmem:[#allocation2 + $0x1f8] sm:$0x3] %vm264_vm1, %v2398_v0 }
  0x78   : > { %329 = vst.msk [vmem:[#allocation2 + $0x208] sm:$0x3] %vm264_vm1, %v2398_v0 }
  0x79   : > { %331 = vst.msk [vmem:[#allocation2 + $0x218] sm:$0x3] %vm264_vm1, %v2398_v0 }
  0x7a   : > { %333 = vst.msk [vmem:[#allocation2 + $0x228] sm:$0x3] %vm264_vm1, %v2398_v0 }
  0x7b   : > { %335 = vst.msk [vmem:[#allocation2 + $0x238] sm:$0x3] %vm264_vm1, %v2398_v0 }
  0x7c   : > { %337 = vst.msk [vmem:[#allocation2 + $0x248] sm:$0x3] %vm264_vm1, %v2398_v0 }
  0x7d   : > { %339 = vst.msk [vmem:[#allocation2 + $0x258] sm:$0x3] %vm264_vm1, %v2398_v0 }
  0x7e   : > { %341 = vst.msk [vmem:[#allocation2 + $0x268] sm:$0x3] %vm264_vm1, %v2398_v0 }
  0x7f   : > { %343 = vst.msk [vmem:[#allocation2 + $0x278] sm:$0x3] %vm264_vm1, %v2398_v0 }
  0x80   : > { %345 = vst.msk [vmem:[#allocation2 + $0x288] sm:$0x3] %vm264_vm1, %v2398_v0 }
  0x81   : > { %347 = vst.msk [vmem:[#allocation2 + $0x298] sm:$0x3] %vm264_vm1, %v2398_v0 }
  0x82   : > { %349 = vst.msk [vmem:[#allocation2 + $0x2a8] sm:$0x3] %vm264_vm1, %v2398_v0 }
  0x83   : > { %351 = vst.msk [vmem:[#allocation2 + $0x2b8] sm:$0x3] %vm264_vm1, %v2398_v0 }
  0x84   : > { %353 = vst.msk [vmem:[#allocation2 + $0x2c8] sm:$0x3] %vm264_vm1, %v2398_v0 }
  0x85   : > { %355 = vst.msk [vmem:[#allocation2 + $0x2d8] sm:$0x3] %vm264_vm1, %v2398_v0 }
  0x86   : > { %357 = vst.msk [vmem:[#allocation2 + $0x2e8] sm:$0x3] %vm264_vm1, %v2398_v0 }
  0x87   : > { %359 = vst.msk [vmem:[#allocation2 + $0x2f8] sm:$0x3] %vm264_vm1, %v2398_v0 }
  0x88   : > { %361 = vst.msk [vmem:[#allocation2 + $0x308] sm:$0x3] %vm264_vm1, %v2398_v0 }
  0x89   : > { %363 = vst.msk [vmem:[#allocation2 + $0x318] sm:$0x3] %vm264_vm1, %v2398_v0 }
  0x8a   : > { %365 = vst.msk [vmem:[#allocation2 + $0x328] sm:$0x3] %vm264_vm1, %v2398_v0 }
  0x8b   : > { %367 = vst.msk [vmem:[#allocation2 + $0x338] sm:$0x3] %vm264_vm1, %v2398_v0 }
  0x8c   : > { %369 = vst.msk [vmem:[#allocation2 + $0x348] sm:$0x3] %vm264_vm1, %v2398_v0 }
  0x8d   : > { %371 = vst.msk [vmem:[#allocation2 + $0x358] sm:$0x3] %vm264_vm1, %v2398_v0 }
  0x8e   : > { %373 = vst.msk [vmem:[#allocation2 + $0x368] sm:$0x3] %vm264_vm1, %v2398_v0 }
  0x8f   : > { %375 = vst.msk [vmem:[#allocation2 + $0x378] sm:$0x3] %vm264_vm1, %v2398_v0 }
  0x90   : > { %377 = vst.msk [vmem:[#allocation2 + $0x388] sm:$0x3] %vm264_vm1, %v2398_v0 }
  0x91   : > { %379 = vst.msk [vmem:[#allocation2 + $0x398] sm:$0x3] %vm264_vm1, %v2398_v0 }
  0x92   : > { %381 = vst.msk [vmem:[#allocation2 + $0x3a8] sm:$0x3] %vm264_vm1, %v2398_v0 }
  0x93   : > { %383 = vst.msk [vmem:[#allocation2 + $0x3b8] sm:$0x3] %vm264_vm1, %v2398_v0  ;;  %v437_v0 = vmul.f32 %v2710_v1, %v401_v53  ;;  %v450_v53 = vmul.f32 %v2710_v1, %v414_v43 }
  0x94   : > { %521 = vst.msk [vmem:[#allocation2 + $0xb1] sm:$0xff] %vm262_vm0, %v488_v26  ;;  %v443_v26 = vmul.f32 %v2710_v1, %v407_v15 }
  0x95   : > { %522 = vst.msk [vmem:[#allocation2 + $0xc1] sm:$0xff] %vm262_vm0, %v489_v30  ;;  %v473_v17 = vadd.f32 %v2727_v6, %v437_v0  ;;  %v444_v30 = vmul.f32 %v2710_v1, %v408_v19 }
  0x96   : > { %523 = vst.msk [vmem:[#allocation2 + $0xd1] sm:$0xff] %vm262_vm0, %v490_v34  ;;  %v445_v34 = vmul.f32 %v2710_v1, %v409_v23  ;;  %v479_v41 = vadd.f32 %v2727_v6, %v443_v26 }
  0x97   : > { %524 = vst.msk [vmem:[#allocation2 + $0xe1] sm:$0xff] %vm262_vm0, %v491_v38  ;;  %v505_v32 = vmax.f32 %v473_v17, 0.0  ;;  %v446_v38 = vmul.f32 %v2710_v1, %v410_v27  ;;  %v480_v45 = vadd.f32 %v2727_v6, %v444_v30 }
  0x98   : > { %525 = vst.msk [vmem:[#allocation2 + $0xf1] sm:$0xff] %vm262_vm0, %v492_v42  ;;  %v447_v42 = vmul.f32 %v2710_v1, %v411_v31  ;;  %v481_v49 = vadd.f32 %v2727_v6, %v445_v34 }
  0x99   : > { %526 = vst.msk [vmem:[#allocation2 + $0x101] sm:$0xff] %vm262_vm0, %v493_v46  ;;  %v448_v46 = vmul.f32 %v2710_v1, %v412_v35  ;;  %v482_v52 = vadd.f32 %v2727_v6, %v446_v38  ;;  %v512_v57 = vmax.f32 %v480_v45, 0.0 }
  0x9a   : > { %527 = vst.msk [vmem:[#allocation2 + $0x111] sm:$0xff] %vm262_vm0, %v494_v50  ;;  %v449_v50 = vmul.f32 %v2710_v1, %v413_v39  ;;  %v483_v55 = vadd.f32 %v2727_v6, %v447_v42  ;;  %v513_v59 = vmax.f32 %v481_v49, 0.0  ;;  %v487_v1 = vadd.f32 %v2727_v6, %v451_v56 }
  0x9b   : > { %528 = vst.msk [vmem:[#allocation2 + $0x121] sm:$0xff] %vm262_vm0, %v495_v54  ;;  %v511_v54 = vmax.f32 %v479_v41, 0.0  ;;  %v514_v61 = vmax.f32 %v482_v52, 0.0 }
  0x9c   : > { %529 = vst.msk [vmem:[#allocation2 + $0x151] sm:$0xff] %vm262_vm0, %v496_v58  ;;  %v484_v58 = vadd.f32 %v2727_v6, %v448_v46  ;;  %v485_v60 = vadd.f32 %v2727_v6, %v449_v50  ;;  %v515_v63 = vmax.f32 %v483_v55, 0.0  ;;  %v519_v4 = vmax.f32 %v487_v1, 0.0 }
  0x9d   : > { %530 = vst.msk [vmem:[#allocation2 + $0x161] sm:$0xff] %vm262_vm0, %v497_v62  ;;  %v486_v62 = vadd.f32 %v2727_v6, %v450_v53 }
  0x9e   : > { %531 = vst.msk [vmem:[#allocation2 + $0x171] sm:$0xff] %vm262_vm0, %v498_v3  ;;  %v516_v0 = vmax.f32 %v484_v58, 0.0  ;;  %v517_v2 = vmax.f32 %v485_v60, 0.0 }
  0x9f   : > { %532 = vst.msk [vmem:[#allocation2 + $0x181] sm:$0xff] %vm262_vm0, %v499_v8  ;;  %v518_v3 = vmax.f32 %v486_v62, 0.0 }
  0xa0   : > { %533 = vst.msk [vmem:[#allocation2 + $0x191] sm:$0xff] %vm262_vm0, %v500_v12 }
  0xa1   : > { %534 = vst.msk [vmem:[#allocation2 + $0x1a1] sm:$0xff] %vm262_vm0, %v501_v16 }
  0xa2   : > { %535 = vst.msk [vmem:[#allocation2 + $0x1b1] sm:$0xff] %vm262_vm0, %v502_v20 }
  0xa3   : > { %536 = vst.msk [vmem:[#allocation2 + $0x1c1] sm:$0xff] %vm262_vm0, %v503_v24 }
  0xa4   : > { %537 = vst.msk [vmem:[#allocation2 + $0x1f1] sm:$0xff] %vm262_vm0, %v504_v28 }
  0xa5   : > { %538 = vst.msk [vmem:[#allocation2 + $0x201] sm:$0xff] %vm262_vm0, %v505_v32 }
  0xa6   : > { %539 = vst.msk [vmem:[#allocation2 + $0x211] sm:$0xff] %vm262_vm0, %v506_v36 }
  0xa7   : > { %540 = vst.msk [vmem:[#allocation2 + $0x221] sm:$0xff] %vm262_vm0, %v507_v40 }
  0xa8   : > { %541 = vst.msk [vmem:[#allocation2 + $0x231] sm:$0xff] %vm262_vm0, %v508_v44 }
  0xa9   : > { %542 = vst.msk [vmem:[#allocation2 + $0x241] sm:$0xff] %vm262_vm0, %v509_v48 }
  0xaa   : > { %543 = vst.msk [vmem:[#allocation2 + $0x251] sm:$0xff] %vm262_vm0, %v510_v51 }
  0xab   : > { %544 = vst.msk [vmem:[#allocation2 + $0x261] sm:$0xff] %vm262_vm0, %v511_v54 }
  0xac   : > { %545 = vst.msk [vmem:[#allocation2 + $0x291] sm:$0xff] %vm262_vm0, %v512_v57 }
  0xad   : > { %546 = vst.msk [vmem:[#allocation2 + $0x2a1] sm:$0xff] %vm262_vm0, %v513_v59 }
  0xae   : > { %547 = vst.msk [vmem:[#allocation2 + $0x2b1] sm:$0xff] %vm262_vm0, %v514_v61 }
  0xaf   : > { %548 = vst.msk [vmem:[#allocation2 + $0x2c1] sm:$0xff] %vm262_vm0, %v515_v63 }
  0xb0   : > { %549 = vst.msk [vmem:[#allocation2 + $0x2d1] sm:$0xff] %vm262_vm0, %v516_v0 }
  0xb1   : > { %550 = vst.msk [vmem:[#allocation2 + $0x2e1] sm:$0xff] %vm262_vm0, %v517_v2 }
  0xb2   : > { %551 = vst.msk [vmem:[#allocation2 + $0x2f1] sm:$0xff] %vm262_vm0, %v518_v3 }
  0xb3   : > { %552 = vst.msk [vmem:[#allocation2 + $0x301] sm:$0xff] %vm262_vm0, %v519_v4 }
  0xb4 PF: > { %s553_s26 = smul.u32 160, %s2380_s18  ;;  %vm631_vm2 = vcmask 1046528   ;;  %s2399_s28 = smov 4   ;;  %vm680_vm3 = vcmask 1045504   ;;  %vm1130_vm4 = vcmask 31744   ;;  %vm1139_vm5 = vcmask 64512  }
  0xb5   : > { %s2400_s29 = smov 8   ;;  %s2401_s30 = smov 12   ;;  %vm1148_vm6 = vcmask 97280   ;;  %vm1157_vm7 = vcmask 130048   ;;  %vm1166_vm8 = vcmask 162816   ;;  %vm1175_vm9 = vcmask 195584  }
  0xb6   : > { %s2876_s27 = scalar_lea.vmem [#allocation2], %s553_s26  ;;  %s2402_s6 = smov 16   ;;  %vm1184_vm10 = vcmask 228352   ;;  %vm1193_vm11 = vcmask 261120   ;;  %vm1202_vm12 = vcmask 293888   ;;  %vm1211_vm13 = vcmask 326656  }
  0xb7   : > { %s2403_s7 = smov 20   ;;  %s2404_s8 = smov 24   ;;  %vm4601_vm14 = vcmask 392192   ;;  %vm4600_vm15 = vcmask 359424   ;;  %vm1238_vm0 = vcmask 424960   ;;  %vm1247_vm1 = vcmask 457728  }
  0xb8   : > { %s2405_s9 = smov 28   ;;  %s2406_s10 = smov 32  }
  0xb9   : > { %s2407_s11 = smov 36   ;;  %s2408_s13 = smov 40  }
  0xba   : > { %v2879_v6 = vld [vmem:[%s2876_s27 + $0x40] sm:$0xff]  ;;  %v2882_v5 = vld [vmem:[%s2876_s27 + $0x48] sm:$0x3]  ;;  %v2894_v16 = vld [vmem:[%s2876_s27 + $0x50] sm:$0xff]  ;;  %s2409_s14 = smov 44   ;;  %s2410_s16 = smov 48  }
  0xbb   : > { %v2885_v7 = vld [vmem:[%s2876_s27 + $0x20] sm:$0xff]  ;;  %v644_v8 = vrot.slane %v2879_v6, 1  ;;  %v645_v9 = vrot.slane %v2882_v5, 1  ;;  %v560_v10 = vld [vmem:[%s2876_s27 + $0x28] sm:$0x3]  ;;  %v2901_v20 = vld [vmem:[%s2876_s27 + $0x30] sm:$0xff] }
  0xbc   : > { %v638_v11 = vrot.slane %v2885_v7, 1  ;;  %v555_v12 = vld [vmem:[%s2876_s27] sm:$0xff]  ;;  %v639_v13 = vrot.slane %v560_v10, 1  ;;  %v556_v14 = vld [vmem:[%s2876_s27 + $0x8] sm:$0x3]  ;;  %v2910_v23 = vld [vmem:[%s2876_s27 + $0x10] sm:$0xff] }
  0xbd   : > { %v632_v15 = vrot.slane %v555_v12, 1  ;;  %v2897_v17 = vsel %vm631_vm2, %v644_v8, %v645_v9  ;;  %v633_v18 = vrot.slane %v556_v14, 1  ;;  %v566_v19 = vld [vmem:[%s2876_s27 + $0x58] sm:$0x3]  ;;  %v647_v26 = vrot.slane %v2894_v16, 1  ;;  %v2928_v35 = vld [vmem:[%s2876_s27 + $0x70] sm:$0xff] }
  0xbe   : > { %v562_v21 = vld [vmem:[%s2876_s27 + $0x38] sm:$0x3]  ;;  %664 = vrot.lane.b32.xlu2 %v2897_v17, %s2399_s28  ;;  %v2907_v22 = vsel %vm631_vm2, %v638_v11, %v639_v13  ;;  %v648_v27 = vrot.slane %v566_v19, 1  ;;  %v641_v28 = vrot.slane %v2901_v20, 1  ;;  %v635_v30 = vrot.slane %v2910_v23, 1  ;;  %v2934_v37 = vld [vmem:[%s2876_s27 + $0x60] sm:$0xff] }
  0xbf   : > { %v558_v24 = vld [vmem:[%s2876_s27 + $0x18] sm:$0x3]  ;;  %660 = vrot.lane.b32.xlu1 %v2907_v22, %s2399_s28  ;;  %v634_v25 = vsel %vm631_vm2, %v632_v15, %v633_v18  ;;  %v642_v29 = vrot.slane %v562_v21, 1  ;;  %v568_v38 = vld [vmem:[%s2876_s27 + $0x68] sm:$0x3]  ;;  %v681_v39 = vrot.slane %v555_v12, 2 }
  0xc0   : > { %656 = vrot.lane.b32.xlu0 %v634_v25, %s2399_s28  ;;  %v636_v31 = vrot.slane %v558_v24, 1  ;;  %v2921_v32 = vsel %vm631_vm2, %v647_v26, %v648_v27  ;;  %v570_v36 = vld [vmem:[%s2876_s27 + $0x78] sm:$0x3]  ;;  %v682_v40 = vrot.slane %v556_v14, 2  ;;  %v653_v41 = vrot.slane %v2928_v35, 1  ;;  %s2411_s17 = smov 52  }
  0xc1   : > { %v2924_v33 = vsel %vm631_vm2, %v641_v28, %v642_v29  ;;  %v654_v42 = vrot.slane %v570_v36, 1  ;;  %v650_v43 = vrot.slane %v2934_v37, 1  ;;  %v651_v44 = vrot.slane %v568_v38, 1  ;;  %v572_v8 = vld [vmem:[%s2876_s27 + $0x88] sm:$0x3]  ;;  %s2412_s19 = smov 56  }
  0xc2   : > { %v637_v34 = vsel %vm631_vm2, %v635_v30, %v636_v31  ;;  %v683_v45 = vsel %vm680_vm3, %v681_v39, %v682_v40  ;;  %v690_v48 = vrot.slane %v2901_v20, 2  ;;  %v691_v49 = vrot.slane %v562_v21, 2  ;;  %v574_v31 = vld [vmem:[%s2876_s27 + $0x98] sm:$0x3]  ;;  %s2413_s25 = smov 60   ;;  %s2414_s26 = smov 64  }
  0xc3   : > { %v2944_v46 = vsel %vm631_vm2, %v653_v41, %v654_v42  ;;  %v2947_v47 = vsel %vm631_vm2, %v650_v43, %v651_v44  ;;  %v687_v50 = vrot.slane %v2885_v7, 2  ;;  %v688_v51 = vrot.slane %v560_v10, 2 }
  0xc4   : > { %v684_v52 = vrot.slane %v2910_v23, 2  ;;  %v685_v53 = vrot.slane %v558_v24, 2  ;;  %v2958_v54 = vsel %vm680_vm3, %v690_v48, %v691_v49  ;;  %v699_v57 = vrot.slane %v2934_v37, 2  ;;  %v3134_v49 = vld [vmem:[%s2876_s27 + $0xb0] sm:$0xff] }
  0xc5   : > { %v2961_v55 = vsel %vm680_vm3, %v687_v50, %v688_v51  ;;  %v700_v58 = vrot.slane %v568_v38, 2  ;;  %v696_v59 = vrot.slane %v2894_v16, 2  ;;  %v697_v60 = vrot.slane %v566_v19, 2  ;;  %v3137_v50 = vld [vmem:[%s2876_s27 + $0xa0] sm:$0xff] }
  0xc6   : > { %666 = vrot.lane.b32.xlu2 %v2921_v32, %s2399_s28  ;;  %v686_v56 = vsel %vm680_vm3, %v684_v52, %v685_v53  ;;  %v693_v61 = vrot.slane %v2879_v6, 2  ;;  %v694_v62 = vrot.slane %v2882_v5, 2  ;;  %v702_v2 = vrot.slane %v2928_v35, 2  ;;  %v571_v5 = vld [vmem:[%s2876_s27 + $0x80] sm:$0xff] }
  0xc7   : > { %662 = vrot.lane.b32.xlu1 %v2924_v33, %s2399_s28  ;;  %v2974_v63 = vsel %vm680_vm3, %v699_v57, %v700_v58  ;;  %v2977_v1 = vsel %vm680_vm3, %v696_v59, %v697_v60  ;;  %v703_v3 = vrot.slane %v570_v36, 2  ;;  %v755_v9 = vrot.slane %v571_v5, 1  ;;  %v3158_v57 = vld [vmem:[%s2876_s27 + $0xc0] sm:$0xff] }
  0xc8   : > { %658 = vrot.lane.b32.xlu0 %v637_v34, %s2399_s28  ;;  %v2980_v0 = vsel %vm680_vm3, %v693_v61, %v694_v62  ;;  %v756_v10 = vrot.slane %v572_v8, 1  ;;  %v782_v14 = vrot.slane %v571_v5, 2  ;;  %v783_v15 = vrot.slane %v572_v8, 2  ;;  %v3173_v61 = vld [vmem:[%s2876_s27 + $0x110] sm:$0xff]  ;;  %v3176_v62 = vld [vmem:[%s2876_s27 + $0x100] sm:$0xff] }
  0xc9   : > { %v2990_v4 = vsel %vm680_vm3, %v702_v2, %v703_v3  ;;  %4620 = vst [vmem:[#allocation21_spill] sm:$0xff] %v3173_v61  ;;  %v576_v2 = vld [vmem:[%s2876_s27 + $0xa8] sm:$0x3]  ;;  %v935_v3 = vrot.slane %v3158_v57, 1  ;;  %v932_v8 = vrot.slane %v3134_v49, 1 }
  0xca   : > { %v757_v11 = vsel %vm631_vm2, %v755_v9, %v756_v10  ;;  %v784_v18 = vsel %vm680_vm3, %v782_v14, %v783_v15  ;;  %v929_v10 = vrot.slane %v3137_v50, 1  ;;  %v930_v14 = vrot.slane %v576_v2, 1 }
  0xce   : > { %705 = vrot.lane.b32.xlu2 %v683_v45, %s2400_s29 }
  0xcf   : > { %670 = vrot.lane.b32.xlu1 %v2944_v46, %s2399_s28 }
  0xd0   : > { %668 = vrot.lane.b32.xlu0 %v2947_v47, %s2399_s28 }
  0xd6   : > { %711 = vrot.lane.b32.xlu2 %v2958_v54, %s2400_s29 }
  0xd7   : > { %709 = vrot.lane.b32.xlu1 %v2961_v55, %s2400_s29 }
  0xd8   : > { %707 = vrot.lane.b32.xlu0 %v686_v56, %s2400_s29 }
  0xde   : > { %717 = vrot.lane.b32.xlu2 %v2974_v63, %s2400_s29 }
  0xdf   : > { %715 = vrot.lane.b32.xlu1 %v2977_v1, %s2400_s29 }
  0xe0   : > { %713 = vrot.lane.b32.xlu0 %v2980_v0, %s2400_s29 }
  0xe6   : > { %732 = vrot.lane.b32.xlu2 %v2885_v7, %s2401_s30 }
  0xe7   : > { %730 = vrot.lane.b32.xlu1 %v2910_v23, %s2401_s30 }
  0xe8   : > { %719 = vrot.lane.b32.xlu0 %v2990_v4, %s2400_s29 }
  0xee   : > { %738 = vrot.lane.b32.xlu2 %v2894_v16, %s2401_s30 }
  0xef   : > { %736 = vrot.lane.b32.xlu1 %v2879_v6, %s2401_s30 }
  0xf0   : > { %734 = vrot.lane.b32.xlu0 %v2901_v20, %s2401_s30 }
  0xf6   : > { %744 = vrot.lane.b32.xlu2 %v571_v5, %s2401_s30 }
  0xf7   : > { %742 = vrot.lane.b32.xlu1 %v2928_v35, %s2401_s30 }
  0xf8   : > { %740 = vrot.lane.b32.xlu0 %v2934_v37, %s2401_s30 }
  0xfe   : > { %762 = vrot.lane.b32.xlu2 %v2924_v33, %s2402_s6 }
  0xff   : > { %760 = vrot.lane.b32.xlu1 %v2907_v22, %s2402_s6 }
 0x100   : > { %758 = vrot.lane.b32.xlu0 %v637_v34, %s2402_s6 }
 0x106   : > { %768 = vrot.lane.b32.xlu2 %v2947_v47, %s2402_s6 }
 0x107   : > { %766 = vrot.lane.b32.xlu1 %v2921_v32, %s2402_s6 }
 0x108   : > { %764 = vrot.lane.b32.xlu0 %v2897_v17, %s2402_s6 }
 0x10e   : > { %785 = vrot.lane.b32.xlu2 %v686_v56, %s2403_s7  ;;  %v3155_v56 = vld [vmem:[%s2876_s27 + $0xd0] sm:$0xff] }
 0x10f   : > { %772 = vrot.lane.b32.xlu1 %v757_v11, %s2402_s6 }
 0x110   : > { %770 = vrot.lane.b32.xlu0 %v2944_v46, %s2402_s6 }
 0x116   : > { %791 = vrot.lane.b32.xlu2 %v2980_v0, %s2403_s7 }
 0x117   : > { %789 = vrot.lane.b32.xlu1 %v2958_v54, %s2403_s7 }
 0x118   : > { %787 = vrot.lane.b32.xlu0 %v2961_v55, %s2403_s7  ;;  %v3033_v12 = vpop.permute.xlu2 %664 }
 0x119   : > { %4602 = vst [vmem:[#allocation3_spill] sm:$0xff] %v3033_v12 }
 0x11e   : > { %797 = vrot.lane.b32.xlu2 %v2990_v4, %s2403_s7 }
 0x11f   : > { %795 = vrot.lane.b32.xlu1 %v2974_v63, %s2403_s7 }
 0x120   : > { %793 = vrot.lane.b32.xlu0 %v2977_v1, %s2403_s7  ;;  %v3041_v13 = vpop.permute.xlu2 %666 }
 0x126   : > { %812 = vrot.lane.b32.xlu2 %v2901_v20, %s2404_s8 }
 0x127   : > { %810 = vrot.lane.b32.xlu1 %v2885_v7, %s2404_s8  ;;  %v573_v7 = vld [vmem:[%s2876_s27 + $0x90] sm:$0xff] }
 0x128   : > { %799 = vrot.lane.b32.xlu0 %v784_v18, %s2403_s7  ;;  %v3049_v19 = vpop.permute.xlu2 %705  ;;  %v862_v45 = vrot.slane %v573_v7, 2 }
 0x129   : > { %4603 = vst [vmem:[#allocation4_spill] sm:$0xff] %v3049_v19 }
 0x12e   : > { %818 = vrot.lane.b32.xlu2 %v2934_v37, %s2404_s8 }
 0x12f   : > { %816 = vrot.lane.b32.xlu1 %v2894_v16, %s2404_s8 }
 0x130   : > { %814 = vrot.lane.b32.xlu0 %v2879_v6, %s2404_s8  ;;  %v3057_v21 = vpop.permute.xlu2 %711 }
 0x131   : > { %v3059_v24 = vpop.permute.xlu1 %660 }
 0x132   : > { %4604 = vst [vmem:[#allocation5_spill] sm:$0xff] %v3059_v24  ;;  %v3061_v25 = vpop.permute.xlu0 %656  ;;  %v3261_v24 = vld [vmem:[%s2876_s27 + $0x108] sm:$0x3] }
 0x133   : > { %4605 = vst [vmem:[#allocation6_spill] sm:$0xff] %v3061_v25 }
 0x136   : > { %824 = vrot.lane.b32.xlu2 %v573_v7, %s2404_s8 }
 0x137   : > { %822 = vrot.lane.b32.xlu1 %v571_v5, %s2404_s8 }
 0x138   : > { %820 = vrot.lane.b32.xlu0 %v2928_v35, %s2404_s8  ;;  %v3068_v26 = vpop.permute.xlu2 %717 }
 0x139   : > { %4606 = vst [vmem:[#allocation7_spill] sm:$0xff] %v3068_v26  ;;  %v3070_v27 = vpop.permute.xlu1 %662 }
 0x13a   : > { %v3072_v6 = vpop.permute.xlu0 %658 }
 0x13e   : > { %842 = vrot.lane.b32.xlu2 %v2897_v17, %s2405_s9  ;;  %v835_v17 = vrot.slane %v573_v7, 1 }
 0x13f   : > { %840 = vrot.lane.b32.xlu1 %v2924_v33, %s2405_s9 }
 0x140   : > { %838 = vrot.lane.b32.xlu0 %v2907_v22, %s2405_s9  ;;  %v3080_v28 = vpop.permute.xlu2 %732  ;;  %v836_v22 = vrot.slane %v574_v31, 1 }
 0x141   : > { %v3082_v29 = vpop.permute.xlu1 %670 }
 0x142   : > { %v3084_v30 = vpop.permute.xlu0 %668  ;;  %v837_v38 = vsel %vm631_vm2, %v835_v17, %v836_v22  ;;  %v931_v17 = vsel %vm631_vm2, %v929_v10, %v930_v14  ;;  %v3218_v22 = vld [vmem:[%s2876_s27 + $0xe8] sm:$0x3]  ;;  %v938_v10 = vrot.slane %v3155_v56, 1 }
 0x146   : > { %848 = vrot.lane.b32.xlu2 %v2944_v46, %s2405_s9 }
 0x147   : > { %846 = vrot.lane.b32.xlu1 %v2947_v47, %s2405_s9  ;;  %v863_v47 = vrot.slane %v574_v31, 2  ;;  %v3214_v31 = vld [vmem:[%s2876_s27 + $0xf8] sm:$0x3] }
 0x148   : > { %844 = vrot.lane.b32.xlu0 %v2921_v32, %s2405_s9  ;;  %v3093_v33 = vpop.permute.xlu2 %738 }
 0x149   : > { %4607 = vst [vmem:[#allocation8_spill] sm:$0xff] %v3093_v33  ;;  %v3095_v34 = vpop.permute.xlu1 %709  ;;  %v864_v51 = vsel %vm680_vm3, %v862_v45, %v863_v47  ;;  %v4581_v47 = vrot.slane %v3214_v31, 1 }
 0x14a   : > { %4608 = vst [vmem:[#allocation9_spill] sm:$0xff] %v3095_v34  ;;  %v3097_v36 = vpop.permute.xlu0 %707  ;;  %v3256_v34 = vld [vmem:[%s2876_s27 + $0x118] sm:$0x3] }
 0x14e   : > { %865 = vrot.lane.b32.xlu2 %v2961_v55, %s2406_s10  ;;  %v3152_v55 = vld [vmem:[%s2876_s27 + $0xe0] sm:$0xff] }
 0x14f   : > { %852 = vrot.lane.b32.xlu1 %v837_v38, %s2405_s9  ;;  %4618 = vst [vmem:[#allocation19_spill] sm:$0xff] %v3152_v55  ;;  %v3223_v38 = vld [vmem:[%s2876_s27 + $0xd8] sm:$0x3] }
 0x150   : > { %850 = vrot.lane.b32.xlu0 %v757_v11, %s2405_s9  ;;  %v3104_v39 = vpop.permute.xlu2 %744  ;;  %v4582_v14 = vrot.slane %v3223_v38, 1 }
 0x151   : > { %v3106_v32 = vpop.permute.xlu1 %715 }
 0x152   : > { %4609 = vst [vmem:[#allocation10_spill] sm:$0xff] %v3106_v32  ;;  %v3108_v40 = vpop.permute.xlu0 %713 }
 0x153   : > { %4610 = vst [vmem:[#allocation11_spill] sm:$0xff] %v3108_v40  ;;  %v995_v40 = vrot.slane %v3176_v62, 2 }
 0x156   : > { %871 = vrot.lane.b32.xlu2 %v2977_v1, %s2406_s10  ;;  %v3182_v1 = vld [vmem:[%s2876_s27 + $0xf0] sm:$0xff] }
 0x157   : > { %869 = vrot.lane.b32.xlu1 %v2980_v0, %s2406_s10  ;;  %v3185_v0 = vld [vmem:[%s2876_s27 + $0xb8] sm:$0x3]  ;;  %v944_v45 = vrot.slane %v3182_v1, 1 }
 0x158   : > { %867 = vrot.lane.b32.xlu0 %v2958_v54, %s2406_s10  ;;  %v3116_v41 = vpop.permute.xlu2 %762  ;;  %v933_v9 = vrot.slane %v3185_v0, 1 }
 0x159   : > { %4611 = vst [vmem:[#allocation12_spill] sm:$0xff] %v3116_v41  ;;  %v3118_v42 = vpop.permute.xlu1 %730  ;;  %v3243_v41 = vsel %vm631_vm2, %v944_v45, %v4581_v47  ;;  %v977_v45 = vrot.slane %v3137_v50, 2  ;;  %v978_v47 = vrot.slane %v576_v2, 2 }
 0x15a   : > { %4612 = vst [vmem:[#allocation13_spill] sm:$0xff] %v3118_v42  ;;  %v3120_v43 = vpop.permute.xlu0 %719  ;;  %v3211_v7 = vsel %vm631_vm2, %v932_v8, %v933_v9  ;;  %v4583_v8 = vrot.slane %v3218_v22, 1 }
 0x15b   : > { %v979_v42 = vsel %vm680_vm3, %v977_v45, %v978_v47  ;;  %v987_v47 = vrot.slane %v3223_v38, 2 }
 0x15e   : > { %877 = vrot.lane.b32.xlu2 %v784_v18, %s2406_s10 }
 0x15f   : > { %875 = vrot.lane.b32.xlu1 %v2990_v4, %s2406_s10 }
 0x160   : > { %873 = vrot.lane.b32.xlu0 %v2974_v63, %s2406_s10  ;;  %v3127_v44 = vpop.permute.xlu2 %768  ;;  %v3179_v63 = vld [vmem:[%s2876_s27 + $0xc8] sm:$0x3] }
 0x161   : > { %4613 = vst [vmem:[#allocation14_spill] sm:$0xff] %v3127_v44  ;;  %v3129_v46 = vpop.permute.xlu1 %736  ;;  %v4580_v4 = vrot.slane %v3179_v63, 1  ;;  %v998_v44 = vrot.slane %v3173_v61, 2 }
 0x162   : > { %v3131_v48 = vpop.permute.xlu0 %734 }
 0x163   : > { %4614 = vst [vmem:[#allocation15_spill] sm:$0xff] %v3131_v48  ;;  %v3208_v18 = vsel %vm631_vm2, %v935_v3, %v4580_v4  ;;  %v941_v3 = vrot.slane %v3152_v55, 1  ;;  %v3253_v48 = vsel %vm631_vm2, %v938_v10, %v4582_v14  ;;  %v950_v10 = vrot.slane %v3173_v61, 1 }
 0x164   : > { %v4585_v14 = vrot.slane %v3256_v34, 1 }
 0x166   : > { %899 = vrot.lane.b32.xlu2 %v3134_v49, %s2407_s11  ;;  %v3282_v2 = vsel %vm631_vm2, %v950_v10, %v4585_v14  ;;  %v983_v10 = vrot.slane %v3158_v57, 2  ;;  %v981_v14 = vrot.slane %v3185_v0, 2  ;;  %v996_v0 = vrot.slane %v3261_v24, 2 }
 0x167   : > { %897 = vrot.lane.b32.xlu1 %v3137_v50, %s2407_s11 }
 0x168   : > { %879 = vrot.lane.b32.xlu0 %v864_v51, %s2406_s10  ;;  %v3145_v52 = vpop.permute.xlu2 %785  ;;  %v997_v12 = vsel %vm680_vm3, %v995_v40, %v996_v0 }
 0x169   : > { %4615 = vst [vmem:[#allocation16_spill] sm:$0xff] %v3145_v52  ;;  %v3147_v53 = vpop.permute.xlu1 %742  ;;  %v947_v52 = vrot.slane %v3176_v62, 1 }
 0x16a   : > { %4616 = vst [vmem:[#allocation17_spill] sm:$0xff] %v3147_v53  ;;  %v3149_v54 = vpop.permute.xlu0 %740 }
 0x16b   : > { %4617 = vst [vmem:[#allocation18_spill] sm:$0xff] %v3149_v54 }
 0x16e   : > { %905 = vrot.lane.b32.xlu2 %v3152_v55, %s2407_s11 }
 0x16f   : > { %903 = vrot.lane.b32.xlu1 %v3155_v56, %s2407_s11 }
 0x170   : > { %901 = vrot.lane.b32.xlu0 %v3158_v57, %s2407_s11  ;;  %v3166_v58 = vpop.permute.xlu2 %791 }
 0x171   : > { %v3168_v59 = vpop.permute.xlu1 %760 }
 0x172   : > { %v3170_v60 = vpop.permute.xlu0 %758 }
 0x173   : > { %4619 = vst [vmem:[#allocation20_spill] sm:$0xff] %v3170_v60  ;;  %v4584_v60 = vrot.slane %v3261_v24, 1 }
 0x175   : > { %v3287_v19 = vsel %vm631_vm2, %v947_v52, %v4584_v60  ;;  %v984_v52 = vrot.slane %v3179_v63, 2 }
 0x176   : > { %911 = vrot.lane.b32.xlu2 %v3173_v61, %s2407_s11 }
 0x177   : > { %909 = vrot.lane.b32.xlu1 %v3176_v62, %s2407_s11 }
 0x178   : > { %907 = vrot.lane.b32.xlu0 %v3182_v1, %s2407_s11  ;;  %v3196_v5 = vpop.permute.xlu2 %797 }
 0x179   : > { %4621 = vst [vmem:[#allocation22_spill] sm:$0xff] %v3196_v5  ;;  %v3201_v11 = vpop.permute.xlu1 %766 }
 0x17a   : > { %4622 = vst [vmem:[#allocation23_spill] sm:$0xff] %v3201_v11  ;;  %v3203_v15 = vpop.permute.xlu0 %764  ;;  %v3310_v11 = vsel %vm680_vm3, %v983_v10, %v984_v52  ;;  %v989_v52 = vrot.slane %v3152_v55, 2 }
 0x17e   : > { %957 = vrot.lane.b32.xlu2 %v3208_v18, %s2408_s13 }
 0x17f   : > { %955 = vrot.lane.b32.xlu1 %v3211_v7, %s2408_s13 }
 0x180   : > { %953 = vrot.lane.b32.xlu0 %v931_v17, %s2408_s13  ;;  %v3230_v51 = vpop.permute.xlu2 %812  ;;  %v3248_v17 = vsel %vm631_vm2, %v941_v3, %v4583_v8 }
 0x181   : > { %v3234_v9 = vpop.permute.xlu1 %772 }
 0x182   : > { %v3238_v4 = vpop.permute.xlu0 %770 }
 0x183   : > { %4623 = vst [vmem:[#allocation24_spill] sm:$0xff] %v3238_v4  ;;  %v999_v4 = vrot.slane %v3256_v34, 2 }
 0x185   : > { %v1000_v0 = vsel %vm680_vm3, %v998_v44, %v999_v4 }
 0x186   : > { %963 = vrot.lane.b32.xlu2 %v3243_v41, %s2408_s13 }
 0x187   : > { %961 = vrot.lane.b32.xlu1 %v3248_v17, %s2408_s13 }
 0x188   : > { %959 = vrot.lane.b32.xlu0 %v3253_v48, %s2408_s13  ;;  %v3268_v3 = vpop.permute.xlu2 %818 }
 0x189   : > { %4624 = vst [vmem:[#allocation25_spill] sm:$0xff] %v3268_v3  ;;  %v3272_v8 = vpop.permute.xlu1 %789 }
 0x18a   : > { %4625 = vst [vmem:[#allocation26_spill] sm:$0xff] %v3272_v8  ;;  %v3276_v50 = vpop.permute.xlu0 %787  ;;  %v986_v8 = vrot.slane %v3155_v56, 2 }
 0x18c   : > { %v3307_v3 = vsel %vm680_vm3, %v986_v8, %v987_v47  ;;  %v992_v47 = vrot.slane %v3182_v1, 2 }
 0x18e   : > { %1001 = vrot.lane.b32.xlu2 %v979_v42, %s2409_s14  ;;  %v980_v42 = vrot.slane %v3134_v49, 2 }
 0x18f   : > { %967 = vrot.lane.b32.xlu1 %v3282_v2, %s2408_s13 }
 0x190   : > { %965 = vrot.lane.b32.xlu0 %v3287_v19, %s2408_s13  ;;  %v3296_v45 = vpop.permute.xlu2 %824  ;;  %v3313_v33 = vsel %vm680_vm3, %v980_v42, %v981_v14  ;;  %v993_v14 = vrot.slane %v3214_v31, 2  ;;  %v990_v42 = vrot.slane %v3218_v22, 2 }
 0x191   : > { %v3300_v60 = vpop.permute.xlu1 %795 }
 0x192   : > { %4626 = vst [vmem:[#allocation27_spill] sm:$0xff] %v3300_v60  ;;  %v3304_v25 = vpop.permute.xlu0 %793  ;;  %v994_v60 = vsel %vm680_vm3, %v992_v47, %v993_v14  ;;  %v991_v5 = vsel %vm680_vm3, %v989_v52, %v990_v42  ;;  %v3367_v42 = vld [vmem:[%s2876_s27 + $0x120] sm:$0xff] }
 0x193   : > { %4627 = vst [vmem:[#allocation28_spill] sm:$0xff] %v3304_v25 }
 0x194   : > { %4637 = vst [vmem:[#allocation38_spill] sm:$0xff] %v3367_v42 }
 0x196   : > { %1007 = vrot.lane.b32.xlu2 %v3307_v3, %s2409_s14 }
 0x197   : > { %1005 = vrot.lane.b32.xlu1 %v3310_v11, %s2409_s14 }
 0x198   : > { %1003 = vrot.lane.b32.xlu0 %v3313_v33, %s2409_s14  ;;  %v3323_v8 = vpop.permute.xlu2 %842 }
 0x199   : > { %4628 = vst [vmem:[#allocation29_spill] sm:$0xff] %v3323_v8  ;;  %v3327_v10 = vpop.permute.xlu1 %810 }
 0x19a   : > { %4629 = vst [vmem:[#allocation30_spill] sm:$0xff] %v3327_v10  ;;  %v3331_v25 = vpop.permute.xlu0 %799 }
 0x19e   : > { %1013 = vrot.lane.b32.xlu2 %v997_v12, %s2409_s14 }
 0x19f   : > { %1011 = vrot.lane.b32.xlu1 %v994_v60, %s2409_s14 }
 0x1a0   : > { %1009 = vrot.lane.b32.xlu0 %v991_v5, %s2409_s14  ;;  %v3339_v8 = vpop.permute.xlu2 %848 }
 0x1a1   : > { %4630 = vst [vmem:[#allocation31_spill] sm:$0xff] %v3339_v8  ;;  %v3341_v10 = vpop.permute.xlu1 %816 }
 0x1a2   : > { %v3345_v40 = vpop.permute.xlu0 %814 }
 0x1a3   : > { %4631 = vst [vmem:[#allocation32_spill] sm:$0xff] %v3345_v40 }
 0x1a6   : > { %1028 = vrot.lane.b32.xlu2 %v3158_v57, %s2410_s16 }
 0x1a7   : > { %1026 = vrot.lane.b32.xlu1 %v3134_v49, %s2410_s16 }
 0x1a8   : > { %1015 = vrot.lane.b32.xlu0 %v1000_v0, %s2409_s14  ;;  %v3351_v47 = vpop.permute.xlu2 %865 }
 0x1a9   : > { %4632 = vst [vmem:[#allocation33_spill] sm:$0xff] %v3351_v47  ;;  %v3353_v14 = vpop.permute.xlu1 %822 }
 0x1aa   : > { %4633 = vst [vmem:[#allocation34_spill] sm:$0xff] %v3353_v14  ;;  %v3355_v52 = vpop.permute.xlu0 %820 }
 0x1ab   : > { %4634 = vst [vmem:[#allocation35_spill] sm:$0xff] %v3355_v52 }
 0x1ae   : > { %1034 = vrot.lane.b32.xlu2 %v3182_v1, %s2410_s16 }
 0x1af   : > { %1032 = vrot.lane.b32.xlu1 %v3152_v55, %s2410_s16 }
 0x1b0   : > { %1030 = vrot.lane.b32.xlu0 %v3155_v56, %s2410_s16  ;;  %v3360_v44 = vpop.permute.xlu2 %871 }
 0x1b1   : > { %4635 = vst [vmem:[#allocation36_spill] sm:$0xff] %v3360_v44  ;;  %v3362_v4 = vpop.permute.xlu1 %840  ;;  %v3388_v44 = vld [vmem:[%s2876_s27 + $0x128] sm:$0x3] }
 0x1b2   : > { %v3364_v49 = vpop.permute.xlu0 %838 }
 0x1b3   : > { %4636 = vst [vmem:[#allocation37_spill] sm:$0xff] %v3364_v49 }
 0x1b6   : > { %1040 = vrot.lane.b32.xlu2 %v3367_v42, %s2410_s16 }
 0x1b7   : > { %1038 = vrot.lane.b32.xlu1 %v3173_v61, %s2410_s16 }
 0x1b8   : > { %1036 = vrot.lane.b32.xlu0 %v3176_v62, %s2410_s16  ;;  %v3372_v40 = vpop.permute.xlu2 %877 }
 0x1b9   : > { %4638 = vst [vmem:[#allocation39_spill] sm:$0xff] %v3372_v40  ;;  %v3374_v47 = vpop.permute.xlu1 %846  ;;  %v1051_v40 = vrot.slane %v3367_v42, 1 }
 0x1ba   : > { %4639 = vst [vmem:[#allocation40_spill] sm:$0xff] %v3374_v47  ;;  %v3376_v8 = vpop.permute.xlu0 %844 }
 0x1be   : > { %1058 = vrot.lane.b32.xlu2 %v3253_v48, %s2411_s17 }
 0x1bf   : > { %1056 = vrot.lane.b32.xlu1 %v3208_v18, %s2411_s17 }
 0x1c0   : > { %1054 = vrot.lane.b32.xlu0 %v3211_v7, %s2411_s17  ;;  %v3381_v49 = vpop.permute.xlu2 %899  ;;  %v4586_v7 = vrot.slane %v3388_v44, 1 }
 0x1c1   : > { %v3383_v52 = vpop.permute.xlu1 %852 }
 0x1c2   : > { %v3385_v14 = vpop.permute.xlu0 %850 }
 0x1c3   : > { %4640 = vst [vmem:[#allocation41_spill] sm:$0xff] %v3385_v14  ;;  %v3404_v14 = vsel %vm631_vm2, %v1051_v40, %v4586_v7 }
 0x1c4   : > { %4643 = vst [vmem:[#allocation44_spill] sm:$0xff] %v3404_v14 }
 0x1c6   : > { %1064 = vrot.lane.b32.xlu2 %v3287_v19, %s2411_s17 }
 0x1c7   : > { %1062 = vrot.lane.b32.xlu1 %v3243_v41, %s2411_s17 }
 0x1c8   : > { %1060 = vrot.lane.b32.xlu0 %v3248_v17, %s2411_s17  ;;  %v3393_v47 = vpop.permute.xlu2 %905 }
 0x1c9   : > { %4641 = vst [vmem:[#allocation42_spill] sm:$0xff] %v3393_v47  ;;  %v3397_v54 = vpop.permute.xlu1 %869 }
 0x1ca   : > { %4642 = vst [vmem:[#allocation43_spill] sm:$0xff] %v3397_v54  ;;  %v3399_v53 = vpop.permute.xlu0 %867 }
 0x1ce   : > { %1081 = vrot.lane.b32.xlu2 %v3313_v33, %s2412_s19 }
 0x1cf   : > { %1068 = vrot.lane.b32.xlu1 %v3404_v14, %s2411_s17 }
 0x1d0   : > { %1066 = vrot.lane.b32.xlu0 %v3282_v2, %s2411_s17  ;;  %v3409_v47 = vpop.permute.xlu2 %911 }
 0x1d1   : > { %v3411_v32 = vpop.permute.xlu1 %875 }
 0x1d2   : > { %v3413_v26 = vpop.permute.xlu0 %873 }
 0x1d3   : > { %4644 = vst [vmem:[#allocation45_spill] sm:$0xff] %v3413_v26  ;;  %v1078_v26 = vrot.slane %v3367_v42, 2 }
 0x1d6   : > { %1087 = vrot.lane.b32.xlu2 %v991_v5, %s2412_s19  ;;  %v1079_v5 = vrot.slane %v3388_v44, 2 }
 0x1d7   : > { %1085 = vrot.lane.b32.xlu1 %v3307_v3, %s2412_s19 }
 0x1d8   : > { %1083 = vrot.lane.b32.xlu0 %v3310_v11, %s2412_s19  ;;  %v3417_v40 = vpop.permute.xlu2 %957  ;;  %v1080_v11 = vsel %vm680_vm3, %v1078_v26, %v1079_v5  ;;  %vm4599_vm3 = vcmask 490496  }
 0x1d9   : > { %4645 = vst [vmem:[#allocation46_spill] sm:$0xff] %v3417_v40  ;;  %v3419_v7 = vpop.permute.xlu1 %897 }
 0x1da   : > { %4646 = vst [vmem:[#allocation47_spill] sm:$0xff] %v3419_v7  ;;  %v3421_v33 = vpop.permute.xlu0 %879 }
 0x1de   : > { %1093 = vrot.lane.b32.xlu2 %v1000_v0, %s2412_s19 }
 0x1df   : > { %1091 = vrot.lane.b32.xlu1 %v997_v12, %s2412_s19 }
 0x1e0   : > { %1089 = vrot.lane.b32.xlu0 %v994_v60, %s2412_s19  ;;  %v3423_v54 = vpop.permute.xlu2 %963 }
 0x1e1   : > { %v3425_v14 = vpop.permute.xlu1 %903 }
 0x1e2   : > { %v3429_v3 = vpop.permute.xlu0 %901 }
 0x1e3   : > { %4647 = vst [vmem:[#allocation48_spill] sm:$0xff] %v3429_v3  ;;  %v3448_v3 = vld [vmem:[%s2876_s27 + $0x130] sm:$0xff] }
 0x1e6   : > { %1108 = vrot.lane.b32.xlu2 %v3155_v56, %s2413_s25 }
 0x1e7   : > { %1106 = vrot.lane.b32.xlu1 %v3158_v57, %s2413_s25 }
 0x1e8   : > { %1095 = vrot.lane.b32.xlu0 %v1080_v11, %s2412_s19  ;;  %v3434_v12 = vpop.permute.xlu2 %1001 }
 0x1e9   : > { %4648 = vst [vmem:[#allocation49_spill] sm:$0xff] %v3434_v12  ;;  %v3436_v60 = vpop.permute.xlu1 %909 }
 0x1ea   : > { %v3438_v0 = vpop.permute.xlu0 %907 }
 0x1ee   : > { %1114 = vrot.lane.b32.xlu2 %v3176_v62, %s2413_s25 }
 0x1ef   : > { %1112 = vrot.lane.b32.xlu1 %v3182_v1, %s2413_s25 }
 0x1f0   : > { %1110 = vrot.lane.b32.xlu0 %v3152_v55, %s2413_s25  ;;  %v3443_v40 = vpop.permute.xlu2 %1007  ;;  %v1132_v55 = vsel %vm1130_vm4, %v2910_v23, %v3072_v6 }
 0x1f1   : > { %v956_v26 = vpop.permute.xlu1 %955 }
 0x1f2   : > { %v3445_v5 = vpop.permute.xlu0 %953 }
 0x1f3   : > { %4649 = vst [vmem:[#allocation50_spill] sm:$0xff] %v3445_v5  ;;  %v1141_v5 = vsel %vm1139_vm5, %v1132_v55, %v3097_v36 }
 0x1f6   : > { %1120 = vrot.lane.b32.xlu2 %v3448_v3, %s2413_s25 }
 0x1f7   : > { %1118 = vrot.lane.b32.xlu1 %v3367_v42, %s2413_s25 }
 0x1f8   : > { %1116 = vrot.lane.b32.xlu0 %v3173_v61, %s2413_s25  ;;  %v3453_v11 = vpop.permute.xlu2 %1013  ;;  %v1150_v61 = vsel %vm1148_vm6, %v1141_v5, %v3080_v28 }
 0x1f9   : > { %v3455_v12 = vpop.permute.xlu1 %961  ;;  %v1159_v42 = vsel %vm1157_vm7, %v1150_v61, %v3168_v59  ;;  %v4652_v61 = vrot.slane %v3218_v22, 1 }
 0x1fa   : > { %4650 = vst [vmem:[#allocation51_spill] sm:$0xff] %v3455_v12  ;;  %v3457_v7 = vpop.permute.xlu0 %959  ;;  %v4651_v12 = vrot.slane %v3179_v63, 1  ;;  %v1168_v6 = vsel %vm1166_vm8, %v1159_v42, %v3276_v50 }
 0x1fb   : > { %v1177_v28 = vsel %vm1175_vm9, %v1168_v6, %v3230_v51 }
 0x1fc   : > { %v1186_v55 = vsel %vm1184_vm10, %v1177_v28, %v3362_v4  ;;  %v3538_v28 = vld [vmem:[%s2876_s27 + $0x138] sm:$0x3] }
 0x1fd   : > { %v1195_v59 = vsel %vm1193_vm11, %v1186_v55, %v3399_v53 }
 0x1fe   : > { %1273 = vrot.lane.b32.xlu2 %v3253_v48, %s2399_s28  ;;  %v1204_v50 = vsel %vm1202_vm12, %v1195_v59, %v3381_v49  ;;  %v1134_v49 = vsel %vm1130_vm4, %v2901_v20, %v3070_v27  ;;  %v4659_v59 = vrot.slane %v3261_v24, 1 }
 0x1ff   : > { %1271 = vrot.lane.b32.xlu1 %v4651_v12, %s2399_s28  ;;  %v1213_v53 = vsel %vm1211_vm13, %v1204_v50, %v956_v26  ;;  %v1143_v20 = vsel %vm1139_vm5, %v1134_v49, %v3057_v21  ;;  %v4658_v21 = vrot.slane %v3256_v34, 1  ;;  %v4665_v49 = vld [vmem:[#allocation18_spill] sm:$0xff] }
 0x200   : > { %1269 = vrot.lane.b32.xlu0 %v3208_v18, %s2399_s28  ;;  %v1029_v23 = vpop.permute.xlu2 %1028  ;;  %v4653_v18 = vrot.slane %v3223_v38, 1 }
 0x201   : > { %v968_v36 = vpop.permute.xlu1 %967 }
 0x202   : > { %v3477_v48 = vpop.permute.xlu0 %965 }
 0x206   : > { %1279 = vrot.lane.b32.xlu2 %v4652_v61, %s2399_s28 }
 0x207   : > { %1277 = vrot.lane.b32.xlu1 %v3248_v17, %s2399_s28  ;;  %v1138_v17 = vsel %vm1130_vm4, %v2928_v35, %v3082_v29  ;;  %v4656_v35 = vrot.slane %v3214_v31, 1 }
 0x208   : > { %1275 = vrot.lane.b32.xlu0 %v4653_v18, %s2399_s28  ;;  %v3493_v51 = vpop.permute.xlu2 %1034  ;;  %v1147_v5 = vsel %vm1139_vm5, %v1138_v17, %v3120_v43  ;;  %v4662_v18 = vld [vmem:[#allocation7_spill] sm:$0xff] }
 0x209   : > { %4654 = vst [vmem:[#allocation52_spill] sm:$0xff] %v3493_v51  ;;  %v3497_v4 = vpop.permute.xlu1 %1005  ;;  %v1156_v26 = vsel %vm1148_vm6, %v1147_v5, %v3104_v39  ;;  %v1152_v39 = vsel %vm1148_vm6, %v1143_v20, %v3129_v46  ;;  %v1137_v46 = vsel %vm1130_vm4, %v2934_v37, %v3084_v30 }
 0x20a   : > { %4655 = vst [vmem:[#allocation53_spill] sm:$0xff] %v3497_v4  ;;  %v1004_v42 = vpop.permute.xlu0 %1003  ;;  %v1165_v29 = vsel %vm1157_vm7, %v1156_v26, %v3234_v9  ;;  %v1161_v9 = vsel %vm1157_vm7, %v1152_v39, %v3203_v15  ;;  %v4668_v39 = vld [vmem:[#allocation14_spill] sm:$0xff] }
 0x20b   : > { %v1222_v12 = vsel %vm4600_vm15, %v1213_v53, %v1004_v42  ;;  %v1170_v15 = vsel %vm1166_vm8, %v1161_v9, %v3166_v58  ;;  %v4663_v42 = vld [vmem:[#allocation10_spill] sm:$0xff] }
 0x20c   : > { %v3507_v6 = vsel %vm4601_vm14, %v1222_v12, %v1029_v23 }
 0x20e   : > { %1285 = vrot.lane.b32.xlu2 %v3287_v19, %s2399_s28  ;;  %v1174_v19 = vsel %vm1166_vm8, %v1165_v29, %v3331_v25 }
 0x20f   : > { %1283 = vrot.lane.b32.xlu1 %v4656_v35, %s2399_s28 }
 0x210   : > { %1281 = vrot.lane.b32.xlu0 %v3243_v41, %s2399_s28  ;;  %v1041_v43 = vpop.permute.xlu2 %1040  ;;  %v1183_v41 = vsel %vm1175_vm9, %v1174_v19, %v3296_v45  ;;  %v1266_v45 = vrot.slane %v3448_v3, 1 }
 0x211   : > { %v3525_v23 = vpop.permute.xlu1 %1011  ;;  %v1192_v25 = vsel %vm1184_vm10, %v1183_v41, %v3383_v52  ;;  %v1267_v52 = vrot.slane %v3538_v28, 1  ;;  %v4669_v41 = vld [vmem:[#allocation22_spill] sm:$0xff] }
 0x212   : > { %v3529_v27 = vpop.permute.xlu0 %1009  ;;  %v1201_v55 = vsel %vm1193_vm11, %v1192_v25, %v3421_v33  ;;  %v1179_v33 = vsel %vm1175_vm9, %v1170_v15, %v3341_v10  ;;  %v1146_v10 = vsel %vm1139_vm5, %v1137_v46, %v4662_v18  ;;  %v4672_v46 = vld [vmem:[#allocation34_spill] sm:$0xff]  ;;  %v4673_v15 = vld [vmem:[#allocation44_spill] sm:$0xff] }
 0x213   : > { %4657 = vst [vmem:[#allocation54_spill] sm:$0xff] %v3529_v27  ;;  %v1188_v37 = vsel %vm1184_vm10, %v1179_v33, %v3376_v8  ;;  %v1210_v30 = vsel %vm1202_vm12, %v1201_v55, %v3409_v47  ;;  %v4664_v8 = vld [vmem:[#allocation17_spill] sm:$0xff]  ;;  %v1268_v5 = vsel %vm631_vm2, %v1266_v45, %v1267_v52  ;;  %v4670_v55 = vrot.slane %v3388_v44, 1  ;;  %v3612_v33 = vld [vmem:[%s2876_s27 + $0x140] sm:$0xff] }
 0x214   : > { %v1219_v50 = vsel %vm1211_vm13, %v1210_v30, %v968_v36  ;;  %v1155_v12 = vsel %vm1148_vm6, %v1146_v10, %v4664_v8  ;;  %v4667_v36 = vld [vmem:[#allocation36_spill] sm:$0xff]  ;;  %v4675_v30 = vld [vmem:[#allocation41_spill] sm:$0xff]  ;;  %v4677_v8 = vld [vmem:[#allocation31_spill] sm:$0xff] }
 0x215   : > { %v1197_v35 = vsel %vm1193_vm11, %v1188_v37, %v4667_v36  ;;  %v3648_v36 = vld [vmem:[%s2876_s27 + $0x170] sm:$0xff] }
 0x216   : > { %1291 = vrot.lane.b32.xlu2 %v4658_v21, %s2399_s28  ;;  %v1206_v19 = vsel %vm1202_vm12, %v1197_v35, %v3425_v14  ;;  %v4671_v21 = vld [vmem:[#allocation27_spill] sm:$0xff] }
 0x217   : > { %1289 = vrot.lane.b32.xlu1 %v3282_v2, %s2399_s28  ;;  %v1136_v2 = vsel %vm1130_vm4, %v2894_v16, %v3041_v13  ;;  %v4666_v13 = vld [vmem:[#allocation24_spill] sm:$0xff]  ;;  %v1215_v20 = vsel %vm1211_vm13, %v1206_v19, %v3457_v7  ;;  %v3655_v35 = vld [vmem:[%s2876_s27 + $0x160] sm:$0xff] }
 0x218   : > { %1287 = vrot.lane.b32.xlu0 %v4659_v59, %s2399_s28  ;;  %v3561_v61 = vpop.permute.xlu2 %1058  ;;  %v1145_v17 = vsel %vm1139_vm5, %v1136_v2, %v4663_v42  ;;  %v1164_v26 = vsel %vm1157_vm7, %v1155_v12, %v4666_v13  ;;  %v4674_v59 = vld [vmem:[#allocation35_spill] sm:$0xff]  ;;  %v1224_v10 = vsel %vm4600_vm15, %v1215_v20, %v3443_v40 }
 0x219   : > { %4660 = vst [vmem:[#allocation55_spill] sm:$0xff] %v3561_v61  ;;  %v3567_v58 = vpop.permute.xlu1 %1026  ;;  %v1154_v16 = vsel %vm1148_vm6, %v1145_v17, %v4665_v49  ;;  %v1173_v25 = vsel %vm1166_vm8, %v1164_v26, %v4669_v41  ;;  %v1325_v17 = vrot.slane %v3612_v33, 7  ;;  %v3642_v26 = vld [vmem:[%s2876_s27 + $0x180] sm:$0xff] }
 0x21a   : > { %4661 = vst [vmem:[#allocation56_spill] sm:$0xff] %v3567_v58  ;;  %v1016_v53 = vpop.permute.xlu0 %1015  ;;  %v1163_v9 = vsel %vm1157_vm7, %v1154_v16, %v4668_v39  ;;  %v1182_v7 = vsel %vm1175_vm9, %v1173_v25, %v4672_v46  ;;  %v3661_v39 = vrot.slane %v3642_v26, 7 }
 0x21b   : > { %v1228_v47 = vsel %vm4600_vm15, %v1219_v50, %v1016_v53  ;;  %v1172_v14 = vsel %vm1166_vm8, %v1163_v9, %v4671_v21  ;;  %v1191_v2 = vsel %vm1184_vm10, %v1182_v7, %v4675_v30 }
 0x21c   : > { %v3588_v29 = vsel %vm4601_vm14, %v1228_v47, %v1041_v43  ;;  %v3603_v43 = vld [vmem:[%s2876_s27 + $0x150] sm:$0xff]  ;;  %v1181_v37 = vsel %vm1175_vm9, %v1172_v14, %v4674_v59  ;;  %v4678_v47 = vld [vmem:[#allocation39_spill] sm:$0xff] }
 0x21d   : > { %v4591_v42 = vrot.slane %v3603_v43, 7  ;;  %v1190_v12 = vsel %vm1184_vm10, %v1181_v37, %v4677_v8  ;;  %v3684_v14 = vld [vmem:[%s2876_s27 + $0x190] sm:$0xff] }
 0x21e   : > { %1297 = vrot.lane.b32.xlu2 %v1268_v5, %s2399_s28  ;;  %v1200_v5 = vsel %vm1193_vm11, %v1191_v2, %v4678_v47  ;;  %v1199_v49 = vsel %vm1193_vm11, %v1190_v12, %v3411_v32  ;;  %v3697_v59 = vrot.slane %v3684_v14, 7 }
 0x21f   : > { %1295 = vrot.lane.b32.xlu1 %v4670_v55, %s2399_s28  ;;  %v1209_v40 = vsel %vm1202_vm12, %v1200_v5, %v3436_v60  ;;  %v1208_v16 = vsel %vm1202_vm12, %v1199_v49, %v3438_v0  ;;  %v3681_v55 = vld [vmem:[%s2876_s27 + $0x1a0] sm:$0xff]  ;;  %v3719_v5 = vld [vmem:[%s2876_s27 + $0x168] sm:$0x3] }
 0x220   : > { %1293 = vrot.lane.b32.xlu0 %v4673_v15, %s2399_s28  ;;  %v1065_v45 = vpop.permute.xlu2 %1064  ;;  %v1218_v13 = vsel %vm1211_vm13, %v1209_v40, %v3477_v48  ;;  %v1217_v60 = vsel %vm1211_vm13, %v1208_v16, %v3423_v54  ;;  %v3665_v54 = vrot.slane %v3648_v36, 7  ;;  %v3723_v40 = vld [vmem:[%s2876_s27 + $0x158] sm:$0x3] }
 0x221   : > { %v1033_v18 = vpop.permute.xlu1 %1032  ;;  %v1227_v48 = vsel %vm4600_vm15, %v1218_v13, %v3453_v11  ;;  %v1226_v19 = vsel %vm4600_vm15, %v1217_v60, %v3525_v23  ;;  %v3668_v11 = vrot.slane %v3655_v35, 7  ;;  %v3676_v23 = vld [vmem:[%s2876_s27 + $0x1b0] sm:$0xff] }
 0x222   : > { %v1233_v50 = vsel %vm4601_vm14, %v1224_v10, %v1033_v18  ;;  %v3621_v53 = vpop.permute.xlu0 %1030  ;;  %4680 = vst [vmem:[#allocation17_spill] sm:$0xff] %v3665_v54  ;;  %v3691_v15 = vrot.slane %v3676_v23, 7  ;;  %v596_v18 = vld [vmem:[%s2876_s27 + $0x148] sm:$0x3] }
 0x223   : > { %4676 = vst [vmem:[#allocation7_spill] sm:$0xff] %v3621_v53 }
 0x226   : > { %1335 = vrot.lane.b32.xlu2 %v4591_v42, %s2400_s29 }
 0x227   : > { %1333 = vrot.lane.b32.xlu1 %v1325_v17, %s2400_s29 }
 0x228   : > { %1299 = vrot.lane.b32.xlu0 %v1267_v52, %s2399_s28  ;;  %v3645_v32 = vpop.permute.xlu2 %1081 }
 0x229   : > { %4679 = vst [vmem:[#allocation10_spill] sm:$0xff] %v3645_v32  ;;  %v1039_v0 = vpop.permute.xlu1 %1038 }
 0x22a   : > { %v1236_v52 = vsel %vm4601_vm14, %v1227_v48, %v1039_v0  ;;  %v1037_v20 = vpop.permute.xlu0 %1036  ;;  %v3737_v0 = vld [vmem:[%s2876_s27 + $0x178] sm:$0x3] }
 0x22b   : > { %v1235_v9 = vsel %vm4601_vm14, %v1226_v19, %v1037_v20 }
 0x22c   : > { %v1244_v41 = vsel %vm1238_vm0, %v1235_v9, %v1065_v45  ;;  %v3694_v45 = vrot.slane %v3681_v55, 7 }
 0x22e   : > { %1341 = vrot.lane.b32.xlu2 %v3661_v39, %s2400_s29 }
 0x22f   : > { %1339 = vrot.lane.b32.xlu1 %v3665_v54, %s2400_s29 }
 0x230   : > { %1337 = vrot.lane.b32.xlu0 %v3668_v11, %s2400_s29  ;;  %v1088_v25 = vpop.permute.xlu2 %1087 }
 0x231   : > { %v1057_v21 = vpop.permute.xlu1 %1056 }
 0x232   : > { %v1240_v46 = vsel %vm1238_vm0, %v3507_v6, %v1057_v21  ;;  %v3688_v7 = vpop.permute.xlu0 %1054  ;;  %v3755_v21 = vld [vmem:[%s2876_s27 + $0x188] sm:$0x3] }
 0x233   : > { %4681 = vst [vmem:[#allocation18_spill] sm:$0xff] %v3688_v7 }
 0x234   : > { %4687 = vst [vmem:[#allocation34_spill] sm:$0xff] %v3755_v21 }
 0x236   : > { %1347 = vrot.lane.b32.xlu2 %v3691_v15, %s2400_s29 }
 0x237   : > { %1345 = vrot.lane.b32.xlu1 %v3694_v45, %s2400_s29 }
 0x238   : > { %1343 = vrot.lane.b32.xlu0 %v3697_v59, %s2400_s29  ;;  %v1094_v6 = vpop.permute.xlu2 %1093 }
 0x239   : > { %v3705_v37 = vpop.permute.xlu1 %1062 }
 0x23a   : > { %4682 = vst [vmem:[#allocation24_spill] sm:$0xff] %v3705_v37  ;;  %v1061_v30 = vpop.permute.xlu0 %1060 }
 0x23b   : > { %v1242_v2 = vsel %vm1238_vm0, %v1233_v50, %v1061_v30 }
 0x23c   : > { %v1251_v10 = vsel %vm1247_vm1, %v1242_v2, %v1088_v25  ;;  %v3752_v25 = vld [vmem:[%s2876_s27 + $0x198] sm:$0x3]  ;;  %v3767_v2 = vld [vmem:[%s2876_s27 + $0x1a8] sm:$0x3] }
 0x23d   : > { %v3863_v32 = vrot.slane %v3767_v2, 1 }
 0x23e   : > { %1369 = vrot.lane.b32.xlu2 %v3603_v43, %s2401_s30 }
 0x23f   : > { %1367 = vrot.lane.b32.xlu1 %v596_v18, %s2401_s30 }
 0x240   : > { %1365 = vrot.lane.b32.xlu0 %v3612_v33, %s2401_s30  ;;  %v1109_v17 = vpop.permute.xlu2 %1108 }
 0x241   : > { %v1069_v8 = vpop.permute.xlu1 %1068 }
 0x242   : > { %v1246_v12 = vsel %vm1238_vm0, %v3588_v29, %v1069_v8  ;;  %v1067_v47 = vpop.permute.xlu0 %1066  ;;  %v1414_v8 = vrot.slane %v596_v18, 1  ;;  %v3792_v18 = vrot.slane %v3719_v5, 1 }
 0x243   : > { %v1245_v50 = vsel %vm1238_vm0, %v1236_v52, %v1067_v47 }
 0x244   : > { %v1254_v49 = vsel %vm1247_vm1, %v1245_v50, %v1094_v6  ;;  %v1413_v50 = vrot.slane %v3612_v33, 1 }
 0x246   : > { %1375 = vrot.lane.b32.xlu2 %v3719_v5, %s2401_s30 }
 0x247   : > { %1373 = vrot.lane.b32.xlu1 %v3655_v35, %s2401_s30 }
 0x248   : > { %1371 = vrot.lane.b32.xlu0 %v3723_v40, %s2401_s30  ;;  %v3731_v29 = vpop.permute.xlu2 %1114 }
 0x249   : > { %4683 = vst [vmem:[#allocation36_spill] sm:$0xff] %v3731_v29  ;;  %v3733_v16 = vpop.permute.xlu1 %1085 }
 0x24a   : > { %4684 = vst [vmem:[#allocation14_spill] sm:$0xff] %v3733_v16  ;;  %v1084_v13 = vpop.permute.xlu0 %1083 }
 0x24b   : > { %v1249_v60 = vsel %vm1247_vm1, %v1240_v46, %v1084_v13 }
 0x24c   : > { %v3740_v48 = vsel %vm4599_vm3, %v1249_v60, %v1109_v17 }
 0x24d   : > { %4685 = vst [vmem:[#allocation22_spill] sm:$0xff] %v3740_v48 }
 0x24e   : > { %1381 = vrot.lane.b32.xlu2 %v3642_v26, %s2401_s30 }
 0x24f   : > { %1379 = vrot.lane.b32.xlu1 %v3737_v0, %s2401_s30 }
 0x250   : > { %1377 = vrot.lane.b32.xlu0 %v3648_v36, %s2401_s30  ;;  %v1121_v19 = vpop.permute.xlu2 %1120 }
 0x251   : > { %v1092_v52 = vpop.permute.xlu1 %1091 }
 0x252   : > { %v1253_v20 = vsel %vm1247_vm1, %v1244_v41, %v1092_v52  ;;  %v3749_v9 = vpop.permute.xlu0 %1089  ;;  %v3788_v52 = vld [vmem:[%s2876_s27 + $0x1b8] sm:$0x3] }
 0x253   : > { %4686 = vst [vmem:[#allocation27_spill] sm:$0xff] %v3749_v9 }
 0x256   : > { %1387 = vrot.lane.b32.xlu2 %v3752_v25, %s2401_s30 }
 0x257   : > { %1385 = vrot.lane.b32.xlu1 %v3684_v14, %s2401_s30 }
 0x258   : > { %1383 = vrot.lane.b32.xlu0 %v3755_v21, %s2401_s30  ;;  %v1274_v46 = vpop.permute.xlu2 %1273 }
 0x259   : > { %v3763_v6 = vpop.permute.xlu1 %1106 }
 0x25a   : > { %4688 = vst [vmem:[#allocation44_spill] sm:$0xff] %v3763_v6  ;;  %v1096_v41 = vpop.permute.xlu0 %1095  ;;  %v1739_v6 = vsel %vm1130_vm4, %v3155_v56, %v1274_v46 }
 0x25b   : > { %v1255_v30 = vsel %vm1247_vm1, %v1246_v12, %v1096_v41  ;;  %v1419_v41 = vrot.slane %v3655_v35, 1 }
 0x25c   : > { %v3770_v17 = vsel %vm4599_vm3, %v1255_v30, %v1121_v19  ;;  %v1415_v19 = vsel %vm631_vm2, %v1413_v50, %v1414_v8  ;;  %v1416_v50 = vrot.slane %v3603_v43, 1 }
 0x25d   : > { %4689 = vst [vmem:[#allocation35_spill] sm:$0xff] %v3770_v17  ;;  %v3835_v17 = vrot.slane %v3752_v25, 1 }
 0x25e   : > { %1393 = vrot.lane.b32.xlu2 %v3676_v23, %s2401_s30 }
 0x25f   : > { %1391 = vrot.lane.b32.xlu1 %v3767_v2, %s2401_s30 }
 0x260   : > { %1389 = vrot.lane.b32.xlu0 %v3681_v55, %s2401_s30  ;;  %v3778_v47 = vpop.permute.xlu2 %1279 }
 0x261   : > { %v1113_v12 = vpop.permute.xlu1 %1112 }
 0x262   : > { %v3782_v13 = vsel %vm4599_vm3, %v1251_v10, %v1113_v12  ;;  %v3784_v60 = vpop.permute.xlu0 %1110  ;;  %v3799_v10 = vrot.slane %v3723_v40, 1 }
 0x263   : > { %4690 = vst [vmem:[#allocation41_spill] sm:$0xff] %v3782_v13 }
 0x264   : > { %4691 = vst [vmem:[#allocation31_spill] sm:$0xff] %v3784_v60  ;;  %v3814_v13 = vsel %vm631_vm2, %v1416_v50, %v3799_v10  ;;  %v3843_v60 = vrot.slane %v3755_v21, 1 }
 0x266   : > { %1439 = vrot.lane.b32.xlu2 %v1414_v8, %s2402_s6  ;;  %4694 = vst [vmem:[#allocation58_spill] sm:$0xff] %v3843_v60 }
 0x267   : > { %1437 = vrot.lane.b32.xlu1 %v1415_v19, %s2402_s6  ;;  %v3810_v19 = vsel %vm631_vm2, %v1419_v41, %v3792_v18  ;;  %v1422_v41 = vrot.slane %v3648_v36, 1 }
 0x268   : > { %1395 = vrot.lane.b32.xlu0 %v3788_v52, %s2401_s30  ;;  %v1286_v33 = vpop.permute.xlu2 %1285 }
 0x269   : > { %v1119_v30 = vpop.permute.xlu1 %1118  ;;  %v1745_v56 = vsel %vm1130_vm4, %v3176_v62, %v1286_v33 }
 0x26a   : > { %v3803_v12 = vsel %vm4599_vm3, %v1254_v49, %v1119_v30  ;;  %v1117_v8 = vpop.permute.xlu0 %1116  ;;  %v3821_v49 = vrot.slane %v3737_v0, 1 }
 0x26b   : > { %4692 = vst [vmem:[#allocation39_spill] sm:$0xff] %v3803_v12  ;;  %v3806_v42 = vsel %vm4599_vm3, %v1253_v20, %v1117_v8  ;;  %vm2009_vm3 = vcmask 1043456  }
 0x26c   : > { %4693 = vst [vmem:[#allocation57_spill] sm:$0xff] %v3806_v42  ;;  %v3830_v50 = vsel %vm631_vm2, %v1422_v41, %v3821_v49  ;;  %v1428_v42 = vrot.slane %v3684_v14, 1  ;;  %v1425_v41 = vrot.slane %v3642_v26, 1 }
 0x26e   : > { %1445 = vrot.lane.b32.xlu2 %v3810_v19, %s2402_s6  ;;  %v3848_v61 = vsel %vm631_vm2, %v1428_v42, %v3835_v17  ;;  %v3852_v53 = vsel %vm631_vm2, %v1425_v41, %v3843_v60  ;;  %v1431_v41 = vrot.slane %v3681_v55, 1 }
 0x26f   : > { %1443 = vrot.lane.b32.xlu1 %v3799_v10, %s2402_s6  ;;  %4695 = vst [vmem:[#allocation59_spill] sm:$0xff] %v3852_v53 }
 0x270   : > { %1441 = vrot.lane.b32.xlu0 %v3814_v13, %s2402_s6  ;;  %v3825_v20 = vpop.permute.xlu2 %1291  ;;  %v3874_v29 = vsel %vm631_vm2, %v1431_v41, %v3863_v32  ;;  %v1434_v41 = vrot.slane %v3676_v23, 1 }
 0x271   : > { %v1272_v30 = vpop.permute.xlu1 %1271 }
 0x272   : > { %v1270_v8 = vpop.permute.xlu0 %1269 }
 0x276   : > { %1451 = vrot.lane.b32.xlu2 %v3821_v49, %s2402_s6 }
 0x277   : > { %1449 = vrot.lane.b32.xlu1 %v3830_v50, %s2402_s6 }
 0x278   : > { %1447 = vrot.lane.b32.xlu0 %v3792_v18, %s2402_s6  ;;  %v1298_v12 = vpop.permute.xlu2 %1297 }
 0x279   : > { %v1278_v48 = vpop.permute.xlu1 %1277  ;;  %v1751_v33 = vsel %vm1130_vm4, %v3448_v3, %v1298_v12  ;;  %v1738_v12 = vsel %vm1130_vm4, %v3179_v63, %v1272_v30 }
 0x27a   : > { %v1276_v16 = vpop.permute.xlu0 %1275 }
 0x27b   : > { %v1740_v4 = vsel %vm1130_vm4, %v3223_v38, %v1276_v16 }
 0x27e   : > { %1457 = vrot.lane.b32.xlu2 %v3848_v61, %s2402_s6 }
 0x27f   : > { %1455 = vrot.lane.b32.xlu1 %v3843_v60, %s2402_s6 }
 0x280   : > { %1453 = vrot.lane.b32.xlu0 %v3852_v53, %s2402_s6  ;;  %v1336_v42 = vpop.permute.xlu2 %1335 }
 0x281   : > { %v1284_v7 = vpop.permute.xlu1 %1283  ;;  %v1755_v38 = vsel %vm1139_vm5, %v1739_v6, %v1336_v42  ;;  %v3870_v16 = vsel %vm1139_vm5, %v1740_v4, %v1336_v42  ;;  %v3886_v42 = vrot.slane %v3788_v52, 1 }
 0x282   : > { %v1282_v58 = vpop.permute.xlu0 %1281  ;;  %v1744_v63 = vsel %vm1130_vm4, %v3214_v31, %v1284_v7 }
 0x283   : > { %v3896_v62 = vsel %vm631_vm2, %v1434_v41, %v3886_v42  ;;  %v1737_v41 = vsel %vm1130_vm4, %v3158_v57, %v1270_v8  ;;  %v1743_v30 = vsel %vm1130_vm4, %v3182_v1, %v1282_v58  ;;  %v4698_v58 = vld [vmem:[#allocation38_spill] sm:$0xff] }
 0x286   : > { %1463 = vrot.lane.b32.xlu2 %v3863_v32, %s2402_s6 }
 0x287   : > { %1461 = vrot.lane.b32.xlu1 %v3874_v29, %s2402_s6 }
 0x288   : > { %1459 = vrot.lane.b32.xlu0 %v3835_v17, %s2402_s6  ;;  %v1342_v46 = vpop.permute.xlu2 %1341 }
 0x289   : > { %v1290_v4 = vpop.permute.xlu1 %1289  ;;  %v1761_v6 = vsel %vm1139_vm5, %v1745_v56, %v1342_v46  ;;  %v4696_v56 = vrot.slane %v3603_v43, 7 }
 0x28a   : > { %v1288_v9 = vpop.permute.xlu0 %1287 }
 0x28b   : > { %v1746_v37 = vsel %vm1130_vm4, %v3261_v24, %v1288_v9 }
 0x28c   : > { %v3892_v51 = vsel %vm1139_vm5, %v1746_v37, %v1342_v46 }
 0x28e   : > { %1487 = vrot.lane.b32.xlu2 %v4696_v56, %s2403_s7 }
 0x28f   : > { %1467 = vrot.lane.b32.xlu1 %v3886_v42, %s2402_s6 }
 0x290   : > { %1465 = vrot.lane.b32.xlu0 %v3896_v62, %s2402_s6  ;;  %v1348_v24 = vpop.permute.xlu2 %1347 }
 0x291   : > { %v1296_v37 = vpop.permute.xlu1 %1295  ;;  %v1767_v9 = vsel %vm1139_vm5, %v1751_v33, %v1348_v24 }
 0x292   : > { %v1294_v46 = vpop.permute.xlu0 %1293 }
 0x296   : > { %1493 = vrot.lane.b32.xlu2 %v3661_v39, %s2403_s7 }
 0x297   : > { %1491 = vrot.lane.b32.xlu1 %v3665_v54, %s2403_s7 }
 0x298   : > { %1489 = vrot.lane.b32.xlu0 %v3668_v11, %s2403_s7  ;;  %v1370_v3 = vpop.permute.xlu2 %1369 }
 0x299   : > { %v1334_v56 = vpop.permute.xlu1 %1333  ;;  %v3919_v33 = vsel %vm1148_vm6, %v1755_v38, %v1370_v3 }
 0x29a   : > { %v1753_v27 = vsel %vm1139_vm5, %v1737_v41, %v1334_v56  ;;  %v1754_v53 = vsel %vm1139_vm5, %v1738_v12, %v1334_v56  ;;  %v1300_v60 = vpop.permute.xlu0 %1299  ;;  %v1748_v12 = vsel %vm1130_vm4, %v3256_v34, %v3825_v20  ;;  %v4699_v41 = vld [vmem:[#allocation21_spill] sm:$0xff] }
 0x29b   : > { %v1752_v54 = vsel %vm1130_vm4, %v3538_v28, %v1300_v60  ;;  %v4697_v60 = vld [vmem:[#allocation19_spill] sm:$0xff] }
 0x29c   : > { %v3926_v21 = vsel %vm1139_vm5, %v1752_v54, %v1348_v24  ;;  %v1742_v54 = vsel %vm1130_vm4, %v3218_v22, %v3778_v47  ;;  %v1750_v22 = vsel %vm1130_vm4, %v3388_v44, %v1296_v37 }
 0x29e   : > { %1514 = vrot.lane.b32.xlu2 %v3723_v40, %s2404_s8  ;;  %v1741_v40 = vsel %vm1130_vm4, %v4697_v60, %v1278_v48  ;;  %v1749_v48 = vsel %vm1130_vm4, %v4698_v58, %v1294_v46 }
 0x29f   : > { %1512 = vrot.lane.b32.xlu1 %v3603_v43, %s2404_s8 }
 0x2a0   : > { %1495 = vrot.lane.b32.xlu0 %v3697_v59, %s2403_s7  ;;  %v1376_v57 = vpop.permute.xlu2 %1375 }
 0x2a1   : > { %v1340_v28 = vpop.permute.xlu1 %1339 }
 0x2a2   : > { %v1759_v43 = vsel %vm1139_vm5, %v1743_v30, %v1340_v28  ;;  %v1760_v8 = vsel %vm1139_vm5, %v1744_v63, %v1340_v28  ;;  %v1338_v38 = vpop.permute.xlu0 %1337 }
 0x2a3   : > { %v1757_v24 = vsel %vm1139_vm5, %v1741_v40, %v1338_v38  ;;  %v1758_v31 = vsel %vm1139_vm5, %v1742_v54, %v1338_v38 }
 0x2a4   : > { %v3948_v7 = vsel %vm1148_vm6, %v1758_v31, %v1376_v57 }
 0x2a6   : > { %1528 = vrot.lane.b32.xlu2 %v3684_v14, %s2404_s8 }
 0x2a7   : > { %1565 = vrot.lane.b32.xlu1 %v3799_v10, %s2405_s9  ;;  %v1747_v10 = vsel %vm1130_vm4, %v4699_v41, %v1290_v4 }
 0x2a8   : > { %1563 = vrot.lane.b32.xlu0 %v3814_v13, %s2405_s9  ;;  %v1382_v1 = vpop.permute.xlu2 %1381 }
 0x2a9   : > { %v1346_v47 = vpop.permute.xlu1 %1345  ;;  %v3961_v3 = vsel %vm1148_vm6, %v1761_v6, %v1382_v1 }
 0x2aa   : > { %v1765_v13 = vsel %vm1139_vm5, %v1749_v48, %v1346_v47  ;;  %v1766_v56 = vsel %vm1139_vm5, %v1750_v22, %v1346_v47  ;;  %v1344_v57 = vpop.permute.xlu0 %1343 }
 0x2ab   : > { %v1763_v44 = vsel %vm1139_vm5, %v1747_v10, %v1344_v57  ;;  %v1764_v37 = vsel %vm1139_vm5, %v1748_v12, %v1344_v57 }
 0x2ae   : > { %1579 = vrot.lane.b32.xlu2 %v3848_v61, %s2405_s9 }
 0x2af   : > { %1613 = vrot.lane.b32.xlu1 %v3668_v11, %s2406_s10 }
 0x2b0   : > { %1530 = vrot.lane.b32.xlu0 %v3752_v25, %s2404_s8  ;;  %v1388_v34 = vpop.permute.xlu2 %1387 }
 0x2b1   : > { %v1368_v20 = vpop.permute.xlu1 %1367  ;;  %v3979_v4 = vsel %vm1148_vm6, %v1764_v37, %v1388_v34 }
 0x2b2   : > { %v1770_v6 = vsel %vm1148_vm6, %v1754_v53, %v1368_v20  ;;  %v1366_v46 = vpop.permute.xlu0 %1365 }
 0x2b3   : > { %v1769_v63 = vsel %vm1148_vm6, %v1753_v27, %v1366_v46 }
 0x2b6   : > { %1640 = vrot.lane.b32.xlu2 %v3719_v5, %s2407_s11 }
 0x2b7   : > { %1638 = vrot.lane.b32.xlu1 %v3655_v35, %s2407_s11 }
 0x2b8   : > { %1581 = vrot.lane.b32.xlu0 %v3835_v17, %s2405_s9  ;;  %v1394_v11 = vpop.permute.xlu2 %1393 }
 0x2b9   : > { %v1374_v30 = vpop.permute.xlu1 %1373  ;;  %v3990_v28 = vsel %vm1148_vm6, %v1767_v9, %v1394_v11 }
 0x2ba   : > { %v1773_v54 = vsel %vm1148_vm6, %v1757_v24, %v1374_v30  ;;  %v1372_v53 = vpop.permute.xlu0 %1371 }
 0x2bb   : > { %v1772_v27 = vsel %vm1148_vm6, %v3870_v16, %v1372_v53 }
 0x2be   : > { %1621 = vrot.lane.b32.xlu2 %v3694_v45, %s2406_s10 }
 0x2bf   : > { %1522 = vrot.lane.b32.xlu1 %v3737_v0, %s2404_s8 }
 0x2c0   : > { %1520 = vrot.lane.b32.xlu0 %v3648_v36, %s2404_s8  ;;  %v1440_v60 = vpop.permute.xlu2 %1439 }
 0x2c1   : > { %v1380_v40 = vpop.permute.xlu1 %1379  ;;  %v1786_v9 = vsel %vm1157_vm7, %v1770_v6, %v1440_v60 }
 0x2c2   : > { %v1776_v38 = vsel %vm1148_vm6, %v1760_v8, %v1380_v40  ;;  %v1378_v24 = vpop.permute.xlu0 %1377  ;;  %v4700_v40 = vld [vmem:[#allocation34_spill] sm:$0xff] }
 0x2c3   : > { %v1775_v31 = vsel %vm1148_vm6, %v1759_v43, %v1378_v24 }
 0x2c6   : > { %1499 = vrot.lane.b32.xlu2 %v3691_v15, %s2403_s7 }
 0x2c7   : > { %1691 = vrot.lane.b32.xlu1 %v3792_v18, %s2408_s13 }
 0x2c8   : > { %1689 = vrot.lane.b32.xlu0 %v3810_v19, %s2408_s13  ;;  %v1446_v16 = vpop.permute.xlu2 %1445 }
 0x2c9   : > { %v1386_v1 = vpop.permute.xlu1 %1385  ;;  %v4011_v22 = vsel %vm1157_vm7, %v1773_v54, %v1446_v16 }
 0x2ca   : > { %v1779_v58 = vsel %vm1148_vm6, %v1763_v44, %v1386_v1  ;;  %v1384_v8 = vpop.permute.xlu0 %1383 }
 0x2cb   : > { %v1778_v43 = vsel %vm1148_vm6, %v3892_v51, %v1384_v8  ;;  %v4702_v8 = vld [vmem:[#allocation59_spill] sm:$0xff] }
 0x2ce   : > { %1654 = vrot.lane.b32.xlu2 %v3681_v55, %s2407_s11 }
 0x2cf   : > { %1573 = vrot.lane.b32.xlu1 %v3821_v49, %s2405_s9 }
 0x2d0   : > { %1571 = vrot.lane.b32.xlu0 %v3830_v50, %s2405_s9  ;;  %v1452_v48 = vpop.permute.xlu2 %1451 }
 0x2d1   : > { %v1392_v47 = vpop.permute.xlu1 %1391  ;;  %v1792_v12 = vsel %vm1157_vm7, %v1776_v38, %v1452_v48 }
 0x2d2   : > { %v1782_v41 = vsel %vm1148_vm6, %v1766_v56, %v1392_v47  ;;  %v1390_v10 = vpop.permute.xlu0 %1389 }
 0x2d3   : > { %v1781_v57 = vsel %vm1148_vm6, %v1765_v13, %v1390_v10 }
 0x2d6   : > { %1538 = vrot.lane.b32.xlu2 %v3788_v52, %s2404_s8 }
 0x2d7   : > { %1536 = vrot.lane.b32.xlu1 %v3676_v23, %s2404_s8 }
 0x2d8   : > { %1656 = vrot.lane.b32.xlu0 %v3767_v2, %s2407_s11  ;;  %v1458_v51 = vpop.permute.xlu2 %1457 }
 0x2d9   : > { %v1438_v44 = vpop.permute.xlu1 %1437  ;;  %v4032_v37 = vsel %vm1157_vm7, %v1779_v58, %v1458_v51  ;;  %v4701_v58 = vld [vmem:[#allocation58_spill] sm:$0xff] }
 0x2da   : > { %v1785_v34 = vsel %vm1157_vm7, %v1769_v63, %v1438_v44  ;;  %v1396_v56 = vpop.permute.xlu0 %1395 }
 0x2db   : > { %v1784_v13 = vsel %vm1148_vm6, %v3926_v21, %v1396_v56 }
 0x2de   : > { %1707 = vrot.lane.b32.xlu2 %v3863_v32, %s2408_s13 }
 0x2df   : > { %1705 = vrot.lane.b32.xlu1 %v3874_v29, %s2408_s13 }
 0x2e0   : > { %1617 = vrot.lane.b32.xlu0 %v3661_v39, %s2406_s10  ;;  %v1464_v20 = vpop.permute.xlu2 %1463 }
 0x2e1   : > { %v1444_v6 = vpop.permute.xlu1 %1443  ;;  %v4044_v46 = vsel %vm1157_vm7, %v1782_v41, %v1464_v20 }
 0x2e2   : > { %v1788_v63 = vsel %vm1157_vm7, %v1772_v27, %v1444_v6  ;;  %v1442_v11 = vpop.permute.xlu0 %1441 }
 0x2e3   : > { %v1787_v21 = vsel %vm1157_vm7, %v3919_v33, %v1442_v11 }
 0x2e6   : > { %1646 = vrot.lane.b32.xlu2 %v3642_v26, %s2407_s11 }
 0x2e7   : > { %1589 = vrot.lane.b32.xlu1 %v3886_v42, %s2405_s9 }
 0x2e8   : > { %1587 = vrot.lane.b32.xlu0 %v3896_v62, %s2405_s9  ;;  %v1488_v39 = vpop.permute.xlu2 %1487 }
 0x2e9   : > { %v1450_v30 = vpop.permute.xlu1 %1449  ;;  %v1801_v54 = vsel %vm1166_vm8, %v1785_v34, %v1488_v39  ;;  %v1802_v53 = vsel %vm1166_vm8, %v1786_v9, %v1488_v39 }
 0x2ea   : > { %v1791_v27 = vsel %vm1157_vm7, %v1775_v31, %v1450_v30  ;;  %v1448_v60 = vpop.permute.xlu0 %1447  ;;  %v4073_v31 = vld [vmem:[%s2876_s27 + $0x1c0] sm:$0xff] }
 0x2eb   : > { %v1790_v33 = vsel %vm1157_vm7, %v3948_v7, %v1448_v60 }
 0x2ee   : > { %1518 = vrot.lane.b32.xlu2 %v3719_v5, %s2404_s8 }
 0x2ef   : > { %1516 = vrot.lane.b32.xlu1 %v3655_v35, %s2404_s8  ;;  %v1486_v35 = vrot.slane %v4073_v31, 7 }
 0x2f0   : > { %1648 = vrot.lane.b32.xlu0 %v4700_v40, %s2407_s11  ;;  %v1494_v38 = vpop.permute.xlu2 %1493 }
 0x2f1   : > { %v1456_v24 = vpop.permute.xlu1 %1455  ;;  %v4067_v16 = vsel %vm1166_vm8, %v1791_v27, %v1494_v38  ;;  %v4070_v9 = vsel %vm1166_vm8, %v1792_v12, %v1494_v38 }
 0x2f2   : > { %v1794_v7 = vsel %vm1157_vm7, %v1778_v43, %v1456_v24  ;;  %v1454_v1 = vpop.permute.xlu0 %1453 }
 0x2f3   : > { %v1793_v5 = vsel %vm1157_vm7, %v3961_v3, %v1454_v1 }
 0x2f6   : > { %1699 = vrot.lane.b32.xlu2 %v4701_v58, %s2408_s13 }
 0x2f7   : > { %1697 = vrot.lane.b32.xlu1 %v4702_v8, %s2408_s13 }
 0x2f8   : > { %1625 = vrot.lane.b32.xlu0 %v1486_v35, %s2406_s10  ;;  %v1515_v48 = vpop.permute.xlu2 %1514 }
 0x2f9   : > { %v1462_v47 = vpop.permute.xlu1 %1461  ;;  %v1818_v43 = vsel %vm1175_vm9, %v1802_v53, %v1515_v48 }
 0x2fa   : > { %v1797_v12 = vsel %vm1157_vm7, %v1781_v57, %v1462_v47  ;;  %v1460_v3 = vpop.permute.xlu0 %1459 }
 0x2fb   : > { %v4090_v41 = vsel %vm1157_vm7, %v3979_v4, %v1460_v3  ;;  %v4106_v4 = vld [vmem:[%s2876_s27 + $0x1c8] sm:$0x3] }
 0x2fe   : > { %1569 = vrot.lane.b32.xlu2 %v3792_v18, %s2405_s9  ;;  %v4111_v18 = vrot.slane %v4106_v4, 1 }
 0x2ff   : > { %1567 = vrot.lane.b32.xlu1 %v3810_v19, %s2405_s9 }
 0x300   : > { %1497 = vrot.lane.b32.xlu0 %v3694_v45, %s2403_s7  ;;  %v1529_v10 = vpop.permute.xlu2 %1528  ;;  %v1560_v45 = vrot.slane %v4073_v31, 1 }
 0x301   : > { %v1468_v51 = vpop.permute.xlu1 %1467 }
 0x302   : > { %v4099_v44 = vsel %vm1157_vm7, %v1784_v13, %v1468_v51  ;;  %v1466_v57 = vpop.permute.xlu0 %1465  ;;  %v4133_v11 = vsel %vm631_vm2, %v1560_v45, %v4111_v18 }
 0x303   : > { %v4103_v34 = vsel %vm1157_vm7, %v3990_v28, %v1466_v57 }
 0x306   : > { %1532 = vrot.lane.b32.xlu2 %v3681_v55, %s2404_s8 }
 0x307   : > { %1664 = vrot.lane.b32.xlu1 %v4106_v4, %s2407_s11 }
 0x308   : > { %1662 = vrot.lane.b32.xlu0 %v4073_v31, %s2407_s11  ;;  %v1580_v19 = vpop.permute.xlu2 %1579 }
 0x309   : > { %v1492_v56 = vpop.permute.xlu1 %1491 }
 0x30a   : > { %v4120_v28 = vsel %vm1166_vm8, %v4011_v22, %v1492_v56  ;;  %v4123_v13 = vsel %vm1166_vm8, %v1790_v33, %v1492_v56  ;;  %v1490_v55 = vpop.permute.xlu0 %1489  ;;  %v4703_v22 = vld [vmem:[#allocation17_spill] sm:$0xff] }
 0x30b   : > { %v4126_v20 = vsel %vm1166_vm8, %v1787_v21, %v1490_v55  ;;  %v4129_v6 = vsel %vm1166_vm8, %v1788_v63, %v1490_v55 }
 0x30e   : > { %1713 = vrot.lane.b32.xlu2 %v4133_v11, %s2408_s13 }
 0x30f   : > { %1615 = vrot.lane.b32.xlu1 %v4703_v22, %s2406_s10 }
 0x310   : > { %1534 = vrot.lane.b32.xlu0 %v3767_v2, %s2404_s8  ;;  %v1641_v39 = vpop.permute.xlu2 %1640 }
 0x311   : > { %v1513_v30 = vpop.permute.xlu1 %1512 }
 0x312   : > { %v1817_v21 = vsel %vm1175_vm9, %v1801_v54, %v1513_v30  ;;  %v1496_v53 = vpop.permute.xlu0 %1495 }
 0x313   : > { %v1809_v63 = vsel %vm1166_vm8, %v1793_v5, %v1496_v53  ;;  %v1810_v27 = vsel %vm1166_vm8, %v1794_v7, %v1496_v53  ;;  %v613_v53 = vld [vmem:[%s2876_s27 + $0x1d0] sm:$0xff] }
 0x314   : > { %v1825_v60 = vsel %vm1175_vm9, %v1809_v63, %v1529_v10 }
 0x315   : > { %v1841_v33 = vsel %vm1184_vm10, %v1825_v60, %v1580_v19 }
 0x316   : > { %1585 = vrot.lane.b32.xlu2 %v3863_v32, %s2405_s9 }
 0x317   : > { %1583 = vrot.lane.b32.xlu1 %v3874_v29, %s2405_s9 }
 0x318   : > { %1715 = vrot.lane.b32.xlu0 %v4111_v18, %s2408_s13  ;;  %v1622_v2 = vpop.permute.xlu2 %1621 }
 0x319   : > { %v1566_v54 = vpop.permute.xlu1 %1565  ;;  %v4153_v38 = vsel %vm1193_vm11, %v1841_v33, %v1622_v2 }
 0x31a   : > { %v1834_v24 = vsel %vm1184_vm10, %v1818_v43, %v1566_v54  ;;  %v1564_v7 = vpop.permute.xlu0 %1563  ;;  %v1686_v54 = vrot.slane %v613_v53, 1 }
 0x31b   : > { %v1833_v1 = vsel %vm1184_vm10, %v1817_v21, %v1564_v7 }
 0x31e   : > { %1524 = vrot.lane.b32.xlu2 %v3642_v26, %s2404_s8 }
 0x31f   : > { %1644 = vrot.lane.b32.xlu1 %v3737_v0, %s2407_s11 }
 0x320   : > { %1642 = vrot.lane.b32.xlu0 %v3648_v36, %s2407_s11  ;;  %v1500_v32 = vpop.permute.xlu2 %1499 }
 0x321   : > { %v1614_v29 = vpop.permute.xlu1 %1613  ;;  %v4164_v5 = vsel %vm1166_vm8, %v1797_v12, %v1500_v32  ;;  %v1814_v48 = vsel %vm1166_vm8, %v4044_v46, %v1500_v32 }
 0x322   : > { %v1850_v47 = vsel %vm1193_vm11, %v1834_v24, %v1614_v29  ;;  %v1531_v43 = vpop.permute.xlu0 %1530 }
 0x323   : > { %v1866_v3 = vsel %vm1202_vm12, %v1850_v47, %v1641_v39  ;;  %v1826_v0 = vsel %vm1175_vm9, %v1810_v27, %v1531_v43 }
 0x326   : > { %1693 = vrot.lane.b32.xlu2 %v3830_v50, %s2408_s13 }
 0x327   : > { %1623 = vrot.lane.b32.xlu1 %v3691_v15, %s2406_s10 }
 0x328   : > { %1526 = vrot.lane.b32.xlu0 %v4700_v40, %s2404_s8  ;;  %v1655_v26 = vpop.permute.xlu2 %1654 }
 0x329   : > { %v1639_v36 = vpop.permute.xlu1 %1638 }
 0x32a   : > { %v1582_v12 = vpop.permute.xlu0 %1581 }
 0x32b   : > { %v1842_v46 = vsel %vm1184_vm10, %v1826_v0, %v1582_v12 }
 0x32c   : > { %v1858_v10 = vsel %vm1193_vm11, %v1842_v46, %v1622_v2  ;;  %v614_v2 = vld [vmem:[%s2876_s27 + $0x1d8] sm:$0x3] }
 0x32e   : > { %1575 = vrot.lane.b32.xlu2 %v4702_v8, %s2405_s9 }
 0x32f   : > { %1501 = vrot.lane.b32.xlu1 %v1486_v35, %s2403_s7  ;;  %v1849_v35 = vsel %vm1193_vm11, %v1833_v1, %v1614_v29 }
 0x330   : > { %1695 = vrot.lane.b32.xlu0 %v3821_v49, %s2408_s13  ;;  %v1539_v15 = vpop.permute.xlu2 %1538  ;;  %v1865_v49 = vsel %vm1202_vm12, %v1849_v35, %v1639_v36 }
 0x331   : > { %v1523_v50 = vpop.permute.xlu1 %1522  ;;  %v4187_v40 = vsel %vm1175_vm9, %v1814_v48, %v1539_v15 }
 0x332   : > { %v1521_v51 = vpop.permute.xlu0 %1520  ;;  %v1822_v29 = vsel %vm1175_vm9, %v4123_v13, %v1523_v50 }
 0x333   : > { %v1821_v43 = vsel %vm1175_vm9, %v4120_v28, %v1521_v51 }
 0x336   : > { %1660 = vrot.lane.b32.xlu2 %v3788_v52, %s2407_s11 }
 0x337   : > { %1658 = vrot.lane.b32.xlu1 %v3676_v23, %s2407_s11 }
 0x338   : > { %1577 = vrot.lane.b32.xlu0 %v4701_v58, %s2405_s9  ;;  %v1708_v8 = vpop.permute.xlu2 %1707 }
 0x339   : > { %v1692_v57 = vpop.permute.xlu1 %1691 }
 0x33a   : > { %v1882_v45 = vsel %vm1211_vm13, %v1866_v3, %v1692_v57  ;;  %v1690_v19 = vpop.permute.xlu0 %1689 }
 0x33b   : > { %v1914_v56 = vrot.slane %v1882_v45, 1  ;;  %v1881_v55 = vsel %vm1211_vm13, %v1865_v49, %v1690_v19 }
 0x33c   : > { %v1913_v22 = vrot.slane %v1881_v55, 1 }
 0x33e   : > { %1619 = vrot.lane.b32.xlu2 %v3697_v59, %s2406_s10  ;;  %v1915_v23 = vsel %vm631_vm2, %v1913_v22, %v1914_v56 }
 0x33f   : > { %1542 = vrot.lane.b32.xlu1 %v4106_v4, %s2404_s8 }
 0x340   : > { %1540 = vrot.lane.b32.xlu0 %v4073_v31, %s2404_s8  ;;  %v1647_v52 = vpop.permute.xlu2 %1646 }
 0x341   : > { %v1574_v58 = vpop.permute.xlu1 %1573 }
 0x342   : > { %v1572_v39 = vpop.permute.xlu0 %1571  ;;  %v1838_v47 = vsel %vm1184_vm10, %v1822_v29, %v1574_v58  ;;  %v1975_v29 = vld [vmem:[%s4575_s1 + $0x28] sm:$0xff] }
 0x346   : > { %1591 = vrot.lane.b32.xlu2 %v4133_v11, %s2405_s9  ;;  %v1873_v11 = vsel %vm1202_vm12, %v4153_v38, %v1655_v26  ;;  %v1837_v26 = vsel %vm1184_vm10, %v1821_v43, %v1572_v39 }
 0x347   : > { %1711 = vrot.lane.b32.xlu1 %v3886_v42, %s2408_s13 }
 0x348   : > { %1709 = vrot.lane.b32.xlu0 %v3896_v62, %s2408_s13  ;;  %v1519_v59 = vpop.permute.xlu2 %1518 }
 0x349   : > { %v4212_v30 = vpop.permute.xlu1 %1536  ;;  %v1820_v4 = vsel %vm1175_vm9, %v4129_v6, %v1519_v59 }
 0x34a   : > { %v1657_v31 = vpop.permute.xlu0 %1656 }
 0x34b   : > { %v1874_v21 = vsel %vm1202_vm12, %v1858_v10, %v1657_v31 }
 0x34c   : > { %v1890_v42 = vsel %vm1211_vm13, %v1874_v21, %v1708_v8 }
 0x34d   : > { %v1926_v60 = vrot.slane %v1890_v42, 1  ;;  %v1983_v42 = vld [vmem:[%s4575_s1 + $0x68] sm:$0xf] }
 0x34e   : > { %1652 = vrot.lane.b32.xlu2 %v3752_v25, %s2407_s11  ;;  %v1612_v25 = vrot.slane %v613_v53, 7  ;;  %2255 = vmatpush.msk.msra.mxu2 %vm2009_vm3, %v1983_v42 }
 0x34f   : > { %1650 = vrot.lane.b32.xlu1 %v3684_v14, %s2407_s11  ;;  %2240 = vmatpush.msk.msra.mxu0 %vm2009_vm3, %v1983_v42 }
 0x350   : > { %1593 = vrot.lane.b32.xlu0 %v4111_v18, %s2405_s9  ;;  %v1700_v62 = vpop.permute.xlu2 %1699  ;;  %v1687_v18 = vrot.slane %v614_v2, 1  ;;  %2254 = vmatpush.msk.msra.mxu1 %vm2009_vm3, %v1983_v42 }
 0x351   : > { %v1706_v6 = vpop.permute.xlu1 %1705  ;;  %2256 = vmatpush.msk.msra.mxu3 %vm2009_vm3, %v1983_v42  ;;  %vm1961_vm3 = vcmask 523264  }
 0x352   : > { %v1889_v63 = vsel %vm1211_vm13, %v1873_v11, %v1706_v6  ;;  %v1618_v27 = vpop.permute.xlu0 %1617  ;;  %v1688_v32 = vsel %vm631_vm2, %v1686_v54, %v1687_v18 }
 0x353   : > { %v1925_v33 = vrot.slane %v1889_v63, 1  ;;  %v1854_v3 = vsel %vm1193_vm11, %v1838_v47, %v1618_v27  ;;  %v1853_v0 = vsel %vm1193_vm11, %v1837_v26, %v1618_v27  ;;  %v1982_v27 = vld [vmem:[%s4575_s1 + $0x60] sm:$0xff] }
 0x354   : > { %v1869_v28 = vsel %vm1202_vm12, %v1853_v0, %v1647_v52  ;;  %2258 = vmatpush.msra.mxu2 %v1982_v27  ;;  %2016 = vmatpush.msra.mxu0 %v1982_v27  ;;  %v1973_v0 = vld [vmem:[%s4575_s1 + $0x18] sm:$0xff] }
 0x355   : > { %v1927_v14 = vsel %vm631_vm2, %v1925_v33, %v1926_v60  ;;  %2257 = vmatpush.msra.mxu1 %v1982_v27  ;;  %2259 = vmatpush.msra.mxu3 %v1982_v27 }
 0x356   : > { %1703 = vrot.lane.b32.xlu2 %v3835_v17, %s2408_s13 }
 0x357   : > { %1701 = vrot.lane.b32.xlu1 %v3848_v61, %s2408_s13 }
 0x358   : > { %1627 = vrot.lane.b32.xlu0 %v1612_v25, %s2406_s10  ;;  %v1570_v38 = vpop.permute.xlu2 %1569  ;;  %v1981_v25 = vld [vmem:[%s4575_s1 + $0x58] sm:$0xff] }
 0x359   : > { %v1590_v24 = vpop.permute.xlu1 %1589  ;;  %v4236_v7 = vsel %vm1184_vm10, %v1820_v4, %v1570_v38  ;;  %2261 = vmatpush.msra.mxu2 %v1981_v25  ;;  %2017 = vmatpush.msra.mxu0 %v1981_v25 }
 0x35a   : > { %v1588_v1 = vpop.permute.xlu0 %1587  ;;  %2260 = vmatpush.msra.mxu1 %v1981_v25  ;;  %2262 = vmatpush.msra.mxu3 %v1981_v25  ;;  %v4712_v25 = vld [vmem:[#allocation42_spill] sm:$0xff] }
 0x35e   : > { %1717 = vrot.lane.b32.xlu2 %v1688_v32, %s2408_s13  ;;  %v1977_v32 = vld [vmem:[%s4575_s1 + $0x38] sm:$0xff] }
 0x35f   : > { %1668 = vrot.lane.b32.xlu1 %v614_v2, %s2407_s11  ;;  %v1980_v2 = vld [vmem:[%s4575_s1 + $0x50] sm:$0xff] }
 0x360   : > { %1666 = vrot.lane.b32.xlu0 %v613_v53, %s2407_s11  ;;  %v1533_v17 = vpop.permute.xlu2 %1532  ;;  %2264 = vmatpush.msra.mxu2 %v1980_v2 }
 0x361   : > { %v4242_v61 = vpop.permute.xlu1 %1516  ;;  %2018 = vmatpush.msra.mxu0 %v1980_v2  ;;  %2263 = vmatpush.msra.mxu1 %v1980_v2 }
 0x362   : > { %v1649_v48 = vpop.permute.xlu0 %1648  ;;  %2265 = vmatpush.msra.mxu3 %v1980_v2  ;;  %v1819_v26 = vsel %vm1175_vm9, %v4126_v20, %v4242_v61  ;;  %v1971_v61 = vld [vmem:[%s4575_s1 + $0x8] sm:$0xff] }
 0x363   : > { %v1870_v36 = vsel %vm1202_vm12, %v1854_v3, %v1649_v48  ;;  %v1974_v3 = vld [vmem:[%s4575_s1 + $0x20] sm:$0xff] }
 0x364   : > { %v1886_v13 = vsel %vm1211_vm13, %v1870_v36, %v1700_v62  ;;  %v1846_v62 = vsel %vm1184_vm10, %v4187_v40, %v1590_v24 }
 0x365   : > { %v1920_v50 = vrot.slane %v1886_v13, 1  ;;  %v1972_v13 = vld [vmem:[%s4575_s1 + $0x10] sm:$0xff] }
 0x366   : > { %1945 = vrot.lane.b32.xlu2 %v1927_v14, %s2414_s26 }
 0x367   : > { %1937 = vrot.lane.b32.xlu1 %v1915_v23, %s2414_s26 }
 0x368   : > { %1719 = vrot.lane.b32.xlu0 %v1687_v18, %s2408_s13  ;;  %v1714_v12 = vpop.permute.xlu2 %1713  ;;  %v1979_v18 = vld [vmem:[%s4575_s1 + $0x48] sm:$0xff] }
 0x369   : > { %v1698_v46 = vpop.permute.xlu1 %1697  ;;  %2267 = vmatpush.msra.mxu2 %v1979_v18  ;;  %2019 = vmatpush.msra.mxu0 %v1979_v18 }
 0x36a   : > { %v1885_v10 = vsel %vm1211_vm13, %v1869_v28, %v1698_v46  ;;  %v1626_v15 = vpop.permute.xlu0 %1625  ;;  %2266 = vmatpush.msra.mxu1 %v1979_v18  ;;  %2268 = vmatpush.msra.mxu3 %v1979_v18  ;;  %v4713_v18 = vld [vmem:[#allocation51_spill] sm:$0xff] }
 0x36b   : > { %v1919_v51 = vrot.slane %v1885_v10, 1 }
 0x36d   : > { %v1921_v8 = vsel %vm631_vm2, %v1919_v51, %v1920_v50 }
 0x370   : > { %1941 = vrot.lane.b32.xlu0 %v1921_v8, %s2414_s26  ;;  %v1586_v35 = vpop.permute.xlu2 %1585  ;;  %v1970_v8 = vld [vmem:[%s4575_s1] sm:$0xff] }
 0x371   : > { %v4261_v57 = vpop.permute.xlu1 %1567 }
 0x372   : > { %v1498_v49 = vpop.permute.xlu0 %1497  ;;  %v1835_v36 = vsel %vm1184_vm10, %v1819_v26, %v4261_v57 }
 0x373   : > { %v1811_v45 = vsel %vm1166_vm8, %v4032_v37, %v1498_v49  ;;  %v1812_v19 = vsel %vm1166_vm8, %v4090_v41, %v1498_v49  ;;  %v1829_v37 = vsel %vm1175_vm9, %v4164_v5, %v4212_v30  ;;  %v1862_v30 = vsel %vm1193_vm11, %v1846_v62, %v1626_v15 }
 0x374   : > { %v4268_v56 = vsel %vm1175_vm9, %v1811_v45, %v1533_v17  ;;  %v1845_v4 = vsel %vm1184_vm10, %v1829_v37, %v1588_v1  ;;  %v1978_v1 = vld [vmem:[%s4575_s1 + $0x40] sm:$0xff]  ;;  %v1976_v17 = vld [vmem:[%s4575_s1 + $0x30] sm:$0xff]  ;;  %v4706_v37 = vld [vmem:[#allocation8_spill] sm:$0xff] }
 0x375   : > { %2270 = vmatpush.msra.mxu2 %v1978_v1  ;;  %2020 = vmatpush.msra.mxu0 %v1978_v1  ;;  %v2355_v45 = vld [vmem:[%s2876_s27 + $0x40] sm:$0xff] }
 0x376   : > { %2269 = vmatpush.msra.mxu1 %v1978_v1  ;;  %2271 = vmatpush.msra.mxu3 %v1978_v1 }
 0x377   : > { %2273 = vmatpush.msra.mxu2 %v1977_v32  ;;  %2021 = vmatpush.msra.mxu0 %v1977_v32 }
 0x378   : > { %v1525_v55 = vpop.permute.xlu2 %1524  ;;  %2272 = vmatpush.msra.mxu1 %v1977_v32  ;;  %2274 = vmatpush.msra.mxu3 %v1977_v32 }
 0x379   : > { %v1665_v22 = vpop.permute.xlu1 %1664  ;;  %v4272_v23 = vsel %vm1175_vm9, %v4067_v16, %v1525_v55  ;;  %v1861_v16 = vsel %vm1193_vm11, %v1845_v4, %v1626_v15  ;;  %2276 = vmatpush.msra.mxu2 %v1976_v17  ;;  %2022 = vmatpush.msra.mxu0 %v1976_v17  ;;  %v4707_v4 = vld [vmem:[#allocation23_spill] sm:$0xff] }
 0x37a   : > { %v1663_v52 = vpop.permute.xlu0 %1662  ;;  %v1878_v53 = vsel %vm1202_vm12, %v1862_v30, %v1665_v22  ;;  %2275 = vmatpush.msra.mxu1 %v1976_v17  ;;  %2277 = vmatpush.msra.mxu3 %v1976_v17  ;;  %v4709_v30 = vld [vmem:[#allocation25_spill] sm:$0xff] }
 0x37b   : > { %v1877_v21 = vsel %vm1202_vm12, %v1861_v16, %v1663_v52  ;;  %2279 = vmatpush.msra.mxu2 %v1975_v29  ;;  %2023 = vmatpush.msra.mxu0 %v1975_v29  ;;  %v4705_v52 = vld [vmem:[#allocation11_spill] sm:$0xff] }
 0x37c   : > { %v1893_v11 = vsel %vm1211_vm13, %v1877_v21, %v1714_v12  ;;  %2278 = vmatpush.msra.mxu1 %v1975_v29  ;;  %2280 = vmatpush.msra.mxu3 %v1975_v29  ;;  %v4708_v21 = vld [vmem:[#allocation28_spill] sm:$0xff] }
 0x37d   : > { %v1931_v60 = vrot.slane %v1893_v11, 1  ;;  %2282 = vmatpush.msra.mxu2 %v1974_v3  ;;  %2024 = vmatpush.msra.mxu0 %v1974_v3 }
 0x37e   : > { %2281 = vmatpush.msra.mxu1 %v1974_v3  ;;  %2283 = vmatpush.msra.mxu3 %v1974_v3 }
 0x37f   : > { %2285 = vmatpush.msra.mxu2 %v1973_v0  ;;  %2025 = vmatpush.msra.mxu0 %v1973_v0 }
 0x380   : > { %v4274_v58 = vpop.permute.xlu2 %1693  ;;  %2284 = vmatpush.msra.mxu1 %v1973_v0  ;;  %2286 = vmatpush.msra.mxu3 %v1973_v0 }
 0x381   : > { %v4276_v39 = vpop.permute.xlu1 %1615  ;;  %2288 = vmatpush.msra.mxu2 %v1972_v13  ;;  %2026 = vmatpush.msra.mxu0 %v1972_v13 }
 0x382   : > { %v1535_v59 = vpop.permute.xlu0 %1534  ;;  %v1851_v12 = vsel %vm1193_vm11, %v1835_v36, %v4276_v39  ;;  %2287 = vmatpush.msra.mxu1 %v1972_v13  ;;  %v1852_v28 = vsel %vm1193_vm11, %v4236_v7, %v4276_v39  ;;  %2289 = vmatpush.msra.mxu3 %v1972_v13  ;;  %v4715_v13 = vld [vmem:[#allocation52_spill] sm:$0xff] }
 0x383   : > { %v1828_v41 = vsel %vm1175_vm9, %v1812_v19, %v1535_v59  ;;  %2291 = vmatpush.msra.mxu2 %v1971_v61  ;;  %2027 = vmatpush.msra.mxu0 %v1971_v61  ;;  %v4704_v19 = vld [vmem:[#allocation3_spill] sm:$0xff] }
 0x384   : > { %v4284_v31 = vsel %vm1184_vm10, %v1828_v41, %v1586_v35  ;;  %2290 = vmatpush.msra.mxu1 %v1971_v61  ;;  %2292 = vmatpush.msra.mxu3 %v1971_v61  ;;  %v1135_v55 = vsel %vm1130_vm4, %v2355_v45, %v4704_v19 }
 0x385   : > { %2294 = vmatpush.msra.mxu2 %v1970_v8  ;;  %2028 = vmatpush.msra.mxu0 %v1970_v8 }
 0x386   : > { %2293 = vmatpush.msra.mxu1 %v1970_v8  ;;  %2295 = vmatpush.msra.mxu3 %v1970_v8  ;;  %v4718_v8 = vld [vmem:[#allocation36_spill] sm:$0xff] }
 0x388   : > { %v4293_v5 = vpop.permute.xlu2 %1575 }
 0x389   : > { %v4297_v6 = vpop.permute.xlu1 %1583 }
 0x38a   : > { %v1716_v63 = vpop.permute.xlu0 %1715  ;;  %v1843_v32 = vsel %vm1184_vm10, %v4268_v56, %v4297_v6  ;;  %v4716_v6 = vld [vmem:[#allocation24_spill] sm:$0xff] }
 0x38b   : > { %v1894_v40 = vsel %vm1211_vm13, %v1878_v53, %v1716_v63  ;;  %v4710_v63 = vld [vmem:[#allocation40_spill] sm:$0xff] }
 0x38c   : > { %v1932_v33 = vrot.slane %v1894_v40, 1 }
 0x38e   : > { %v1933_v14 = vsel %vm631_vm2, %v1931_v60, %v1932_v33  ;;  %v4711_v60 = vld [vmem:[#allocation45_spill] sm:$0xff] }
 0x38f   : > { %1949 = vrot.lane.b32.xlu1 %v1933_v14, %s2414_s26 }
 0x390   : > { %v4315_v54 = vpop.permute.xlu2 %1660 }
 0x391   : > { %v1645_v38 = vpop.permute.xlu1 %1644 }
 0x392   : > { %v1643_v24 = vpop.permute.xlu0 %1642  ;;  %v1868_v50 = vsel %vm1202_vm12, %v1852_v28, %v1645_v38  ;;  %v4717_v28 = vld [vmem:[#allocation27_spill] sm:$0xff] }
 0x393   : > { %v1867_v20 = vsel %vm1202_vm12, %v1851_v12, %v1643_v24  ;;  %v4714_v24 = vld [vmem:[#allocation54_spill] sm:$0xff] }
 0x394   : > { %v1883_v10 = vsel %vm1211_vm13, %v1867_v20, %v4274_v58  ;;  %v1144_v58 = vsel %vm1139_vm5, %v1135_v55, %v4705_v52 }
 0x395   : > { %v1916_v7 = vrot.slane %v1883_v10, 1  ;;  %v1153_v41 = vsel %vm1148_vm6, %v1144_v58, %v4706_v37  ;;  %v4721_v58 = vld [vmem:[#allocation4_spill] sm:$0xff] }
 0x396   : > { %v1162_v16 = vsel %vm1157_vm7, %v1153_v41, %v4707_v4  ;;  %v4723_v41 = vld [vmem:[#allocation20_spill] sm:$0xff] }
 0x397   : > { %v1171_v42 = vsel %vm1166_vm8, %v1162_v16, %v4708_v21 }
 0x398   : > { %v4329_v48 = vpop.permute.xlu2 %1619  ;;  %v1180_v11 = vsel %vm1175_vm9, %v1171_v42, %v4709_v30  ;;  %v4724_v30 = vld [vmem:[#allocation16_spill] sm:$0xff] }
 0x399   : > { %v4331_v47 = vpop.permute.xlu1 %1623  ;;  %v1189_v27 = vsel %vm1184_vm10, %v1180_v11, %v4710_v63 }
 0x39a   : > { %v4333_v43 = vpop.permute.xlu0 %1526  ;;  %v1198_v33 = vsel %vm1193_vm11, %v1189_v27, %v4711_v60  ;;  %v1860_v14 = vsel %vm1193_vm11, %v4284_v31, %v4331_v47  ;;  %v1859_v29 = vsel %vm1193_vm11, %v1843_v32, %v4331_v47  ;;  %v4725_v60 = vld [vmem:[#allocation30_spill] sm:$0xff]  ;;  %v4729_v32 = vld [vmem:[#allocation15_spill] sm:$0xff] }
 0x39b   : > { %v1207_v2 = vsel %vm1202_vm12, %v1198_v33, %v4712_v25  ;;  %v1876_v26 = vsel %vm1202_vm12, %v1860_v14, %v4315_v54 }
 0x39c   : > { %v1216_v38 = vsel %vm1211_vm13, %v1207_v2, %v4713_v18  ;;  %v4727_v18 = vld [vmem:[#allocation5_spill] sm:$0xff] }
 0x39d   : > { %v1225_v1 = vsel %vm4600_vm15, %v1216_v38, %v4714_v24  ;;  %vm1984_vm15 = vcmask 883712   ;;  %v4728_v38 = vld [vmem:[#allocation9_spill] sm:$0xff] }
 0x39e   : > { %v1234_v12 = vsel %vm4601_vm14, %v1225_v1, %v4715_v13  ;;  %vm4719_vm14 = vcmask 490496  }
 0x39f   : > { %v1243_v61 = vsel %vm1238_vm0, %v1234_v12, %v4716_v6 }
 0x3a0   : > { %v4355_v46 = vpop.permute.xlu2 %1591  ;;  %v1252_v10 = vsel %vm1247_vm1, %v1243_v61, %v4717_v28 }
 0x3a1   : > { %v4362_v15 = vpop.permute.xlu1 %1501 }
 0x3a2   : > { %v1696_v51 = vpop.permute.xlu0 %1695  ;;  %v1815_v12 = vsel %vm1166_vm8, %v4103_v34, %v4362_v15 }
 0x3a3   : > { %v1884_v35 = vsel %vm1211_vm13, %v1868_v50, %v1696_v51  ;;  %v1824_v50 = vsel %vm1175_vm9, %v4070_v9, %v4333_v43  ;;  %v4722_v43 = vld [vmem:[#allocation13_spill] sm:$0xff] }
 0x3a4   : > { %v1917_v57 = vrot.slane %v1884_v35, 1  ;;  %v1261_v35 = vsel %vm4719_vm14, %v1252_v10, %v4718_v8 }
 0x3a6   : > { %v1918_v49 = vsel %vm631_vm2, %v1916_v7, %v1917_v57  ;;  %v2356_v7 = vld [vmem:[%s2876_s27] sm:$0xff]  ;;  %v4720_v57 = vld [vmem:[#allocation6_spill] sm:$0xff] }
 0x3a7   : > { %1939 = vrot.lane.b32.xlu2 %v1918_v49, %s2414_s26  ;;  %v1131_v49 = vsel %vm1130_vm4, %v2356_v7, %v4720_v57  ;;  %v4740_v57 = vld [vmem:[#allocation18_spill] sm:$0xff] }
 0x3a8   : > { %v1653_v22 = vpop.permute.xlu2 %1652 }
 0x3a9   : > { %v1659_v39 = vpop.permute.xlu1 %1658 }
 0x3aa   : > { %v1578_v59 = vpop.permute.xlu0 %1577  ;;  %v1875_v31 = vsel %vm1202_vm12, %v1859_v29, %v1659_v39  ;;  %v1140_v39 = vsel %vm1139_vm5, %v1131_v49, %v4721_v58 }
 0x3ab   : > { %v1840_v45 = vsel %vm1184_vm10, %v1824_v50, %v1578_v59  ;;  %v1149_v37 = vsel %vm1148_vm6, %v1140_v39, %v4722_v43  ;;  %v1839_v59 = vsel %vm1184_vm10, %v4272_v23, %v4293_v5  ;;  %v4726_v23 = vld [vmem:[#allocation37_spill] sm:$0xff]  ;;  %v4742_v39 = vld [vmem:[#allocation43_spill] sm:$0xff]  ;;  %v4743_v43 = vld [vmem:[#allocation48_spill] sm:$0xff] }
 0x3ac   : > { %v1856_v9 = vsel %vm1193_vm11, %v1840_v45, %v4329_v48  ;;  %v1158_v4 = vsel %vm1157_vm7, %v1149_v37, %v4723_v41  ;;  %v1855_v21 = vsel %vm1193_vm11, %v1839_v59, %v4329_v48  ;;  %v2357_v48 = vld [vmem:[%s2876_s27 + $0x20] sm:$0xff]  ;;  %v4741_v45 = vld [vmem:[#allocation29_spill] sm:$0xff]  ;;  %v4744_v41 = vld [vmem:[#allocation10_spill] sm:$0xff] }
 0x3ad   : > { %v1872_v16 = vsel %vm1202_vm12, %v1856_v9, %v1653_v22  ;;  %v1167_v11 = vsel %vm1166_vm8, %v1158_v4, %v4724_v30 }
 0x3ae   : > { %v1176_v33 = vsel %vm1175_vm9, %v1167_v11, %v4725_v60 }
 0x3af   : > { %v1185_v5 = vsel %vm1184_vm10, %v1176_v33, %v4726_v23  ;;  %v4750_v23 = vld [vmem:[#allocation7_spill] sm:$0xff] }
 0x3b0   : > { %v1704_v62 = vpop.permute.xlu2 %1703 }
 0x3b1   : > { %v4384_v53 = vpop.permute.xlu1 %1542  ;;  %v1888_v42 = vsel %vm1211_vm13, %v1872_v16, %v1704_v62  ;;  %v1133_v62 = vsel %vm1130_vm4, %v2357_v48, %v4727_v18  ;;  %vm4737_vm4 = vcmask 359424   ;;  %v4745_v16 = vld [vmem:[#allocation44_spill] sm:$0xff]  ;;  %v4753_v48 = vld [vmem:[#allocation14_spill] sm:$0xff] }
 0x3b2   : > { %v4388_v40 = vpop.permute.xlu0 %1540  ;;  %v1923_v22 = vrot.slane %v1888_v42, 1  ;;  %v1142_v24 = vsel %vm1139_vm5, %v1133_v62, %v4728_v38  ;;  %vm4739_vm5 = vcmask 392192   ;;  %v4754_v62 = vld [vmem:[#allocation31_spill] sm:$0xff] }
 0x3b3   : > { %v1151_v29 = vsel %vm1148_vm6, %v1142_v24, %v4729_v32  ;;  %v1831_v6 = vsel %vm1175_vm9, %v1815_v12, %v4388_v40  ;;  %vm4746_vm6 = vmmov %vm4719_vm14 }
 0x3b4   : > { %v1847_v7 = vsel %vm1184_vm10, %v1831_v6, %v4355_v46 }
 0x3b8   : > { %v4404_v17 = vpop.permute.xlu2 %1717 }
 0x3b9   : > { %v1712_v3 = vpop.permute.xlu1 %1711 }
 0x3ba   : > { %v1892_v36 = vsel %vm1211_vm13, %v1876_v26, %v1712_v3  ;;  %v1710_v0 = vpop.permute.xlu0 %1709  ;;  %v4730_v3 = vld [vmem:[#allocation33_spill] sm:$0xff] }
 0x3bb   : > { %v1929_v20 = vrot.slane %v1892_v36, 1  ;;  %v1891_v56 = vsel %vm1211_vm13, %v1875_v31, %v1710_v0  ;;  %v1194_v26 = vsel %vm1193_vm11, %v1185_v5, %v4730_v3  ;;  %v4731_v31 = vld [vmem:[#allocation47_spill] sm:$0xff]  ;;  %v4732_v0 = vld [vmem:[#allocation50_spill] sm:$0xff] }
 0x3bc   : > { %v1928_v47 = vrot.slane %v1891_v56, 1  ;;  %v1203_v36 = vsel %vm1202_vm12, %v1194_v26, %v4731_v31  ;;  %v4756_v3 = vld [vmem:[#allocation22_spill] sm:$0xff]  ;;  %v4757_v31 = vld [vmem:[#allocation39_spill] sm:$0xff] }
 0x3bd   : > { %v1212_v13 = vsel %vm1211_vm13, %v1203_v36, %v4732_v0 }
 0x3be   : > { %v1930_v54 = vsel %vm631_vm2, %v1928_v47, %v1929_v20  ;;  %v4733_v20 = vld [vmem:[#allocation12_spill] sm:$0xff]  ;;  %v4734_v47 = vld [vmem:[#allocation26_spill] sm:$0xff] }
 0x3bf   : > { %1947 = vrot.lane.b32.xlu0 %v1930_v54, %s2414_s26  ;;  %v1160_v56 = vsel %vm1157_vm7, %v1151_v29, %v4733_v20  ;;  %v4735_v54 = vld [vmem:[#allocation32_spill] sm:$0xff]  ;;  %vm4749_vm7 = vmmov %vm4737_vm4 }
 0x3c0   : > { %v1946_v51 = vpop.permute.xlu2 %1945  ;;  %v1169_v28 = vsel %vm1166_vm8, %v1160_v56, %v4734_v47  ;;  %v4759_v56 = vld [vmem:[#allocation35_spill] sm:$0xff]  ;;  %v4760_v47 = vld [vmem:[#allocation41_spill] sm:$0xff] }
 0x3c1   : > { %v1651_v19 = vpop.permute.xlu1 %1650  ;;  %v1966_v55 = vsel %vm1961_vm3, %v1261_v35, %v1946_v51  ;;  %v1178_v50 = vsel %vm1175_vm9, %v1169_v28, %v4735_v54  ;;  %v4736_v51 = vld [vmem:[#allocation49_spill] sm:$0xff]  ;;  %v4738_v35 = vld [vmem:[#allocation56_spill] sm:$0xff] }
 0x3c2   : > { %v1594_v52 = vpop.permute.xlu0 %1593  ;;  %2245 = vmatmul.msk.f32.vlgmr.msra.gmra.mxu2 %vm1984_vm15, %v1966_v55  ;;  %v1871_v63 = vsel %vm1202_vm12, %v1855_v21, %v1651_v19  ;;  %v1221_v8 = vsel %vm4737_vm4, %v1212_v13, %v4736_v51  ;;  %v1187_v19 = vsel %vm1184_vm10, %v1178_v50, %v4741_v45  ;;  %v1816_v55 = vsel %vm1166_vm8, %v4099_v44, %v4362_v15  ;;  %vm4751_vm8 = vmmov %vm4739_vm5  ;;  %v4758_v13 = vld [vmem:[#allocation57_spill] sm:$0xff] }
 0x3c3   : > { %v1230_v34 = vsel %vm4739_vm5, %v1221_v8, %v4738_v35  ;;  %v1196_v9 = vsel %vm1193_vm11, %v1187_v19, %v4742_v39  ;;  %v1832_v46 = vsel %vm1175_vm9, %v1816_v55, %v4384_v53  ;;  %vm4755_vm9 = vmmov %vm4746_vm6 }
 0x3c4   : > { %v1239_v40 = vsel %vm1238_vm0, %v1230_v34, %v4740_v57  ;;  %v1205_v37 = vsel %vm1202_vm12, %v1196_v9, %v4743_v43  ;;  %v1848_v59 = vsel %vm1184_vm10, %v1832_v46, %v1594_v52  ;;  %v4748_v52 = vld [vmem:[#allocation53_spill] sm:$0xff] }
 0x3c5   : > { %v1248_v4 = vsel %vm1247_vm1, %v1239_v40, %v4744_v41 }
 0x3c6   : > { %v1257_v21 = vsel %vm4746_vm6, %v1248_v4, %v4745_v16 }
 0x3c9   : > { %v1702_v27 = vpop.permute.xlu1 %1701 }
 0x3ca   : > { %v1887_v25 = vsel %vm1211_vm13, %v1871_v63, %v1702_v27  ;;  %v1628_v2 = vpop.permute.xlu0 %1627  ;;  %v4747_v63 = vld [vmem:[#allocation46_spill] sm:$0xff] }
 0x3cb   : > { %v1922_v14 = vrot.slane %v1887_v25, 1  ;;  %v1863_v49 = vsel %vm1193_vm11, %v1847_v7, %v1628_v2  ;;  %v1864_v44 = vsel %vm1193_vm11, %v1848_v59, %v1628_v2  ;;  %v1214_v27 = vsel %vm1211_vm13, %v1205_v37, %v4747_v63 }
 0x3cc   : > { %v1223_v33 = vsel %vm4749_vm7, %v1214_v27, %v4748_v52 }
 0x3cd   : > { %v1924_v1 = vsel %vm631_vm2, %v1922_v14, %v1923_v22  ;;  %v4752_v22 = vld [vmem:[#allocation55_spill] sm:$0xff] }
 0x3ce   : > { %1943 = vrot.lane.b32.xlu1 %v1924_v1, %s2414_s26 }
 0x3d1   : > { %v1669_v61 = vpop.permute.xlu1 %1668 }
 0x3d2   : > { %v1667_v10 = vpop.permute.xlu0 %1666  ;;  %v1880_v30 = vsel %vm1202_vm12, %v1864_v44, %v1669_v61 }
 0x3d3   : > { %v1879_v58 = vsel %vm1202_vm12, %v1863_v49, %v1667_v10 }
 0x3d4   : > { %v1895_v15 = vsel %vm1211_vm13, %v1879_v58, %v4404_v17  ;;  %v1232_v17 = vsel %vm4751_vm8, %v1223_v33, %v4750_v23 }
 0x3d5   : > { %v1934_v25 = vrot.slane %v1895_v15, 1  ;;  %v1241_v14 = vsel %vm1238_vm0, %v1232_v17, %v4752_v22 }
 0x3d6   : > { %v1250_v18 = vsel %vm1247_vm1, %v1241_v14, %v4753_v48 }
 0x3d7   : > { %v1259_v38 = vsel %vm4755_vm9, %v1250_v18, %v4754_v62 }
 0x3d9   : > { %v1938_v42 = vpop.permute.xlu1 %1937 }
 0x3da   : > { %v1720_v53 = vpop.permute.xlu0 %1719  ;;  %v1962_v11 = vsel %vm1961_vm3, %v1257_v21, %v1938_v42 }
 0x3db   : > { %v1896_v60 = vsel %vm1211_vm13, %v1880_v30, %v1720_v53  ;;  %2241 = vmatmul.msk.f32.vlgmr.msra.gmra.mxu0 %vm1984_vm15, %v1962_v11 }
 0x3dc   : > { %v1935_v2 = vrot.slane %v1896_v60, 1 }
 0x3de   : > { %v1936_v5 = vsel %vm631_vm2, %v1934_v25, %v1935_v2  ;;  %vm2096_vm2 = vcmask 1040384  }
 0x3df   : > { %1951 = vrot.lane.b32.xlu2 %v1936_v5, %s2414_s26 }
 0x3e2   : > { %v1942_v24 = vpop.permute.xlu0 %1941 }
 0x3e3   : > { %v1964_v1 = vsel %vm1961_vm3, %v1259_v38, %v1942_v24 }
 0x3e4   : > { %2243 = vmatmul.msk.f32.vlgmr.msra.gmra.mxu1 %vm1984_vm15, %v1964_v1 }
 0x401   : > { %v1950_v32 = vpop.permute.xlu1 %1949  ;;  %v1940_v29 = vpop.permute.xlu2 %1939 }
 0x402   : > { %v1963_v26 = vsel %vm1961_vm3, %v4756_v3, %v1940_v29  ;;  %v1968_v36 = vsel %vm1961_vm3, %v4757_v31, %v1950_v32 }
 0x403   : > { %2242 = vmatmul.msk.f32.gmra.mxu0 %vm1984_vm15, %v1963_v26  ;;  %2247 = vmatmul.msk.f32.vlgmr.msra.gmra.mxu3 %vm1984_vm15, %v1968_v36 }
 0x431   : > { %v1948_v0 = vpop.permute.xlu0 %1947 }
 0x432   : > { %v1967_v12 = vsel %vm1961_vm3, %v4758_v13, %v1948_v0 }
 0x433   : > { %2246 = vmatmul.msk.f32.gmra.mxu2 %vm1984_vm15, %v1967_v12 }
 0x439   : > { %v1952_v20 = vpop.permute.xlu2 %1951 }
 0x43a   : > { %v1969_v6 = vsel %vm1961_vm3, %v4759_v56, %v1952_v20 }
 0x43b   : > { %2248 = vmatmul.msk.f32.gmra.mxu3 %vm1984_vm15, %v1969_v6 }
 0x440   : > { %v1944_v61 = vpop.permute.xlu1 %1943 }
 0x441   : > { %v1965_v28 = vsel %vm1961_vm3, %v4760_v47, %v1944_v61 }
 0x442   : > { %2244 = vmatmul.msk.f32.gmra.mxu1 %vm1984_vm15, %v1965_v28 }
 0x445   : > { %v2042_v10 = vpop.f32.mrf.mxu2 }
 0x446   : > { %2058 = vst [vmem:[%s2492_s15 + $0x20] sm:$0xff] %v2042_v10  ;;  %v2079_v46 = vmul.f32 %v2042_v10, %v2042_v10 }
 0x458   : > { %v2030_v54 = vpop.f32.mrf.mxu0 }
 0x459   : > { %2054 = vst [vmem:[%s2492_s15] sm:$0xff] %v2030_v54  ;;  %v2075_v7 = vmul.f32 %v2030_v54, %v2030_v54 }
 0x461   : > { %v2036_v50 = vpop.f32.mrf.mxu1 }
 0x462   : > { %2056 = vst [vmem:[%s2492_s15 + $0x10] sm:$0xff] %v2036_v50  ;;  %v2077_v49 = vmul.f32 %v2036_v50, %v2036_v50 }
 0x480   : > { %v2033_v51 = vpop.f32.mrf.mxu0 }
 0x481   : > { %2055 = vst [vmem:[%s2492_s15 + $0x8] sm:$0xff] %v2033_v51  ;;  %v2076_v34 = vmul.f32 %v2033_v51, %v2033_v51  ;;  %v2062_v57 = vadd.f32 %v2033_v51, %v2030_v54 }
 0x483   : > { %v2083_v40 = vadd.f32 %v2076_v34, %v2075_v7  ;;  %v2063_v19 = vadd.f32 %v2062_v57, %v2036_v50 }
 0x485   : > { %v2084_v9 = vadd.f32 %v2083_v40, %v2077_v49 }
 0x486   : > { %v2048_v8 = vpop.f32.mrf.mxu3 }
 0x487   : > { %2060 = vst [vmem:[%s2492_s15 + $0x30] sm:$0xff] %v2048_v8  ;;  %v2081_v16 = vmul.f32 %v2048_v8, %v2048_v8 }
 0x4b6   : > { %v2045_v35 = vpop.f32.mrf.mxu2 }
 0x4b7   : > { %2059 = vst [vmem:[%s2492_s15 + $0x28] sm:$0xff] %v2045_v35  ;;  %v2080_v41 = vmul.f32 %v2045_v35, %v2045_v35 }
 0x4be   : > { %v2051_v45 = vpop.f32.mrf.mxu3 }
 0x4bf   : > { %2061 = vst [vmem:[%s2492_s15 + $0x38] sm:$0xff] %v2051_v45  ;;  %v2039_v55 = vpop.f32.mrf.mxu1  ;;  %v2082_v15 = vmul.f32 %v2051_v45, %v2051_v45 }
 0x4c0   : > { %2057 = vst [vmem:[%s2492_s15 + $0x18] sm:$0xff] %v2039_v55  ;;  %v2064_v58 = vadd.f32 %v2063_v19, %v2039_v55  ;;  %v2078_v39 = vmul.f32 %v2039_v55, %v2039_v55 }
 0x4c2   : > { %v2065_v43 = vadd.f32 %v2064_v58, %v2042_v10  ;;  %v2085_v37 = vadd.f32 %v2084_v9, %v2078_v39 }
 0x4c4   : > { %v2066_v4 = vadd.f32 %v2065_v43, %v2045_v35  ;;  %v2086_v59 = vadd.f32 %v2085_v37, %v2079_v46 }
 0x4c6   : > { %v2067_v21 = vadd.f32 %v2066_v4, %v2048_v8  ;;  %v2087_v44 = vadd.f32 %v2086_v59, %v2080_v41 }
 0x4c8   : > { %v2068_v42 = vadd.f32 %v2067_v21, %v2051_v45  ;;  %v2088_v30 = vadd.f32 %v2087_v44, %v2081_v16 }
 0x4ca   : > { %v2069_v53 = vrot.slane %v2068_v42, 4  ;;  %v2089_v11 = vadd.f32 %v2088_v30, %v2082_v15 }
 0x4cc   : > { %v2070_v63 = vadd.f32 %v2069_v53, %v2068_v42  ;;  %v2090_v27 = vrot.slane %v2089_v11, 4 }
 0x4ce   : > { %v2071_v60 = vrot.slane %v2070_v63, 2  ;;  %v2091_v52 = vadd.f32 %v2090_v27, %v2089_v11 }
 0x4d0   : > { %v2072_v33 = vadd.f32 %v2071_v60, %v2070_v63  ;;  %v2092_v25 = vrot.slane %v2091_v52, 2 }
 0x4d2   : > { %v2073_v2 = vrot.slane %v2072_v33, 1  ;;  %v2093_v23 = vadd.f32 %v2092_v25, %v2091_v52 }
 0x4d4   : > { %v2094_v17 = vrot.slane %v2093_v23, 1  ;;  %v2074_v5 = vadd.f32 %v2073_v2, %v2072_v33  ;;  %2100 = sbr.rel (%p2239_p7) target bundleno = 1242 (0x4da), region = 44 }
 0x4d6   : > { %v2095_v22 = vadd.f32 %v2094_v17, %v2093_v23 }
 0x4d8   : > { %v2097_v14 = vsel %vm2096_vm2, %v2074_v5, %v2095_v22 }
 0x4d9   : > { %2101 = vst [vmem:[%s2487_s12] sm:$0x3] %v2097_v14 }
 0x4da PF: > { %p2250_p8 = scmp.eq.s32.totalorder %s2380_s18, 0 }
 0x4dc   : > { %2105 = sbr.rel (%p2250_p8) target bundleno = 1253 (0x4e5), region = 48 }
 0x4e1   : > { %v2106_v48 = vld [vmem:[%s2487_s12] sm:$0x3] }
 0x4e2   : > { %v2107_v18 = vadd.f32 %v2106_v48, %v2097_v14 }
 0x4e4   : > { %2108 = vst [vmem:[%s2487_s12] sm:$0x3] %v2107_v18 }
 0x4e5 PF: > { %s16_s22 = sadd.s32 1, %s2396_s22   ;;  %s4761_s18 = smov %s2388_s20 }
 0x4e6   : > { %p13_p9 = scmp.ge.s32.totalorder %s16_s22, 10   ;;  %s4762_s19 = smov %s2392_s21 }
 0x4e7   : > { %s4763_s20 = smov %s4766_s23  ;;  %s4764_s21 = smov %s4770_s24 }
 0x4e8   :  { %15 = sbr.rel (!%p13_p9) target bundleno = 3 (0x3), region = 92 }

// kernel: encode_forward.3
= control target key start
LH: loop header
LB: loop body
LE: loop exit
PB: predicated region body
PF: predicated region fallthrough
CT: control target
= control target key end

     0   :  { %s6922_s18 = smov 0   ;;  %s6924_s19 = smov 0   ;;  %s9357_s0 = inlined_call_operand.vmem [shape: f32[2,4,16,16,4], index: 0, kind: input, shape index: {}]   ;;  %s9358_s1 = inlined_call_operand.vmem [shape: f32[108,128], index: 1, kind: input, shape index: {}]   ;;  %s9359_s2 = inlined_call_operand.vmem [shape: f32[1,4], index: 2, kind: input, shape index: {}, may-alias: {2,3}]   ;;  %s9360_s3 = inlined_call_operand.vmem [shape: f32[1,4], index: 3, kind: input, shape index: {}, may-alias: {2,3}]   ;;  %s9361_s4 = inlined_call_operand.vmem [shape: f32[2,4,8,8,128], index: 4, kind: output, shape index: {0}]   ;;  %s9362_s5 = inlined_call_operand.vmem [shape: f32[2,2,128], index: 5, kind: output, shape index: {1}]  }
   0x1   :  { %s6926_s20 = smov 0   ;;  %s6928_s21 = smov 0  }
   0x2   :  { %s6930_s22 = smov 0  }
   0x3 LB: > { %s25_s2 = sadd.s32 1, %s6865_s20  ;;  %s28_s3 = sadd.s32 1, %s6869_s21  ;;  %s6873_s22 = sphi %s6930_s22, %s16_s22   ;;  %s6869_s21 = sphi %s6928_s21, %s9547_s21   ;;  %s6865_s20 = sphi %s6926_s20, %s9546_s20   ;;  %s6861_s19 = sphi %s6924_s19, %s9545_s19   ;;  %s6857_s18 = sphi %s6922_s18, %s9544_s18  }
   0x4   : > { %p26_p0 = scmp.ge.s32.totalorder %s25_s2, 4  ;;  %p6199_p1 = scmp.ge.s32.totalorder %s6873_s22, 1 }
   0x5   : > { %p204_p2 = scmp.lt.s32.totalorder %s6873_s22, 9 }
   0x6   : > { %s9549_s2 = smov (%p26_p0, %s25_s2), 0  ;;  %s9551_s3 = smov (!%p26_p0, %s28_s3), %s6869_s21 }
   0x7   : > { %p205_p3 = pnand %p6199_p1, %p204_p2  ;;  %p30_p4 = scmp.ge.s32.totalorder %s9551_s3, 2 }
   0x9   : > { %s9553_s3 = smov (%p30_p4, %s9551_s3), 0  ;;  %208 = sbr.rel (%p205_p3) target bundleno = 1698 (0x6a2), region = 36 }
   0xe   : > { %p240_p5 = scmp.lt.s32.totalorder %s6861_s19, 1  ;;  %p247_p6 = scmp.lt.s32.totalorder %s6857_s18, 3 }
   0xf   : > { %p6206_p7 = scmp.ne.s32.totalorder %s6857_s18, 0 }
  0x10   : > { %s9555_s19 = smov (!%p240_p5, %s6861_s19), 1 }
  0x11   : > { %s248_s23 = scalar_select %p247_p6, %s6857_s18, 3 }
  0x12   : > { %s6732_s24 = sshll.u32 %s9555_s19, 10  ;;  %s6203_s25 = sshll.u32 %s9555_s19, 5 }
  0x13   : > { %s6959_s28 = scalar_lea.vmem %s9357_s0, %s6732_s24  ;;  %s6202_s29 = sshll.u32 %s248_s23, 3 }
  0x14   : > { %s251_s30 = sadd.s32 %s6203_s25, %s6202_s29  ;;  %s6205_s6 = sshll.u32 %s9555_s19, 1 }
  0x15   : > { %s6204_s7 = sshll.u32 %s251_s30, 3  ;;  %s6964_s10 = scalar_lea.vmem %s9362_s5, %s6205_s6 }
  0x16   : > { %s6969_s13 = scalar_lea.vmem %s9361_s4, %s6204_s7  ;;  %261 = sbr.rel (%p6206_p7) target bundleno = 625 (0x271), region = 40 }
  0x1b   : > { %vm262_vm0 = vcmask 31744   ;;  %v6875_v0 = vmov 0.0   ;;  %vm264_vm1 = vcmask 25600   ;;  %v384_v1 = vld [vmem:[%s6959_s28] sm:$0xff]  ;;  %v386_v2 = vld [vmem:[%s6959_s28 + $0x10] sm:$0xff]  ;;  %v385_v15 = vld [vmem:[%s6959_s28 + $0x8] sm:$0xff] }
  0x1c   : > { %286 = vst.msk [vmem:[#allocation2 + $0xb0] sm:$0xff] %vm262_vm0, %v6875_v0  ;;  %v640_v3 = vrot.slane %v384_v1, 2  ;;  %v646_v4 = vrot.slane %v386_v2, 2  ;;  %v7119_v5 = vld [vmem:[%s6959_s28 + $0x20] sm:$0xff]  ;;  %v7122_v6 = vld [vmem:[%s6959_s28 + $0x30] sm:$0xff]  ;;  %v641_v7 = vrot.slane %v384_v1, 4 }
  0x1d   : > { %263 = vst.msk [vmem:[#allocation2] sm:$0xff] %vm262_vm0, %v6875_v0  ;;  %v647_v8 = vrot.slane %v386_v2, 4  ;;  %v652_v9 = vrot.slane %v7119_v5, 2  ;;  %v658_v10 = vrot.slane %v7122_v6, 2  ;;  %v642_v11 = vrot.slane %v384_v1, 6  ;;  %v387_v16 = vld [vmem:[%s6959_s28 + $0x18] sm:$0xff] }
  0x1e   : > { %266 = vst.msk [vmem:[#allocation2 + $0x10] sm:$0xff] %vm262_vm0, %v6875_v0  ;;  %v648_v12 = vrot.slane %v386_v2, 6  ;;  %v6207_v13 = vrot.slane %v384_v1, 9  ;;  %v6208_v14 = vrot.slane %v640_v3, 9  ;;  %v6209_v17 = vrot.slane %v641_v7, 9  ;;  %v7157_v63 = vld [vmem:[%s6959_s28 + $0x28] sm:$0xff] }
  0x1f   : > { %268 = vst.msk [vmem:[#allocation2 + $0x20] sm:$0xff] %vm262_vm0, %v6875_v0  ;;  %v6215_v18 = vrot.slane %v386_v2, 9  ;;  %v643_v19 = vrot.slane %v385_v15, 2  ;;  %v649_v20 = vrot.slane %v387_v16, 2  ;;  %v6210_v21 = vrot.slane %v642_v11, 9 }
  0x20   : > { %270 = vst.msk [vmem:[#allocation2 + $0x30] sm:$0xff] %vm262_vm0, %v6875_v0  ;;  %v6216_v22 = vrot.slane %v646_v4, 9  ;;  %v644_v23 = vrot.slane %v385_v15, 4  ;;  %v650_v24 = vrot.slane %v387_v16, 4  ;;  %v6211_v25 = vrot.slane %v385_v15, 9 }
  0x21   : > { %272 = vst.msk [vmem:[#allocation2 + $0x40] sm:$0xff] %vm262_vm0, %v6875_v0  ;;  %v6217_v26 = vrot.slane %v647_v8, 9  ;;  %v645_v27 = vrot.slane %v385_v15, 6  ;;  %v651_v28 = vrot.slane %v387_v16, 6  ;;  %v6212_v29 = vrot.slane %v643_v19, 9 }
  0x22   : > { %274 = vst.msk [vmem:[#allocation2 + $0x50] sm:$0xff] %vm262_vm0, %v6875_v0  ;;  %v6218_v30 = vrot.slane %v648_v12, 9  ;;  %v6213_v31 = vrot.slane %v644_v23, 9  ;;  %v6219_v32 = vrot.slane %v387_v16, 9  ;;  %v6220_v33 = vrot.slane %v649_v20, 9 }
  0x23   : > { %276 = vst.msk [vmem:[#allocation2 + $0x60] sm:$0xff] %vm262_vm0, %v6875_v0  ;;  %v6221_v34 = vrot.slane %v650_v24, 9  ;;  %v6214_v35 = vrot.slane %v645_v27, 9  ;;  %v6222_v36 = vrot.slane %v651_v28, 9  ;;  %v2944_v37 = vmax.f32 %v384_v1, %v6207_v13  ;;  %v391_v13 = vld [vmem:[%s6959_s28 + $0x38] sm:$0xff] }
  0x24   : > { %278 = vst.msk [vmem:[#allocation2 + $0x70] sm:$0xff] %vm262_vm0, %v6875_v0  ;;  %v2945_v38 = vmax.f32 %v640_v3, %v6208_v14  ;;  %v2946_v39 = vmax.f32 %v641_v7, %v6209_v17  ;;  %v2947_v40 = vmax.f32 %v642_v11, %v6210_v21  ;;  %v2948_v41 = vmax.f32 %v385_v15, %v6211_v25 }
  0x25   : > { %280 = vst.msk [vmem:[#allocation2 + $0x80] sm:$0xff] %vm262_vm0, %v6875_v0  ;;  %v2949_v42 = vmax.f32 %v643_v19, %v6212_v29  ;;  %v2950_v43 = vmax.f32 %v644_v23, %v6213_v31  ;;  %v2951_v44 = vmax.f32 %v645_v27, %v6214_v35  ;;  %v2952_v45 = vmax.f32 %v386_v2, %v6215_v18 }
  0x26   : > { %282 = vst.msk [vmem:[#allocation2 + $0x90] sm:$0xff] %vm262_vm0, %v6875_v0  ;;  %v2953_v46 = vmax.f32 %v646_v4, %v6216_v22  ;;  %v2954_v47 = vmax.f32 %v647_v8, %v6217_v26  ;;  %v2955_v48 = vmax.f32 %v648_v12, %v6218_v30  ;;  %v2956_v49 = vmax.f32 %v387_v16, %v6219_v32 }
  0x27   : > { %284 = vst.msk [vmem:[#allocation2 + $0xa0] sm:$0xff] %vm262_vm0, %v6875_v0  ;;  %v2957_v50 = vmax.f32 %v649_v20, %v6220_v33  ;;  %v2958_v51 = vmax.f32 %v650_v24, %v6221_v34  ;;  %v2959_v52 = vmax.f32 %v651_v28, %v6222_v36  ;;  %v3456_v53 = vmax.f32 %v2944_v37, %v2952_v45 }
  0x28   : > { %288 = vst.msk [vmem:[#allocation2 + $0xc0] sm:$0xff] %vm262_vm0, %v6875_v0  ;;  %v3457_v54 = vmax.f32 %v2945_v38, %v2953_v46  ;;  %v3458_v55 = vmax.f32 %v2946_v39, %v2954_v47  ;;  %v3459_v56 = vmax.f32 %v2947_v40, %v2955_v48  ;;  %v3460_v57 = vmax.f32 %v2948_v41, %v2956_v49 }
  0x29   : > { %290 = vst.msk [vmem:[#allocation2 + $0xd0] sm:$0xff] %vm262_vm0, %v6875_v0  ;;  %v3461_v58 = vmax.f32 %v2949_v42, %v2957_v50  ;;  %v3462_v59 = vmax.f32 %v2950_v43, %v2958_v51  ;;  %v3463_v60 = vmax.f32 %v2951_v44, %v2959_v52  ;;  %v3968_v61 = vperm.slane %v3456_v53, 0 }
  0x2a   : > { %292 = vst.msk [vmem:[#allocation2 + $0xe0] sm:$0xff] %vm262_vm0, %v6875_v0  ;;  %v3969_v62 = vperm.slane %v3457_v54, 0  ;;  %v3970_v1 = vperm.slane %v3458_v55, 0  ;;  %v3971_v2 = vperm.slane %v3459_v56, 0  ;;  %v3972_v3 = vperm.slane %v3460_v57, 0 }
  0x2b   : > { %294 = vst.msk [vmem:[#allocation2 + $0xf0] sm:$0xff] %vm262_vm0, %v6875_v0  ;;  %v3973_v4 = vperm.slane %v3461_v58, 0  ;;  %v3974_v7 = vperm.slane %v3462_v59, 0  ;;  %v3975_v8 = vperm.slane %v3463_v60, 0  ;;  %vm4224_vm2 = vcmask 1041409  }
  0x2c   : > { %296 = vst.msk [vmem:[#allocation2 + $0x100] sm:$0xff] %vm262_vm0, %v6875_v0  ;;  %vm4226_vm3 = vcmask 1042434   ;;  %v4225_v11 = vsel %vm4224_vm2, %v3969_v62, %v3968_v61  ;;  %vm4228_vm4 = vcmask 1043459   ;;  %vm4230_vm5 = vcmask 1044484  }
  0x2d   : > { %298 = vst.msk [vmem:[#allocation2 + $0x110] sm:$0xff] %vm262_vm0, %v6875_v0  ;;  %vm4232_vm6 = vcmask 1045509   ;;  %v4227_v12 = vsel %vm4226_vm3, %v3970_v1, %v4225_v11  ;;  %vm4234_vm7 = vcmask 1046534   ;;  %vm4236_vm8 = vcmask 1047559  }
  0x2e   : > { %300 = vst.msk [vmem:[#allocation2 + $0x120] sm:$0xff] %vm262_vm0, %v6875_v0  ;;  %v653_v14 = vrot.slane %v7119_v5, 4  ;;  %v4229_v15 = vsel %vm4228_vm4, %v3971_v2, %v4227_v12  ;;  %v654_v16 = vrot.slane %v7119_v5, 6  ;;  %v655_v17 = vrot.slane %v7157_v63, 2 }
  0x2f   : > { %302 = vst.msk [vmem:[#allocation2 + $0x130] sm:$0xff] %vm262_vm0, %v6875_v0  ;;  %v656_v18 = vrot.slane %v7157_v63, 4  ;;  %v4231_v19 = vsel %vm4230_vm5, %v3972_v3, %v4229_v15  ;;  %v657_v20 = vrot.slane %v7157_v63, 6  ;;  %v659_v21 = vrot.slane %v7122_v6, 4 }
  0x30   : > { %304 = vst.msk [vmem:[#allocation2 + $0x140] sm:$0xff] %vm262_vm0, %v6875_v0  ;;  %v660_v22 = vrot.slane %v7122_v6, 6  ;;  %v4233_v23 = vsel %vm4232_vm6, %v3973_v4, %v4231_v19  ;;  %v661_v24 = vrot.slane %v391_v13, 2  ;;  %v662_v25 = vrot.slane %v391_v13, 4 }
  0x31   : > { %306 = vst.msk [vmem:[#allocation2 + $0x150] sm:$0xff] %vm262_vm0, %v6875_v0  ;;  %v663_v26 = vrot.slane %v391_v13, 6  ;;  %v4235_v27 = vsel %vm4234_vm7, %v3974_v7, %v4233_v23  ;;  %v6223_v28 = vrot.slane %v7119_v5, 9  ;;  %v6224_v29 = vrot.slane %v652_v9, 9  ;;  %v7230_v7 = vld [vmem:[%s6959_s28 + $0x48] sm:$0xff] }
  0x32   : > { %308 = vst.msk [vmem:[#allocation2 + $0x160] sm:$0xff] %vm262_vm0, %v6875_v0  ;;  %v6225_v30 = vrot.slane %v653_v14, 9  ;;  %v7195_v31 = vsel %vm4236_vm8, %v3975_v8, %v4235_v27  ;;  %v6226_v32 = vrot.slane %v654_v16, 9  ;;  %v6227_v33 = vrot.slane %v7157_v63, 9  ;;  %v7233_v8 = vld [vmem:[%s6959_s28 + $0x50] sm:$0xff] }
  0x33   : > { %310 = vst.msk [vmem:[#allocation2 + $0x170] sm:$0xff] %vm262_vm0, %v6875_v0  ;;  %v6228_v34 = vrot.slane %v655_v17, 9  ;;  %v6229_v35 = vrot.slane %v656_v18, 9  ;;  %v6230_v36 = vrot.slane %v657_v20, 9  ;;  %v6231_v37 = vrot.slane %v7122_v6, 9 }
  0x34   : > { %312 = vst.msk [vmem:[#allocation2 + $0x180] sm:$0xff] %vm262_vm0, %v6875_v0  ;;  %v6232_v38 = vrot.slane %v658_v10, 9  ;;  %v6233_v39 = vrot.slane %v659_v21, 9  ;;  %v6234_v40 = vrot.slane %v660_v22, 9  ;;  %v6235_v41 = vrot.slane %v391_v13, 9 }
  0x35   : > { %314 = vst.msk [vmem:[#allocation2 + $0x190] sm:$0xff] %vm262_vm0, %v6875_v0  ;;  %v6236_v42 = vrot.slane %v661_v24, 9  ;;  %v6237_v43 = vrot.slane %v662_v25, 9  ;;  %v6238_v44 = vrot.slane %v663_v26, 9  ;;  %v2960_v45 = vmax.f32 %v7119_v5, %v6223_v28 }
  0x36   : > { %316 = vst.msk [vmem:[#allocation2 + $0x1a0] sm:$0xff] %vm262_vm0, %v6875_v0  ;;  %v2961_v46 = vmax.f32 %v652_v9, %v6224_v29  ;;  %v2962_v47 = vmax.f32 %v653_v14, %v6225_v30  ;;  %v2963_v48 = vmax.f32 %v654_v16, %v6226_v32  ;;  %v2964_v49 = vmax.f32 %v7157_v63, %v6227_v33  ;;  %v7225_v63 = vld [vmem:[%s6959_s28 + $0x40] sm:$0xff] }
  0x37   : > { %318 = vst.msk [vmem:[#allocation2 + $0x1b0] sm:$0xff] %vm262_vm0, %v6875_v0  ;;  %v2965_v50 = vmax.f32 %v655_v17, %v6228_v34  ;;  %v2966_v51 = vmax.f32 %v656_v18, %v6229_v35  ;;  %v2967_v52 = vmax.f32 %v657_v20, %v6230_v36  ;;  %v2968_v53 = vmax.f32 %v7122_v6, %v6231_v37  ;;  %v7241_v18 = vld [vmem:[%s6959_s28 + $0x58] sm:$0xff] }
  0x38   : > { %320 = vst.msk [vmem:[#allocation2 + $0x1c0] sm:$0xff] %vm262_vm0, %v6875_v0  ;;  %v2969_v54 = vmax.f32 %v658_v10, %v6232_v38  ;;  %v2970_v5 = vmax.f32 %v659_v21, %v6233_v39  ;;  %v2971_v9 = vmax.f32 %v660_v22, %v6234_v40  ;;  %v2972_v55 = vmax.f32 %v391_v13, %v6235_v41 }
  0x39   : > { %322 = vst.msk [vmem:[#allocation2 + $0x1d0] sm:$0xff] %vm262_vm0, %v6875_v0  ;;  %v2973_v56 = vmax.f32 %v661_v24, %v6236_v42  ;;  %v2974_v57 = vmax.f32 %v662_v25, %v6237_v43  ;;  %v2975_v58 = vmax.f32 %v663_v26, %v6238_v44  ;;  %v3464_v59 = vmax.f32 %v2960_v45, %v2968_v53 }
  0x3a   : > { %324 = vst.msk [vmem:[#allocation2 + $0x1e0] sm:$0xff] %vm262_vm0, %v6875_v0  ;;  %v3465_v60 = vmax.f32 %v2961_v46, %v2969_v54  ;;  %v3466_v6 = vmax.f32 %v2962_v47, %v2970_v5  ;;  %v3467_v10 = vmax.f32 %v2963_v48, %v2971_v9  ;;  %v3468_v61 = vmax.f32 %v2964_v49, %v2972_v55 }
  0x3b   : > { %326 = vst.msk [vmem:[#allocation2 + $0x1f0] sm:$0xff] %vm262_vm0, %v6875_v0  ;;  %v3469_v62 = vmax.f32 %v2965_v50, %v2973_v56  ;;  %v3470_v1 = vmax.f32 %v2966_v51, %v2974_v57  ;;  %v3471_v2 = vmax.f32 %v2967_v52, %v2975_v58  ;;  %v3976_v3 = vperm.slane %v3464_v59, 0 }
  0x3c   : > { %328 = vst.msk [vmem:[#allocation2 + $0x200] sm:$0xff] %vm262_vm0, %v6875_v0  ;;  %v3977_v4 = vperm.slane %v3465_v60, 0  ;;  %v3978_v11 = vperm.slane %v3466_v6, 0  ;;  %v3979_v12 = vperm.slane %v3467_v10, 0  ;;  %v3980_v13 = vperm.slane %v3468_v61, 0 }
  0x3d   : > { %330 = vst.msk [vmem:[#allocation2 + $0x210] sm:$0xff] %vm262_vm0, %v6875_v0  ;;  %v3981_v14 = vperm.slane %v3469_v62, 0  ;;  %v3982_v15 = vperm.slane %v3470_v1, 0  ;;  %v3983_v16 = vperm.slane %v3471_v2, 0  ;;  %v664_v19 = vrot.slane %v7225_v63, 2 }
  0x3e   : > { %332 = vst.msk [vmem:[#allocation2 + $0x220] sm:$0xff] %vm262_vm0, %v6875_v0  ;;  %v4238_v17 = vsel %vm4224_vm2, %v3977_v4, %v3976_v3  ;;  %v665_v21 = vrot.slane %v7225_v63, 4  ;;  %v666_v22 = vrot.slane %v7225_v63, 6  ;;  %v667_v23 = vrot.slane %v7230_v7, 2 }
  0x3f   : > { %334 = vst.msk [vmem:[#allocation2 + $0x230] sm:$0xff] %vm262_vm0, %v6875_v0  ;;  %v4239_v20 = vsel %vm4226_vm3, %v3978_v11, %v4238_v17  ;;  %v668_v25 = vrot.slane %v7230_v7, 4  ;;  %v669_v26 = vrot.slane %v7230_v7, 6  ;;  %v670_v27 = vrot.slane %v7233_v8, 2 }
  0x40   : > { %336 = vst.msk [vmem:[#allocation2 + $0x240] sm:$0xff] %vm262_vm0, %v6875_v0  ;;  %v4240_v24 = vsel %vm4228_vm4, %v3979_v12, %v4239_v20  ;;  %v671_v29 = vrot.slane %v7233_v8, 4  ;;  %v672_v30 = vrot.slane %v7233_v8, 6  ;;  %v673_v32 = vrot.slane %v7241_v18, 2 }
  0x41   : > { %338 = vst.msk [vmem:[#allocation2 + $0x250] sm:$0xff] %vm262_vm0, %v6875_v0  ;;  %v4241_v28 = vsel %vm4230_vm5, %v3980_v13, %v4240_v24  ;;  %v674_v34 = vrot.slane %v7241_v18, 4  ;;  %v675_v35 = vrot.slane %v7241_v18, 6  ;;  %v6239_v36 = vrot.slane %v7225_v63, 9  ;;  %v398_v24 = vld [vmem:[%s6959_s28 + $0x70] sm:$0xff] }
  0x42   : > { %340 = vst.msk [vmem:[#allocation2 + $0x260] sm:$0xff] %vm262_vm0, %v6875_v0  ;;  %v4242_v33 = vsel %vm4232_vm6, %v3981_v14, %v4241_v28  ;;  %v6240_v38 = vrot.slane %v664_v19, 9  ;;  %v6241_v39 = vrot.slane %v665_v21, 9  ;;  %v6242_v40 = vrot.slane %v666_v22, 9  ;;  %v396_v14 = vld [vmem:[%s6959_s28 + $0x60] sm:$0xff] }
  0x43   : > { %342 = vst.msk [vmem:[#allocation2 + $0x270] sm:$0xff] %vm262_vm0, %v6875_v0  ;;  %v4243_v37 = vsel %vm4234_vm7, %v3982_v15, %v4242_v33  ;;  %v6243_v42 = vrot.slane %v7230_v7, 9  ;;  %v6244_v43 = vrot.slane %v667_v23, 9  ;;  %v6245_v44 = vrot.slane %v668_v25, 9 }
  0x44   : > { %344 = vst.msk [vmem:[#allocation2 + $0x280] sm:$0xff] %vm262_vm0, %v6875_v0  ;;  %v4244_v41 = vsel %vm4236_vm8, %v3983_v16, %v4243_v37  ;;  %v6246_v45 = vrot.slane %v669_v26, 9  ;;  %v6247_v46 = vrot.slane %v7233_v8, 9  ;;  %v6248_v47 = vrot.slane %v670_v27, 9 }
  0x45   : > { %346 = vst.msk [vmem:[#allocation2 + $0x290] sm:$0xff] %vm262_vm0, %v6875_v0  ;;  %v6249_v48 = vrot.slane %v671_v29, 9  ;;  %v6250_v49 = vrot.slane %v672_v30, 9  ;;  %v6251_v50 = vrot.slane %v7241_v18, 9  ;;  %v6252_v51 = vrot.slane %v673_v32, 9 }
  0x46   : > { %348 = vst.msk [vmem:[#allocation2 + $0x2a0] sm:$0xff] %vm262_vm0, %v6875_v0  ;;  %v6253_v52 = vrot.slane %v674_v34, 9  ;;  %v6254_v53 = vrot.slane %v675_v35, 9  ;;  %v2976_v54 = vmax.f32 %v7225_v63, %v6239_v36  ;;  %v2977_v5 = vmax.f32 %v664_v19, %v6240_v38  ;;  %v397_v19 = vld [vmem:[%s6959_s28 + $0x68] sm:$0xff] }
  0x47   : > { %350 = vst.msk [vmem:[#allocation2 + $0x2b0] sm:$0xff] %vm262_vm0, %v6875_v0  ;;  %v2978_v9 = vmax.f32 %v665_v21, %v6241_v39  ;;  %v2979_v55 = vmax.f32 %v666_v22, %v6242_v40  ;;  %v2980_v56 = vmax.f32 %v7230_v7, %v6243_v42  ;;  %v2981_v57 = vmax.f32 %v667_v23, %v6244_v43 }
  0x48   : > { %352 = vst.msk [vmem:[#allocation2 + $0x2c0] sm:$0xff] %vm262_vm0, %v6875_v0  ;;  %v2982_v58 = vmax.f32 %v668_v25, %v6245_v44  ;;  %v2983_v59 = vmax.f32 %v669_v26, %v6246_v45  ;;  %v2984_v60 = vmax.f32 %v7233_v8, %v6247_v46  ;;  %v2985_v6 = vmax.f32 %v670_v27, %v6248_v47  ;;  %v399_v27 = vld [vmem:[%s6959_s28 + $0x78] sm:$0xff] }
  0x49   : > { %354 = vst.msk [vmem:[#allocation2 + $0x2d0] sm:$0xff] %vm262_vm0, %v6875_v0  ;;  %v2986_v10 = vmax.f32 %v671_v29, %v6249_v48  ;;  %v2987_v61 = vmax.f32 %v672_v30, %v6250_v49  ;;  %v2988_v62 = vmax.f32 %v7241_v18, %v6251_v50  ;;  %v2989_v63 = vmax.f32 %v673_v32, %v6252_v51 }
  0x4a   : > { %356 = vst.msk [vmem:[#allocation2 + $0x2e0] sm:$0xff] %vm262_vm0, %v6875_v0  ;;  %v2990_v1 = vmax.f32 %v674_v34, %v6253_v52  ;;  %v2991_v2 = vmax.f32 %v675_v35, %v6254_v53  ;;  %v3472_v3 = vmax.f32 %v2976_v54, %v2984_v60  ;;  %v3473_v4 = vmax.f32 %v2977_v5, %v2985_v6 }
  0x4b   : > { %358 = vst.msk [vmem:[#allocation2 + $0x2f0] sm:$0xff] %vm262_vm0, %v6875_v0  ;;  %v3474_v7 = vmax.f32 %v2978_v9, %v2986_v10  ;;  %v3475_v8 = vmax.f32 %v2979_v55, %v2987_v61  ;;  %v3476_v11 = vmax.f32 %v2980_v56, %v2988_v62  ;;  %v3477_v12 = vmax.f32 %v2981_v57, %v2989_v63 }
  0x4c   : > { %360 = vst.msk [vmem:[#allocation2 + $0x300] sm:$0xff] %vm262_vm0, %v6875_v0  ;;  %v3478_v13 = vmax.f32 %v2982_v58, %v2990_v1  ;;  %v3479_v15 = vmax.f32 %v2983_v59, %v2991_v2  ;;  %v3984_v16 = vperm.slane %v3472_v3, 0  ;;  %v3985_v17 = vperm.slane %v3473_v4, 0 }
  0x4d   : > { %362 = vst.msk [vmem:[#allocation2 + $0x310] sm:$0xff] %vm262_vm0, %v6875_v0  ;;  %v3986_v18 = vperm.slane %v3474_v7, 0  ;;  %v3987_v20 = vperm.slane %v3475_v8, 0  ;;  %v3988_v21 = vperm.slane %v3476_v11, 0  ;;  %v3989_v22 = vperm.slane %v3477_v12, 0 }
  0x4e   : > { %364 = vst.msk [vmem:[#allocation2 + $0x320] sm:$0xff] %vm262_vm0, %v6875_v0  ;;  %v3990_v23 = vperm.slane %v3478_v13, 0  ;;  %v3991_v25 = vperm.slane %v3479_v15, 0  ;;  %v4245_v26 = vsel %vm4224_vm2, %v3985_v17, %v3984_v16  ;;  %v677_v28 = vrot.slane %v396_v14, 4 }
  0x4f   : > { %366 = vst.msk [vmem:[#allocation2 + $0x330] sm:$0xff] %vm262_vm0, %v6875_v0  ;;  %v4246_v29 = vsel %vm4226_vm3, %v3986_v18, %v4245_v26  ;;  %v678_v30 = vrot.slane %v396_v14, 6  ;;  %v679_v32 = vrot.slane %v397_v19, 2  ;;  %v680_v33 = vrot.slane %v397_v19, 4 }
  0x50   : > { %368 = vst.msk [vmem:[#allocation2 + $0x340] sm:$0xff] %vm262_vm0, %v6875_v0  ;;  %v681_v34 = vrot.slane %v397_v19, 6  ;;  %v682_v35 = vrot.slane %v398_v24, 2  ;;  %v683_v36 = vrot.slane %v398_v24, 4  ;;  %v684_v38 = vrot.slane %v398_v24, 6 }
  0x51   : > { %370 = vst.msk [vmem:[#allocation2 + $0x350] sm:$0xff] %vm262_vm0, %v6875_v0  ;;  %v685_v39 = vrot.slane %v399_v27, 2  ;;  %v686_v40 = vrot.slane %v399_v27, 4  ;;  %v687_v42 = vrot.slane %v399_v27, 6  ;;  %v6255_v43 = vrot.slane %v396_v14, 9 }
  0x52   : > { %372 = vst.msk [vmem:[#allocation2 + $0x360] sm:$0xff] %vm262_vm0, %v6875_v0  ;;  %v6257_v46 = vrot.slane %v677_v28, 9  ;;  %v6258_v47 = vrot.slane %v678_v30, 9  ;;  %v6259_v48 = vrot.slane %v397_v19, 9  ;;  %v6260_v50 = vrot.slane %v679_v32, 9 }
  0x53   : > { %374 = vst.msk [vmem:[#allocation2 + $0x370] sm:$0xff] %vm262_vm0, %v6875_v0  ;;  %v6261_v51 = vrot.slane %v680_v33, 9  ;;  %v6262_v52 = vrot.slane %v681_v34, 9  ;;  %v6263_v53 = vrot.slane %v398_v24, 9  ;;  %v6264_v54 = vrot.slane %v682_v35, 9 }
  0x54   : > { %376 = vst.msk [vmem:[#allocation2 + $0x380] sm:$0xff] %vm262_vm0, %v6875_v0  ;;  %v6265_v5 = vrot.slane %v683_v36, 9  ;;  %v6266_v9 = vrot.slane %v684_v38, 9  ;;  %v6267_v55 = vrot.slane %v399_v27, 9  ;;  %v6268_v56 = vrot.slane %v685_v39, 9 }
  0x55   : > { %378 = vst.msk [vmem:[#allocation2 + $0x390] sm:$0xff] %vm262_vm0, %v6875_v0  ;;  %v6269_v57 = vrot.slane %v686_v40, 9  ;;  %v6270_v58 = vrot.slane %v687_v42, 9  ;;  %v2992_v59 = vmax.f32 %v396_v14, %v6255_v43  ;;  %v2994_v6 = vmax.f32 %v677_v28, %v6257_v46 }
  0x56   : > { %380 = vst.msk [vmem:[#allocation2 + $0x3a0] sm:$0xff] %vm262_vm0, %v6875_v0  ;;  %v2995_v10 = vmax.f32 %v678_v30, %v6258_v47  ;;  %v2996_v61 = vmax.f32 %v397_v19, %v6259_v48  ;;  %v2997_v62 = vmax.f32 %v679_v32, %v6260_v50  ;;  %v2998_v63 = vmax.f32 %v680_v33, %v6261_v51  ;;  %v402_v32 = vld [vmem:[%s6959_s28 + $0x90] sm:$0xff] }
  0x57   : > { %382 = vst.msk [vmem:[#allocation2 + $0x3b0] sm:$0xff] %vm262_vm0, %v6875_v0  ;;  %v2999_v1 = vmax.f32 %v681_v34, %v6262_v52  ;;  %v3000_v2 = vmax.f32 %v398_v24, %v6263_v53  ;;  %v3001_v3 = vmax.f32 %v682_v35, %v6264_v54  ;;  %v3002_v4 = vmax.f32 %v683_v36, %v6265_v5 }
  0x58   : > { %287 = vst.msk [vmem:[#allocation2 + $0xb8] sm:$0x3] %vm264_vm1, %v6875_v0  ;;  %v3003_v7 = vmax.f32 %v684_v38, %v6266_v9  ;;  %v3004_v8 = vmax.f32 %v399_v27, %v6267_v55  ;;  %v3005_v11 = vmax.f32 %v685_v39, %v6268_v56  ;;  %v3006_v12 = vmax.f32 %v686_v40, %v6269_v57  ;;  %v401_v27 = vld [vmem:[%s6959_s28 + $0x88] sm:$0xff] }
  0x59   : > { %265 = vst.msk [vmem:[#allocation2 + $0x8] sm:$0x3] %vm264_vm1, %v6875_v0  ;;  %v3007_v13 = vmax.f32 %v687_v42, %v6270_v58  ;;  %v3480_v15 = vmax.f32 %v2992_v59, %v3000_v2  ;;  %v691_v38 = vrot.slane %v401_v27, 2  ;;  %v692_v39 = vrot.slane %v401_v27, 4 }
  0x5a   : > { %267 = vst.msk [vmem:[#allocation2 + $0x18] sm:$0x3] %vm264_vm1, %v6875_v0  ;;  %v3483_v17 = vmax.f32 %v2995_v10, %v3003_v7  ;;  %v3484_v18 = vmax.f32 %v2996_v61, %v3004_v8  ;;  %v3485_v19 = vmax.f32 %v2997_v62, %v3005_v11  ;;  %v693_v40 = vrot.slane %v401_v27, 6 }
  0x5b   : > { %269 = vst.msk [vmem:[#allocation2 + $0x28] sm:$0x3] %vm264_vm1, %v6875_v0  ;;  %v694_v42 = vrot.slane %v402_v32, 2  ;;  %v695_v43 = vrot.slane %v402_v32, 4  ;;  %v6275_v5 = vrot.slane %v401_v27, 9  ;;  %v6276_v9 = vrot.slane %v691_v38, 9 }
  0x5c   : > { %271 = vst.msk [vmem:[#allocation2 + $0x38] sm:$0x3] %vm264_vm1, %v6875_v0  ;;  %v3995_v26 = vperm.slane %v3483_v17, 0  ;;  %v3997_v28 = vperm.slane %v3485_v19, 0  ;;  %v6277_v56 = vrot.slane %v692_v39, 9  ;;  %v6278_v57 = vrot.slane %v693_v40, 9 }
  0x5d   : > { %273 = vst.msk [vmem:[#allocation2 + $0x48] sm:$0x3] %vm264_vm1, %v6875_v0  ;;  %v6279_v58 = vrot.slane %v402_v32, 9  ;;  %v6280_v59 = vrot.slane %v694_v42, 9  ;;  %v3012_v7 = vmax.f32 %v401_v27, %v6275_v5  ;;  %v3013_v8 = vmax.f32 %v691_v38, %v6276_v9 }
  0x5e   : > { %275 = vst.msk [vmem:[#allocation2 + $0x58] sm:$0x3] %vm264_vm1, %v6875_v0  ;;  %v3014_v11 = vmax.f32 %v692_v39, %v6277_v56  ;;  %v407_v39 = vld [vmem:[%s6959_s28 + $0xb8] sm:$0xff] }
  0x5f   : > { %277 = vst.msk [vmem:[#allocation2 + $0x68] sm:$0x3] %vm264_vm1, %v6875_v0  ;;  %v711_v5 = vrot.slane %v407_v39, 6 }
  0x60   : > { %279 = vst.msk [vmem:[#allocation2 + $0x78] sm:$0x3] %vm264_vm1, %v6875_v0 }
  0x61   : > { %281 = vst.msk [vmem:[#allocation2 + $0x88] sm:$0x3] %vm264_vm1, %v6875_v0 }
  0x62   : > { %283 = vst.msk [vmem:[#allocation2 + $0x98] sm:$0x3] %vm264_vm1, %v6875_v0 }
  0x63   : > { %285 = vst.msk [vmem:[#allocation2 + $0xa8] sm:$0x3] %vm264_vm1, %v6875_v0 }
  0x64   : > { %289 = vst.msk [vmem:[#allocation2 + $0xc8] sm:$0x3] %vm264_vm1, %v6875_v0 }
  0x65   : > { %291 = vst.msk [vmem:[#allocation2 + $0xd8] sm:$0x3] %vm264_vm1, %v6875_v0 }
  0x66   : > { %293 = vst.msk [vmem:[#allocation2 + $0xe8] sm:$0x3] %vm264_vm1, %v6875_v0 }
  0x67   : > { %295 = vst.msk [vmem:[#allocation2 + $0xf8] sm:$0x3] %vm264_vm1, %v6875_v0 }
  0x68   : > { %297 = vst.msk [vmem:[#allocation2 + $0x108] sm:$0x3] %vm264_vm1, %v6875_v0 }
  0x69   : > { %299 = vst.msk [vmem:[#allocation2 + $0x118] sm:$0x3] %vm264_vm1, %v6875_v0 }
  0x6a   : > { %301 = vst.msk [vmem:[#allocation2 + $0x128] sm:$0x3] %vm264_vm1, %v6875_v0 }
  0x6b   : > { %303 = vst.msk [vmem:[#allocation2 + $0x138] sm:$0x3] %vm264_vm1, %v6875_v0 }
  0x6c   : > { %305 = vst.msk [vmem:[#allocation2 + $0x148] sm:$0x3] %vm264_vm1, %v6875_v0 }
  0x6d   : > { %307 = vst.msk [vmem:[#allocation2 + $0x158] sm:$0x3] %vm264_vm1, %v6875_v0 }
  0x6e   : > { %309 = vst.msk [vmem:[#allocation2 + $0x168] sm:$0x3] %vm264_vm1, %v6875_v0 }
  0x6f   : > { %311 = vst.msk [vmem:[#allocation2 + $0x178] sm:$0x3] %vm264_vm1, %v6875_v0 }
  0x70   : > { %313 = vst.msk [vmem:[#allocation2 + $0x188] sm:$0x3] %vm264_vm1, %v6875_v0 }
  0x71   : > { %315 = vst.msk [vmem:[#allocation2 + $0x198] sm:$0x3] %vm264_vm1, %v6875_v0 }
  0x72   : > { %317 = vst.msk [vmem:[#allocation2 + $0x1a8] sm:$0x3] %vm264_vm1, %v6875_v0 }
  0x73   : > { %319 = vst.msk [vmem:[#allocation2 + $0x1b8] sm:$0x3] %vm264_vm1, %v6875_v0 }
  0x74   : > { %321 = vst.msk [vmem:[#allocation2 + $0x1c8] sm:$0x3] %vm264_vm1, %v6875_v0 }
  0x75   : > { %323 = vst.msk [vmem:[#allocation2 + $0x1d8] sm:$0x3] %vm264_vm1, %v6875_v0 }
  0x76   : > { %325 = vst.msk [vmem:[#allocation2 + $0x1e8] sm:$0x3] %vm264_vm1, %v6875_v0 }
  0x77   : > { %327 = vst.msk [vmem:[#allocation2 + $0x1f8] sm:$0x3] %vm264_vm1, %v6875_v0 }
  0x78   : > { %329 = vst.msk [vmem:[#allocation2 + $0x208] sm:$0x3] %vm264_vm1, %v6875_v0 }
  0x79   : > { %331 = vst.msk [vmem:[#allocation2 + $0x218] sm:$0x3] %vm264_vm1, %v6875_v0 }
  0x7a   : > { %333 = vst.msk [vmem:[#allocation2 + $0x228] sm:$0x3] %vm264_vm1, %v6875_v0 }
  0x7b   : > { %335 = vst.msk [vmem:[#allocation2 + $0x238] sm:$0x3] %vm264_vm1, %v6875_v0 }
  0x7c   : > { %337 = vst.msk [vmem:[#allocation2 + $0x248] sm:$0x3] %vm264_vm1, %v6875_v0 }
  0x7d   : > { %339 = vst.msk [vmem:[#allocation2 + $0x258] sm:$0x3] %vm264_vm1, %v6875_v0 }
  0x7e   : > { %341 = vst.msk [vmem:[#allocation2 + $0x268] sm:$0x3] %vm264_vm1, %v6875_v0 }
  0x7f   : > { %343 = vst.msk [vmem:[#allocation2 + $0x278] sm:$0x3] %vm264_vm1, %v6875_v0 }
  0x80   : > { %345 = vst.msk [vmem:[#allocation2 + $0x288] sm:$0x3] %vm264_vm1, %v6875_v0 }
  0x81   : > { %347 = vst.msk [vmem:[#allocation2 + $0x298] sm:$0x3] %vm264_vm1, %v6875_v0 }
  0x82   : > { %349 = vst.msk [vmem:[#allocation2 + $0x2a8] sm:$0x3] %vm264_vm1, %v6875_v0 }
  0x83   : > { %351 = vst.msk [vmem:[#allocation2 + $0x2b8] sm:$0x3] %vm264_vm1, %v6875_v0 }
  0x84   : > { %353 = vst.msk [vmem:[#allocation2 + $0x2c8] sm:$0x3] %vm264_vm1, %v6875_v0 }
  0x85   : > { %355 = vst.msk [vmem:[#allocation2 + $0x2d8] sm:$0x3] %vm264_vm1, %v6875_v0 }
  0x86   : > { %357 = vst.msk [vmem:[#allocation2 + $0x2e8] sm:$0x3] %vm264_vm1, %v6875_v0 }
  0x87   : > { %359 = vst.msk [vmem:[#allocation2 + $0x2f8] sm:$0x3] %vm264_vm1, %v6875_v0 }
  0x88   : > { %361 = vst.msk [vmem:[#allocation2 + $0x308] sm:$0x3] %vm264_vm1, %v6875_v0 }
  0x89   : > { %363 = vst.msk [vmem:[#allocation2 + $0x318] sm:$0x3] %vm264_vm1, %v6875_v0 }
  0x8a   : > { %365 = vst.msk [vmem:[#allocation2 + $0x328] sm:$0x3] %vm264_vm1, %v6875_v0 }
  0x8b   : > { %367 = vst.msk [vmem:[#allocation2 + $0x338] sm:$0x3] %vm264_vm1, %v6875_v0 }
  0x8c   : > { %369 = vst.msk [vmem:[#allocation2 + $0x348] sm:$0x3] %vm264_vm1, %v6875_v0 }
  0x8d   : > { %371 = vst.msk [vmem:[#allocation2 + $0x358] sm:$0x3] %vm264_vm1, %v6875_v0 }
  0x8e   : > { %373 = vst.msk [vmem:[#allocation2 + $0x368] sm:$0x3] %vm264_vm1, %v6875_v0 }
  0x8f   : > { %375 = vst.msk [vmem:[#allocation2 + $0x378] sm:$0x3] %vm264_vm1, %v6875_v0 }
  0x90   : > { %377 = vst.msk [vmem:[#allocation2 + $0x388] sm:$0x3] %vm264_vm1, %v6875_v0 }
  0x91   : > { %379 = vst.msk [vmem:[#allocation2 + $0x398] sm:$0x3] %vm264_vm1, %v6875_v0 }
  0x92   : > { %381 = vst.msk [vmem:[#allocation2 + $0x3a8] sm:$0x3] %vm264_vm1, %v6875_v0 }
  0x93   : > { %383 = vst.msk [vmem:[#allocation2 + $0x3b8] sm:$0x3] %vm264_vm1, %v6875_v0  ;;  %v676_v0 = vrot.slane %v396_v14, 2  ;;  %v3482_v14 = vmax.f32 %v2994_v6, %v3002_v4 }
  0x94   : > { %4488 = vst.msk [vmem:[#allocation2 + $0xb1] sm:$0xff] %vm262_vm0, %v7195_v31  ;;  %v4247_v31 = vsel %vm4228_vm4, %v3987_v20, %v4246_v29  ;;  %v3486_v20 = vmax.f32 %v2998_v63, %v3006_v12  ;;  %v3015_v12 = vmax.f32 %v693_v40, %v6278_v57 }
  0x95   : > { %4489 = vst.msk [vmem:[#allocation2 + $0xc1] sm:$0xff] %vm262_vm0, %v4244_v41  ;;  %v4248_v37 = vsel %vm4230_vm5, %v3988_v21, %v4247_v31  ;;  %v6256_v44 = vrot.slane %v676_v0, 9  ;;  %v3487_v21 = vmax.f32 %v2999_v1, %v3007_v13  ;;  %v403_v31 = vld [vmem:[%s6959_s28 + $0x98] sm:$0xff]  ;;  %v3016_v13 = vmax.f32 %v402_v32, %v6279_v58 }
  0x96   : > { %v4249_v41 = vsel %vm4232_vm6, %v3989_v22, %v4248_v37  ;;  %v400_v22 = vld [vmem:[%s6959_s28 + $0x80] sm:$0xff]  ;;  %v3998_v29 = vperm.slane %v3486_v20, 0  ;;  %v697_v46 = vrot.slane %v403_v31, 2  ;;  %v698_v47 = vrot.slane %v403_v31, 4 }
  0x97   : > { %v4250_v45 = vsel %vm4234_vm7, %v3990_v23, %v4249_v41  ;;  %v2993_v60 = vmax.f32 %v676_v0, %v6256_v44  ;;  %v3992_v23 = vperm.slane %v3480_v15, 0  ;;  %v3996_v0 = vperm.slane %v3484_v18, 0 }
  0x98   : > { %v4251_v49 = vsel %vm4236_vm8, %v3991_v25, %v4250_v45  ;;  %v3994_v25 = vperm.slane %v3482_v14, 0  ;;  %v3999_v30 = vperm.slane %v3487_v21, 0  ;;  %v688_v34 = vrot.slane %v400_v22, 2 }
  0x99   : > { %4490 = vst.msk [vmem:[#allocation2 + $0xd1] sm:$0xff] %vm262_vm0, %v4251_v49  ;;  %v3481_v16 = vmax.f32 %v2993_v60, %v3001_v3  ;;  %v689_v35 = vrot.slane %v400_v22, 4  ;;  %v690_v36 = vrot.slane %v400_v22, 6  ;;  %v696_v44 = vrot.slane %v402_v32, 6 }
  0x9a   : > { %v699_v48 = vrot.slane %v403_v31, 6  ;;  %v6271_v50 = vrot.slane %v400_v22, 9  ;;  %v6272_v51 = vrot.slane %v688_v34, 9  ;;  %v6281_v60 = vrot.slane %v695_v43, 9 }
  0x9b   : > { %v3993_v24 = vperm.slane %v3481_v16, 0  ;;  %v6273_v52 = vrot.slane %v689_v35, 9  ;;  %v6274_v54 = vrot.slane %v690_v36, 9  ;;  %v6282_v6 = vrot.slane %v696_v44, 9 }
  0x9c   : > { %v6283_v10 = vrot.slane %v403_v31, 9  ;;  %v6284_v61 = vrot.slane %v697_v46, 9  ;;  %v6285_v62 = vrot.slane %v698_v47, 9  ;;  %v6286_v63 = vrot.slane %v699_v48, 9 }
  0x9d   : > { %v4252_v33 = vsel %vm4224_vm2, %v3993_v24, %v3992_v23  ;;  %v3008_v1 = vmax.f32 %v400_v22, %v6271_v50  ;;  %v3009_v2 = vmax.f32 %v688_v34, %v6272_v51  ;;  %v3010_v3 = vmax.f32 %v689_v35, %v6273_v52  ;;  %v406_v35 = vld [vmem:[%s6959_s28 + $0xb0] sm:$0xff] }
  0x9e   : > { %v4253_v37 = vsel %vm4226_vm3, %v3994_v25, %v4252_v33  ;;  %v3011_v4 = vmax.f32 %v690_v36, %v6274_v54  ;;  %v3017_v15 = vmax.f32 %v694_v42, %v6280_v59  ;;  %v3018_v16 = vmax.f32 %v695_v43, %v6281_v60 }
  0x9f   : > { %v4254_v41 = vsel %vm4228_vm4, %v3995_v26, %v4253_v37  ;;  %v3019_v14 = vmax.f32 %v696_v44, %v6282_v6  ;;  %v3020_v17 = vmax.f32 %v403_v31, %v6283_v10  ;;  %v3021_v18 = vmax.f32 %v697_v46, %v6284_v61  ;;  %v404_v26 = vld [vmem:[%s6959_s28 + $0xa0] sm:$0xff] }
  0xa0   : > { %v4255_v45 = vsel %vm4230_vm5, %v3996_v0, %v4254_v41  ;;  %v3022_v19 = vmax.f32 %v698_v47, %v6285_v62  ;;  %v3023_v20 = vmax.f32 %v699_v48, %v6286_v63  ;;  %v3488_v21 = vmax.f32 %v3008_v1, %v3016_v13 }
  0xa1   : > { %v4256_v49 = vsel %vm4232_vm6, %v3997_v28, %v4255_v45  ;;  %v3489_v22 = vmax.f32 %v3009_v2, %v3017_v15  ;;  %v3490_v23 = vmax.f32 %v3010_v3, %v3018_v16  ;;  %v3491_v24 = vmax.f32 %v3011_v4, %v3019_v14 }
  0xa2   : > { %v4257_v53 = vsel %vm4234_vm7, %v3998_v29, %v4256_v49  ;;  %v3492_v25 = vmax.f32 %v3012_v7, %v3020_v17  ;;  %v3493_v27 = vmax.f32 %v3013_v8, %v3021_v18  ;;  %v3494_v0 = vmax.f32 %v3014_v11, %v3022_v19 }
  0xa3   : > { %v4258_v55 = vsel %vm4236_vm8, %v3999_v30, %v4257_v53  ;;  %v3495_v28 = vmax.f32 %v3015_v12, %v3023_v20  ;;  %v4000_v29 = vperm.slane %v3488_v21, 0  ;;  %v405_v30 = vld [vmem:[%s6959_s28 + $0xa8] sm:$0xff]  ;;  %v4001_v32 = vperm.slane %v3489_v22, 0 }
  0xa4   : > { %4491 = vst.msk [vmem:[#allocation2 + $0xe1] sm:$0xff] %vm262_vm0, %v4258_v55  ;;  %v4002_v33 = vperm.slane %v3490_v23, 0  ;;  %v4003_v34 = vperm.slane %v3491_v24, 0  ;;  %v4004_v31 = vperm.slane %v3492_v25, 0  ;;  %v4005_v36 = vperm.slane %v3493_v27, 0 }
  0xa5   : > { %v4006_v37 = vperm.slane %v3494_v0, 0  ;;  %v4007_v38 = vperm.slane %v3495_v28, 0  ;;  %v700_v40 = vrot.slane %v404_v26, 2  ;;  %v4259_v41 = vsel %vm4224_vm2, %v4001_v32, %v4000_v29 }
  0xa6   : > { %v701_v42 = vrot.slane %v404_v26, 4  ;;  %v702_v43 = vrot.slane %v404_v26, 6  ;;  %v703_v44 = vrot.slane %v405_v30, 2  ;;  %v4260_v45 = vsel %vm4226_vm3, %v4002_v33, %v4259_v41 }
  0xa7   : > { %v704_v46 = vrot.slane %v405_v30, 4  ;;  %v705_v47 = vrot.slane %v405_v30, 6  ;;  %v706_v48 = vrot.slane %v406_v35, 2  ;;  %v4261_v49 = vsel %vm4228_vm4, %v4003_v34, %v4260_v45  ;;  %v408_v34 = vld [vmem:[%s6959_s28 + $0xc0] sm:$0xff] }
  0xa8   : > { %v707_v50 = vrot.slane %v406_v35, 4  ;;  %v708_v51 = vrot.slane %v406_v35, 6  ;;  %v709_v52 = vrot.slane %v407_v39, 2  ;;  %v4262_v53 = vsel %vm4230_vm5, %v4004_v31, %v4261_v49 }
  0xa9   : > { %v710_v54 = vrot.slane %v407_v39, 4  ;;  %v6287_v9 = vrot.slane %v404_v26, 9  ;;  %v4263_v55 = vsel %vm4232_vm6, %v4005_v36, %v4262_v53  ;;  %v6288_v56 = vrot.slane %v700_v40, 9 }
  0xaa   : > { %v6289_v57 = vrot.slane %v701_v42, 9  ;;  %v6290_v58 = vrot.slane %v702_v43, 9  ;;  %v4264_v59 = vsel %vm4234_vm7, %v4006_v37, %v4263_v55  ;;  %v6291_v60 = vrot.slane %v405_v30, 9 }
  0xab   : > { %v6292_v6 = vrot.slane %v703_v44, 9  ;;  %v6293_v10 = vrot.slane %v704_v46, 9  ;;  %v4265_v61 = vsel %vm4236_vm8, %v4007_v38, %v4264_v59  ;;  %v6294_v62 = vrot.slane %v705_v47, 9  ;;  %v409_v38 = vld [vmem:[%s6959_s28 + $0xc8] sm:$0xff] }
  0xac   : > { %v6295_v63 = vrot.slane %v406_v35, 9  ;;  %v6296_v1 = vrot.slane %v706_v48, 9  ;;  %4492 = vst.msk [vmem:[#allocation2 + $0xf1] sm:$0xff] %vm262_vm0, %v4265_v61  ;;  %v6297_v2 = vrot.slane %v707_v50, 9  ;;  %v6298_v3 = vrot.slane %v708_v51, 9 }
  0xad   : > { %v6299_v4 = vrot.slane %v407_v39, 9  ;;  %v6300_v7 = vrot.slane %v709_v52, 9  ;;  %v6301_v8 = vrot.slane %v710_v54, 9  ;;  %v6302_v11 = vrot.slane %v711_v5, 9 }
  0xae   : > { %v3024_v12 = vmax.f32 %v404_v26, %v6287_v9  ;;  %v3025_v13 = vmax.f32 %v700_v40, %v6288_v56  ;;  %v3026_v15 = vmax.f32 %v701_v42, %v6289_v57  ;;  %v3027_v16 = vmax.f32 %v702_v43, %v6290_v58  ;;  %v410_v43 = vld [vmem:[%s6959_s28 + $0xd0] sm:$0xff] }
  0xaf   : > { %v3028_v14 = vmax.f32 %v405_v30, %v6291_v60  ;;  %v3029_v17 = vmax.f32 %v703_v44, %v6292_v6  ;;  %v3030_v18 = vmax.f32 %v704_v46, %v6293_v10  ;;  %v3031_v19 = vmax.f32 %v705_v47, %v6294_v62  ;;  %v411_v47 = vld [vmem:[%s6959_s28 + $0xd8] sm:$0xff] }
  0xb0   : > { %v3032_v20 = vmax.f32 %v406_v35, %v6295_v63  ;;  %v3033_v21 = vmax.f32 %v706_v48, %v6296_v1  ;;  %v3034_v22 = vmax.f32 %v707_v50, %v6297_v2  ;;  %v3035_v23 = vmax.f32 %v708_v51, %v6298_v3 }
  0xb1   : > { %v3036_v24 = vmax.f32 %v407_v39, %v6299_v4  ;;  %v3037_v25 = vmax.f32 %v709_v52, %v6300_v7  ;;  %v3038_v27 = vmax.f32 %v710_v54, %v6301_v8  ;;  %v3039_v0 = vmax.f32 %v711_v5, %v6302_v11 }
  0xb2   : > { %v3496_v28 = vmax.f32 %v3024_v12, %v3032_v20  ;;  %v3497_v26 = vmax.f32 %v3025_v13, %v3033_v21  ;;  %v3498_v29 = vmax.f32 %v3026_v15, %v3034_v22  ;;  %v3499_v32 = vmax.f32 %v3027_v16, %v3035_v23 }
  0xb3   : > { %v3500_v33 = vmax.f32 %v3028_v14, %v3036_v24  ;;  %v3501_v30 = vmax.f32 %v3029_v17, %v3037_v25  ;;  %v3502_v31 = vmax.f32 %v3030_v18, %v3038_v27  ;;  %v3503_v36 = vmax.f32 %v3031_v19, %v3039_v0 }
  0xb4   : > { %v4008_v35 = vperm.slane %v3496_v28, 0  ;;  %v4009_v37 = vperm.slane %v3497_v26, 0  ;;  %v4010_v40 = vperm.slane %v3498_v29, 0  ;;  %v4011_v41 = vperm.slane %v3499_v32, 0 }
  0xb5   : > { %v4012_v39 = vperm.slane %v3500_v33, 0  ;;  %v4013_v42 = vperm.slane %v3501_v30, 0  ;;  %v4014_v44 = vperm.slane %v3502_v31, 0  ;;  %v4015_v45 = vperm.slane %v3503_v36, 0 }
  0xb6   : > { %v4266_v46 = vsel %vm4224_vm2, %v4009_v37, %v4008_v35  ;;  %v712_v48 = vrot.slane %v408_v34, 2  ;;  %v713_v50 = vrot.slane %v408_v34, 4  ;;  %v714_v51 = vrot.slane %v408_v34, 6 }
  0xb7   : > { %v4267_v49 = vsel %vm4226_vm3, %v4010_v40, %v4266_v46  ;;  %v715_v52 = vrot.slane %v409_v38, 2  ;;  %v716_v54 = vrot.slane %v409_v38, 4  ;;  %v717_v5 = vrot.slane %v409_v38, 6  ;;  %v413_v46 = vld [vmem:[%s6959_s28 + $0xe8] sm:$0xff] }
  0xb8   : > { %v4268_v53 = vsel %vm4228_vm4, %v4011_v41, %v4267_v49  ;;  %v718_v9 = vrot.slane %v410_v43, 2  ;;  %v719_v56 = vrot.slane %v410_v43, 4  ;;  %v720_v57 = vrot.slane %v410_v43, 6 }
  0xb9   : > { %v4269_v55 = vsel %vm4230_vm5, %v4012_v39, %v4268_v53  ;;  %v721_v58 = vrot.slane %v411_v47, 2  ;;  %v722_v60 = vrot.slane %v411_v47, 4  ;;  %v723_v6 = vrot.slane %v411_v47, 6  ;;  %v412_v39 = vld [vmem:[%s6959_s28 + $0xe0] sm:$0xff] }
  0xba   : > { %v4270_v59 = vsel %vm4232_vm6, %v4013_v42, %v4269_v55  ;;  %v6303_v10 = vrot.slane %v408_v34, 9  ;;  %v6304_v62 = vrot.slane %v712_v48, 9  ;;  %v6305_v63 = vrot.slane %v713_v50, 9 }
  0xbb   : > { %v4271_v61 = vsel %vm4234_vm7, %v4014_v44, %v4270_v59  ;;  %v6306_v1 = vrot.slane %v714_v51, 9  ;;  %v6307_v3 = vrot.slane %v409_v38, 9  ;;  %v6308_v4 = vrot.slane %v715_v52, 9 }
  0xbc   : > { %v4272_v2 = vsel %vm4236_vm8, %v4015_v45, %v4271_v61  ;;  %v6309_v7 = vrot.slane %v716_v54, 9  ;;  %v6310_v8 = vrot.slane %v717_v5, 9  ;;  %v6311_v11 = vrot.slane %v410_v43, 9 }
  0xbd   : > { %4493 = vst.msk [vmem:[#allocation2 + $0x101] sm:$0xff] %vm262_vm0, %v4272_v2  ;;  %v6312_v12 = vrot.slane %v718_v9, 9  ;;  %v6313_v13 = vrot.slane %v719_v56, 9  ;;  %v6314_v15 = vrot.slane %v720_v57, 9  ;;  %v6315_v16 = vrot.slane %v411_v47, 9 }
  0xbe   : > { %v6316_v14 = vrot.slane %v721_v58, 9  ;;  %v6317_v17 = vrot.slane %v722_v60, 9  ;;  %v6318_v18 = vrot.slane %v723_v6, 9  ;;  %v3040_v19 = vmax.f32 %v408_v34, %v6303_v10 }
  0xbf   : > { %v3041_v20 = vmax.f32 %v712_v48, %v6304_v62  ;;  %v3042_v21 = vmax.f32 %v713_v50, %v6305_v63  ;;  %v3043_v22 = vmax.f32 %v714_v51, %v6306_v1  ;;  %v3044_v23 = vmax.f32 %v409_v38, %v6307_v3  ;;  %v414_v51 = vld [vmem:[%s6959_s28 + $0xf0] sm:$0xff] }
  0xc0   : > { %v3045_v24 = vmax.f32 %v715_v52, %v6308_v4  ;;  %v3046_v25 = vmax.f32 %v716_v54, %v6309_v7  ;;  %v3047_v27 = vmax.f32 %v717_v5, %v6310_v8  ;;  %v3048_v0 = vmax.f32 %v410_v43, %v6311_v11  ;;  %v415_v54 = vld [vmem:[%s6959_s28 + $0xf8] sm:$0xff] }
  0xc1   : > { %v3049_v28 = vmax.f32 %v718_v9, %v6312_v12  ;;  %v3050_v26 = vmax.f32 %v719_v56, %v6313_v13  ;;  %v3051_v29 = vmax.f32 %v720_v57, %v6314_v15  ;;  %v3052_v32 = vmax.f32 %v411_v47, %v6315_v16 }
  0xc2   : > { %v3053_v33 = vmax.f32 %v721_v58, %v6316_v14  ;;  %v3054_v30 = vmax.f32 %v722_v60, %v6317_v17  ;;  %v3055_v31 = vmax.f32 %v723_v6, %v6318_v18  ;;  %v3504_v36 = vmax.f32 %v3040_v19, %v3048_v0 }
  0xc3   : > { %v3505_v35 = vmax.f32 %v3041_v20, %v3049_v28  ;;  %v3506_v34 = vmax.f32 %v3042_v21, %v3050_v26  ;;  %v3507_v37 = vmax.f32 %v3043_v22, %v3051_v29  ;;  %v3508_v40 = vmax.f32 %v3044_v23, %v3052_v32 }
  0xc4   : > { %v3509_v38 = vmax.f32 %v3045_v24, %v3053_v33  ;;  %v3510_v41 = vmax.f32 %v3046_v25, %v3054_v30  ;;  %v3511_v42 = vmax.f32 %v3047_v27, %v3055_v31  ;;  %v4016_v43 = vperm.slane %v3504_v36, 0 }
  0xc5   : > { %v4017_v44 = vperm.slane %v3505_v35, 0  ;;  %v4018_v45 = vperm.slane %v3506_v34, 0  ;;  %v4019_v47 = vperm.slane %v3507_v37, 0  ;;  %v4020_v48 = vperm.slane %v3508_v40, 0 }
  0xc6   : > { %v4021_v49 = vperm.slane %v3509_v38, 0  ;;  %v4022_v50 = vperm.slane %v3510_v41, 0  ;;  %v4023_v52 = vperm.slane %v3511_v42, 0  ;;  %v724_v5 = vrot.slane %v412_v39, 2 }
  0xc7   : > { %v4273_v53 = vsel %vm4224_vm2, %v4017_v44, %v4016_v43  ;;  %v725_v9 = vrot.slane %v412_v39, 4  ;;  %v726_v56 = vrot.slane %v412_v39, 6  ;;  %v727_v57 = vrot.slane %v413_v46, 2 }
  0xc8   : > { %v4274_v55 = vsel %vm4226_vm3, %v4018_v45, %v4273_v53  ;;  %v728_v58 = vrot.slane %v413_v46, 4  ;;  %v729_v60 = vrot.slane %v413_v46, 6  ;;  %v730_v6 = vrot.slane %v414_v51, 2 }
  0xc9   : > { %v4275_v59 = vsel %vm4228_vm4, %v4019_v47, %v4274_v55  ;;  %v731_v10 = vrot.slane %v414_v51, 4  ;;  %v732_v62 = vrot.slane %v414_v51, 6  ;;  %v733_v63 = vrot.slane %v415_v54, 2 }
  0xca   : > { %v4276_v61 = vsel %vm4230_vm5, %v4020_v48, %v4275_v59  ;;  %v734_v1 = vrot.slane %v415_v54, 4  ;;  %v735_v3 = vrot.slane %v415_v54, 6  ;;  %v6319_v4 = vrot.slane %v412_v39, 9  ;;  %v419_v59 = vld [vmem:[%s6959_s28 + $0x118] sm:$0xff] }
  0xcb   : > { %v4277_v2 = vsel %vm4232_vm6, %v4021_v49, %v4276_v61  ;;  %v6320_v7 = vrot.slane %v724_v5, 9  ;;  %v6321_v11 = vrot.slane %v725_v9, 9  ;;  %v6322_v12 = vrot.slane %v726_v56, 9  ;;  %v416_v49 = vld [vmem:[%s6959_s28 + $0x100] sm:$0xff] }
  0xcc   : > { %v4278_v8 = vsel %vm4234_vm7, %v4022_v50, %v4277_v2  ;;  %v6323_v13 = vrot.slane %v413_v46, 9  ;;  %v6324_v16 = vrot.slane %v727_v57, 9  ;;  %v6325_v14 = vrot.slane %v728_v58, 9 }
  0xcd   : > { %v4279_v15 = vsel %vm4236_vm8, %v4023_v52, %v4278_v8  ;;  %v6326_v17 = vrot.slane %v729_v60, 9  ;;  %v6327_v18 = vrot.slane %v414_v51, 9  ;;  %v6328_v19 = vrot.slane %v730_v6, 9 }
  0xce   : > { %4494 = vst.msk [vmem:[#allocation2 + $0x111] sm:$0xff] %vm262_vm0, %v4279_v15  ;;  %v6329_v20 = vrot.slane %v731_v10, 9  ;;  %v6330_v21 = vrot.slane %v732_v62, 9  ;;  %v6331_v22 = vrot.slane %v415_v54, 9  ;;  %v6332_v23 = vrot.slane %v733_v63, 9 }
  0xcf   : > { %v6333_v24 = vrot.slane %v734_v1, 9  ;;  %v6334_v25 = vrot.slane %v735_v3, 9  ;;  %v3056_v27 = vmax.f32 %v412_v39, %v6319_v4  ;;  %v3057_v0 = vmax.f32 %v724_v5, %v6320_v7 }
  0xd0   : > { %v3058_v28 = vmax.f32 %v725_v9, %v6321_v11  ;;  %v3059_v26 = vmax.f32 %v726_v56, %v6322_v12  ;;  %v3060_v29 = vmax.f32 %v413_v46, %v6323_v13  ;;  %v3061_v32 = vmax.f32 %v727_v57, %v6324_v16  ;;  %v418_v57 = vld [vmem:[%s6959_s28 + $0x110] sm:$0xff] }
  0xd1   : > { %v3062_v33 = vmax.f32 %v728_v58, %v6325_v14  ;;  %v3063_v30 = vmax.f32 %v729_v60, %v6326_v17  ;;  %v3064_v31 = vmax.f32 %v414_v51, %v6327_v18  ;;  %v3065_v36 = vmax.f32 %v730_v6, %v6328_v19 }
  0xd2   : > { %v3066_v35 = vmax.f32 %v731_v10, %v6329_v20  ;;  %v3067_v34 = vmax.f32 %v732_v62, %v6330_v21  ;;  %v3068_v37 = vmax.f32 %v415_v54, %v6331_v22  ;;  %v3069_v40 = vmax.f32 %v733_v63, %v6332_v23  ;;  %v417_v54 = vld [vmem:[%s6959_s28 + $0x108] sm:$0xff] }
  0xd3   : > { %v3070_v38 = vmax.f32 %v734_v1, %v6333_v24  ;;  %v3071_v41 = vmax.f32 %v735_v3, %v6334_v25  ;;  %v3512_v42 = vmax.f32 %v3056_v27, %v3064_v31  ;;  %v3513_v43 = vmax.f32 %v3057_v0, %v3065_v36 }
  0xd4   : > { %v3514_v39 = vmax.f32 %v3058_v28, %v3066_v35  ;;  %v3515_v44 = vmax.f32 %v3059_v26, %v3067_v34  ;;  %v3516_v45 = vmax.f32 %v3060_v29, %v3068_v37  ;;  %v3517_v46 = vmax.f32 %v3061_v32, %v3069_v40 }
  0xd5   : > { %v3518_v47 = vmax.f32 %v3062_v33, %v3070_v38  ;;  %v3519_v48 = vmax.f32 %v3063_v30, %v3071_v41  ;;  %v4024_v50 = vperm.slane %v3512_v42, 0  ;;  %v4025_v51 = vperm.slane %v3513_v43, 0 }
  0xd6   : > { %v4026_v52 = vperm.slane %v3514_v39, 0  ;;  %v4027_v53 = vperm.slane %v3515_v44, 0  ;;  %v4028_v5 = vperm.slane %v3516_v45, 0  ;;  %v4029_v9 = vperm.slane %v3517_v46, 0 }
  0xd7   : > { %v4030_v55 = vperm.slane %v3518_v47, 0  ;;  %v4031_v56 = vperm.slane %v3519_v48, 0  ;;  %v4280_v58 = vsel %vm4224_vm2, %v4025_v51, %v4024_v50  ;;  %v736_v60 = vrot.slane %v416_v49, 2 }
  0xd8   : > { %v737_v6 = vrot.slane %v416_v49, 4  ;;  %v738_v10 = vrot.slane %v416_v49, 6  ;;  %v4281_v61 = vsel %vm4226_vm3, %v4026_v52, %v4280_v58  ;;  %v739_v62 = vrot.slane %v417_v54, 2 }
  0xd9   : > { %v740_v63 = vrot.slane %v417_v54, 4  ;;  %v741_v1 = vrot.slane %v417_v54, 6  ;;  %v4282_v2 = vsel %vm4228_vm4, %v4027_v53, %v4281_v61  ;;  %v742_v3 = vrot.slane %v418_v57, 2  ;;  %v420_v53 = vld [vmem:[%s6959_s28 + $0x120] sm:$0xff] }
  0xda   : > { %v743_v4 = vrot.slane %v418_v57, 4  ;;  %v744_v7 = vrot.slane %v418_v57, 6  ;;  %v4283_v8 = vsel %vm4230_vm5, %v4028_v5, %v4282_v2  ;;  %v745_v11 = vrot.slane %v419_v59, 2 }
  0xdb   : > { %v746_v12 = vrot.slane %v419_v59, 4  ;;  %v747_v13 = vrot.slane %v419_v59, 6  ;;  %v4284_v15 = vsel %vm4232_vm6, %v4029_v9, %v4283_v8  ;;  %v6335_v16 = vrot.slane %v416_v49, 9 }
  0xdc   : > { %v6336_v14 = vrot.slane %v736_v60, 9  ;;  %v6337_v17 = vrot.slane %v737_v6, 9  ;;  %v4285_v18 = vsel %vm4234_vm7, %v4030_v55, %v4284_v15  ;;  %v6338_v19 = vrot.slane %v738_v10, 9 }
  0xdd   : > { %v6339_v20 = vrot.slane %v417_v54, 9  ;;  %v6340_v21 = vrot.slane %v739_v62, 9  ;;  %v4286_v22 = vsel %vm4236_vm8, %v4031_v56, %v4285_v18  ;;  %v6341_v23 = vrot.slane %v740_v63, 9  ;;  %v421_v56 = vld [vmem:[%s6959_s28 + $0x128] sm:$0xff] }
  0xde   : > { %v6342_v24 = vrot.slane %v741_v1, 9  ;;  %v6343_v25 = vrot.slane %v418_v57, 9  ;;  %4495 = vst.msk [vmem:[#allocation2 + $0x121] sm:$0xff] %vm262_vm0, %v4286_v22  ;;  %v6344_v27 = vrot.slane %v742_v3, 9  ;;  %v6345_v0 = vrot.slane %v743_v4, 9 }
  0xdf   : > { %v6346_v28 = vrot.slane %v744_v7, 9  ;;  %v6347_v26 = vrot.slane %v419_v59, 9  ;;  %v6348_v29 = vrot.slane %v745_v11, 9  ;;  %v6349_v32 = vrot.slane %v746_v12, 9 }
  0xe0   : > { %v6350_v33 = vrot.slane %v747_v13, 9  ;;  %v3072_v30 = vmax.f32 %v416_v49, %v6335_v16  ;;  %v3073_v31 = vmax.f32 %v736_v60, %v6336_v14  ;;  %v3074_v36 = vmax.f32 %v737_v6, %v6337_v17  ;;  %v422_v6 = vld [vmem:[%s6959_s28 + $0x130] sm:$0xff] }
  0xe1   : > { %v3075_v35 = vmax.f32 %v738_v10, %v6338_v19  ;;  %v3076_v34 = vmax.f32 %v417_v54, %v6339_v20  ;;  %v3077_v37 = vmax.f32 %v739_v62, %v6340_v21  ;;  %v3078_v40 = vmax.f32 %v740_v63, %v6341_v23  ;;  %v423_v63 = vld [vmem:[%s6959_s28 + $0x138] sm:$0xff] }
  0xe2   : > { %v3079_v38 = vmax.f32 %v741_v1, %v6342_v24  ;;  %v3080_v41 = vmax.f32 %v418_v57, %v6343_v25  ;;  %v3081_v42 = vmax.f32 %v742_v3, %v6344_v27  ;;  %v3082_v43 = vmax.f32 %v743_v4, %v6345_v0 }
  0xe3   : > { %v3083_v39 = vmax.f32 %v744_v7, %v6346_v28  ;;  %v3084_v44 = vmax.f32 %v419_v59, %v6347_v26  ;;  %v3085_v45 = vmax.f32 %v745_v11, %v6348_v29  ;;  %v3086_v46 = vmax.f32 %v746_v12, %v6349_v32 }
  0xe4   : > { %v3087_v47 = vmax.f32 %v747_v13, %v6350_v33  ;;  %v3520_v48 = vmax.f32 %v3072_v30, %v3080_v41  ;;  %v3521_v49 = vmax.f32 %v3073_v31, %v3081_v42  ;;  %v3522_v50 = vmax.f32 %v3074_v36, %v3082_v43 }
  0xe5   : > { %v3523_v51 = vmax.f32 %v3075_v35, %v3083_v39  ;;  %v3524_v52 = vmax.f32 %v3076_v34, %v3084_v44  ;;  %v3525_v54 = vmax.f32 %v3077_v37, %v3085_v45  ;;  %v3526_v5 = vmax.f32 %v3078_v40, %v3086_v46 }
  0xe6   : > { %v3527_v9 = vmax.f32 %v3079_v38, %v3087_v47  ;;  %v4032_v55 = vperm.slane %v3520_v48, 0  ;;  %v4033_v57 = vperm.slane %v3521_v49, 0  ;;  %v4034_v58 = vperm.slane %v3522_v50, 0 }
  0xe7   : > { %v4035_v60 = vperm.slane %v3523_v51, 0  ;;  %v4036_v59 = vperm.slane %v3524_v52, 0  ;;  %v4037_v10 = vperm.slane %v3525_v54, 0  ;;  %v4038_v61 = vperm.slane %v3526_v5, 0 }
  0xe8   : > { %v4039_v62 = vperm.slane %v3527_v9, 0  ;;  %v748_v1 = vrot.slane %v420_v53, 2  ;;  %v4287_v2 = vsel %vm4224_vm2, %v4033_v57, %v4032_v55  ;;  %v749_v3 = vrot.slane %v420_v53, 4 }
  0xe9   : > { %v750_v4 = vrot.slane %v420_v53, 6  ;;  %v751_v7 = vrot.slane %v421_v56, 2  ;;  %v4288_v8 = vsel %vm4226_vm3, %v4034_v58, %v4287_v2  ;;  %v752_v11 = vrot.slane %v421_v56, 4 }
  0xea   : > { %v753_v12 = vrot.slane %v421_v56, 6  ;;  %v754_v13 = vrot.slane %v422_v6, 2  ;;  %v4289_v15 = vsel %vm4228_vm4, %v4035_v60, %v4288_v8  ;;  %v755_v16 = vrot.slane %v422_v6, 4  ;;  %v424_v60 = vld [vmem:[%s6959_s28 + $0x140] sm:$0xff] }
  0xeb   : > { %v756_v14 = vrot.slane %v422_v6, 6  ;;  %v757_v17 = vrot.slane %v423_v63, 2  ;;  %v4290_v18 = vsel %vm4230_vm5, %v4036_v59, %v4289_v15  ;;  %v758_v19 = vrot.slane %v423_v63, 4 }
  0xec   : > { %v759_v20 = vrot.slane %v423_v63, 6  ;;  %v6351_v21 = vrot.slane %v420_v53, 9  ;;  %v4291_v22 = vsel %vm4232_vm6, %v4037_v10, %v4290_v18  ;;  %v6352_v23 = vrot.slane %v748_v1, 9 }
  0xed   : > { %v6353_v24 = vrot.slane %v749_v3, 9  ;;  %v6354_v25 = vrot.slane %v750_v4, 9  ;;  %v4292_v27 = vsel %vm4234_vm7, %v4038_v61, %v4291_v22  ;;  %v6355_v0 = vrot.slane %v421_v56, 9 }
  0xee   : > { %v6356_v28 = vrot.slane %v751_v7, 9  ;;  %v6357_v26 = vrot.slane %v752_v11, 9  ;;  %v4293_v29 = vsel %vm4236_vm8, %v4039_v62, %v4292_v27  ;;  %v6358_v32 = vrot.slane %v753_v12, 9  ;;  %v425_v62 = vld [vmem:[%s6959_s28 + $0x148] sm:$0xff] }
  0xef   : > { %v6359_v33 = vrot.slane %v422_v6, 9  ;;  %v6360_v30 = vrot.slane %v754_v13, 9  ;;  %4496 = vst.msk [vmem:[#allocation2 + $0x151] sm:$0xff] %vm262_vm0, %v4293_v29  ;;  %v6361_v31 = vrot.slane %v755_v16, 9  ;;  %v6362_v36 = vrot.slane %v756_v14, 9 }
  0xf0   : > { %v6363_v35 = vrot.slane %v423_v63, 9  ;;  %v6364_v34 = vrot.slane %v757_v17, 9  ;;  %v6365_v37 = vrot.slane %v758_v19, 9  ;;  %v6366_v40 = vrot.slane %v759_v20, 9 }
  0xf1   : > { %v3088_v38 = vmax.f32 %v420_v53, %v6351_v21  ;;  %v3089_v41 = vmax.f32 %v748_v1, %v6352_v23  ;;  %v3090_v42 = vmax.f32 %v749_v3, %v6353_v24  ;;  %v3091_v43 = vmax.f32 %v750_v4, %v6354_v25  ;;  %v426_v4 = vld [vmem:[%s6959_s28 + $0x150] sm:$0xff] }
  0xf2   : > { %v3092_v39 = vmax.f32 %v421_v56, %v6355_v0  ;;  %v3093_v44 = vmax.f32 %v751_v7, %v6356_v28  ;;  %v3094_v45 = vmax.f32 %v752_v11, %v6357_v26  ;;  %v3095_v46 = vmax.f32 %v753_v12, %v6358_v32  ;;  %v427_v12 = vld [vmem:[%s6959_s28 + $0x158] sm:$0xff] }
  0xf3   : > { %v3096_v47 = vmax.f32 %v422_v6, %v6359_v33  ;;  %v3097_v48 = vmax.f32 %v754_v13, %v6360_v30  ;;  %v3098_v49 = vmax.f32 %v755_v16, %v6361_v31  ;;  %v3099_v50 = vmax.f32 %v756_v14, %v6362_v36 }
  0xf4   : > { %v3100_v51 = vmax.f32 %v423_v63, %v6363_v35  ;;  %v3101_v52 = vmax.f32 %v757_v17, %v6364_v34  ;;  %v3102_v54 = vmax.f32 %v758_v19, %v6365_v37  ;;  %v3103_v5 = vmax.f32 %v759_v20, %v6366_v40 }
  0xf5   : > { %v3528_v9 = vmax.f32 %v3088_v38, %v3096_v47  ;;  %v3529_v53 = vmax.f32 %v3089_v41, %v3097_v48  ;;  %v3530_v55 = vmax.f32 %v3090_v42, %v3098_v49  ;;  %v3531_v57 = vmax.f32 %v3091_v43, %v3099_v50 }
  0xf6   : > { %v3532_v58 = vmax.f32 %v3092_v39, %v3100_v51  ;;  %v3533_v56 = vmax.f32 %v3093_v44, %v3101_v52  ;;  %v3534_v59 = vmax.f32 %v3094_v45, %v3102_v54  ;;  %v3535_v10 = vmax.f32 %v3095_v46, %v3103_v5 }
  0xf7   : > { %v4040_v6 = vperm.slane %v3528_v9, 0  ;;  %v4041_v61 = vperm.slane %v3529_v53, 0  ;;  %v4042_v1 = vperm.slane %v3530_v55, 0  ;;  %v4043_v2 = vperm.slane %v3531_v57, 0 }
  0xf8   : > { %v4044_v63 = vperm.slane %v3532_v58, 0  ;;  %v4045_v3 = vperm.slane %v3533_v56, 0  ;;  %v4046_v7 = vperm.slane %v3534_v59, 0  ;;  %v4047_v8 = vperm.slane %v3535_v10, 0 }
  0xf9   : > { %v4294_v11 = vsel %vm4224_vm2, %v4041_v61, %v4040_v6  ;;  %v760_v13 = vrot.slane %v424_v60, 2  ;;  %v761_v16 = vrot.slane %v424_v60, 4  ;;  %v762_v14 = vrot.slane %v424_v60, 6 }
  0xfa   : > { %v4295_v15 = vsel %vm4226_vm3, %v4042_v1, %v4294_v11  ;;  %v763_v17 = vrot.slane %v425_v62, 2  ;;  %v764_v19 = vrot.slane %v425_v62, 4  ;;  %v765_v20 = vrot.slane %v425_v62, 6  ;;  %v429_v11 = vld [vmem:[%s6959_s28 + $0x168] sm:$0xff] }
  0xfb   : > { %v4296_v18 = vsel %vm4228_vm4, %v4043_v2, %v4295_v15  ;;  %v766_v21 = vrot.slane %v426_v4, 2  ;;  %v767_v23 = vrot.slane %v426_v4, 4  ;;  %v768_v24 = vrot.slane %v426_v4, 6 }
  0xfc   : > { %v4297_v22 = vsel %vm4230_vm5, %v4044_v63, %v4296_v18  ;;  %v769_v25 = vrot.slane %v427_v12, 2  ;;  %v770_v0 = vrot.slane %v427_v12, 4  ;;  %v771_v28 = vrot.slane %v427_v12, 6  ;;  %v428_v63 = vld [vmem:[%s6959_s28 + $0x160] sm:$0xff] }
  0xfd   : > { %v4298_v27 = vsel %vm4232_vm6, %v4045_v3, %v4297_v22  ;;  %v6367_v26 = vrot.slane %v424_v60, 9  ;;  %v6368_v32 = vrot.slane %v760_v13, 9  ;;  %v6369_v33 = vrot.slane %v761_v16, 9 }
  0xfe   : > { %v4299_v29 = vsel %vm4234_vm7, %v4046_v7, %v4298_v27  ;;  %v6370_v30 = vrot.slane %v762_v14, 9  ;;  %v6371_v36 = vrot.slane %v425_v62, 9  ;;  %v6372_v35 = vrot.slane %v763_v17, 9 }
  0xff   : > { %v4300_v31 = vsel %vm4236_vm8, %v4047_v8, %v4299_v29  ;;  %v6373_v34 = vrot.slane %v764_v19, 9  ;;  %v6374_v37 = vrot.slane %v765_v20, 9  ;;  %v6375_v40 = vrot.slane %v426_v4, 9 }
 0x100   : > { %4497 = vst.msk [vmem:[#allocation2 + $0x161] sm:$0xff] %vm262_vm0, %v4300_v31  ;;  %v6376_v38 = vrot.slane %v766_v21, 9  ;;  %v6377_v41 = vrot.slane %v767_v23, 9  ;;  %v6378_v42 = vrot.slane %v768_v24, 9  ;;  %v6379_v43 = vrot.slane %v427_v12, 9 }
 0x101   : > { %v6380_v39 = vrot.slane %v769_v25, 9  ;;  %v6381_v44 = vrot.slane %v770_v0, 9  ;;  %v6382_v45 = vrot.slane %v771_v28, 9  ;;  %v3104_v46 = vmax.f32 %v424_v60, %v6367_v26 }
 0x102   : > { %v3105_v47 = vmax.f32 %v760_v13, %v6368_v32  ;;  %v3106_v48 = vmax.f32 %v761_v16, %v6369_v33  ;;  %v3107_v49 = vmax.f32 %v762_v14, %v6370_v30  ;;  %v3108_v50 = vmax.f32 %v425_v62, %v6371_v36  ;;  %v430_v14 = vld [vmem:[%s6959_s28 + $0x170] sm:$0xff] }
 0x103   : > { %v3109_v51 = vmax.f32 %v763_v17, %v6372_v35  ;;  %v3110_v52 = vmax.f32 %v764_v19, %v6373_v34  ;;  %v3111_v54 = vmax.f32 %v765_v20, %v6374_v37  ;;  %v3112_v5 = vmax.f32 %v426_v4, %v6375_v40  ;;  %v431_v19 = vld [vmem:[%s6959_s28 + $0x178] sm:$0xff] }
 0x104   : > { %v3113_v9 = vmax.f32 %v766_v21, %v6376_v38  ;;  %v3114_v53 = vmax.f32 %v767_v23, %v6377_v41  ;;  %v3115_v55 = vmax.f32 %v768_v24, %v6378_v42  ;;  %v3116_v57 = vmax.f32 %v427_v12, %v6379_v43 }
 0x105   : > { %v3117_v58 = vmax.f32 %v769_v25, %v6380_v39  ;;  %v3118_v56 = vmax.f32 %v770_v0, %v6381_v44  ;;  %v3119_v59 = vmax.f32 %v771_v28, %v6382_v45  ;;  %v3536_v10 = vmax.f32 %v3104_v46, %v3112_v5 }
 0x106   : > { %v3537_v6 = vmax.f32 %v3105_v47, %v3113_v9  ;;  %v3538_v60 = vmax.f32 %v3106_v48, %v3114_v53  ;;  %v3539_v61 = vmax.f32 %v3107_v49, %v3115_v55  ;;  %v3540_v1 = vmax.f32 %v3108_v50, %v3116_v57 }
 0x107   : > { %v3541_v62 = vmax.f32 %v3109_v51, %v3117_v58  ;;  %v3542_v2 = vmax.f32 %v3110_v52, %v3118_v56  ;;  %v3543_v3 = vmax.f32 %v3111_v54, %v3119_v59  ;;  %v4048_v4 = vperm.slane %v3536_v10, 0 }
 0x108   : > { %v4049_v7 = vperm.slane %v3537_v6, 0  ;;  %v4050_v8 = vperm.slane %v3538_v60, 0  ;;  %v4051_v12 = vperm.slane %v3539_v61, 0  ;;  %v4052_v13 = vperm.slane %v3540_v1, 0 }
 0x109   : > { %v4053_v15 = vperm.slane %v3541_v62, 0  ;;  %v4054_v16 = vperm.slane %v3542_v2, 0  ;;  %v4055_v17 = vperm.slane %v3543_v3, 0  ;;  %v772_v20 = vrot.slane %v428_v63, 2 }
 0x10a   : > { %v4301_v18 = vsel %vm4224_vm2, %v4049_v7, %v4048_v4  ;;  %v773_v21 = vrot.slane %v428_v63, 4  ;;  %v774_v23 = vrot.slane %v428_v63, 6  ;;  %v775_v24 = vrot.slane %v429_v11, 2 }
 0x10b   : > { %v4302_v22 = vsel %vm4226_vm3, %v4050_v8, %v4301_v18  ;;  %v776_v25 = vrot.slane %v429_v11, 4  ;;  %v777_v0 = vrot.slane %v429_v11, 6  ;;  %v778_v28 = vrot.slane %v430_v14, 2 }
 0x10c   : > { %v4303_v27 = vsel %vm4228_vm4, %v4051_v12, %v4302_v22  ;;  %v779_v26 = vrot.slane %v430_v14, 4  ;;  %v780_v32 = vrot.slane %v430_v14, 6  ;;  %v781_v33 = vrot.slane %v431_v19, 2 }
 0x10d   : > { %v4304_v29 = vsel %vm4230_vm5, %v4052_v13, %v4303_v27  ;;  %v782_v30 = vrot.slane %v431_v19, 4  ;;  %v783_v36 = vrot.slane %v431_v19, 6  ;;  %v6383_v35 = vrot.slane %v428_v63, 9  ;;  %v435_v27 = vld [vmem:[%s6959_s28 + $0x198] sm:$0xff] }
 0x10e   : > { %v4305_v31 = vsel %vm4232_vm6, %v4053_v15, %v4304_v29  ;;  %v6384_v34 = vrot.slane %v772_v20, 9  ;;  %v6385_v40 = vrot.slane %v773_v21, 9  ;;  %v6386_v38 = vrot.slane %v774_v23, 9  ;;  %v432_v15 = vld [vmem:[%s6959_s28 + $0x180] sm:$0xff] }
 0x10f   : > { %v4306_v37 = vsel %vm4234_vm7, %v4054_v16, %v4305_v31  ;;  %v6387_v41 = vrot.slane %v429_v11, 9  ;;  %v6388_v43 = vrot.slane %v775_v24, 9  ;;  %v6389_v39 = vrot.slane %v776_v25, 9 }
 0x110   : > { %v4307_v42 = vsel %vm4236_vm8, %v4055_v17, %v4306_v37  ;;  %v6390_v44 = vrot.slane %v777_v0, 9  ;;  %v6391_v45 = vrot.slane %v430_v14, 9  ;;  %v6392_v46 = vrot.slane %v778_v28, 9 }
 0x111   : > { %4498 = vst.msk [vmem:[#allocation2 + $0x171] sm:$0xff] %vm262_vm0, %v4307_v42  ;;  %v6393_v47 = vrot.slane %v779_v26, 9  ;;  %v6394_v48 = vrot.slane %v780_v32, 9  ;;  %v6395_v49 = vrot.slane %v431_v19, 9  ;;  %v6396_v50 = vrot.slane %v781_v33, 9 }
 0x112   : > { %v6397_v51 = vrot.slane %v782_v30, 9  ;;  %v6398_v52 = vrot.slane %v783_v36, 9  ;;  %v3120_v54 = vmax.f32 %v428_v63, %v6383_v35  ;;  %v3121_v5 = vmax.f32 %v772_v20, %v6384_v34 }
 0x113   : > { %v3122_v9 = vmax.f32 %v773_v21, %v6385_v40  ;;  %v3123_v53 = vmax.f32 %v774_v23, %v6386_v38  ;;  %v3124_v55 = vmax.f32 %v429_v11, %v6387_v41  ;;  %v3125_v57 = vmax.f32 %v775_v24, %v6388_v43  ;;  %v434_v24 = vld [vmem:[%s6959_s28 + $0x190] sm:$0xff] }
 0x114   : > { %v3126_v58 = vmax.f32 %v776_v25, %v6389_v39  ;;  %v3127_v56 = vmax.f32 %v777_v0, %v6390_v44  ;;  %v3128_v59 = vmax.f32 %v430_v14, %v6391_v45  ;;  %v3129_v10 = vmax.f32 %v778_v28, %v6392_v46 }
 0x115   : > { %v3130_v6 = vmax.f32 %v779_v26, %v6393_v47  ;;  %v3131_v60 = vmax.f32 %v780_v32, %v6394_v48  ;;  %v3132_v61 = vmax.f32 %v431_v19, %v6395_v49  ;;  %v3133_v1 = vmax.f32 %v781_v33, %v6396_v50  ;;  %v433_v19 = vld [vmem:[%s6959_s28 + $0x188] sm:$0xff] }
 0x116   : > { %v3134_v62 = vmax.f32 %v782_v30, %v6397_v51  ;;  %v3135_v2 = vmax.f32 %v783_v36, %v6398_v52  ;;  %v3544_v3 = vmax.f32 %v3120_v54, %v3128_v59  ;;  %v3545_v4 = vmax.f32 %v3121_v5, %v3129_v10 }
 0x117   : > { %v3546_v63 = vmax.f32 %v3122_v9, %v3130_v6  ;;  %v3547_v7 = vmax.f32 %v3123_v53, %v3131_v60  ;;  %v3548_v8 = vmax.f32 %v3124_v55, %v3132_v61  ;;  %v3549_v11 = vmax.f32 %v3125_v57, %v3133_v1 }
 0x118   : > { %v3550_v12 = vmax.f32 %v3126_v58, %v3134_v62  ;;  %v3551_v13 = vmax.f32 %v3127_v56, %v3135_v2  ;;  %v4056_v16 = vperm.slane %v3544_v3, 0  ;;  %v4057_v14 = vperm.slane %v3545_v4, 0 }
 0x119   : > { %v4058_v17 = vperm.slane %v3546_v63, 0  ;;  %v4059_v18 = vperm.slane %v3547_v7, 0  ;;  %v4060_v20 = vperm.slane %v3548_v8, 0  ;;  %v4061_v21 = vperm.slane %v3549_v11, 0 }
 0x11a   : > { %v4062_v22 = vperm.slane %v3550_v12, 0  ;;  %v4063_v23 = vperm.slane %v3551_v13, 0  ;;  %v4308_v25 = vsel %vm4224_vm2, %v4057_v14, %v4056_v16  ;;  %v784_v0 = vrot.slane %v432_v15, 2 }
 0x11b   : > { %v785_v28 = vrot.slane %v432_v15, 4  ;;  %v786_v26 = vrot.slane %v432_v15, 6  ;;  %v4309_v29 = vsel %vm4226_vm3, %v4058_v17, %v4308_v25  ;;  %v787_v32 = vrot.slane %v433_v19, 2 }
 0x11c   : > { %v788_v33 = vrot.slane %v433_v19, 4  ;;  %v789_v30 = vrot.slane %v433_v19, 6  ;;  %v4310_v31 = vsel %vm4228_vm4, %v4059_v18, %v4309_v29  ;;  %v790_v36 = vrot.slane %v434_v24, 2  ;;  %v436_v18 = vld [vmem:[%s6959_s28 + $0x1a0] sm:$0xff] }
 0x11d   : > { %v791_v35 = vrot.slane %v434_v24, 4  ;;  %v792_v34 = vrot.slane %v434_v24, 6  ;;  %v4311_v37 = vsel %vm4230_vm5, %v4060_v20, %v4310_v31  ;;  %v793_v40 = vrot.slane %v435_v27, 2 }
 0x11e   : > { %v794_v38 = vrot.slane %v435_v27, 4  ;;  %v795_v41 = vrot.slane %v435_v27, 6  ;;  %v4312_v42 = vsel %vm4232_vm6, %v4061_v21, %v4311_v37  ;;  %v6399_v43 = vrot.slane %v432_v15, 9 }
 0x11f   : > { %v6400_v39 = vrot.slane %v784_v0, 9  ;;  %v6401_v44 = vrot.slane %v785_v28, 9  ;;  %v4313_v45 = vsel %vm4234_vm7, %v4062_v22, %v4312_v42  ;;  %v6402_v46 = vrot.slane %v786_v26, 9 }
 0x120   : > { %v6403_v47 = vrot.slane %v433_v19, 9  ;;  %v6404_v48 = vrot.slane %v787_v32, 9  ;;  %v4314_v49 = vsel %vm4236_vm8, %v4063_v23, %v4313_v45  ;;  %v6405_v50 = vrot.slane %v788_v33, 9  ;;  %v437_v23 = vld [vmem:[%s6959_s28 + $0x1a8] sm:$0xff] }
 0x121   : > { %v6406_v51 = vrot.slane %v789_v30, 9  ;;  %v6407_v52 = vrot.slane %v434_v24, 9  ;;  %4499 = vst.msk [vmem:[#allocation2 + $0x181] sm:$0xff] %vm262_vm0, %v4314_v49  ;;  %v6408_v54 = vrot.slane %v790_v36, 9  ;;  %v6409_v5 = vrot.slane %v791_v35, 9 }
 0x122   : > { %v6410_v9 = vrot.slane %v792_v34, 9  ;;  %v6411_v53 = vrot.slane %v435_v27, 9  ;;  %v6412_v55 = vrot.slane %v793_v40, 9  ;;  %v6413_v57 = vrot.slane %v794_v38, 9 }
 0x123   : > { %v6414_v58 = vrot.slane %v795_v41, 9  ;;  %v3136_v56 = vmax.f32 %v432_v15, %v6399_v43  ;;  %v3137_v59 = vmax.f32 %v784_v0, %v6400_v39  ;;  %v3138_v10 = vmax.f32 %v785_v28, %v6401_v44  ;;  %v438_v28 = vld [vmem:[%s6959_s28 + $0x1b0] sm:$0xff] }
 0x124   : > { %v3139_v6 = vmax.f32 %v786_v26, %v6402_v46  ;;  %v3140_v60 = vmax.f32 %v433_v19, %v6403_v47  ;;  %v3141_v61 = vmax.f32 %v787_v32, %v6404_v48  ;;  %v3142_v1 = vmax.f32 %v788_v33, %v6405_v50  ;;  %v439_v33 = vld [vmem:[%s6959_s28 + $0x1b8] sm:$0xff] }
 0x125   : > { %v3143_v62 = vmax.f32 %v789_v30, %v6406_v51  ;;  %v3144_v2 = vmax.f32 %v434_v24, %v6407_v52  ;;  %v3145_v3 = vmax.f32 %v790_v36, %v6408_v54  ;;  %v3146_v4 = vmax.f32 %v791_v35, %v6409_v5 }
 0x126   : > { %v3147_v63 = vmax.f32 %v792_v34, %v6410_v9  ;;  %v3148_v7 = vmax.f32 %v435_v27, %v6411_v53  ;;  %v3149_v8 = vmax.f32 %v793_v40, %v6412_v55  ;;  %v3150_v11 = vmax.f32 %v794_v38, %v6413_v57 }
 0x127   : > { %v3151_v12 = vmax.f32 %v795_v41, %v6414_v58  ;;  %v3552_v13 = vmax.f32 %v3136_v56, %v3144_v2  ;;  %v3553_v15 = vmax.f32 %v3137_v59, %v3145_v3  ;;  %v3554_v16 = vmax.f32 %v3138_v10, %v3146_v4 }
 0x128   : > { %v3555_v14 = vmax.f32 %v3139_v6, %v3147_v63  ;;  %v3556_v17 = vmax.f32 %v3140_v60, %v3148_v7  ;;  %v3557_v19 = vmax.f32 %v3141_v61, %v3149_v8  ;;  %v3558_v20 = vmax.f32 %v3142_v1, %v3150_v11 }
 0x129   : > { %v3559_v21 = vmax.f32 %v3143_v62, %v3151_v12  ;;  %v4064_v22 = vperm.slane %v3552_v13, 0  ;;  %v4065_v24 = vperm.slane %v3553_v15, 0  ;;  %v4066_v25 = vperm.slane %v3554_v16, 0 }
 0x12a   : > { %v4067_v0 = vperm.slane %v3555_v14, 0  ;;  %v4068_v27 = vperm.slane %v3556_v17, 0  ;;  %v4069_v26 = vperm.slane %v3557_v19, 0  ;;  %v4070_v29 = vperm.slane %v3558_v20, 0 }
 0x12b   : > { %v4071_v32 = vperm.slane %v3559_v21, 0  ;;  %v796_v30 = vrot.slane %v436_v18, 2  ;;  %v4315_v31 = vsel %vm4224_vm2, %v4065_v24, %v4064_v22  ;;  %v797_v36 = vrot.slane %v436_v18, 4 }
 0x12c   : > { %v798_v35 = vrot.slane %v436_v18, 6  ;;  %v799_v34 = vrot.slane %v437_v23, 2  ;;  %v4316_v37 = vsel %vm4226_vm3, %v4066_v25, %v4315_v31  ;;  %v800_v40 = vrot.slane %v437_v23, 4 }
 0x12d   : > { %v801_v38 = vrot.slane %v437_v23, 6  ;;  %v802_v41 = vrot.slane %v438_v28, 2  ;;  %v4317_v42 = vsel %vm4228_vm4, %v4067_v0, %v4316_v37  ;;  %v803_v43 = vrot.slane %v438_v28, 4  ;;  %v440_v0 = vld [vmem:[%s6959_s28 + $0x1c0] sm:$0xff] }
 0x12e   : > { %v804_v39 = vrot.slane %v438_v28, 6  ;;  %v805_v44 = vrot.slane %v439_v33, 2  ;;  %v4318_v45 = vsel %vm4230_vm5, %v4068_v27, %v4317_v42  ;;  %v806_v46 = vrot.slane %v439_v33, 4 }
 0x12f   : > { %v807_v47 = vrot.slane %v439_v33, 6  ;;  %v6415_v48 = vrot.slane %v436_v18, 9  ;;  %v4319_v49 = vsel %vm4232_vm6, %v4069_v26, %v4318_v45  ;;  %v6416_v50 = vrot.slane %v796_v30, 9 }
 0x130   : > { %v6417_v51 = vrot.slane %v797_v36, 9  ;;  %v6418_v52 = vrot.slane %v798_v35, 9  ;;  %v4320_v54 = vsel %vm4234_vm7, %v4070_v29, %v4319_v49  ;;  %v6419_v5 = vrot.slane %v437_v23, 9 }
 0x131   : > { %v6420_v9 = vrot.slane %v799_v34, 9  ;;  %v6421_v53 = vrot.slane %v800_v40, 9  ;;  %v4321_v55 = vsel %vm4236_vm8, %v4071_v32, %v4320_v54  ;;  %v6422_v57 = vrot.slane %v801_v38, 9  ;;  %v441_v32 = vld [vmem:[%s6959_s28 + $0x1c8] sm:$0xff] }
 0x132   : > { %v6423_v58 = vrot.slane %v438_v28, 9  ;;  %v6424_v56 = vrot.slane %v802_v41, 9  ;;  %4500 = vst.msk [vmem:[#allocation2 + $0x191] sm:$0xff] %vm262_vm0, %v4321_v55  ;;  %v6425_v59 = vrot.slane %v803_v43, 9  ;;  %v6426_v10 = vrot.slane %v804_v39, 9 }
 0x133   : > { %v6427_v6 = vrot.slane %v439_v33, 9  ;;  %v6428_v60 = vrot.slane %v805_v44, 9  ;;  %v6429_v61 = vrot.slane %v806_v46, 9  ;;  %v6430_v1 = vrot.slane %v807_v47, 9 }
 0x134   : > { %v3152_v62 = vmax.f32 %v436_v18, %v6415_v48  ;;  %v3153_v2 = vmax.f32 %v796_v30, %v6416_v50  ;;  %v3154_v3 = vmax.f32 %v797_v36, %v6417_v51  ;;  %v3155_v4 = vmax.f32 %v798_v35, %v6418_v52  ;;  %v442_v35 = vld [vmem:[%s6959_s28 + $0x1d0] sm:$0xff] }
 0x135   : > { %v3156_v63 = vmax.f32 %v437_v23, %v6419_v5  ;;  %v3157_v7 = vmax.f32 %v799_v34, %v6420_v9  ;;  %v3158_v8 = vmax.f32 %v800_v40, %v6421_v53  ;;  %v3159_v11 = vmax.f32 %v801_v38, %v6422_v57  ;;  %v443_v38 = vld [vmem:[%s6959_s28 + $0x1d8] sm:$0xff] }
 0x136   : > { %v3160_v12 = vmax.f32 %v438_v28, %v6423_v58  ;;  %v3161_v13 = vmax.f32 %v802_v41, %v6424_v56  ;;  %v3162_v15 = vmax.f32 %v803_v43, %v6425_v59  ;;  %v3163_v16 = vmax.f32 %v804_v39, %v6426_v10 }
 0x137   : > { %v3164_v14 = vmax.f32 %v439_v33, %v6427_v6  ;;  %v3165_v17 = vmax.f32 %v805_v44, %v6428_v60  ;;  %v3166_v19 = vmax.f32 %v806_v46, %v6429_v61  ;;  %v3167_v20 = vmax.f32 %v807_v47, %v6430_v1 }
 0x138   : > { %v3560_v21 = vmax.f32 %v3152_v62, %v3160_v12  ;;  %v3561_v18 = vmax.f32 %v3153_v2, %v3161_v13  ;;  %v3562_v22 = vmax.f32 %v3154_v3, %v3162_v15  ;;  %v3563_v24 = vmax.f32 %v3155_v4, %v3163_v16 }
 0x139   : > { %v3564_v25 = vmax.f32 %v3156_v63, %v3164_v14  ;;  %v3565_v23 = vmax.f32 %v3157_v7, %v3165_v17  ;;  %v3566_v27 = vmax.f32 %v3158_v8, %v3166_v19  ;;  %v3567_v26 = vmax.f32 %v3159_v11, %v3167_v20 }
 0x13a   : > { %v4072_v28 = vperm.slane %v3560_v21, 0  ;;  %v4073_v29 = vperm.slane %v3561_v18, 0  ;;  %v4074_v30 = vperm.slane %v3562_v22, 0  ;;  %v4075_v31 = vperm.slane %v3563_v24, 0 }
 0x13b   : > { %v4076_v33 = vperm.slane %v3564_v25, 0  ;;  %v4077_v36 = vperm.slane %v3565_v23, 0  ;;  %v4078_v34 = vperm.slane %v3566_v27, 0  ;;  %v4079_v37 = vperm.slane %v3567_v26, 0 }
 0x13c   : > { %v4322_v40 = vsel %vm4224_vm2, %v4073_v29, %v4072_v28  ;;  %v808_v41 = vrot.slane %v440_v0, 2  ;;  %v809_v43 = vrot.slane %v440_v0, 4  ;;  %v810_v39 = vrot.slane %v440_v0, 6 }
 0x13d   : > { %v4323_v42 = vsel %vm4226_vm3, %v4074_v30, %v4322_v40  ;;  %v811_v44 = vrot.slane %v441_v32, 2  ;;  %v812_v46 = vrot.slane %v441_v32, 4  ;;  %v813_v47 = vrot.slane %v441_v32, 6  ;;  %v445_v40 = vld [vmem:[%s6959_s28 + $0x1e8] sm:$0xff] }
 0x13e   : > { %v4324_v45 = vsel %vm4228_vm4, %v4075_v31, %v4323_v42  ;;  %v814_v48 = vrot.slane %v442_v35, 2  ;;  %v815_v50 = vrot.slane %v442_v35, 4  ;;  %v816_v51 = vrot.slane %v442_v35, 6 }
 0x13f   : > { %v4325_v49 = vsel %vm4230_vm5, %v4076_v33, %v4324_v45  ;;  %v817_v52 = vrot.slane %v443_v38, 2  ;;  %v818_v5 = vrot.slane %v443_v38, 4  ;;  %v819_v9 = vrot.slane %v443_v38, 6  ;;  %v444_v33 = vld [vmem:[%s6959_s28 + $0x1e0] sm:$0xff] }
 0x140   : > { %v4326_v54 = vsel %vm4232_vm6, %v4077_v36, %v4325_v49  ;;  %v6431_v53 = vrot.slane %v440_v0, 9  ;;  %v6432_v57 = vrot.slane %v808_v41, 9  ;;  %v6433_v58 = vrot.slane %v809_v43, 9 }
 0x141   : > { %v4327_v55 = vsel %vm4234_vm7, %v4078_v34, %v4326_v54  ;;  %v6434_v56 = vrot.slane %v810_v39, 9  ;;  %v6435_v10 = vrot.slane %v441_v32, 9  ;;  %v6436_v6 = vrot.slane %v811_v44, 9 }
 0x142   : > { %v4328_v59 = vsel %vm4236_vm8, %v4079_v37, %v4327_v55  ;;  %v6437_v60 = vrot.slane %v812_v46, 9  ;;  %v6438_v61 = vrot.slane %v813_v47, 9  ;;  %v6439_v1 = vrot.slane %v442_v35, 9 }
 0x143   : > { %4501 = vst.msk [vmem:[#allocation2 + $0x1a1] sm:$0xff] %vm262_vm0, %v4328_v59  ;;  %v6440_v62 = vrot.slane %v814_v48, 9  ;;  %v6441_v2 = vrot.slane %v815_v50, 9  ;;  %v6442_v3 = vrot.slane %v816_v51, 9  ;;  %v6443_v4 = vrot.slane %v443_v38, 9 }
 0x144   : > { %v6444_v63 = vrot.slane %v817_v52, 9  ;;  %v6445_v7 = vrot.slane %v818_v5, 9  ;;  %v6446_v8 = vrot.slane %v819_v9, 9  ;;  %v3168_v11 = vmax.f32 %v440_v0, %v6431_v53 }
 0x145   : > { %v3169_v12 = vmax.f32 %v808_v41, %v6432_v57  ;;  %v3170_v13 = vmax.f32 %v809_v43, %v6433_v58  ;;  %v3171_v15 = vmax.f32 %v810_v39, %v6434_v56  ;;  %v3172_v16 = vmax.f32 %v441_v32, %v6435_v10  ;;  %v446_v39 = vld [vmem:[%s6959_s28 + $0x1f0] sm:$0xff] }
 0x146   : > { %v3173_v14 = vmax.f32 %v811_v44, %v6436_v6  ;;  %v3174_v17 = vmax.f32 %v812_v46, %v6437_v60  ;;  %v3175_v19 = vmax.f32 %v813_v47, %v6438_v61  ;;  %v3176_v20 = vmax.f32 %v442_v35, %v6439_v1  ;;  %v447_v46 = vld [vmem:[%s6959_s28 + $0x1f8] sm:$0xff] }
 0x147   : > { %v3177_v21 = vmax.f32 %v814_v48, %v6440_v62  ;;  %v3178_v18 = vmax.f32 %v815_v50, %v6441_v2  ;;  %v3179_v22 = vmax.f32 %v816_v51, %v6442_v3  ;;  %v3180_v24 = vmax.f32 %v443_v38, %v6443_v4 }
 0x148   : > { %v3181_v25 = vmax.f32 %v817_v52, %v6444_v63  ;;  %v3182_v23 = vmax.f32 %v818_v5, %v6445_v7  ;;  %v3183_v27 = vmax.f32 %v819_v9, %v6446_v8  ;;  %v3568_v26 = vmax.f32 %v3168_v11, %v3176_v20 }
 0x149   : > { %v3569_v28 = vmax.f32 %v3169_v12, %v3177_v21  ;;  %v3570_v0 = vmax.f32 %v3170_v13, %v3178_v18  ;;  %v3571_v29 = vmax.f32 %v3171_v15, %v3179_v22  ;;  %v3572_v30 = vmax.f32 %v3172_v16, %v3180_v24 }
 0x14a   : > { %v3573_v32 = vmax.f32 %v3173_v14, %v3181_v25  ;;  %v3574_v31 = vmax.f32 %v3174_v17, %v3182_v23  ;;  %v3575_v36 = vmax.f32 %v3175_v19, %v3183_v27  ;;  %v4080_v35 = vperm.slane %v3568_v26, 0 }
 0x14b   : > { %v4081_v34 = vperm.slane %v3569_v28, 0  ;;  %v4082_v37 = vperm.slane %v3570_v0, 0  ;;  %v4083_v38 = vperm.slane %v3571_v29, 0  ;;  %v4084_v41 = vperm.slane %v3572_v30, 0 }
 0x14c   : > { %v4085_v42 = vperm.slane %v3573_v32, 0  ;;  %v4086_v43 = vperm.slane %v3574_v31, 0  ;;  %v4087_v44 = vperm.slane %v3575_v36, 0  ;;  %v820_v47 = vrot.slane %v444_v33, 2 }
 0x14d   : > { %v4329_v45 = vsel %vm4224_vm2, %v4081_v34, %v4080_v35  ;;  %v821_v48 = vrot.slane %v444_v33, 4  ;;  %v822_v50 = vrot.slane %v444_v33, 6  ;;  %v823_v51 = vrot.slane %v445_v40, 2 }
 0x14e   : > { %v4330_v49 = vsel %vm4226_vm3, %v4082_v37, %v4329_v45  ;;  %v824_v52 = vrot.slane %v445_v40, 4  ;;  %v825_v5 = vrot.slane %v445_v40, 6  ;;  %v826_v9 = vrot.slane %v446_v39, 2 }
 0x14f   : > { %v4331_v54 = vsel %vm4228_vm4, %v4083_v38, %v4330_v49  ;;  %v827_v53 = vrot.slane %v446_v39, 4  ;;  %v828_v57 = vrot.slane %v446_v39, 6  ;;  %v829_v58 = vrot.slane %v447_v46, 2 }
 0x150   : > { %v4332_v55 = vsel %vm4230_vm5, %v4084_v41, %v4331_v54  ;;  %v830_v56 = vrot.slane %v447_v46, 4  ;;  %v831_v10 = vrot.slane %v447_v46, 6  ;;  %v6447_v6 = vrot.slane %v444_v33, 9  ;;  %v451_v54 = vld [vmem:[%s6959_s28 + $0x218] sm:$0xff] }
 0x151   : > { %v4333_v59 = vsel %vm4232_vm6, %v4085_v42, %v4332_v55  ;;  %v6448_v60 = vrot.slane %v820_v47, 9  ;;  %v6449_v1 = vrot.slane %v821_v48, 9  ;;  %v6450_v62 = vrot.slane %v822_v50, 9  ;;  %v448_v42 = vld [vmem:[%s6959_s28 + $0x200] sm:$0xff] }
 0x152   : > { %v4334_v61 = vsel %vm4234_vm7, %v4086_v43, %v4333_v59  ;;  %v6451_v2 = vrot.slane %v445_v40, 9  ;;  %v6452_v4 = vrot.slane %v823_v51, 9  ;;  %v6453_v63 = vrot.slane %v824_v52, 9 }
 0x153   : > { %v4335_v3 = vsel %vm4236_vm8, %v4087_v44, %v4334_v61  ;;  %v6454_v7 = vrot.slane %v825_v5, 9  ;;  %v6455_v8 = vrot.slane %v446_v39, 9  ;;  %v6456_v11 = vrot.slane %v826_v9, 9 }
 0x154   : > { %4502 = vst.msk [vmem:[#allocation2 + $0x1b1] sm:$0xff] %vm262_vm0, %v4335_v3  ;;  %v6457_v12 = vrot.slane %v827_v53, 9  ;;  %v6458_v13 = vrot.slane %v828_v57, 9  ;;  %v6459_v15 = vrot.slane %v447_v46, 9  ;;  %v6460_v16 = vrot.slane %v829_v58, 9 }
 0x155   : > { %v6461_v14 = vrot.slane %v830_v56, 9  ;;  %v6462_v17 = vrot.slane %v831_v10, 9  ;;  %v3184_v19 = vmax.f32 %v444_v33, %v6447_v6  ;;  %v3185_v20 = vmax.f32 %v820_v47, %v6448_v60 }
 0x156   : > { %v3186_v21 = vmax.f32 %v821_v48, %v6449_v1  ;;  %v3187_v18 = vmax.f32 %v822_v50, %v6450_v62  ;;  %v3188_v22 = vmax.f32 %v445_v40, %v6451_v2  ;;  %v3189_v24 = vmax.f32 %v823_v51, %v6452_v4  ;;  %v450_v51 = vld [vmem:[%s6959_s28 + $0x210] sm:$0xff] }
 0x157   : > { %v3190_v25 = vmax.f32 %v824_v52, %v6453_v63  ;;  %v3191_v23 = vmax.f32 %v825_v5, %v6454_v7  ;;  %v3192_v27 = vmax.f32 %v446_v39, %v6455_v8  ;;  %v3193_v26 = vmax.f32 %v826_v9, %v6456_v11 }
 0x158   : > { %v3194_v28 = vmax.f32 %v827_v53, %v6457_v12  ;;  %v3195_v0 = vmax.f32 %v828_v57, %v6458_v13  ;;  %v3196_v29 = vmax.f32 %v447_v46, %v6459_v15  ;;  %v3197_v30 = vmax.f32 %v829_v58, %v6460_v16  ;;  %v449_v46 = vld [vmem:[%s6959_s28 + $0x208] sm:$0xff] }
 0x159   : > { %v3198_v32 = vmax.f32 %v830_v56, %v6461_v14  ;;  %v3199_v31 = vmax.f32 %v831_v10, %v6462_v17  ;;  %v3576_v36 = vmax.f32 %v3184_v19, %v3192_v27  ;;  %v3577_v35 = vmax.f32 %v3185_v20, %v3193_v26 }
 0x15a   : > { %v3578_v33 = vmax.f32 %v3186_v21, %v3194_v28  ;;  %v3579_v34 = vmax.f32 %v3187_v18, %v3195_v0  ;;  %v3580_v37 = vmax.f32 %v3188_v22, %v3196_v29  ;;  %v3581_v40 = vmax.f32 %v3189_v24, %v3197_v30 }
 0x15b   : > { %v3582_v38 = vmax.f32 %v3190_v25, %v3198_v32  ;;  %v3583_v41 = vmax.f32 %v3191_v23, %v3199_v31  ;;  %v4088_v43 = vperm.slane %v3576_v36, 0  ;;  %v4089_v39 = vperm.slane %v3577_v35, 0 }
 0x15c   : > { %v4090_v44 = vperm.slane %v3578_v33, 0  ;;  %v4091_v45 = vperm.slane %v3579_v34, 0  ;;  %v4092_v47 = vperm.slane %v3580_v37, 0  ;;  %v4093_v48 = vperm.slane %v3581_v40, 0 }
 0x15d   : > { %v4094_v49 = vperm.slane %v3582_v38, 0  ;;  %v4095_v50 = vperm.slane %v3583_v41, 0  ;;  %v4336_v52 = vsel %vm4224_vm2, %v4089_v39, %v4088_v43  ;;  %v832_v5 = vrot.slane %v448_v42, 2 }
 0x15e   : > { %v833_v9 = vrot.slane %v448_v42, 4  ;;  %v834_v53 = vrot.slane %v448_v42, 6  ;;  %v4337_v55 = vsel %vm4226_vm3, %v4090_v44, %v4336_v52  ;;  %v835_v57 = vrot.slane %v449_v46, 2 }
 0x15f   : > { %v836_v58 = vrot.slane %v449_v46, 4  ;;  %v837_v56 = vrot.slane %v449_v46, 6  ;;  %v4338_v59 = vsel %vm4228_vm4, %v4091_v45, %v4337_v55  ;;  %v838_v10 = vrot.slane %v450_v51, 2  ;;  %v452_v45 = vld [vmem:[%s6959_s28 + $0x220] sm:$0xff] }
 0x160   : > { %v839_v6 = vrot.slane %v450_v51, 4  ;;  %v840_v60 = vrot.slane %v450_v51, 6  ;;  %v4339_v61 = vsel %vm4230_vm5, %v4092_v47, %v4338_v59  ;;  %v841_v1 = vrot.slane %v451_v54, 2 }
 0x161   : > { %v842_v62 = vrot.slane %v451_v54, 4  ;;  %v843_v2 = vrot.slane %v451_v54, 6  ;;  %v4340_v3 = vsel %vm4232_vm6, %v4093_v48, %v4339_v61  ;;  %v6463_v4 = vrot.slane %v448_v42, 9 }
 0x162   : > { %v6464_v63 = vrot.slane %v832_v5, 9  ;;  %v6465_v7 = vrot.slane %v833_v9, 9  ;;  %v4341_v8 = vsel %vm4234_vm7, %v4094_v49, %v4340_v3  ;;  %v6466_v11 = vrot.slane %v834_v53, 9 }
 0x163   : > { %v6467_v12 = vrot.slane %v449_v46, 9  ;;  %v6468_v13 = vrot.slane %v835_v57, 9  ;;  %v4342_v15 = vsel %vm4236_vm8, %v4095_v50, %v4341_v8  ;;  %v6469_v16 = vrot.slane %v836_v58, 9  ;;  %v453_v50 = vld [vmem:[%s6959_s28 + $0x228] sm:$0xff] }
 0x164   : > { %v6470_v14 = vrot.slane %v837_v56, 9  ;;  %v6471_v17 = vrot.slane %v450_v51, 9  ;;  %4503 = vst.msk [vmem:[#allocation2 + $0x1c1] sm:$0xff] %vm262_vm0, %v4342_v15  ;;  %v6472_v19 = vrot.slane %v838_v10, 9  ;;  %v6473_v20 = vrot.slane %v839_v6, 9 }
 0x165   : > { %v6474_v21 = vrot.slane %v840_v60, 9  ;;  %v6475_v18 = vrot.slane %v451_v54, 9  ;;  %v6476_v22 = vrot.slane %v841_v1, 9  ;;  %v6477_v24 = vrot.slane %v842_v62, 9 }
 0x166   : > { %v6478_v25 = vrot.slane %v843_v2, 9  ;;  %v3200_v23 = vmax.f32 %v448_v42, %v6463_v4  ;;  %v3201_v27 = vmax.f32 %v832_v5, %v6464_v63  ;;  %v3202_v26 = vmax.f32 %v833_v9, %v6465_v7  ;;  %v454_v9 = vld [vmem:[%s6959_s28 + $0x230] sm:$0xff] }
 0x167   : > { %v3203_v28 = vmax.f32 %v834_v53, %v6466_v11  ;;  %v3204_v0 = vmax.f32 %v449_v46, %v6467_v12  ;;  %v3205_v29 = vmax.f32 %v835_v57, %v6468_v13  ;;  %v3206_v30 = vmax.f32 %v836_v58, %v6469_v16  ;;  %v455_v58 = vld [vmem:[%s6959_s28 + $0x238] sm:$0xff] }
 0x168   : > { %v3207_v32 = vmax.f32 %v837_v56, %v6470_v14  ;;  %v3208_v31 = vmax.f32 %v450_v51, %v6471_v17  ;;  %v3209_v36 = vmax.f32 %v838_v10, %v6472_v19  ;;  %v3210_v35 = vmax.f32 %v839_v6, %v6473_v20 }
 0x169   : > { %v3211_v33 = vmax.f32 %v840_v60, %v6474_v21  ;;  %v3212_v34 = vmax.f32 %v451_v54, %v6475_v18  ;;  %v3213_v37 = vmax.f32 %v841_v1, %v6476_v22  ;;  %v3214_v40 = vmax.f32 %v842_v62, %v6477_v24 }
 0x16a   : > { %v3215_v38 = vmax.f32 %v843_v2, %v6478_v25  ;;  %v3584_v41 = vmax.f32 %v3200_v23, %v3208_v31  ;;  %v3585_v42 = vmax.f32 %v3201_v27, %v3209_v36  ;;  %v3586_v43 = vmax.f32 %v3202_v26, %v3210_v35 }
 0x16b   : > { %v3587_v39 = vmax.f32 %v3203_v28, %v3211_v33  ;;  %v3588_v44 = vmax.f32 %v3204_v0, %v3212_v34  ;;  %v3589_v46 = vmax.f32 %v3205_v29, %v3213_v37  ;;  %v3590_v47 = vmax.f32 %v3206_v30, %v3214_v40 }
 0x16c   : > { %v3591_v48 = vmax.f32 %v3207_v32, %v3215_v38  ;;  %v4096_v49 = vperm.slane %v3584_v41, 0  ;;  %v4097_v51 = vperm.slane %v3585_v42, 0  ;;  %v4098_v52 = vperm.slane %v3586_v43, 0 }
 0x16d   : > { %v4099_v5 = vperm.slane %v3587_v39, 0  ;;  %v4100_v54 = vperm.slane %v3588_v44, 0  ;;  %v4101_v53 = vperm.slane %v3589_v46, 0  ;;  %v4102_v55 = vperm.slane %v3590_v47, 0 }
 0x16e   : > { %v4103_v57 = vperm.slane %v3591_v48, 0  ;;  %v844_v56 = vrot.slane %v452_v45, 2  ;;  %v4343_v59 = vsel %vm4224_vm2, %v4097_v51, %v4096_v49  ;;  %v845_v10 = vrot.slane %v452_v45, 4 }
 0x16f   : > { %v846_v6 = vrot.slane %v452_v45, 6  ;;  %v847_v60 = vrot.slane %v453_v50, 2  ;;  %v4344_v61 = vsel %vm4226_vm3, %v4098_v52, %v4343_v59  ;;  %v848_v1 = vrot.slane %v453_v50, 4 }
 0x170   : > { %v849_v62 = vrot.slane %v453_v50, 6  ;;  %v850_v2 = vrot.slane %v454_v9, 2  ;;  %v4345_v3 = vsel %vm4228_vm4, %v4099_v5, %v4344_v61  ;;  %v851_v4 = vrot.slane %v454_v9, 4  ;;  %v456_v5 = vld [vmem:[%s6959_s28 + $0x240] sm:$0xff] }
 0x171   : > { %v852_v63 = vrot.slane %v454_v9, 6  ;;  %v853_v7 = vrot.slane %v455_v58, 2  ;;  %v4346_v8 = vsel %vm4230_vm5, %v4100_v54, %v4345_v3  ;;  %v854_v11 = vrot.slane %v455_v58, 4 }
 0x172   : > { %v855_v12 = vrot.slane %v455_v58, 6  ;;  %v6479_v13 = vrot.slane %v452_v45, 9  ;;  %v4347_v15 = vsel %vm4232_vm6, %v4101_v53, %v4346_v8  ;;  %v6480_v16 = vrot.slane %v844_v56, 9 }
 0x173   : > { %v6481_v14 = vrot.slane %v845_v10, 9  ;;  %v6482_v17 = vrot.slane %v846_v6, 9  ;;  %v4348_v19 = vsel %vm4234_vm7, %v4102_v55, %v4347_v15  ;;  %v6483_v20 = vrot.slane %v453_v50, 9 }
 0x174   : > { %v6484_v21 = vrot.slane %v847_v60, 9  ;;  %v6485_v18 = vrot.slane %v848_v1, 9  ;;  %v4349_v22 = vsel %vm4236_vm8, %v4103_v57, %v4348_v19  ;;  %v6486_v24 = vrot.slane %v849_v62, 9  ;;  %v457_v57 = vld [vmem:[%s6959_s28 + $0x248] sm:$0xff] }
 0x175   : > { %v6487_v25 = vrot.slane %v454_v9, 9  ;;  %v6488_v23 = vrot.slane %v850_v2, 9  ;;  %4504 = vst.msk [vmem:[#allocation2 + $0x1f1] sm:$0xff] %vm262_vm0, %v4349_v22  ;;  %v6489_v27 = vrot.slane %v851_v4, 9  ;;  %v6490_v26 = vrot.slane %v852_v63, 9 }
 0x176   : > { %v6491_v28 = vrot.slane %v455_v58, 9  ;;  %v6492_v0 = vrot.slane %v853_v7, 9  ;;  %v6493_v29 = vrot.slane %v854_v11, 9  ;;  %v6494_v30 = vrot.slane %v855_v12, 9 }
 0x177   : > { %v3216_v32 = vmax.f32 %v452_v45, %v6479_v13  ;;  %v3217_v31 = vmax.f32 %v844_v56, %v6480_v16  ;;  %v3218_v36 = vmax.f32 %v845_v10, %v6481_v14  ;;  %v3219_v35 = vmax.f32 %v846_v6, %v6482_v17  ;;  %v458_v6 = vld [vmem:[%s6959_s28 + $0x250] sm:$0xff] }
 0x178   : > { %v3220_v33 = vmax.f32 %v453_v50, %v6483_v20  ;;  %v3221_v34 = vmax.f32 %v847_v60, %v6484_v21  ;;  %v3222_v37 = vmax.f32 %v848_v1, %v6485_v18  ;;  %v3223_v40 = vmax.f32 %v849_v62, %v6486_v24  ;;  %v459_v62 = vld [vmem:[%s6959_s28 + $0x258] sm:$0xff] }
 0x179   : > { %v3224_v38 = vmax.f32 %v454_v9, %v6487_v25  ;;  %v3225_v41 = vmax.f32 %v850_v2, %v6488_v23  ;;  %v3226_v42 = vmax.f32 %v851_v4, %v6489_v27  ;;  %v3227_v43 = vmax.f32 %v852_v63, %v6490_v26 }
 0x17a   : > { %v3228_v39 = vmax.f32 %v455_v58, %v6491_v28  ;;  %v3229_v44 = vmax.f32 %v853_v7, %v6492_v0  ;;  %v3230_v46 = vmax.f32 %v854_v11, %v6493_v29  ;;  %v3231_v47 = vmax.f32 %v855_v12, %v6494_v30 }
 0x17b   : > { %v3592_v48 = vmax.f32 %v3216_v32, %v3224_v38  ;;  %v3593_v45 = vmax.f32 %v3217_v31, %v3225_v41  ;;  %v3594_v49 = vmax.f32 %v3218_v36, %v3226_v42  ;;  %v3595_v51 = vmax.f32 %v3219_v35, %v3227_v43 }
 0x17c   : > { %v3596_v52 = vmax.f32 %v3220_v33, %v3228_v39  ;;  %v3597_v50 = vmax.f32 %v3221_v34, %v3229_v44  ;;  %v3598_v54 = vmax.f32 %v3222_v37, %v3230_v46  ;;  %v3599_v53 = vmax.f32 %v3223_v40, %v3231_v47 }
 0x17d   : > { %v4104_v9 = vperm.slane %v3592_v48, 0  ;;  %v4105_v55 = vperm.slane %v3593_v45, 0  ;;  %v4106_v56 = vperm.slane %v3594_v49, 0  ;;  %v4107_v59 = vperm.slane %v3595_v51, 0 }
 0x17e   : > { %v4108_v58 = vperm.slane %v3596_v52, 0  ;;  %v4109_v10 = vperm.slane %v3597_v50, 0  ;;  %v4110_v60 = vperm.slane %v3598_v54, 0  ;;  %v4111_v61 = vperm.slane %v3599_v53, 0 }
 0x17f   : > { %v4350_v1 = vsel %vm4224_vm2, %v4105_v55, %v4104_v9  ;;  %v856_v2 = vrot.slane %v456_v5, 2  ;;  %v857_v4 = vrot.slane %v456_v5, 4  ;;  %v858_v63 = vrot.slane %v456_v5, 6 }
 0x180   : > { %v4351_v3 = vsel %vm4226_vm3, %v4106_v56, %v4350_v1  ;;  %v859_v7 = vrot.slane %v457_v57, 2  ;;  %v860_v11 = vrot.slane %v457_v57, 4  ;;  %v861_v12 = vrot.slane %v457_v57, 6  ;;  %v461_v1 = vld [vmem:[%s6959_s28 + $0x268] sm:$0xff] }
 0x181   : > { %v4352_v8 = vsel %vm4228_vm4, %v4107_v59, %v4351_v3  ;;  %v862_v13 = vrot.slane %v458_v6, 2  ;;  %v863_v16 = vrot.slane %v458_v6, 4  ;;  %v864_v14 = vrot.slane %v458_v6, 6 }
 0x182   : > { %v4353_v15 = vsel %vm4230_vm5, %v4108_v58, %v4352_v8  ;;  %v865_v17 = vrot.slane %v459_v62, 2  ;;  %v866_v20 = vrot.slane %v459_v62, 4  ;;  %v867_v21 = vrot.slane %v459_v62, 6  ;;  %v460_v58 = vld [vmem:[%s6959_s28 + $0x260] sm:$0xff] }
 0x183   : > { %v4354_v19 = vsel %vm4232_vm6, %v4109_v10, %v4353_v15  ;;  %v6495_v18 = vrot.slane %v456_v5, 9  ;;  %v6496_v24 = vrot.slane %v856_v2, 9  ;;  %v6497_v25 = vrot.slane %v857_v4, 9 }
 0x184   : > { %v4355_v22 = vsel %vm4234_vm7, %v4110_v60, %v4354_v19  ;;  %v6498_v23 = vrot.slane %v858_v63, 9  ;;  %v6499_v26 = vrot.slane %v457_v57, 9  ;;  %v6500_v28 = vrot.slane %v859_v7, 9 }
 0x185   : > { %v4356_v27 = vsel %vm4236_vm8, %v4111_v61, %v4355_v22  ;;  %v6501_v0 = vrot.slane %v860_v11, 9  ;;  %v6502_v29 = vrot.slane %v861_v12, 9  ;;  %v6503_v30 = vrot.slane %v458_v6, 9 }
 0x186   : > { %4505 = vst.msk [vmem:[#allocation2 + $0x201] sm:$0xff] %vm262_vm0, %v4356_v27  ;;  %v6504_v32 = vrot.slane %v862_v13, 9  ;;  %v6505_v31 = vrot.slane %v863_v16, 9  ;;  %v6506_v36 = vrot.slane %v864_v14, 9  ;;  %v6507_v35 = vrot.slane %v459_v62, 9 }
 0x187   : > { %v6508_v33 = vrot.slane %v865_v17, 9  ;;  %v6509_v34 = vrot.slane %v866_v20, 9  ;;  %v6510_v37 = vrot.slane %v867_v21, 9  ;;  %v3232_v40 = vmax.f32 %v456_v5, %v6495_v18 }
 0x188   : > { %v3233_v38 = vmax.f32 %v856_v2, %v6496_v24  ;;  %v3234_v41 = vmax.f32 %v857_v4, %v6497_v25  ;;  %v3235_v42 = vmax.f32 %v858_v63, %v6498_v23  ;;  %v3236_v43 = vmax.f32 %v457_v57, %v6499_v26  ;;  %v462_v63 = vld [vmem:[%s6959_s28 + $0x270] sm:$0xff] }
 0x189   : > { %v3237_v39 = vmax.f32 %v859_v7, %v6500_v28  ;;  %v3238_v44 = vmax.f32 %v860_v11, %v6501_v0  ;;  %v3239_v46 = vmax.f32 %v861_v12, %v6502_v29  ;;  %v3240_v47 = vmax.f32 %v458_v6, %v6503_v30  ;;  %v463_v11 = vld [vmem:[%s6959_s28 + $0x278] sm:$0xff] }
 0x18a   : > { %v3241_v48 = vmax.f32 %v862_v13, %v6504_v32  ;;  %v3242_v45 = vmax.f32 %v863_v16, %v6505_v31  ;;  %v3243_v49 = vmax.f32 %v864_v14, %v6506_v36  ;;  %v3244_v51 = vmax.f32 %v459_v62, %v6507_v35 }
 0x18b   : > { %v3245_v52 = vmax.f32 %v865_v17, %v6508_v33  ;;  %v3246_v50 = vmax.f32 %v866_v20, %v6509_v34  ;;  %v3247_v54 = vmax.f32 %v867_v21, %v6510_v37  ;;  %v3600_v53 = vmax.f32 %v3232_v40, %v3240_v47 }
 0x18c   : > { %v3601_v9 = vmax.f32 %v3233_v38, %v3241_v48  ;;  %v3602_v5 = vmax.f32 %v3234_v41, %v3242_v45  ;;  %v3603_v55 = vmax.f32 %v3235_v42, %v3243_v49  ;;  %v3604_v56 = vmax.f32 %v3236_v43, %v3244_v51 }
 0x18d   : > { %v3605_v57 = vmax.f32 %v3237_v39, %v3245_v52  ;;  %v3606_v59 = vmax.f32 %v3238_v44, %v3246_v50  ;;  %v3607_v10 = vmax.f32 %v3239_v46, %v3247_v54  ;;  %v4112_v6 = vperm.slane %v3600_v53, 0 }
 0x18e   : > { %v4113_v60 = vperm.slane %v3601_v9, 0  ;;  %v4114_v61 = vperm.slane %v3602_v5, 0  ;;  %v4115_v62 = vperm.slane %v3603_v55, 0  ;;  %v4116_v2 = vperm.slane %v3604_v56, 0 }
 0x18f   : > { %v4117_v3 = vperm.slane %v3605_v57, 0  ;;  %v4118_v4 = vperm.slane %v3606_v59, 0  ;;  %v4119_v7 = vperm.slane %v3607_v10, 0  ;;  %v868_v12 = vrot.slane %v460_v58, 2 }
 0x190   : > { %v4357_v8 = vsel %vm4224_vm2, %v4113_v60, %v4112_v6  ;;  %v869_v13 = vrot.slane %v460_v58, 4  ;;  %v870_v16 = vrot.slane %v460_v58, 6  ;;  %v871_v14 = vrot.slane %v461_v1, 2 }
 0x191   : > { %v4358_v15 = vsel %vm4226_vm3, %v4114_v61, %v4357_v8  ;;  %v872_v17 = vrot.slane %v461_v1, 4  ;;  %v873_v20 = vrot.slane %v461_v1, 6  ;;  %v874_v21 = vrot.slane %v462_v63, 2 }
 0x192   : > { %v4359_v19 = vsel %vm4228_vm4, %v4115_v62, %v4358_v15  ;;  %v875_v18 = vrot.slane %v462_v63, 4  ;;  %v876_v24 = vrot.slane %v462_v63, 6  ;;  %v877_v25 = vrot.slane %v463_v11, 2 }
 0x193   : > { %v4360_v22 = vsel %vm4230_vm5, %v4116_v2, %v4359_v19  ;;  %v878_v23 = vrot.slane %v463_v11, 4  ;;  %v879_v26 = vrot.slane %v463_v11, 6  ;;  %v6511_v28 = vrot.slane %v460_v58, 9  ;;  %v467_v19 = vld [vmem:[%s6959_s28 + $0x298] sm:$0xff] }
 0x194   : > { %v4361_v27 = vsel %vm4232_vm6, %v4117_v3, %v4360_v22  ;;  %v6512_v0 = vrot.slane %v868_v12, 9  ;;  %v6513_v30 = vrot.slane %v869_v13, 9  ;;  %v6514_v32 = vrot.slane %v870_v16, 9  ;;  %v464_v3 = vld [vmem:[%s6959_s28 + $0x280] sm:$0xff] }
 0x195   : > { %v4362_v29 = vsel %vm4234_vm7, %v4118_v4, %v4361_v27  ;;  %v6515_v31 = vrot.slane %v461_v1, 9  ;;  %v6516_v35 = vrot.slane %v871_v14, 9  ;;  %v6517_v33 = vrot.slane %v872_v17, 9 }
 0x196   : > { %v4363_v36 = vsel %vm4236_vm8, %v4119_v7, %v4362_v29  ;;  %v6518_v34 = vrot.slane %v873_v20, 9  ;;  %v6519_v37 = vrot.slane %v462_v63, 9  ;;  %v6520_v40 = vrot.slane %v874_v21, 9 }
 0x197   : > { %4506 = vst.msk [vmem:[#allocation2 + $0x211] sm:$0xff] %vm262_vm0, %v4363_v36  ;;  %v6521_v38 = vrot.slane %v875_v18, 9  ;;  %v6522_v41 = vrot.slane %v876_v24, 9  ;;  %v6523_v42 = vrot.slane %v463_v11, 9  ;;  %v6524_v43 = vrot.slane %v877_v25, 9 }
 0x198   : > { %v6525_v39 = vrot.slane %v878_v23, 9  ;;  %v6526_v44 = vrot.slane %v879_v26, 9  ;;  %v3248_v46 = vmax.f32 %v460_v58, %v6511_v28  ;;  %v3249_v47 = vmax.f32 %v868_v12, %v6512_v0 }
 0x199   : > { %v3250_v48 = vmax.f32 %v869_v13, %v6513_v30  ;;  %v3251_v45 = vmax.f32 %v870_v16, %v6514_v32  ;;  %v3252_v49 = vmax.f32 %v461_v1, %v6515_v31  ;;  %v3253_v51 = vmax.f32 %v871_v14, %v6516_v35  ;;  %v466_v14 = vld [vmem:[%s6959_s28 + $0x290] sm:$0xff] }
 0x19a   : > { %v3254_v52 = vmax.f32 %v872_v17, %v6517_v33  ;;  %v3255_v50 = vmax.f32 %v873_v20, %v6518_v34  ;;  %v3256_v54 = vmax.f32 %v462_v63, %v6519_v37  ;;  %v3257_v53 = vmax.f32 %v874_v21, %v6520_v40 }
 0x19b   : > { %v3258_v9 = vmax.f32 %v875_v18, %v6521_v38  ;;  %v3259_v5 = vmax.f32 %v876_v24, %v6522_v41  ;;  %v3260_v55 = vmax.f32 %v463_v11, %v6523_v42  ;;  %v3261_v56 = vmax.f32 %v877_v25, %v6524_v43  ;;  %v465_v11 = vld [vmem:[%s6959_s28 + $0x288] sm:$0xff] }
 0x19c   : > { %v3262_v57 = vmax.f32 %v878_v23, %v6525_v39  ;;  %v3263_v59 = vmax.f32 %v879_v26, %v6526_v44  ;;  %v3608_v10 = vmax.f32 %v3248_v46, %v3256_v54  ;;  %v3609_v6 = vmax.f32 %v3249_v47, %v3257_v53 }
 0x19d   : > { %v3610_v58 = vmax.f32 %v3250_v48, %v3258_v9  ;;  %v3611_v60 = vmax.f32 %v3251_v45, %v3259_v5  ;;  %v3612_v61 = vmax.f32 %v3252_v49, %v3260_v55  ;;  %v3613_v1 = vmax.f32 %v3253_v51, %v3261_v56 }
 0x19e   : > { %v3614_v62 = vmax.f32 %v3254_v52, %v3262_v57  ;;  %v3615_v2 = vmax.f32 %v3255_v50, %v3263_v59  ;;  %v4120_v4 = vperm.slane %v3608_v10, 0  ;;  %v4121_v63 = vperm.slane %v3609_v6, 0 }
 0x19f   : > { %v4122_v7 = vperm.slane %v3610_v58, 0  ;;  %v4123_v8 = vperm.slane %v3611_v60, 0  ;;  %v4124_v12 = vperm.slane %v3612_v61, 0  ;;  %v4125_v13 = vperm.slane %v3613_v1, 0 }
 0x1a0   : > { %v4126_v15 = vperm.slane %v3614_v62, 0  ;;  %v4127_v16 = vperm.slane %v3615_v2, 0  ;;  %v4364_v17 = vsel %vm4224_vm2, %v4121_v63, %v4120_v4  ;;  %v880_v20 = vrot.slane %v464_v3, 2 }
 0x1a1   : > { %v881_v21 = vrot.slane %v464_v3, 4  ;;  %v882_v18 = vrot.slane %v464_v3, 6  ;;  %v4365_v22 = vsel %vm4226_vm3, %v4122_v7, %v4364_v17  ;;  %v883_v24 = vrot.slane %v465_v11, 2 }
 0x1a2   : > { %v884_v25 = vrot.slane %v465_v11, 4  ;;  %v885_v23 = vrot.slane %v465_v11, 6  ;;  %v4366_v27 = vsel %vm4228_vm4, %v4123_v8, %v4365_v22  ;;  %v886_v26 = vrot.slane %v466_v14, 2  ;;  %v468_v8 = vld [vmem:[%s6959_s28 + $0x2a0] sm:$0xff] }
 0x1a3   : > { %v887_v28 = vrot.slane %v466_v14, 4  ;;  %v888_v0 = vrot.slane %v466_v14, 6  ;;  %v4367_v29 = vsel %vm4230_vm5, %v4124_v12, %v4366_v27  ;;  %v889_v30 = vrot.slane %v467_v19, 2 }
 0x1a4   : > { %v890_v32 = vrot.slane %v467_v19, 4  ;;  %v891_v31 = vrot.slane %v467_v19, 6  ;;  %v4368_v36 = vsel %vm4232_vm6, %v4125_v13, %v4367_v29  ;;  %v6527_v35 = vrot.slane %v464_v3, 9 }
 0x1a5   : > { %v6528_v33 = vrot.slane %v880_v20, 9  ;;  %v6529_v34 = vrot.slane %v881_v21, 9  ;;  %v4369_v37 = vsel %vm4234_vm7, %v4126_v15, %v4368_v36  ;;  %v6530_v40 = vrot.slane %v882_v18, 9 }
 0x1a6   : > { %v6531_v38 = vrot.slane %v465_v11, 9  ;;  %v6532_v41 = vrot.slane %v883_v24, 9  ;;  %v4370_v42 = vsel %vm4236_vm8, %v4127_v16, %v4369_v37  ;;  %v6533_v43 = vrot.slane %v884_v25, 9  ;;  %v469_v16 = vld [vmem:[%s6959_s28 + $0x2a8] sm:$0xff] }
 0x1a7   : > { %v6534_v39 = vrot.slane %v885_v23, 9  ;;  %v6535_v44 = vrot.slane %v466_v14, 9  ;;  %4507 = vst.msk [vmem:[#allocation2 + $0x221] sm:$0xff] %vm262_vm0, %v4370_v42  ;;  %v6536_v46 = vrot.slane %v886_v26, 9  ;;  %v6537_v47 = vrot.slane %v887_v28, 9 }
 0x1a8   : > { %v6538_v48 = vrot.slane %v888_v0, 9  ;;  %v6539_v45 = vrot.slane %v467_v19, 9  ;;  %v6540_v49 = vrot.slane %v889_v30, 9  ;;  %v6541_v51 = vrot.slane %v890_v32, 9 }
 0x1a9   : > { %v6542_v52 = vrot.slane %v891_v31, 9  ;;  %v3264_v50 = vmax.f32 %v464_v3, %v6527_v35  ;;  %v3265_v54 = vmax.f32 %v880_v20, %v6528_v33  ;;  %v3266_v53 = vmax.f32 %v881_v21, %v6529_v34  ;;  %v470_v21 = vld [vmem:[%s6959_s28 + $0x2b0] sm:$0xff] }
 0x1aa   : > { %v3267_v9 = vmax.f32 %v882_v18, %v6530_v40  ;;  %v3268_v5 = vmax.f32 %v465_v11, %v6531_v38  ;;  %v3269_v55 = vmax.f32 %v883_v24, %v6532_v41  ;;  %v3270_v56 = vmax.f32 %v884_v25, %v6533_v43  ;;  %v471_v25 = vld [vmem:[%s6959_s28 + $0x2b8] sm:$0xff] }
 0x1ab   : > { %v3271_v57 = vmax.f32 %v885_v23, %v6534_v39  ;;  %v3272_v59 = vmax.f32 %v466_v14, %v6535_v44  ;;  %v3273_v10 = vmax.f32 %v886_v26, %v6536_v46  ;;  %v3274_v6 = vmax.f32 %v887_v28, %v6537_v47 }
 0x1ac   : > { %v3275_v58 = vmax.f32 %v888_v0, %v6538_v48  ;;  %v3276_v60 = vmax.f32 %v467_v19, %v6539_v45  ;;  %v3277_v61 = vmax.f32 %v889_v30, %v6540_v49  ;;  %v3278_v1 = vmax.f32 %v890_v32, %v6541_v51 }
 0x1ad   : > { %v3279_v62 = vmax.f32 %v891_v31, %v6542_v52  ;;  %v3616_v2 = vmax.f32 %v3264_v50, %v3272_v59  ;;  %v3617_v3 = vmax.f32 %v3265_v54, %v3273_v10  ;;  %v3618_v4 = vmax.f32 %v3266_v53, %v3274_v6 }
 0x1ae   : > { %v3619_v63 = vmax.f32 %v3267_v9, %v3275_v58  ;;  %v3620_v7 = vmax.f32 %v3268_v5, %v3276_v60  ;;  %v3621_v11 = vmax.f32 %v3269_v55, %v3277_v61  ;;  %v3622_v12 = vmax.f32 %v3270_v56, %v3278_v1 }
 0x1af   : > { %v3623_v13 = vmax.f32 %v3271_v57, %v3279_v62  ;;  %v4128_v15 = vperm.slane %v3616_v2, 0  ;;  %v4129_v14 = vperm.slane %v3617_v3, 0  ;;  %v4130_v17 = vperm.slane %v3618_v4, 0 }
 0x1b0   : > { %v4131_v20 = vperm.slane %v3619_v63, 0  ;;  %v4132_v19 = vperm.slane %v3620_v7, 0  ;;  %v4133_v18 = vperm.slane %v3621_v11, 0  ;;  %v4134_v22 = vperm.slane %v3622_v12, 0 }
 0x1b1   : > { %v4135_v24 = vperm.slane %v3623_v13, 0  ;;  %v892_v23 = vrot.slane %v468_v8, 2  ;;  %v4371_v27 = vsel %vm4224_vm2, %v4129_v14, %v4128_v15  ;;  %v893_v26 = vrot.slane %v468_v8, 4 }
 0x1b2   : > { %v894_v28 = vrot.slane %v468_v8, 6  ;;  %v895_v0 = vrot.slane %v469_v16, 2  ;;  %v4372_v29 = vsel %vm4226_vm3, %v4130_v17, %v4371_v27  ;;  %v896_v30 = vrot.slane %v469_v16, 4 }
 0x1b3   : > { %v897_v32 = vrot.slane %v469_v16, 6  ;;  %v898_v31 = vrot.slane %v470_v21, 2  ;;  %v4373_v36 = vsel %vm4228_vm4, %v4131_v20, %v4372_v29  ;;  %v899_v35 = vrot.slane %v470_v21, 4  ;;  %v472_v20 = vld [vmem:[%s6959_s28 + $0x2c0] sm:$0xff] }
 0x1b4   : > { %v900_v33 = vrot.slane %v470_v21, 6  ;;  %v901_v34 = vrot.slane %v471_v25, 2  ;;  %v4374_v37 = vsel %vm4230_vm5, %v4132_v19, %v4373_v36  ;;  %v902_v40 = vrot.slane %v471_v25, 4 }
 0x1b5   : > { %v903_v38 = vrot.slane %v471_v25, 6  ;;  %v6543_v41 = vrot.slane %v468_v8, 9  ;;  %v4375_v42 = vsel %vm4232_vm6, %v4133_v18, %v4374_v37  ;;  %v6544_v43 = vrot.slane %v892_v23, 9 }
 0x1b6   : > { %v6545_v39 = vrot.slane %v893_v26, 9  ;;  %v6546_v44 = vrot.slane %v894_v28, 9  ;;  %v4376_v46 = vsel %vm4234_vm7, %v4134_v22, %v4375_v42  ;;  %v6547_v47 = vrot.slane %v469_v16, 9 }
 0x1b7   : > { %v6548_v48 = vrot.slane %v895_v0, 9  ;;  %v6549_v45 = vrot.slane %v896_v30, 9  ;;  %v4377_v49 = vsel %vm4236_vm8, %v4135_v24, %v4376_v46  ;;  %v6550_v51 = vrot.slane %v897_v32, 9  ;;  %v473_v24 = vld [vmem:[%s6959_s28 + $0x2c8] sm:$0xff] }
 0x1b8   : > { %v6551_v52 = vrot.slane %v470_v21, 9  ;;  %v6552_v50 = vrot.slane %v898_v31, 9  ;;  %4508 = vst.msk [vmem:[#allocation2 + $0x231] sm:$0xff] %vm262_vm0, %v4377_v49  ;;  %v6553_v54 = vrot.slane %v899_v35, 9  ;;  %v6554_v53 = vrot.slane %v900_v33, 9 }
 0x1b9   : > { %v6555_v9 = vrot.slane %v471_v25, 9  ;;  %v6556_v5 = vrot.slane %v901_v34, 9  ;;  %v6557_v55 = vrot.slane %v902_v40, 9  ;;  %v6558_v56 = vrot.slane %v903_v38, 9 }
 0x1ba   : > { %v3280_v57 = vmax.f32 %v468_v8, %v6543_v41  ;;  %v3281_v59 = vmax.f32 %v892_v23, %v6544_v43  ;;  %v3282_v10 = vmax.f32 %v893_v26, %v6545_v39  ;;  %v3283_v6 = vmax.f32 %v894_v28, %v6546_v44  ;;  %v474_v28 = vld [vmem:[%s6959_s28 + $0x2d0] sm:$0xff] }
 0x1bb   : > { %v3284_v58 = vmax.f32 %v469_v16, %v6547_v47  ;;  %v3285_v60 = vmax.f32 %v895_v0, %v6548_v48  ;;  %v3286_v61 = vmax.f32 %v896_v30, %v6549_v45  ;;  %v3287_v1 = vmax.f32 %v897_v32, %v6550_v51  ;;  %v475_v32 = vld [vmem:[%s6959_s28 + $0x2d8] sm:$0xff] }
 0x1bc   : > { %v3288_v62 = vmax.f32 %v470_v21, %v6551_v52  ;;  %v3289_v2 = vmax.f32 %v898_v31, %v6552_v50  ;;  %v3290_v3 = vmax.f32 %v899_v35, %v6553_v54  ;;  %v3291_v4 = vmax.f32 %v900_v33, %v6554_v53 }
 0x1bd   : > { %v3292_v63 = vmax.f32 %v471_v25, %v6555_v9  ;;  %v3293_v7 = vmax.f32 %v901_v34, %v6556_v5  ;;  %v3294_v11 = vmax.f32 %v902_v40, %v6557_v55  ;;  %v3295_v12 = vmax.f32 %v903_v38, %v6558_v56 }
 0x1be   : > { %v3624_v13 = vmax.f32 %v3280_v57, %v3288_v62  ;;  %v3625_v8 = vmax.f32 %v3281_v59, %v3289_v2  ;;  %v3626_v15 = vmax.f32 %v3282_v10, %v3290_v3  ;;  %v3627_v14 = vmax.f32 %v3283_v6, %v3291_v4 }
 0x1bf   : > { %v3628_v17 = vmax.f32 %v3284_v58, %v3292_v63  ;;  %v3629_v16 = vmax.f32 %v3285_v60, %v3293_v7  ;;  %v3630_v19 = vmax.f32 %v3286_v61, %v3294_v11  ;;  %v3631_v18 = vmax.f32 %v3287_v1, %v3295_v12 }
 0x1c0   : > { %v4136_v21 = vperm.slane %v3624_v13, 0  ;;  %v4137_v22 = vperm.slane %v3625_v8, 0  ;;  %v4138_v23 = vperm.slane %v3626_v15, 0  ;;  %v4139_v27 = vperm.slane %v3627_v14, 0 }
 0x1c1   : > { %v4140_v25 = vperm.slane %v3628_v17, 0  ;;  %v4141_v26 = vperm.slane %v3629_v16, 0  ;;  %v4142_v0 = vperm.slane %v3630_v19, 0  ;;  %v4143_v29 = vperm.slane %v3631_v18, 0 }
 0x1c2   : > { %v4378_v30 = vsel %vm4224_vm2, %v4137_v22, %v4136_v21  ;;  %v904_v31 = vrot.slane %v472_v20, 2  ;;  %v905_v35 = vrot.slane %v472_v20, 4  ;;  %v906_v33 = vrot.slane %v472_v20, 6 }
 0x1c3   : > { %v4379_v36 = vsel %vm4226_vm3, %v4138_v23, %v4378_v30  ;;  %v907_v34 = vrot.slane %v473_v24, 2  ;;  %v908_v40 = vrot.slane %v473_v24, 4  ;;  %v909_v38 = vrot.slane %v473_v24, 6  ;;  %v477_v30 = vld [vmem:[%s6959_s28 + $0x2e8] sm:$0xff] }
 0x1c4   : > { %v4380_v37 = vsel %vm4228_vm4, %v4139_v27, %v4379_v36  ;;  %v910_v41 = vrot.slane %v474_v28, 2  ;;  %v911_v43 = vrot.slane %v474_v28, 4  ;;  %v912_v39 = vrot.slane %v474_v28, 6 }
 0x1c5   : > { %v4381_v42 = vsel %vm4230_vm5, %v4140_v25, %v4380_v37  ;;  %v913_v44 = vrot.slane %v475_v32, 2  ;;  %v914_v47 = vrot.slane %v475_v32, 4  ;;  %v915_v48 = vrot.slane %v475_v32, 6  ;;  %v476_v25 = vld [vmem:[%s6959_s28 + $0x2e0] sm:$0xff] }
 0x1c6   : > { %v4382_v46 = vsel %vm4232_vm6, %v4141_v26, %v4381_v42  ;;  %v6559_v45 = vrot.slane %v472_v20, 9  ;;  %v6560_v51 = vrot.slane %v904_v31, 9  ;;  %v6561_v52 = vrot.slane %v905_v35, 9 }
 0x1c7   : > { %v4383_v49 = vsel %vm4234_vm7, %v4142_v0, %v4382_v46  ;;  %v6562_v50 = vrot.slane %v906_v33, 9  ;;  %v6563_v53 = vrot.slane %v473_v24, 9  ;;  %v6564_v9 = vrot.slane %v907_v34, 9 }
 0x1c8   : > { %v4384_v54 = vsel %vm4236_vm8, %v4143_v29, %v4383_v49  ;;  %v6565_v5 = vrot.slane %v908_v40, 9  ;;  %v6566_v55 = vrot.slane %v909_v38, 9  ;;  %v6567_v56 = vrot.slane %v474_v28, 9 }
 0x1c9   : > { %4509 = vst.msk [vmem:[#allocation2 + $0x241] sm:$0xff] %vm262_vm0, %v4384_v54  ;;  %v6568_v57 = vrot.slane %v910_v41, 9  ;;  %v6569_v59 = vrot.slane %v911_v43, 9  ;;  %v6570_v10 = vrot.slane %v912_v39, 9  ;;  %v6571_v6 = vrot.slane %v475_v32, 9 }
 0x1ca   : > { %v6572_v58 = vrot.slane %v913_v44, 9  ;;  %v6573_v60 = vrot.slane %v914_v47, 9  ;;  %v6574_v61 = vrot.slane %v915_v48, 9  ;;  %v3296_v1 = vmax.f32 %v472_v20, %v6559_v45 }
 0x1cb   : > { %v3297_v62 = vmax.f32 %v904_v31, %v6560_v51  ;;  %v3298_v2 = vmax.f32 %v905_v35, %v6561_v52  ;;  %v3299_v3 = vmax.f32 %v906_v33, %v6562_v50  ;;  %v3300_v4 = vmax.f32 %v473_v24, %v6563_v53  ;;  %v478_v33 = vld [vmem:[%s6959_s28 + $0x2f0] sm:$0xff] }
 0x1cc   : > { %v3301_v63 = vmax.f32 %v907_v34, %v6564_v9  ;;  %v3302_v7 = vmax.f32 %v908_v40, %v6565_v5  ;;  %v3303_v11 = vmax.f32 %v909_v38, %v6566_v55  ;;  %v3304_v12 = vmax.f32 %v474_v28, %v6567_v56  ;;  %v479_v40 = vld [vmem:[%s6959_s28 + $0x2f8] sm:$0xff] }
 0x1cd   : > { %v3305_v13 = vmax.f32 %v910_v41, %v6568_v57  ;;  %v3306_v8 = vmax.f32 %v911_v43, %v6569_v59  ;;  %v3307_v15 = vmax.f32 %v912_v39, %v6570_v10  ;;  %v3308_v14 = vmax.f32 %v475_v32, %v6571_v6 }
 0x1ce   : > { %v3309_v17 = vmax.f32 %v913_v44, %v6572_v58  ;;  %v3310_v16 = vmax.f32 %v914_v47, %v6573_v60  ;;  %v3311_v19 = vmax.f32 %v915_v48, %v6574_v61  ;;  %v3632_v18 = vmax.f32 %v3296_v1, %v3304_v12 }
 0x1cf   : > { %v3633_v21 = vmax.f32 %v3297_v62, %v3305_v13  ;;  %v3634_v20 = vmax.f32 %v3298_v2, %v3306_v8  ;;  %v3635_v22 = vmax.f32 %v3299_v3, %v3307_v15  ;;  %v3636_v23 = vmax.f32 %v3300_v4, %v3308_v14 }
 0x1d0   : > { %v3637_v24 = vmax.f32 %v3301_v63, %v3309_v17  ;;  %v3638_v27 = vmax.f32 %v3302_v7, %v3310_v16  ;;  %v3639_v26 = vmax.f32 %v3303_v11, %v3311_v19  ;;  %v4144_v28 = vperm.slane %v3632_v18, 0 }
 0x1d1   : > { %v4145_v0 = vperm.slane %v3633_v21, 0  ;;  %v4146_v29 = vperm.slane %v3634_v20, 0  ;;  %v4147_v32 = vperm.slane %v3635_v22, 0  ;;  %v4148_v31 = vperm.slane %v3636_v23, 0 }
 0x1d2   : > { %v4149_v36 = vperm.slane %v3637_v24, 0  ;;  %v4150_v35 = vperm.slane %v3638_v27, 0  ;;  %v4151_v34 = vperm.slane %v3639_v26, 0  ;;  %v916_v38 = vrot.slane %v476_v25, 2 }
 0x1d3   : > { %v4385_v37 = vsel %vm4224_vm2, %v4145_v0, %v4144_v28  ;;  %v917_v41 = vrot.slane %v476_v25, 4  ;;  %v918_v43 = vrot.slane %v476_v25, 6  ;;  %v919_v39 = vrot.slane %v477_v30, 2 }
 0x1d4   : > { %v4386_v42 = vsel %vm4226_vm3, %v4146_v29, %v4385_v37  ;;  %v920_v44 = vrot.slane %v477_v30, 4  ;;  %v921_v47 = vrot.slane %v477_v30, 6  ;;  %v922_v48 = vrot.slane %v478_v33, 2 }
 0x1d5   : > { %v4387_v46 = vsel %vm4228_vm4, %v4147_v32, %v4386_v42  ;;  %v923_v45 = vrot.slane %v478_v33, 4  ;;  %v924_v51 = vrot.slane %v478_v33, 6  ;;  %v925_v52 = vrot.slane %v479_v40, 2 }
 0x1d6   : > { %v4388_v49 = vsel %vm4230_vm5, %v4148_v31, %v4387_v46  ;;  %v926_v50 = vrot.slane %v479_v40, 4  ;;  %v927_v53 = vrot.slane %v479_v40, 6  ;;  %v6575_v9 = vrot.slane %v476_v25, 9  ;;  %v483_v46 = vld [vmem:[%s6959_s28 + $0x318] sm:$0xff] }
 0x1d7   : > { %v4389_v54 = vsel %vm4232_vm6, %v4149_v36, %v4388_v49  ;;  %v6576_v5 = vrot.slane %v916_v38, 9  ;;  %v6577_v56 = vrot.slane %v917_v41, 9  ;;  %v6578_v57 = vrot.slane %v918_v43, 9  ;;  %v480_v36 = vld [vmem:[%s6959_s28 + $0x300] sm:$0xff] }
 0x1d8   : > { %v4390_v55 = vsel %vm4234_vm7, %v4150_v35, %v4389_v54  ;;  %v6579_v59 = vrot.slane %v477_v30, 9  ;;  %v6580_v6 = vrot.slane %v919_v39, 9  ;;  %v6581_v58 = vrot.slane %v920_v44, 9 }
 0x1d9   : > { %v4391_v10 = vsel %vm4236_vm8, %v4151_v34, %v4390_v55  ;;  %v6582_v60 = vrot.slane %v921_v47, 9  ;;  %v6583_v61 = vrot.slane %v478_v33, 9  ;;  %v6584_v1 = vrot.slane %v922_v48, 9 }
 0x1da   : > { %4510 = vst.msk [vmem:[#allocation2 + $0x251] sm:$0xff] %vm262_vm0, %v4391_v10  ;;  %v6585_v62 = vrot.slane %v923_v45, 9  ;;  %v6586_v2 = vrot.slane %v924_v51, 9  ;;  %v6587_v3 = vrot.slane %v479_v40, 9  ;;  %v6588_v4 = vrot.slane %v925_v52, 9 }
 0x1db   : > { %v6589_v63 = vrot.slane %v926_v50, 9  ;;  %v6590_v7 = vrot.slane %v927_v53, 9  ;;  %v3312_v11 = vmax.f32 %v476_v25, %v6575_v9  ;;  %v3313_v12 = vmax.f32 %v916_v38, %v6576_v5 }
 0x1dc   : > { %v3314_v13 = vmax.f32 %v917_v41, %v6577_v56  ;;  %v3315_v8 = vmax.f32 %v918_v43, %v6578_v57  ;;  %v3316_v15 = vmax.f32 %v477_v30, %v6579_v59  ;;  %v3317_v14 = vmax.f32 %v919_v39, %v6580_v6  ;;  %v482_v39 = vld [vmem:[%s6959_s28 + $0x310] sm:$0xff] }
 0x1dd   : > { %v3318_v17 = vmax.f32 %v920_v44, %v6581_v58  ;;  %v3319_v16 = vmax.f32 %v921_v47, %v6582_v60  ;;  %v3320_v19 = vmax.f32 %v478_v33, %v6583_v61  ;;  %v3321_v18 = vmax.f32 %v922_v48, %v6584_v1 }
 0x1de   : > { %v3322_v21 = vmax.f32 %v923_v45, %v6585_v62  ;;  %v3323_v20 = vmax.f32 %v924_v51, %v6586_v2  ;;  %v3324_v22 = vmax.f32 %v479_v40, %v6587_v3  ;;  %v3325_v23 = vmax.f32 %v925_v52, %v6588_v4  ;;  %v481_v40 = vld [vmem:[%s6959_s28 + $0x308] sm:$0xff] }
 0x1df   : > { %v3326_v24 = vmax.f32 %v926_v50, %v6589_v63  ;;  %v3327_v27 = vmax.f32 %v927_v53, %v6590_v7  ;;  %v3640_v26 = vmax.f32 %v3312_v11, %v3320_v19  ;;  %v3641_v28 = vmax.f32 %v3313_v12, %v3321_v18 }
 0x1e0   : > { %v3642_v25 = vmax.f32 %v3314_v13, %v3322_v21  ;;  %v3643_v0 = vmax.f32 %v3315_v8, %v3323_v20  ;;  %v3644_v29 = vmax.f32 %v3316_v15, %v3324_v22  ;;  %v3645_v30 = vmax.f32 %v3317_v14, %v3325_v23 }
 0x1e1   : > { %v3646_v32 = vmax.f32 %v3318_v17, %v3326_v24  ;;  %v3647_v31 = vmax.f32 %v3319_v16, %v3327_v27  ;;  %v4152_v35 = vperm.slane %v3640_v26, 0  ;;  %v4153_v33 = vperm.slane %v3641_v28, 0 }
 0x1e2   : > { %v4154_v34 = vperm.slane %v3642_v25, 0  ;;  %v4155_v37 = vperm.slane %v3643_v0, 0  ;;  %v4156_v38 = vperm.slane %v3644_v29, 0  ;;  %v4157_v41 = vperm.slane %v3645_v30, 0 }
 0x1e3   : > { %v4158_v42 = vperm.slane %v3646_v32, 0  ;;  %v4159_v43 = vperm.slane %v3647_v31, 0  ;;  %v4392_v44 = vsel %vm4224_vm2, %v4153_v33, %v4152_v35  ;;  %v928_v47 = vrot.slane %v480_v36, 2 }
 0x1e4   : > { %v929_v48 = vrot.slane %v480_v36, 4  ;;  %v930_v45 = vrot.slane %v480_v36, 6  ;;  %v4393_v49 = vsel %vm4226_vm3, %v4154_v34, %v4392_v44  ;;  %v931_v51 = vrot.slane %v481_v40, 2 }
 0x1e5   : > { %v932_v52 = vrot.slane %v481_v40, 4  ;;  %v933_v50 = vrot.slane %v481_v40, 6  ;;  %v4394_v54 = vsel %vm4228_vm4, %v4155_v37, %v4393_v49  ;;  %v934_v53 = vrot.slane %v482_v39, 2  ;;  %v484_v37 = vld [vmem:[%s6959_s28 + $0x320] sm:$0xff] }
 0x1e6   : > { %v935_v9 = vrot.slane %v482_v39, 4  ;;  %v936_v5 = vrot.slane %v482_v39, 6  ;;  %v4395_v55 = vsel %vm4230_vm5, %v4156_v38, %v4394_v54  ;;  %v937_v56 = vrot.slane %v483_v46, 2 }
 0x1e7   : > { %v938_v57 = vrot.slane %v483_v46, 4  ;;  %v939_v59 = vrot.slane %v483_v46, 6  ;;  %v4396_v10 = vsel %vm4232_vm6, %v4157_v41, %v4395_v55  ;;  %v6591_v6 = vrot.slane %v480_v36, 9 }
 0x1e8   : > { %v6592_v58 = vrot.slane %v928_v47, 9  ;;  %v6593_v60 = vrot.slane %v929_v48, 9  ;;  %v4397_v61 = vsel %vm4234_vm7, %v4158_v42, %v4396_v10  ;;  %v6594_v1 = vrot.slane %v930_v45, 9 }
 0x1e9   : > { %v6595_v62 = vrot.slane %v481_v40, 9  ;;  %v6596_v2 = vrot.slane %v931_v51, 9  ;;  %v4398_v3 = vsel %vm4236_vm8, %v4159_v43, %v4397_v61  ;;  %v6597_v4 = vrot.slane %v932_v52, 9  ;;  %v485_v43 = vld [vmem:[%s6959_s28 + $0x328] sm:$0xff] }
 0x1ea   : > { %v6598_v63 = vrot.slane %v933_v50, 9  ;;  %v6599_v7 = vrot.slane %v482_v39, 9  ;;  %4511 = vst.msk [vmem:[#allocation2 + $0x261] sm:$0xff] %vm262_vm0, %v4398_v3  ;;  %v6600_v11 = vrot.slane %v934_v53, 9  ;;  %v6601_v12 = vrot.slane %v935_v9, 9 }
 0x1eb   : > { %v6602_v13 = vrot.slane %v936_v5, 9  ;;  %v6603_v8 = vrot.slane %v483_v46, 9  ;;  %v6604_v15 = vrot.slane %v937_v56, 9  ;;  %v6605_v14 = vrot.slane %v938_v57, 9 }
 0x1ec   : > { %v6606_v17 = vrot.slane %v939_v59, 9  ;;  %v3328_v16 = vmax.f32 %v480_v36, %v6591_v6  ;;  %v3329_v19 = vmax.f32 %v928_v47, %v6592_v58  ;;  %v3330_v18 = vmax.f32 %v929_v48, %v6593_v60  ;;  %v486_v48 = vld [vmem:[%s6959_s28 + $0x330] sm:$0xff] }
 0x1ed   : > { %v3331_v21 = vmax.f32 %v930_v45, %v6594_v1  ;;  %v3332_v20 = vmax.f32 %v481_v40, %v6595_v62  ;;  %v3333_v22 = vmax.f32 %v931_v51, %v6596_v2  ;;  %v3334_v23 = vmax.f32 %v932_v52, %v6597_v4  ;;  %v487_v52 = vld [vmem:[%s6959_s28 + $0x338] sm:$0xff] }
 0x1ee   : > { %v3335_v24 = vmax.f32 %v933_v50, %v6598_v63  ;;  %v3336_v27 = vmax.f32 %v482_v39, %v6599_v7  ;;  %v3337_v26 = vmax.f32 %v934_v53, %v6600_v11  ;;  %v3338_v28 = vmax.f32 %v935_v9, %v6601_v12 }
 0x1ef   : > { %v3339_v25 = vmax.f32 %v936_v5, %v6602_v13  ;;  %v3340_v0 = vmax.f32 %v483_v46, %v6603_v8  ;;  %v3341_v29 = vmax.f32 %v937_v56, %v6604_v15  ;;  %v3342_v30 = vmax.f32 %v938_v57, %v6605_v14 }
 0x1f0   : > { %v3343_v32 = vmax.f32 %v939_v59, %v6606_v17  ;;  %v3648_v31 = vmax.f32 %v3328_v16, %v3336_v27  ;;  %v3649_v36 = vmax.f32 %v3329_v19, %v3337_v26  ;;  %v3650_v35 = vmax.f32 %v3330_v18, %v3338_v28 }
 0x1f1   : > { %v3651_v33 = vmax.f32 %v3331_v21, %v3339_v25  ;;  %v3652_v34 = vmax.f32 %v3332_v20, %v3340_v0  ;;  %v3653_v40 = vmax.f32 %v3333_v22, %v3341_v29  ;;  %v3654_v38 = vmax.f32 %v3334_v23, %v3342_v30 }
 0x1f2   : > { %v3655_v41 = vmax.f32 %v3335_v24, %v3343_v32  ;;  %v4160_v42 = vperm.slane %v3648_v31, 0  ;;  %v4161_v39 = vperm.slane %v3649_v36, 0  ;;  %v4162_v44 = vperm.slane %v3650_v35, 0 }
 0x1f3   : > { %v4163_v47 = vperm.slane %v3651_v33, 0  ;;  %v4164_v46 = vperm.slane %v3652_v34, 0  ;;  %v4165_v45 = vperm.slane %v3653_v40, 0  ;;  %v4166_v49 = vperm.slane %v3654_v38, 0 }
 0x1f4   : > { %v4167_v51 = vperm.slane %v3655_v41, 0  ;;  %v940_v50 = vrot.slane %v484_v37, 2  ;;  %v4399_v54 = vsel %vm4224_vm2, %v4161_v39, %v4160_v42  ;;  %v941_v53 = vrot.slane %v484_v37, 4 }
 0x1f5   : > { %v942_v9 = vrot.slane %v484_v37, 6  ;;  %v943_v5 = vrot.slane %v485_v43, 2  ;;  %v4400_v55 = vsel %vm4226_vm3, %v4162_v44, %v4399_v54  ;;  %v944_v56 = vrot.slane %v485_v43, 4 }
 0x1f6   : > { %v945_v57 = vrot.slane %v485_v43, 6  ;;  %v946_v59 = vrot.slane %v486_v48, 2  ;;  %v4401_v10 = vsel %vm4228_vm4, %v4163_v47, %v4400_v55  ;;  %v947_v6 = vrot.slane %v486_v48, 4  ;;  %v488_v47 = vld [vmem:[%s6959_s28 + $0x340] sm:$0xff] }
 0x1f7   : > { %v948_v58 = vrot.slane %v486_v48, 6  ;;  %v949_v60 = vrot.slane %v487_v52, 2  ;;  %v4402_v61 = vsel %vm4230_vm5, %v4164_v46, %v4401_v10  ;;  %v950_v1 = vrot.slane %v487_v52, 4 }
 0x1f8   : > { %v951_v62 = vrot.slane %v487_v52, 6  ;;  %v6607_v2 = vrot.slane %v484_v37, 9  ;;  %v4403_v3 = vsel %vm4232_vm6, %v4165_v45, %v4402_v61  ;;  %v6608_v4 = vrot.slane %v940_v50, 9 }
 0x1f9   : > { %v6609_v63 = vrot.slane %v941_v53, 9  ;;  %v6610_v7 = vrot.slane %v942_v9, 9  ;;  %v4404_v11 = vsel %vm4234_vm7, %v4166_v49, %v4403_v3  ;;  %v6611_v12 = vrot.slane %v485_v43, 9 }
 0x1fa   : > { %v6612_v13 = vrot.slane %v943_v5, 9  ;;  %v6613_v8 = vrot.slane %v944_v56, 9  ;;  %v4405_v15 = vsel %vm4236_vm8, %v4167_v51, %v4404_v11  ;;  %v6614_v14 = vrot.slane %v945_v57, 9  ;;  %v489_v51 = vld [vmem:[%s6959_s28 + $0x348] sm:$0xff] }
 0x1fb   : > { %v6615_v17 = vrot.slane %v486_v48, 9  ;;  %v6616_v16 = vrot.slane %v946_v59, 9  ;;  %4512 = vst.msk [vmem:[#allocation2 + $0x291] sm:$0xff] %vm262_vm0, %v4405_v15  ;;  %v6617_v19 = vrot.slane %v947_v6, 9  ;;  %v6618_v18 = vrot.slane %v948_v58, 9 }
 0x1fc   : > { %v6619_v21 = vrot.slane %v487_v52, 9  ;;  %v6620_v20 = vrot.slane %v949_v60, 9  ;;  %v6621_v22 = vrot.slane %v950_v1, 9  ;;  %v6622_v23 = vrot.slane %v951_v62, 9 }
 0x1fd   : > { %v3344_v24 = vmax.f32 %v484_v37, %v6607_v2  ;;  %v3345_v27 = vmax.f32 %v940_v50, %v6608_v4  ;;  %v3346_v26 = vmax.f32 %v941_v53, %v6609_v63  ;;  %v3347_v28 = vmax.f32 %v942_v9, %v6610_v7  ;;  %v490_v9 = vld [vmem:[%s6959_s28 + $0x350] sm:$0xff] }
 0x1fe   : > { %v3348_v25 = vmax.f32 %v485_v43, %v6611_v12  ;;  %v3349_v0 = vmax.f32 %v943_v5, %v6612_v13  ;;  %v3350_v29 = vmax.f32 %v944_v56, %v6613_v8  ;;  %v3351_v30 = vmax.f32 %v945_v57, %v6614_v14  ;;  %v491_v57 = vld [vmem:[%s6959_s28 + $0x358] sm:$0xff] }
 0x1ff   : > { %v3352_v32 = vmax.f32 %v486_v48, %v6615_v17  ;;  %v3353_v31 = vmax.f32 %v946_v59, %v6616_v16  ;;  %v3354_v36 = vmax.f32 %v947_v6, %v6617_v19  ;;  %v3355_v35 = vmax.f32 %v948_v58, %v6618_v18 }
 0x200   : > { %v3356_v33 = vmax.f32 %v487_v52, %v6619_v21  ;;  %v3357_v34 = vmax.f32 %v949_v60, %v6620_v20  ;;  %v3358_v40 = vmax.f32 %v950_v1, %v6621_v22  ;;  %v3359_v38 = vmax.f32 %v951_v62, %v6622_v23 }
 0x201   : > { %v3656_v41 = vmax.f32 %v3344_v24, %v3352_v32  ;;  %v3657_v37 = vmax.f32 %v3345_v27, %v3353_v31  ;;  %v3658_v42 = vmax.f32 %v3346_v26, %v3354_v36  ;;  %v3659_v39 = vmax.f32 %v3347_v28, %v3355_v35 }
 0x202   : > { %v3660_v44 = vmax.f32 %v3348_v25, %v3356_v33  ;;  %v3661_v43 = vmax.f32 %v3349_v0, %v3357_v34  ;;  %v3662_v46 = vmax.f32 %v3350_v29, %v3358_v40  ;;  %v3663_v45 = vmax.f32 %v3351_v30, %v3359_v38 }
 0x203   : > { %v4168_v48 = vperm.slane %v3656_v41, 0  ;;  %v4169_v49 = vperm.slane %v3657_v37, 0  ;;  %v4170_v50 = vperm.slane %v3658_v42, 0  ;;  %v4171_v54 = vperm.slane %v3659_v39, 0 }
 0x204   : > { %v4172_v52 = vperm.slane %v3660_v44, 0  ;;  %v4173_v53 = vperm.slane %v3661_v43, 0  ;;  %v4174_v5 = vperm.slane %v3662_v46, 0  ;;  %v4175_v55 = vperm.slane %v3663_v45, 0 }
 0x205   : > { %v4406_v56 = vsel %vm4224_vm2, %v4169_v49, %v4168_v48  ;;  %v952_v59 = vrot.slane %v488_v47, 2  ;;  %v953_v6 = vrot.slane %v488_v47, 4  ;;  %v954_v58 = vrot.slane %v488_v47, 6 }
 0x206   : > { %v4407_v10 = vsel %vm4226_vm3, %v4170_v50, %v4406_v56  ;;  %v955_v60 = vrot.slane %v489_v51, 2  ;;  %v956_v1 = vrot.slane %v489_v51, 4  ;;  %v957_v62 = vrot.slane %v489_v51, 6  ;;  %v493_v56 = vld [vmem:[%s6959_s28 + $0x368] sm:$0xff] }
 0x207   : > { %v4408_v61 = vsel %vm4228_vm4, %v4171_v54, %v4407_v10  ;;  %v958_v2 = vrot.slane %v490_v9, 2  ;;  %v959_v4 = vrot.slane %v490_v9, 4  ;;  %v960_v63 = vrot.slane %v490_v9, 6 }
 0x208   : > { %v4409_v3 = vsel %vm4230_vm5, %v4172_v52, %v4408_v61  ;;  %v961_v7 = vrot.slane %v491_v57, 2  ;;  %v962_v12 = vrot.slane %v491_v57, 4  ;;  %v963_v13 = vrot.slane %v491_v57, 6  ;;  %v492_v52 = vld [vmem:[%s6959_s28 + $0x360] sm:$0xff] }
 0x209   : > { %v4410_v11 = vsel %vm4232_vm6, %v4173_v53, %v4409_v3  ;;  %v6623_v8 = vrot.slane %v488_v47, 9  ;;  %v6624_v14 = vrot.slane %v952_v59, 9  ;;  %v6625_v17 = vrot.slane %v953_v6, 9 }
 0x20a   : > { %v4411_v15 = vsel %vm4234_vm7, %v4174_v5, %v4410_v11  ;;  %v6626_v16 = vrot.slane %v954_v58, 9  ;;  %v6627_v18 = vrot.slane %v489_v51, 9  ;;  %v6628_v21 = vrot.slane %v955_v60, 9 }
 0x20b   : > { %v4412_v19 = vsel %vm4236_vm8, %v4175_v55, %v4411_v15  ;;  %v6629_v20 = vrot.slane %v956_v1, 9  ;;  %v6630_v22 = vrot.slane %v957_v62, 9  ;;  %v6631_v23 = vrot.slane %v490_v9, 9 }
 0x20c   : > { %4513 = vst.msk [vmem:[#allocation2 + $0x2a1] sm:$0xff] %vm262_vm0, %v4412_v19  ;;  %v6632_v24 = vrot.slane %v958_v2, 9  ;;  %v6633_v27 = vrot.slane %v959_v4, 9  ;;  %v6634_v26 = vrot.slane %v960_v63, 9  ;;  %v6635_v28 = vrot.slane %v491_v57, 9 }
 0x20d   : > { %v6636_v25 = vrot.slane %v961_v7, 9  ;;  %v6637_v0 = vrot.slane %v962_v12, 9  ;;  %v6638_v29 = vrot.slane %v963_v13, 9  ;;  %v3360_v30 = vmax.f32 %v488_v47, %v6623_v8 }
 0x20e   : > { %v3361_v32 = vmax.f32 %v952_v59, %v6624_v14  ;;  %v3362_v31 = vmax.f32 %v953_v6, %v6625_v17  ;;  %v3363_v36 = vmax.f32 %v954_v58, %v6626_v16  ;;  %v3364_v35 = vmax.f32 %v489_v51, %v6627_v18  ;;  %v494_v58 = vld [vmem:[%s6959_s28 + $0x370] sm:$0xff] }
 0x20f   : > { %v3365_v33 = vmax.f32 %v955_v60, %v6628_v21  ;;  %v3366_v34 = vmax.f32 %v956_v1, %v6629_v20  ;;  %v3367_v40 = vmax.f32 %v957_v62, %v6630_v22  ;;  %v3368_v38 = vmax.f32 %v490_v9, %v6631_v23  ;;  %v495_v1 = vld [vmem:[%s6959_s28 + $0x378] sm:$0xff] }
 0x210   : > { %v3369_v41 = vmax.f32 %v958_v2, %v6632_v24  ;;  %v3370_v37 = vmax.f32 %v959_v4, %v6633_v27  ;;  %v3371_v42 = vmax.f32 %v960_v63, %v6634_v26  ;;  %v3372_v39 = vmax.f32 %v491_v57, %v6635_v28 }
 0x211   : > { %v3373_v44 = vmax.f32 %v961_v7, %v6636_v25  ;;  %v3374_v43 = vmax.f32 %v962_v12, %v6637_v0  ;;  %v3375_v46 = vmax.f32 %v963_v13, %v6638_v29  ;;  %v3664_v45 = vmax.f32 %v3360_v30, %v3368_v38 }
 0x212   : > { %v3665_v48 = vmax.f32 %v3361_v32, %v3369_v41  ;;  %v3666_v47 = vmax.f32 %v3362_v31, %v3370_v37  ;;  %v3667_v49 = vmax.f32 %v3363_v36, %v3371_v42  ;;  %v3668_v50 = vmax.f32 %v3364_v35, %v3372_v39 }
 0x213   : > { %v3669_v51 = vmax.f32 %v3365_v33, %v3373_v44  ;;  %v3670_v54 = vmax.f32 %v3366_v34, %v3374_v43  ;;  %v3671_v53 = vmax.f32 %v3367_v40, %v3375_v46  ;;  %v4176_v9 = vperm.slane %v3664_v45, 0 }
 0x214   : > { %v4177_v5 = vperm.slane %v3665_v48, 0  ;;  %v4178_v55 = vperm.slane %v3666_v47, 0  ;;  %v4179_v57 = vperm.slane %v3667_v49, 0  ;;  %v4180_v59 = vperm.slane %v3668_v50, 0 }
 0x215   : > { %v4181_v10 = vperm.slane %v3669_v51, 0  ;;  %v4182_v6 = vperm.slane %v3670_v54, 0  ;;  %v4183_v60 = vperm.slane %v3671_v53, 0  ;;  %v964_v62 = vrot.slane %v492_v52, 2 }
 0x216   : > { %v4413_v61 = vsel %vm4224_vm2, %v4177_v5, %v4176_v9  ;;  %v965_v2 = vrot.slane %v492_v52, 4  ;;  %v966_v4 = vrot.slane %v492_v52, 6  ;;  %v967_v63 = vrot.slane %v493_v56, 2 }
 0x217   : > { %v4414_v3 = vsel %vm4226_vm3, %v4178_v55, %v4413_v61  ;;  %v968_v7 = vrot.slane %v493_v56, 4  ;;  %v969_v12 = vrot.slane %v493_v56, 6  ;;  %v970_v13 = vrot.slane %v494_v58, 2 }
 0x218   : > { %v4415_v11 = vsel %vm4228_vm4, %v4179_v57, %v4414_v3  ;;  %v971_v8 = vrot.slane %v494_v58, 4  ;;  %v972_v14 = vrot.slane %v494_v58, 6  ;;  %v973_v17 = vrot.slane %v495_v1, 2 }
 0x219   : > { %v4416_v15 = vsel %vm4230_vm5, %v4180_v59, %v4415_v11  ;;  %v974_v16 = vrot.slane %v495_v1, 4  ;;  %v975_v18 = vrot.slane %v495_v1, 6  ;;  %v6639_v21 = vrot.slane %v492_v52, 9  ;;  %v499_v11 = vld [vmem:[%s6959_s28 + $0x398] sm:$0xff] }
 0x21a   : > { %v4417_v19 = vsel %vm4232_vm6, %v4181_v10, %v4416_v15  ;;  %v6640_v20 = vrot.slane %v964_v62, 9  ;;  %v6641_v23 = vrot.slane %v965_v2, 9  ;;  %v6642_v24 = vrot.slane %v966_v4, 9  ;;  %v496_v10 = vld [vmem:[%s6959_s28 + $0x380] sm:$0xff] }
 0x21b   : > { %v4418_v22 = vsel %vm4234_vm7, %v4182_v6, %v4417_v19  ;;  %v6643_v27 = vrot.slane %v493_v56, 9  ;;  %v6644_v28 = vrot.slane %v967_v63, 9  ;;  %v6645_v25 = vrot.slane %v968_v7, 9 }
 0x21c   : > { %v4419_v26 = vsel %vm4236_vm8, %v4183_v60, %v4418_v22  ;;  %v6646_v0 = vrot.slane %v969_v12, 9  ;;  %v6647_v29 = vrot.slane %v494_v58, 9  ;;  %v6648_v30 = vrot.slane %v970_v13, 9 }
 0x21d   : > { %4514 = vst.msk [vmem:[#allocation2 + $0x2b1] sm:$0xff] %vm262_vm0, %v4419_v26  ;;  %v6649_v32 = vrot.slane %v971_v8, 9  ;;  %v6650_v31 = vrot.slane %v972_v14, 9  ;;  %v6651_v36 = vrot.slane %v495_v1, 9  ;;  %v6652_v35 = vrot.slane %v973_v17, 9 }
 0x21e   : > { %v6653_v33 = vrot.slane %v974_v16, 9  ;;  %v6654_v34 = vrot.slane %v975_v18, 9  ;;  %v3376_v40 = vmax.f32 %v492_v52, %v6639_v21  ;;  %v3377_v38 = vmax.f32 %v964_v62, %v6640_v20 }
 0x21f   : > { %v3378_v41 = vmax.f32 %v965_v2, %v6641_v23  ;;  %v3379_v37 = vmax.f32 %v966_v4, %v6642_v24  ;;  %v3380_v42 = vmax.f32 %v493_v56, %v6643_v27  ;;  %v3381_v39 = vmax.f32 %v967_v63, %v6644_v28  ;;  %v498_v63 = vld [vmem:[%s6959_s28 + $0x390] sm:$0xff] }
 0x220   : > { %v3382_v44 = vmax.f32 %v968_v7, %v6645_v25  ;;  %v3383_v43 = vmax.f32 %v969_v12, %v6646_v0  ;;  %v3384_v46 = vmax.f32 %v494_v58, %v6647_v29  ;;  %v3385_v45 = vmax.f32 %v970_v13, %v6648_v30 }
 0x221   : > { %v3386_v48 = vmax.f32 %v971_v8, %v6649_v32  ;;  %v3387_v47 = vmax.f32 %v972_v14, %v6650_v31  ;;  %v3388_v49 = vmax.f32 %v495_v1, %v6651_v36  ;;  %v3389_v50 = vmax.f32 %v973_v17, %v6652_v35  ;;  %v497_v1 = vld [vmem:[%s6959_s28 + $0x388] sm:$0xff] }
 0x222   : > { %v3390_v51 = vmax.f32 %v974_v16, %v6653_v33  ;;  %v3391_v54 = vmax.f32 %v975_v18, %v6654_v34  ;;  %v3672_v53 = vmax.f32 %v3376_v40, %v3384_v46  ;;  %v3673_v9 = vmax.f32 %v3377_v38, %v3385_v45 }
 0x223   : > { %v3674_v52 = vmax.f32 %v3378_v41, %v3386_v48  ;;  %v3675_v5 = vmax.f32 %v3379_v37, %v3387_v47  ;;  %v3676_v55 = vmax.f32 %v3380_v42, %v3388_v49  ;;  %v3677_v56 = vmax.f32 %v3381_v39, %v3389_v50 }
 0x224   : > { %v3678_v57 = vmax.f32 %v3382_v44, %v3390_v51  ;;  %v3679_v59 = vmax.f32 %v3383_v43, %v3391_v54  ;;  %v4184_v6 = vperm.slane %v3672_v53, 0  ;;  %v4185_v58 = vperm.slane %v3673_v9, 0 }
 0x225   : > { %v4186_v60 = vperm.slane %v3674_v52, 0  ;;  %v4187_v61 = vperm.slane %v3675_v5, 0  ;;  %v4188_v62 = vperm.slane %v3676_v55, 0  ;;  %v4189_v2 = vperm.slane %v3677_v56, 0 }
 0x226   : > { %v4190_v3 = vperm.slane %v3678_v57, 0  ;;  %v4191_v4 = vperm.slane %v3679_v59, 0  ;;  %v4420_v7 = vsel %vm4224_vm2, %v4185_v58, %v4184_v6  ;;  %v976_v12 = vrot.slane %v496_v10, 2 }
 0x227   : > { %v977_v13 = vrot.slane %v496_v10, 4  ;;  %v978_v8 = vrot.slane %v496_v10, 6  ;;  %v4421_v15 = vsel %vm4226_vm3, %v4186_v60, %v4420_v7  ;;  %v979_v14 = vrot.slane %v497_v1, 2 }
 0x228   : > { %v980_v17 = vrot.slane %v497_v1, 4  ;;  %v981_v16 = vrot.slane %v497_v1, 6  ;;  %v4422_v19 = vsel %vm4228_vm4, %v4187_v61, %v4421_v15  ;;  %v982_v18 = vrot.slane %v498_v63, 2  ;;  %v500_v61 = vld [vmem:[%s6959_s28 + $0x3a0] sm:$0xff] }
 0x229   : > { %v983_v21 = vrot.slane %v498_v63, 4  ;;  %v984_v20 = vrot.slane %v498_v63, 6  ;;  %v4423_v22 = vsel %vm4230_vm5, %v4188_v62, %v4422_v19  ;;  %v985_v23 = vrot.slane %v499_v11, 2 }
 0x22a   : > { %v986_v24 = vrot.slane %v499_v11, 4  ;;  %v987_v27 = vrot.slane %v499_v11, 6  ;;  %v4424_v26 = vsel %vm4232_vm6, %v4189_v2, %v4423_v22  ;;  %v6655_v28 = vrot.slane %v496_v10, 9 }
 0x22b   : > { %v6656_v25 = vrot.slane %v976_v12, 9  ;;  %v6657_v0 = vrot.slane %v977_v13, 9  ;;  %v4425_v29 = vsel %vm4234_vm7, %v4190_v3, %v4424_v26  ;;  %v6658_v30 = vrot.slane %v978_v8, 9 }
 0x22c   : > { %v6659_v32 = vrot.slane %v497_v1, 9  ;;  %v6660_v31 = vrot.slane %v979_v14, 9  ;;  %v4426_v36 = vsel %vm4236_vm8, %v4191_v4, %v4425_v29  ;;  %v6661_v35 = vrot.slane %v980_v17, 9  ;;  %v501_v4 = vld [vmem:[%s6959_s28 + $0x3a8] sm:$0xff] }
 0x22d   : > { %v6662_v33 = vrot.slane %v981_v16, 9  ;;  %v6663_v34 = vrot.slane %v498_v63, 9  ;;  %4515 = vst.msk [vmem:[#allocation2 + $0x2c1] sm:$0xff] %vm262_vm0, %v4426_v36  ;;  %v6664_v40 = vrot.slane %v982_v18, 9  ;;  %v6665_v38 = vrot.slane %v983_v21, 9 }
 0x22e   : > { %v6666_v41 = vrot.slane %v984_v20, 9  ;;  %v6667_v37 = vrot.slane %v499_v11, 9  ;;  %v6668_v42 = vrot.slane %v985_v23, 9  ;;  %v6669_v39 = vrot.slane %v986_v24, 9 }
 0x22f   : > { %v6670_v44 = vrot.slane %v987_v27, 9  ;;  %v3392_v43 = vmax.f32 %v496_v10, %v6655_v28  ;;  %v3393_v46 = vmax.f32 %v976_v12, %v6656_v25  ;;  %v3394_v45 = vmax.f32 %v977_v13, %v6657_v0  ;;  %v502_v13 = vld [vmem:[%s6959_s28 + $0x3b0] sm:$0xff] }
 0x230   : > { %v3395_v48 = vmax.f32 %v978_v8, %v6658_v30  ;;  %v3396_v47 = vmax.f32 %v497_v1, %v6659_v32  ;;  %v3397_v49 = vmax.f32 %v979_v14, %v6660_v31  ;;  %v3398_v50 = vmax.f32 %v980_v17, %v6661_v35  ;;  %v503_v17 = vld [vmem:[%s6959_s28 + $0x3b8] sm:$0xff] }
 0x231   : > { %v3399_v51 = vmax.f32 %v981_v16, %v6662_v33  ;;  %v3400_v54 = vmax.f32 %v498_v63, %v6663_v34  ;;  %v3401_v53 = vmax.f32 %v982_v18, %v6664_v40  ;;  %v3402_v9 = vmax.f32 %v983_v21, %v6665_v38 }
 0x232   : > { %v3403_v52 = vmax.f32 %v984_v20, %v6666_v41  ;;  %v3404_v5 = vmax.f32 %v499_v11, %v6667_v37  ;;  %v3405_v55 = vmax.f32 %v985_v23, %v6668_v42  ;;  %v3406_v56 = vmax.f32 %v986_v24, %v6669_v39 }
 0x233   : > { %v3407_v57 = vmax.f32 %v987_v27, %v6670_v44  ;;  %v3680_v59 = vmax.f32 %v3392_v43, %v3400_v54  ;;  %v3681_v10 = vmax.f32 %v3393_v46, %v3401_v53  ;;  %v3682_v6 = vmax.f32 %v3394_v45, %v3402_v9 }
 0x234   : > { %v3683_v58 = vmax.f32 %v3395_v48, %v3403_v52  ;;  %v3684_v60 = vmax.f32 %v3396_v47, %v3404_v5  ;;  %v3685_v1 = vmax.f32 %v3397_v49, %v3405_v55  ;;  %v3686_v62 = vmax.f32 %v3398_v50, %v3406_v56 }
 0x235   : > { %v3687_v2 = vmax.f32 %v3399_v51, %v3407_v57  ;;  %v4192_v3 = vperm.slane %v3680_v59, 0  ;;  %v4193_v63 = vperm.slane %v3681_v10, 0  ;;  %v4194_v7 = vperm.slane %v3682_v6, 0 }
 0x236   : > { %v4195_v12 = vperm.slane %v3683_v58, 0  ;;  %v4196_v11 = vperm.slane %v3684_v60, 0  ;;  %v4197_v8 = vperm.slane %v3685_v1, 0  ;;  %v4198_v15 = vperm.slane %v3686_v62, 0 }
 0x237   : > { %v4199_v14 = vperm.slane %v3687_v2, 0  ;;  %v988_v16 = vrot.slane %v500_v61, 2  ;;  %v4427_v19 = vsel %vm4224_vm2, %v4193_v63, %v4192_v3  ;;  %v989_v18 = vrot.slane %v500_v61, 4 }
 0x238   : > { %v990_v21 = vrot.slane %v500_v61, 6  ;;  %v991_v20 = vrot.slane %v501_v4, 2  ;;  %v4428_v22 = vsel %vm4226_vm3, %v4194_v7, %v4427_v19  ;;  %v992_v23 = vrot.slane %v501_v4, 4 }
 0x239   : > { %v993_v24 = vrot.slane %v501_v4, 6  ;;  %v994_v27 = vrot.slane %v502_v13, 2  ;;  %v4429_v26 = vsel %vm4228_vm4, %v4195_v12, %v4428_v22  ;;  %v995_v28 = vrot.slane %v502_v13, 4  ;;  %v504_v12 = vld [vmem:[%s6959_s28 + $0x3c0] sm:$0xff] }
 0x23a   : > { %v996_v25 = vrot.slane %v502_v13, 6  ;;  %v997_v0 = vrot.slane %v503_v17, 2  ;;  %v4430_v29 = vsel %vm4230_vm5, %v4196_v11, %v4429_v26  ;;  %v998_v30 = vrot.slane %v503_v17, 4 }
 0x23b   : > { %v999_v32 = vrot.slane %v503_v17, 6  ;;  %v6671_v31 = vrot.slane %v500_v61, 9  ;;  %v4431_v36 = vsel %vm4232_vm6, %v4197_v8, %v4430_v29  ;;  %v6672_v35 = vrot.slane %v988_v16, 9 }
 0x23c   : > { %v6673_v33 = vrot.slane %v989_v18, 9  ;;  %v6674_v34 = vrot.slane %v990_v21, 9  ;;  %v4432_v40 = vsel %vm4234_vm7, %v4198_v15, %v4431_v36  ;;  %v6675_v38 = vrot.slane %v501_v4, 9 }
 0x23d   : > { %v6676_v41 = vrot.slane %v991_v20, 9  ;;  %v6677_v37 = vrot.slane %v992_v23, 9  ;;  %v4433_v42 = vsel %vm4236_vm8, %v4199_v14, %v4432_v40  ;;  %v6678_v39 = vrot.slane %v993_v24, 9  ;;  %v505_v14 = vld [vmem:[%s6959_s28 + $0x3c8] sm:$0xff] }
 0x23e   : > { %v6679_v44 = vrot.slane %v502_v13, 9  ;;  %v6680_v43 = vrot.slane %v994_v27, 9  ;;  %4516 = vst.msk [vmem:[#allocation2 + $0x2d1] sm:$0xff] %vm262_vm0, %v4433_v42  ;;  %v6681_v46 = vrot.slane %v995_v28, 9  ;;  %v6682_v45 = vrot.slane %v996_v25, 9 }
 0x23f   : > { %v6683_v48 = vrot.slane %v503_v17, 9  ;;  %v6684_v47 = vrot.slane %v997_v0, 9  ;;  %v6685_v49 = vrot.slane %v998_v30, 9  ;;  %v6686_v50 = vrot.slane %v999_v32, 9 }
 0x240   : > { %v3408_v51 = vmax.f32 %v500_v61, %v6671_v31  ;;  %v3409_v54 = vmax.f32 %v988_v16, %v6672_v35  ;;  %v3410_v53 = vmax.f32 %v989_v18, %v6673_v33  ;;  %v3411_v9 = vmax.f32 %v990_v21, %v6674_v34  ;;  %v506_v21 = vld [vmem:[%s6959_s28 + $0x3d0] sm:$0xff] }
 0x241   : > { %v3412_v52 = vmax.f32 %v501_v4, %v6675_v38  ;;  %v3413_v5 = vmax.f32 %v991_v20, %v6676_v41  ;;  %v3414_v55 = vmax.f32 %v992_v23, %v6677_v37  ;;  %v3415_v56 = vmax.f32 %v993_v24, %v6678_v39  ;;  %v507_v24 = vld [vmem:[%s6959_s28 + $0x3d8] sm:$0xff] }
 0x242   : > { %v3416_v57 = vmax.f32 %v502_v13, %v6679_v44  ;;  %v3417_v59 = vmax.f32 %v994_v27, %v6680_v43  ;;  %v3418_v10 = vmax.f32 %v995_v28, %v6681_v46  ;;  %v3419_v6 = vmax.f32 %v996_v25, %v6682_v45 }
 0x243   : > { %v3420_v58 = vmax.f32 %v503_v17, %v6683_v48  ;;  %v3421_v60 = vmax.f32 %v997_v0, %v6684_v47  ;;  %v3422_v1 = vmax.f32 %v998_v30, %v6685_v49  ;;  %v3423_v62 = vmax.f32 %v999_v32, %v6686_v50 }
 0x244   : > { %v3688_v2 = vmax.f32 %v3408_v51, %v3416_v57  ;;  %v3689_v61 = vmax.f32 %v3409_v54, %v3417_v59  ;;  %v3690_v3 = vmax.f32 %v3410_v53, %v3418_v10  ;;  %v3691_v63 = vmax.f32 %v3411_v9, %v3419_v6 }
 0x245   : > { %v3692_v7 = vmax.f32 %v3412_v52, %v3420_v58  ;;  %v3693_v4 = vmax.f32 %v3413_v5, %v3421_v60  ;;  %v3694_v11 = vmax.f32 %v3414_v55, %v3422_v1  ;;  %v3695_v8 = vmax.f32 %v3415_v56, %v3423_v62 }
 0x246   : > { %v4200_v13 = vperm.slane %v3688_v2, 0  ;;  %v4201_v15 = vperm.slane %v3689_v61, 0  ;;  %v4202_v16 = vperm.slane %v3690_v3, 0  ;;  %v4203_v19 = vperm.slane %v3691_v63, 0 }
 0x247   : > { %v4204_v17 = vperm.slane %v3692_v7, 0  ;;  %v4205_v18 = vperm.slane %v3693_v4, 0  ;;  %v4206_v20 = vperm.slane %v3694_v11, 0  ;;  %v4207_v22 = vperm.slane %v3695_v8, 0 }
 0x248   : > { %v4434_v23 = vsel %vm4224_vm2, %v4201_v15, %v4200_v13  ;;  %v1000_v27 = vrot.slane %v504_v12, 2  ;;  %v1001_v28 = vrot.slane %v504_v12, 4  ;;  %v1002_v25 = vrot.slane %v504_v12, 6 }
 0x249   : > { %v4435_v26 = vsel %vm4226_vm3, %v4202_v16, %v4434_v23  ;;  %v1003_v0 = vrot.slane %v505_v14, 2  ;;  %v1004_v30 = vrot.slane %v505_v14, 4  ;;  %v1005_v32 = vrot.slane %v505_v14, 6  ;;  %v509_v23 = vld [vmem:[%s6959_s28 + $0x3e8] sm:$0xff] }
 0x24a   : > { %v4436_v29 = vsel %vm4228_vm4, %v4203_v19, %v4435_v26  ;;  %v1006_v31 = vrot.slane %v506_v21, 2  ;;  %v1007_v35 = vrot.slane %v506_v21, 4  ;;  %v1008_v33 = vrot.slane %v506_v21, 6 }
 0x24b   : > { %v4437_v36 = vsel %vm4230_vm5, %v4204_v17, %v4436_v29  ;;  %v1009_v34 = vrot.slane %v507_v24, 2  ;;  %v1010_v38 = vrot.slane %v507_v24, 4  ;;  %v1011_v41 = vrot.slane %v507_v24, 6  ;;  %v508_v17 = vld [vmem:[%s6959_s28 + $0x3e0] sm:$0xff] }
 0x24c   : > { %v4438_v40 = vsel %vm4232_vm6, %v4205_v18, %v4437_v36  ;;  %v6687_v37 = vrot.slane %v504_v12, 9  ;;  %v6688_v39 = vrot.slane %v1000_v27, 9  ;;  %v6689_v44 = vrot.slane %v1001_v28, 9 }
 0x24d   : > { %v4439_v42 = vsel %vm4234_vm7, %v4206_v20, %v4438_v40  ;;  %v6690_v43 = vrot.slane %v1002_v25, 9  ;;  %v6691_v45 = vrot.slane %v505_v14, 9  ;;  %v6692_v48 = vrot.slane %v1003_v0, 9 }
 0x24e   : > { %v4440_v46 = vsel %vm4236_vm8, %v4207_v22, %v4439_v42  ;;  %v6693_v47 = vrot.slane %v1004_v30, 9  ;;  %v6694_v49 = vrot.slane %v1005_v32, 9  ;;  %v6695_v50 = vrot.slane %v506_v21, 9 }
 0x24f   : > { %4517 = vst.msk [vmem:[#allocation2 + $0x2e1] sm:$0xff] %vm262_vm0, %v4440_v46  ;;  %v6696_v51 = vrot.slane %v1006_v31, 9  ;;  %v6697_v54 = vrot.slane %v1007_v35, 9  ;;  %v6698_v53 = vrot.slane %v1008_v33, 9  ;;  %v6699_v9 = vrot.slane %v507_v24, 9 }
 0x250   : > { %v6700_v52 = vrot.slane %v1009_v34, 9  ;;  %v6701_v5 = vrot.slane %v1010_v38, 9  ;;  %v6702_v55 = vrot.slane %v1011_v41, 9  ;;  %v3424_v56 = vmax.f32 %v504_v12, %v6687_v37 }
 0x251   : > { %v3425_v57 = vmax.f32 %v1000_v27, %v6688_v39  ;;  %v3426_v59 = vmax.f32 %v1001_v28, %v6689_v44  ;;  %v3427_v10 = vmax.f32 %v1002_v25, %v6690_v43  ;;  %v3428_v6 = vmax.f32 %v505_v14, %v6691_v45  ;;  %v510_v25 = vld [vmem:[%s6959_s28 + $0x3f0] sm:$0xff] }
 0x252   : > { %v3429_v58 = vmax.f32 %v1003_v0, %v6692_v48  ;;  %v3430_v60 = vmax.f32 %v1004_v30, %v6693_v47  ;;  %v3431_v1 = vmax.f32 %v1005_v32, %v6694_v49  ;;  %v3432_v62 = vmax.f32 %v506_v21, %v6695_v50  ;;  %v511_v30 = vld [vmem:[%s6959_s28 + $0x3f8] sm:$0xff] }
 0x253   : > { %v3433_v2 = vmax.f32 %v1006_v31, %v6696_v51  ;;  %v3434_v61 = vmax.f32 %v1007_v35, %v6697_v54  ;;  %v3435_v3 = vmax.f32 %v1008_v33, %v6698_v53  ;;  %v3436_v63 = vmax.f32 %v507_v24, %v6699_v9 }
 0x254   : > { %v3437_v7 = vmax.f32 %v1009_v34, %v6700_v52  ;;  %v3438_v4 = vmax.f32 %v1010_v38, %v6701_v5  ;;  %v3439_v11 = vmax.f32 %v1011_v41, %v6702_v55  ;;  %v3696_v8 = vmax.f32 %v3424_v56, %v3432_v62 }
 0x255   : > { %v3697_v13 = vmax.f32 %v3425_v57, %v3433_v2  ;;  %v3698_v12 = vmax.f32 %v3426_v59, %v3434_v61  ;;  %v3699_v15 = vmax.f32 %v3427_v10, %v3435_v3  ;;  %v3700_v16 = vmax.f32 %v3428_v6, %v3436_v63 }
 0x256   : > { %v3701_v14 = vmax.f32 %v3429_v58, %v3437_v7  ;;  %v3702_v19 = vmax.f32 %v3430_v60, %v3438_v4  ;;  %v3703_v18 = vmax.f32 %v3431_v1, %v3439_v11  ;;  %v4208_v21 = vperm.slane %v3696_v8, 0 }
 0x257   : > { %v4209_v20 = vperm.slane %v3697_v13, 0  ;;  %v4210_v22 = vperm.slane %v3698_v12, 0  ;;  %v4211_v24 = vperm.slane %v3699_v15, 0  ;;  %v4212_v27 = vperm.slane %v3700_v16, 0 }
 0x258   : > { %v4213_v26 = vperm.slane %v3701_v14, 0  ;;  %v4214_v28 = vperm.slane %v3702_v19, 0  ;;  %v4215_v0 = vperm.slane %v3703_v18, 0  ;;  %v1012_v32 = vrot.slane %v508_v17, 2 }
 0x259   : > { %v4441_v29 = vsel %vm4224_vm2, %v4209_v20, %v4208_v21  ;;  %v1013_v31 = vrot.slane %v508_v17, 4  ;;  %v1014_v35 = vrot.slane %v508_v17, 6  ;;  %v1015_v33 = vrot.slane %v509_v23, 2 }
 0x25a   : > { %v4442_v36 = vsel %vm4226_vm3, %v4210_v22, %v4441_v29  ;;  %v1016_v34 = vrot.slane %v509_v23, 4  ;;  %v1017_v38 = vrot.slane %v509_v23, 6  ;;  %v1018_v41 = vrot.slane %v510_v25, 2 }
 0x25b   : > { %v4443_v40 = vsel %vm4228_vm4, %v4211_v24, %v4442_v36  ;;  %v1019_v37 = vrot.slane %v510_v25, 4  ;;  %v1020_v39 = vrot.slane %v510_v25, 6  ;;  %v1021_v44 = vrot.slane %v511_v30, 2 }
 0x25c   : > { %v4444_v42 = vsel %vm4230_vm5, %v4212_v27, %v4443_v40  ;;  %v1022_v43 = vrot.slane %v511_v30, 4  ;;  %v1023_v45 = vrot.slane %v511_v30, 6  ;;  %v6703_v48 = vrot.slane %v508_v17, 9 }
 0x25d   : > { %v4445_v46 = vsel %vm4232_vm6, %v4213_v26, %v4444_v42  ;;  %v6704_v47 = vrot.slane %v1012_v32, 9  ;;  %v6705_v50 = vrot.slane %v1013_v31, 9  ;;  %v6706_v51 = vrot.slane %v1014_v35, 9 }
 0x25e   : > { %v4446_v49 = vsel %vm4234_vm7, %v4214_v28, %v4445_v46  ;;  %v6707_v54 = vrot.slane %v509_v23, 9  ;;  %v6708_v9 = vrot.slane %v1015_v33, 9  ;;  %v6709_v52 = vrot.slane %v1016_v34, 9 }
 0x25f   : > { %v4447_v53 = vsel %vm4236_vm8, %v4215_v0, %v4446_v49  ;;  %v6710_v5 = vrot.slane %v1017_v38, 9  ;;  %v6711_v55 = vrot.slane %v510_v25, 9  ;;  %v6712_v56 = vrot.slane %v1018_v41, 9 }
 0x260   : > { %4518 = vst.msk [vmem:[#allocation2 + $0x2f1] sm:$0xff] %vm262_vm0, %v4447_v53  ;;  %v6713_v57 = vrot.slane %v1019_v37, 9  ;;  %v6714_v59 = vrot.slane %v1020_v39, 9  ;;  %v6715_v10 = vrot.slane %v511_v30, 9  ;;  %v6716_v6 = vrot.slane %v1021_v44, 9 }
 0x261   : > { %v6717_v58 = vrot.slane %v1022_v43, 9  ;;  %v6718_v60 = vrot.slane %v1023_v45, 9  ;;  %v3440_v1 = vmax.f32 %v508_v17, %v6703_v48  ;;  %v3441_v62 = vmax.f32 %v1012_v32, %v6704_v47 }
 0x262   : > { %v3442_v2 = vmax.f32 %v1013_v31, %v6705_v50  ;;  %v3443_v61 = vmax.f32 %v1014_v35, %v6706_v51  ;;  %v3444_v3 = vmax.f32 %v509_v23, %v6707_v54  ;;  %v3445_v63 = vmax.f32 %v1015_v33, %v6708_v9 }
 0x263   : > { %v3446_v7 = vmax.f32 %v1016_v34, %v6709_v52  ;;  %v3447_v4 = vmax.f32 %v1017_v38, %v6710_v5  ;;  %v3448_v11 = vmax.f32 %v510_v25, %v6711_v55  ;;  %v3449_v8 = vmax.f32 %v1018_v41, %v6712_v56 }
 0x264   : > { %v3450_v13 = vmax.f32 %v1019_v37, %v6713_v57  ;;  %v3451_v12 = vmax.f32 %v1020_v39, %v6714_v59  ;;  %v3452_v15 = vmax.f32 %v511_v30, %v6715_v10  ;;  %v3453_v16 = vmax.f32 %v1021_v44, %v6716_v6 }
 0x265   : > { %v3454_v14 = vmax.f32 %v1022_v43, %v6717_v58  ;;  %v3455_v19 = vmax.f32 %v1023_v45, %v6718_v60  ;;  %v3704_v18 = vmax.f32 %v3440_v1, %v3448_v11  ;;  %v3705_v21 = vmax.f32 %v3441_v62, %v3449_v8 }
 0x266   : > { %v3706_v20 = vmax.f32 %v3442_v2, %v3450_v13  ;;  %v3707_v22 = vmax.f32 %v3443_v61, %v3451_v12  ;;  %v3708_v17 = vmax.f32 %v3444_v3, %v3452_v15  ;;  %v3709_v24 = vmax.f32 %v3445_v63, %v3453_v16 }
 0x267   : > { %v3710_v27 = vmax.f32 %v3446_v7, %v3454_v14  ;;  %v3711_v26 = vmax.f32 %v3447_v4, %v3455_v19  ;;  %v4216_v23 = vperm.slane %v3704_v18, 0  ;;  %v4217_v28 = vperm.slane %v3705_v21, 0 }
 0x268   : > { %v4218_v0 = vperm.slane %v3706_v20, 0  ;;  %v4219_v29 = vperm.slane %v3707_v22, 0  ;;  %v4220_v25 = vperm.slane %v3708_v17, 0  ;;  %v4221_v32 = vperm.slane %v3709_v24, 0 }
 0x269   : > { %v4448_v31 = vsel %vm4224_vm2, %v4217_v28, %v4216_v23  ;;  %v4222_v30 = vperm.slane %v3710_v27, 0  ;;  %v4223_v35 = vperm.slane %v3711_v26, 0 }
 0x26a   : > { %v4449_v36 = vsel %vm4226_vm3, %v4218_v0, %v4448_v31 }
 0x26b   : > { %v4450_v33 = vsel %vm4228_vm4, %v4219_v29, %v4449_v36 }
 0x26c   : > { %v4451_v34 = vsel %vm4230_vm5, %v4220_v25, %v4450_v33 }
 0x26d   : > { %v4452_v40 = vsel %vm4232_vm6, %v4221_v32, %v4451_v34 }
 0x26e   : > { %v4453_v38 = vsel %vm4234_vm7, %v4222_v30, %v4452_v40 }
 0x26f   : > { %v4454_v41 = vsel %vm4236_vm8, %v4223_v35, %v4453_v38 }
 0x270   : > { %4519 = vst.msk [vmem:[#allocation2 + $0x301] sm:$0xff] %vm262_vm0, %v4454_v41 }
 0x271 PF: > { %s4520_s14 = smul.u32 160, %s6857_s18  ;;  %vm4598_vm9 = vcmask 1046528   ;;  %s6876_s16 = smov 4   ;;  %vm4647_vm10 = vcmask 1045504   ;;  %vm5097_vm11 = vcmask 31744   ;;  %vm5106_vm12 = vcmask 64512  }
 0x272   : > { %s6877_s17 = smov 8   ;;  %s6878_s19 = smov 12   ;;  %vm5115_vm13 = vcmask 97280   ;;  %vm5124_vm14 = vcmask 130048   ;;  %vm5133_vm15 = vcmask 162816   ;;  %vm5142_vm0 = vcmask 195584  }
 0x273   : > { %s7659_s15 = scalar_lea.vmem [#allocation2], %s4520_s14  ;;  %s6879_s23 = smov 16   ;;  %vm5151_vm1 = vcmask 228352   ;;  %vm5160_vm2 = vcmask 261120   ;;  %vm5169_vm3 = vcmask 293888   ;;  %vm5178_vm4 = vcmask 326656  }
 0x274   : > { %s6880_s24 = smov 20   ;;  %s6881_s25 = smov 24   ;;  %vm9384_vm5 = vcmask 392192   ;;  %vm9383_vm6 = vcmask 359424   ;;  %vm5205_vm7 = vcmask 424960   ;;  %vm5214_vm8 = vcmask 457728  }
 0x275   : > { %s6882_s26 = smov 28   ;;  %s6883_s27 = smov 32  }
 0x276   : > { %s6884_s28 = smov 36   ;;  %s6885_s29 = smov 40  }
 0x277   : > { %v7662_v37 = vld [vmem:[%s7659_s15 + $0x40] sm:$0xff]  ;;  %v7665_v42 = vld [vmem:[%s7659_s15 + $0x48] sm:$0x3]  ;;  %v7677_v51 = vld [vmem:[%s7659_s15 + $0x50] sm:$0xff]  ;;  %s6886_s30 = smov 44   ;;  %s6887_s6 = smov 48  }
 0x278   : > { %v7668_v39 = vld [vmem:[%s7659_s15 + $0x20] sm:$0xff]  ;;  %v4611_v44 = vrot.slane %v7662_v37, 1  ;;  %v4612_v43 = vrot.slane %v7665_v42, 1  ;;  %v4527_v46 = vld [vmem:[%s7659_s15 + $0x28] sm:$0x3]  ;;  %v7684_v52 = vld [vmem:[%s7659_s15 + $0x30] sm:$0xff] }
 0x279   : > { %v4605_v45 = vrot.slane %v7668_v39, 1  ;;  %v4522_v48 = vld [vmem:[%s7659_s15] sm:$0xff]  ;;  %v4606_v47 = vrot.slane %v4527_v46, 1  ;;  %v4523_v49 = vld [vmem:[%s7659_s15 + $0x8] sm:$0x3]  ;;  %v7693_v56 = vld [vmem:[%s7659_s15 + $0x10] sm:$0xff] }
 0x27a   : > { %v4599_v50 = vrot.slane %v4522_v48, 1  ;;  %v7680_v54 = vsel %vm4598_vm9, %v4611_v44, %v4612_v43  ;;  %v4600_v53 = vrot.slane %v4523_v49, 1  ;;  %v4533_v9 = vld [vmem:[%s7659_s15 + $0x58] sm:$0x3]  ;;  %v4614_v10 = vrot.slane %v7677_v51, 1  ;;  %v7711_v63 = vld [vmem:[%s7659_s15 + $0x70] sm:$0xff] }
 0x27b   : > { %v4529_v5 = vld [vmem:[%s7659_s15 + $0x38] sm:$0x3]  ;;  %4631 = vrot.lane.b32.xlu2 %v7680_v54, %s6876_s16  ;;  %v7690_v55 = vsel %vm4598_vm9, %v4605_v45, %v4606_v47  ;;  %v4615_v6 = vrot.slane %v4533_v9, 1  ;;  %v4608_v58 = vrot.slane %v7684_v52, 1  ;;  %v4602_v1 = vrot.slane %v7693_v56, 1  ;;  %v7717_v4 = vld [vmem:[%s7659_s15 + $0x60] sm:$0xff] }
 0x27c   : > { %v4525_v57 = vld [vmem:[%s7659_s15 + $0x18] sm:$0x3]  ;;  %4627 = vrot.lane.b32.xlu1 %v7690_v55, %s6876_s16  ;;  %v4601_v59 = vsel %vm4598_vm9, %v4599_v50, %v4600_v53  ;;  %v4609_v60 = vrot.slane %v4529_v5, 1  ;;  %v4535_v11 = vld [vmem:[%s7659_s15 + $0x68] sm:$0x3]  ;;  %v4648_v8 = vrot.slane %v4522_v48, 2 }
 0x27d   : > { %4623 = vrot.lane.b32.xlu0 %v4601_v59, %s6876_s16  ;;  %v4603_v62 = vrot.slane %v4525_v57, 1  ;;  %v7704_v2 = vsel %vm4598_vm9, %v4614_v10, %v4615_v6  ;;  %v4537_v7 = vld [vmem:[%s7659_s15 + $0x78] sm:$0x3]  ;;  %v4649_v13 = vrot.slane %v4523_v49, 2  ;;  %v4620_v12 = vrot.slane %v7711_v63, 1  ;;  %s6888_s7 = smov 52  }
 0x27e   : > { %v7707_v61 = vsel %vm4598_vm9, %v4608_v58, %v4609_v60  ;;  %v4621_v15 = vrot.slane %v4537_v7, 1  ;;  %v4617_v16 = vrot.slane %v7717_v4, 1  ;;  %v4618_v14 = vrot.slane %v4535_v11, 1  ;;  %v4539_v44 = vld [vmem:[%s7659_s15 + $0x88] sm:$0x3]  ;;  %s6889_s8 = smov 56  }
 0x27f   : > { %v4604_v3 = vsel %vm4598_vm9, %v4602_v1, %v4603_v62  ;;  %v4650_v19 = vsel %vm4647_vm10, %v4648_v8, %v4649_v13  ;;  %v4657_v20 = vrot.slane %v7684_v52, 2  ;;  %v4658_v22 = vrot.slane %v4529_v5, 2  ;;  %v4541_v62 = vld [vmem:[%s7659_s15 + $0x98] sm:$0x3]  ;;  %s6890_s9 = smov 60   ;;  %s6891_s11 = smov 64  }
 0x280   : > { %v7727_v18 = vsel %vm4598_vm9, %v4620_v12, %v4621_v15  ;;  %v7730_v21 = vsel %vm4598_vm9, %v4617_v16, %v4618_v14  ;;  %v4654_v17 = vrot.slane %v7668_v39, 2  ;;  %v4655_v24 = vrot.slane %v4527_v46, 2 }
 0x281   : > { %v4651_v27 = vrot.slane %v7693_v56, 2  ;;  %v4652_v26 = vrot.slane %v4525_v57, 2  ;;  %v7741_v23 = vsel %vm4647_vm10, %v4657_v20, %v4658_v22  ;;  %v4666_v29 = vrot.slane %v7717_v4, 2  ;;  %v7917_v22 = vld [vmem:[%s7659_s15 + $0xb0] sm:$0xff] }
 0x282   : > { %v7744_v28 = vsel %vm4647_vm10, %v4654_v17, %v4655_v24  ;;  %v4667_v25 = vrot.slane %v4535_v11, 2  ;;  %v4663_v32 = vrot.slane %v7677_v51, 2  ;;  %v4664_v31 = vrot.slane %v4533_v9, 2  ;;  %v7920_v17 = vld [vmem:[%s7659_s15 + $0xa0] sm:$0xff] }
 0x283   : > { %4633 = vrot.lane.b32.xlu2 %v7704_v2, %s6876_s16  ;;  %v4653_v0 = vsel %vm4647_vm10, %v4651_v27, %v4652_v26  ;;  %v4660_v30 = vrot.slane %v7662_v37, 2  ;;  %v4661_v36 = vrot.slane %v7665_v42, 2  ;;  %v4669_v40 = vrot.slane %v7711_v63, 2  ;;  %v4538_v42 = vld [vmem:[%s7659_s15 + $0x80] sm:$0xff] }
 0x284   : > { %4629 = vrot.lane.b32.xlu1 %v7707_v61, %s6876_s16  ;;  %v7757_v35 = vsel %vm4647_vm10, %v4666_v29, %v4667_v25  ;;  %v7760_v33 = vsel %vm4647_vm10, %v4663_v32, %v4664_v31  ;;  %v4670_v38 = vrot.slane %v4537_v7, 2  ;;  %v4722_v43 = vrot.slane %v4538_v42, 1  ;;  %v7941_v29 = vld [vmem:[%s7659_s15 + $0xc0] sm:$0xff] }
 0x285   : > { %4625 = vrot.lane.b32.xlu0 %v4604_v3, %s6876_s16  ;;  %v7763_v34 = vsel %vm4647_vm10, %v4660_v30, %v4661_v36  ;;  %v4723_v46 = vrot.slane %v4539_v44, 1  ;;  %v4749_v49 = vrot.slane %v4538_v42, 2  ;;  %v4750_v50 = vrot.slane %v4539_v44, 2  ;;  %v7956_v30 = vld [vmem:[%s7659_s15 + $0x110] sm:$0xff]  ;;  %v7959_v36 = vld [vmem:[%s7659_s15 + $0x100] sm:$0xff] }
 0x286   : > { %v7773_v41 = vsel %vm4647_vm10, %v4669_v40, %v4670_v38  ;;  %9403 = vst [vmem:[#allocation21_spill] sm:$0xff] %v7956_v30  ;;  %v4543_v40 = vld [vmem:[%s7659_s15 + $0xa8] sm:$0x3]  ;;  %v4902_v38 = vrot.slane %v7941_v29, 1  ;;  %v4899_v44 = vrot.slane %v7917_v22, 1 }
 0x287   : > { %v4724_v45 = vsel %vm4598_vm9, %v4722_v43, %v4723_v46  ;;  %v4751_v53 = vsel %vm4647_vm10, %v4749_v49, %v4750_v50  ;;  %v4896_v46 = vrot.slane %v7920_v17, 1  ;;  %v4897_v49 = vrot.slane %v4543_v40, 1 }
 0x28b   : > { %4672 = vrot.lane.b32.xlu2 %v4650_v19, %s6877_s17 }
 0x28c   : > { %4637 = vrot.lane.b32.xlu1 %v7727_v18, %s6876_s16 }
 0x28d   : > { %4635 = vrot.lane.b32.xlu0 %v7730_v21, %s6876_s16 }
 0x293   : > { %4678 = vrot.lane.b32.xlu2 %v7741_v23, %s6877_s17 }
 0x294   : > { %4676 = vrot.lane.b32.xlu1 %v7744_v28, %s6877_s17 }
 0x295   : > { %4674 = vrot.lane.b32.xlu0 %v4653_v0, %s6877_s17 }
 0x29b   : > { %4684 = vrot.lane.b32.xlu2 %v7757_v35, %s6877_s17 }
 0x29c   : > { %4682 = vrot.lane.b32.xlu1 %v7760_v33, %s6877_s17 }
 0x29d   : > { %4680 = vrot.lane.b32.xlu0 %v7763_v34, %s6877_s17 }
 0x2a3   : > { %4699 = vrot.lane.b32.xlu2 %v7668_v39, %s6878_s19 }
 0x2a4   : > { %4697 = vrot.lane.b32.xlu1 %v7693_v56, %s6878_s19 }
 0x2a5   : > { %4686 = vrot.lane.b32.xlu0 %v7773_v41, %s6877_s17 }
 0x2ab   : > { %4705 = vrot.lane.b32.xlu2 %v7677_v51, %s6878_s19 }
 0x2ac   : > { %4703 = vrot.lane.b32.xlu1 %v7662_v37, %s6878_s19 }
 0x2ad   : > { %4701 = vrot.lane.b32.xlu0 %v7684_v52, %s6878_s19 }
 0x2b3   : > { %4711 = vrot.lane.b32.xlu2 %v4538_v42, %s6878_s19 }
 0x2b4   : > { %4709 = vrot.lane.b32.xlu1 %v7711_v63, %s6878_s19 }
 0x2b5   : > { %4707 = vrot.lane.b32.xlu0 %v7717_v4, %s6878_s19 }
 0x2bb   : > { %4729 = vrot.lane.b32.xlu2 %v7707_v61, %s6879_s23 }
 0x2bc   : > { %4727 = vrot.lane.b32.xlu1 %v7690_v55, %s6879_s23 }
 0x2bd   : > { %4725 = vrot.lane.b32.xlu0 %v4604_v3, %s6879_s23 }
 0x2c3   : > { %4735 = vrot.lane.b32.xlu2 %v7730_v21, %s6879_s23 }
 0x2c4   : > { %4733 = vrot.lane.b32.xlu1 %v7704_v2, %s6879_s23 }
 0x2c5   : > { %4731 = vrot.lane.b32.xlu0 %v7680_v54, %s6879_s23 }
 0x2cb   : > { %4752 = vrot.lane.b32.xlu2 %v4653_v0, %s6880_s24  ;;  %v7938_v0 = vld [vmem:[%s7659_s15 + $0xd0] sm:$0xff] }
 0x2cc   : > { %4739 = vrot.lane.b32.xlu1 %v4724_v45, %s6879_s23 }
 0x2cd   : > { %4737 = vrot.lane.b32.xlu0 %v7727_v18, %s6879_s23 }
 0x2d3   : > { %4758 = vrot.lane.b32.xlu2 %v7763_v34, %s6880_s24 }
 0x2d4   : > { %4756 = vrot.lane.b32.xlu1 %v7741_v23, %s6880_s24 }
 0x2d5   : > { %4754 = vrot.lane.b32.xlu0 %v7744_v28, %s6880_s24  ;;  %v7816_v48 = vpop.permute.xlu2 %4631 }
 0x2d6   : > { %9385 = vst [vmem:[#allocation3_spill] sm:$0xff] %v7816_v48 }
 0x2db   : > { %4764 = vrot.lane.b32.xlu2 %v7773_v41, %s6880_s24 }
 0x2dc   : > { %4762 = vrot.lane.b32.xlu1 %v7757_v35, %s6880_s24 }
 0x2dd   : > { %4760 = vrot.lane.b32.xlu0 %v7760_v33, %s6880_s24  ;;  %v7824_v47 = vpop.permute.xlu2 %4633 }
 0x2e3   : > { %4779 = vrot.lane.b32.xlu2 %v7684_v52, %s6881_s25 }
 0x2e4   : > { %4777 = vrot.lane.b32.xlu1 %v7668_v39, %s6881_s25  ;;  %v4540_v39 = vld [vmem:[%s7659_s15 + $0x90] sm:$0xff] }
 0x2e5   : > { %4766 = vrot.lane.b32.xlu0 %v4751_v53, %s6880_s24  ;;  %v7832_v9 = vpop.permute.xlu2 %4672  ;;  %v4829_v19 = vrot.slane %v4540_v39, 2 }
 0x2e6   : > { %9386 = vst [vmem:[#allocation4_spill] sm:$0xff] %v7832_v9 }
 0x2eb   : > { %4785 = vrot.lane.b32.xlu2 %v7717_v4, %s6881_s25 }
 0x2ec   : > { %4783 = vrot.lane.b32.xlu1 %v7677_v51, %s6881_s25 }
 0x2ed   : > { %4781 = vrot.lane.b32.xlu0 %v7662_v37, %s6881_s25  ;;  %v7840_v5 = vpop.permute.xlu2 %4678 }
 0x2ee   : > { %v7842_v57 = vpop.permute.xlu1 %4627 }
 0x2ef   : > { %9387 = vst [vmem:[#allocation5_spill] sm:$0xff] %v7842_v57  ;;  %v7844_v59 = vpop.permute.xlu0 %4623  ;;  %v8044_v57 = vld [vmem:[%s7659_s15 + $0x108] sm:$0x3] }
 0x2f0   : > { %9388 = vst [vmem:[#allocation6_spill] sm:$0xff] %v7844_v59 }
 0x2f3   : > { %4791 = vrot.lane.b32.xlu2 %v4540_v39, %s6881_s25 }
 0x2f4   : > { %4789 = vrot.lane.b32.xlu1 %v4538_v42, %s6881_s25 }
 0x2f5   : > { %4787 = vrot.lane.b32.xlu0 %v7711_v63, %s6881_s25  ;;  %v7851_v10 = vpop.permute.xlu2 %4684 }
 0x2f6   : > { %9389 = vst [vmem:[#allocation7_spill] sm:$0xff] %v7851_v10  ;;  %v7853_v6 = vpop.permute.xlu1 %4629 }
 0x2f7   : > { %v7855_v37 = vpop.permute.xlu0 %4625 }
 0x2fb   : > { %4809 = vrot.lane.b32.xlu2 %v7680_v54, %s6882_s26  ;;  %v4802_v54 = vrot.slane %v4540_v39, 1 }
 0x2fc   : > { %4807 = vrot.lane.b32.xlu1 %v7707_v61, %s6882_s26 }
 0x2fd   : > { %4805 = vrot.lane.b32.xlu0 %v7690_v55, %s6882_s26  ;;  %v7863_v58 = vpop.permute.xlu2 %4699  ;;  %v4803_v55 = vrot.slane %v4541_v62, 1 }
 0x2fe   : > { %v7865_v60 = vpop.permute.xlu1 %4637 }
 0x2ff   : > { %v7867_v1 = vpop.permute.xlu0 %4635  ;;  %v4804_v11 = vsel %vm4598_vm9, %v4802_v54, %v4803_v55  ;;  %v4898_v54 = vsel %vm4598_vm9, %v4896_v46, %v4897_v49  ;;  %v8001_v55 = vld [vmem:[%s7659_s15 + $0xe8] sm:$0x3]  ;;  %v4905_v46 = vrot.slane %v7938_v0, 1 }
 0x303   : > { %4815 = vrot.lane.b32.xlu2 %v7727_v18, %s6882_s26 }
 0x304   : > { %4813 = vrot.lane.b32.xlu1 %v7730_v21, %s6882_s26  ;;  %v4830_v21 = vrot.slane %v4541_v62, 2  ;;  %v7997_v62 = vld [vmem:[%s7659_s15 + $0xf8] sm:$0x3] }
 0x305   : > { %4811 = vrot.lane.b32.xlu0 %v7704_v2, %s6882_s26  ;;  %v7876_v61 = vpop.permute.xlu2 %4705 }
 0x306   : > { %9390 = vst [vmem:[#allocation8_spill] sm:$0xff] %v7876_v61  ;;  %v7878_v3 = vpop.permute.xlu1 %4676  ;;  %v4831_v24 = vsel %vm4647_vm10, %v4829_v19, %v4830_v21  ;;  %v9364_v21 = vrot.slane %v7997_v62, 1 }
 0x307   : > { %9391 = vst [vmem:[#allocation9_spill] sm:$0xff] %v7878_v3  ;;  %v7880_v7 = vpop.permute.xlu0 %4674  ;;  %v8039_v3 = vld [vmem:[%s7659_s15 + $0x118] sm:$0x3] }
 0x30b   : > { %4832 = vrot.lane.b32.xlu2 %v7744_v28, %s6883_s27  ;;  %v7935_v28 = vld [vmem:[%s7659_s15 + $0xe0] sm:$0xff] }
 0x30c   : > { %4819 = vrot.lane.b32.xlu1 %v4804_v11, %s6882_s26  ;;  %9401 = vst [vmem:[#allocation19_spill] sm:$0xff] %v7935_v28  ;;  %v8006_v11 = vld [vmem:[%s7659_s15 + $0xd8] sm:$0x3] }
 0x30d   : > { %4817 = vrot.lane.b32.xlu0 %v4724_v45, %s6882_s26  ;;  %v7887_v8 = vpop.permute.xlu2 %4711  ;;  %v9365_v49 = vrot.slane %v8006_v11, 1 }
 0x30e   : > { %v7889_v2 = vpop.permute.xlu1 %4682 }
 0x30f   : > { %9392 = vst [vmem:[#allocation10_spill] sm:$0xff] %v7889_v2  ;;  %v7891_v13 = vpop.permute.xlu0 %4680 }
 0x310   : > { %9393 = vst [vmem:[#allocation11_spill] sm:$0xff] %v7891_v13  ;;  %v4962_v13 = vrot.slane %v7959_v36, 2 }
 0x313   : > { %4838 = vrot.lane.b32.xlu2 %v7760_v33, %s6883_s27  ;;  %v7965_v33 = vld [vmem:[%s7659_s15 + $0xf0] sm:$0xff] }
 0x314   : > { %4836 = vrot.lane.b32.xlu1 %v7763_v34, %s6883_s27  ;;  %v7968_v34 = vld [vmem:[%s7659_s15 + $0xb8] sm:$0x3]  ;;  %v4911_v19 = vrot.slane %v7965_v33, 1 }
 0x315   : > { %4834 = vrot.lane.b32.xlu0 %v7741_v23, %s6883_s27  ;;  %v7899_v12 = vpop.permute.xlu2 %4729  ;;  %v4900_v43 = vrot.slane %v7968_v34, 1 }
 0x316   : > { %9394 = vst [vmem:[#allocation12_spill] sm:$0xff] %v7899_v12  ;;  %v7901_v15 = vpop.permute.xlu1 %4697  ;;  %v8026_v12 = vsel %vm4598_vm9, %v4911_v19, %v9364_v21  ;;  %v4944_v19 = vrot.slane %v7920_v17, 2  ;;  %v4945_v21 = vrot.slane %v4543_v40, 2 }
 0x317   : > { %9395 = vst [vmem:[#allocation13_spill] sm:$0xff] %v7901_v15  ;;  %v7903_v16 = vpop.permute.xlu0 %4686  ;;  %v7994_v39 = vsel %vm4598_vm9, %v4899_v44, %v4900_v43  ;;  %v9366_v44 = vrot.slane %v8001_v55, 1 }
 0x318   : > { %v4946_v15 = vsel %vm4647_vm10, %v4944_v19, %v4945_v21  ;;  %v4954_v21 = vrot.slane %v8006_v11, 2 }
 0x31b   : > { %4844 = vrot.lane.b32.xlu2 %v4751_v53, %s6883_s27 }
 0x31c   : > { %4842 = vrot.lane.b32.xlu1 %v7773_v41, %s6883_s27 }
 0x31d   : > { %4840 = vrot.lane.b32.xlu0 %v7757_v35, %s6883_s27  ;;  %v7910_v14 = vpop.permute.xlu2 %4735  ;;  %v7962_v35 = vld [vmem:[%s7659_s15 + $0xc8] sm:$0x3] }
 0x31e   : > { %9396 = vst [vmem:[#allocation14_spill] sm:$0xff] %v7910_v14  ;;  %v7912_v18 = vpop.permute.xlu1 %4703  ;;  %v9363_v41 = vrot.slane %v7962_v35, 1  ;;  %v4965_v14 = vrot.slane %v7956_v30, 2 }
 0x31f   : > { %v7914_v20 = vpop.permute.xlu0 %4701 }
 0x320   : > { %9397 = vst [vmem:[#allocation15_spill] sm:$0xff] %v7914_v20  ;;  %v7991_v53 = vsel %vm4598_vm9, %v4902_v38, %v9363_v41  ;;  %v4908_v38 = vrot.slane %v7935_v28, 1  ;;  %v8036_v20 = vsel %vm4598_vm9, %v4905_v46, %v9365_v49  ;;  %v4917_v46 = vrot.slane %v7956_v30, 1 }
 0x321   : > { %v9368_v49 = vrot.slane %v8039_v3, 1 }
 0x323   : > { %4866 = vrot.lane.b32.xlu2 %v7917_v22, %s6884_s28  ;;  %v8065_v40 = vsel %vm4598_vm9, %v4917_v46, %v9368_v49  ;;  %v4950_v46 = vrot.slane %v7941_v29, 2  ;;  %v4948_v49 = vrot.slane %v7968_v34, 2  ;;  %v4963_v34 = vrot.slane %v8044_v57, 2 }
 0x324   : > { %4864 = vrot.lane.b32.xlu1 %v7920_v17, %s6884_s28 }
 0x325   : > { %4846 = vrot.lane.b32.xlu0 %v4831_v24, %s6883_s27  ;;  %v7928_v27 = vpop.permute.xlu2 %4752  ;;  %v4964_v48 = vsel %vm4647_vm10, %v4962_v13, %v4963_v34 }
 0x326   : > { %9398 = vst [vmem:[#allocation16_spill] sm:$0xff] %v7928_v27  ;;  %v7930_v26 = vpop.permute.xlu1 %4709  ;;  %v4914_v27 = vrot.slane %v7959_v36, 1 }
 0x327   : > { %9399 = vst [vmem:[#allocation17_spill] sm:$0xff] %v7930_v26  ;;  %v7932_v23 = vpop.permute.xlu0 %4707 }
 0x328   : > { %9400 = vst [vmem:[#allocation18_spill] sm:$0xff] %v7932_v23 }
 0x32b   : > { %4872 = vrot.lane.b32.xlu2 %v7935_v28, %s6884_s28 }
 0x32c   : > { %4870 = vrot.lane.b32.xlu1 %v7938_v0, %s6884_s28 }
 0x32d   : > { %4868 = vrot.lane.b32.xlu0 %v7941_v29, %s6884_s28  ;;  %v7949_v25 = vpop.permute.xlu2 %4758 }
 0x32e   : > { %v7951_v32 = vpop.permute.xlu1 %4727 }
 0x32f   : > { %v7953_v31 = vpop.permute.xlu0 %4725 }
 0x330   : > { %9402 = vst [vmem:[#allocation20_spill] sm:$0xff] %v7953_v31  ;;  %v9367_v31 = vrot.slane %v8044_v57, 1 }
 0x332   : > { %v8070_v9 = vsel %vm4598_vm9, %v4914_v27, %v9367_v31  ;;  %v4951_v27 = vrot.slane %v7962_v35, 2 }
 0x333   : > { %4878 = vrot.lane.b32.xlu2 %v7956_v30, %s6884_s28 }
 0x334   : > { %4876 = vrot.lane.b32.xlu1 %v7959_v36, %s6884_s28 }
 0x335   : > { %4874 = vrot.lane.b32.xlu0 %v7965_v33, %s6884_s28  ;;  %v7979_v42 = vpop.permute.xlu2 %4764 }
 0x336   : > { %9404 = vst [vmem:[#allocation22_spill] sm:$0xff] %v7979_v42  ;;  %v7984_v45 = vpop.permute.xlu1 %4733 }
 0x337   : > { %9405 = vst [vmem:[#allocation23_spill] sm:$0xff] %v7984_v45  ;;  %v7986_v50 = vpop.permute.xlu0 %4731  ;;  %v8093_v45 = vsel %vm4647_vm10, %v4950_v46, %v4951_v27  ;;  %v4956_v27 = vrot.slane %v7935_v28, 2 }
 0x33b   : > { %4924 = vrot.lane.b32.xlu2 %v7991_v53, %s6885_s29 }
 0x33c   : > { %4922 = vrot.lane.b32.xlu1 %v7994_v39, %s6885_s29 }
 0x33d   : > { %4920 = vrot.lane.b32.xlu0 %v4898_v54, %s6885_s29  ;;  %v8013_v24 = vpop.permute.xlu2 %4779  ;;  %v8031_v54 = vsel %vm4598_vm9, %v4908_v38, %v9366_v44 }
 0x33e   : > { %v8017_v43 = vpop.permute.xlu1 %4739 }
 0x33f   : > { %v8021_v41 = vpop.permute.xlu0 %4737 }
 0x340   : > { %9406 = vst [vmem:[#allocation24_spill] sm:$0xff] %v8021_v41  ;;  %v4966_v41 = vrot.slane %v8039_v3, 2 }
 0x342   : > { %v4967_v34 = vsel %vm4647_vm10, %v4965_v14, %v4966_v41 }
 0x343   : > { %4930 = vrot.lane.b32.xlu2 %v8026_v12, %s6885_s29 }
 0x344   : > { %4928 = vrot.lane.b32.xlu1 %v8031_v54, %s6885_s29 }
 0x345   : > { %4926 = vrot.lane.b32.xlu0 %v8036_v20, %s6885_s29  ;;  %v8051_v38 = vpop.permute.xlu2 %4785 }
 0x346   : > { %9407 = vst [vmem:[#allocation25_spill] sm:$0xff] %v8051_v38  ;;  %v8055_v44 = vpop.permute.xlu1 %4756 }
 0x347   : > { %9408 = vst [vmem:[#allocation26_spill] sm:$0xff] %v8055_v44  ;;  %v8059_v17 = vpop.permute.xlu0 %4754  ;;  %v4953_v44 = vrot.slane %v7938_v0, 2 }
 0x349   : > { %v8090_v38 = vsel %vm4647_vm10, %v4953_v44, %v4954_v21  ;;  %v4959_v21 = vrot.slane %v7965_v33, 2 }
 0x34b   : > { %4968 = vrot.lane.b32.xlu2 %v4946_v15, %s6886_s30  ;;  %v4947_v15 = vrot.slane %v7917_v22, 2 }
 0x34c   : > { %4934 = vrot.lane.b32.xlu1 %v8065_v40, %s6885_s29 }
 0x34d   : > { %4932 = vrot.lane.b32.xlu0 %v8070_v9, %s6885_s29  ;;  %v8079_v19 = vpop.permute.xlu2 %4791  ;;  %v8096_v61 = vsel %vm4647_vm10, %v4947_v15, %v4948_v49  ;;  %v4960_v49 = vrot.slane %v7997_v62, 2  ;;  %v4957_v15 = vrot.slane %v8001_v55, 2 }
 0x34e   : > { %v8083_v31 = vpop.permute.xlu1 %4762 }
 0x34f   : > { %9409 = vst [vmem:[#allocation27_spill] sm:$0xff] %v8083_v31  ;;  %v8087_v59 = vpop.permute.xlu0 %4760  ;;  %v4961_v31 = vsel %vm4647_vm10, %v4959_v21, %v4960_v49  ;;  %v4958_v42 = vsel %vm4647_vm10, %v4956_v27, %v4957_v15  ;;  %v8150_v15 = vld [vmem:[%s7659_s15 + $0x120] sm:$0xff] }
 0x350   : > { %9410 = vst [vmem:[#allocation28_spill] sm:$0xff] %v8087_v59 }
 0x351   : > { %9420 = vst [vmem:[#allocation38_spill] sm:$0xff] %v8150_v15 }
 0x353   : > { %4974 = vrot.lane.b32.xlu2 %v8090_v38, %s6886_s30 }
 0x354   : > { %4972 = vrot.lane.b32.xlu1 %v8093_v45, %s6886_s30 }
 0x355   : > { %4970 = vrot.lane.b32.xlu0 %v8096_v61, %s6886_s30  ;;  %v8106_v44 = vpop.permute.xlu2 %4809 }
 0x356   : > { %9411 = vst [vmem:[#allocation29_spill] sm:$0xff] %v8106_v44  ;;  %v8110_v46 = vpop.permute.xlu1 %4777 }
 0x357   : > { %9412 = vst [vmem:[#allocation30_spill] sm:$0xff] %v8110_v46  ;;  %v8114_v59 = vpop.permute.xlu0 %4766 }
 0x35b   : > { %4980 = vrot.lane.b32.xlu2 %v4964_v48, %s6886_s30 }
 0x35c   : > { %4978 = vrot.lane.b32.xlu1 %v4961_v31, %s6886_s30 }
 0x35d   : > { %4976 = vrot.lane.b32.xlu0 %v4958_v42, %s6886_s30  ;;  %v8122_v44 = vpop.permute.xlu2 %4815 }
 0x35e   : > { %9413 = vst [vmem:[#allocation31_spill] sm:$0xff] %v8122_v44  ;;  %v8124_v46 = vpop.permute.xlu1 %4783 }
 0x35f   : > { %v8128_v13 = vpop.permute.xlu0 %4781 }
 0x360   : > { %9414 = vst [vmem:[#allocation32_spill] sm:$0xff] %v8128_v13 }
 0x363   : > { %4995 = vrot.lane.b32.xlu2 %v7941_v29, %s6887_s6 }
 0x364   : > { %4993 = vrot.lane.b32.xlu1 %v7917_v22, %s6887_s6 }
 0x365   : > { %4982 = vrot.lane.b32.xlu0 %v4967_v34, %s6886_s30  ;;  %v8134_v21 = vpop.permute.xlu2 %4832 }
 0x366   : > { %9415 = vst [vmem:[#allocation33_spill] sm:$0xff] %v8134_v21  ;;  %v8136_v49 = vpop.permute.xlu1 %4789 }
 0x367   : > { %9416 = vst [vmem:[#allocation34_spill] sm:$0xff] %v8136_v49  ;;  %v8138_v27 = vpop.permute.xlu0 %4787 }
 0x368   : > { %9417 = vst [vmem:[#allocation35_spill] sm:$0xff] %v8138_v27 }
 0x36b   : > { %5001 = vrot.lane.b32.xlu2 %v7965_v33, %s6887_s6 }
 0x36c   : > { %4999 = vrot.lane.b32.xlu1 %v7935_v28, %s6887_s6 }
 0x36d   : > { %4997 = vrot.lane.b32.xlu0 %v7938_v0, %s6887_s6  ;;  %v8143_v14 = vpop.permute.xlu2 %4838 }
 0x36e   : > { %9418 = vst [vmem:[#allocation36_spill] sm:$0xff] %v8143_v14  ;;  %v8145_v41 = vpop.permute.xlu1 %4807  ;;  %v8171_v14 = vld [vmem:[%s7659_s15 + $0x128] sm:$0x3] }
 0x36f   : > { %v8147_v22 = vpop.permute.xlu0 %4805 }
 0x370   : > { %9419 = vst [vmem:[#allocation37_spill] sm:$0xff] %v8147_v22 }
 0x373   : > { %5007 = vrot.lane.b32.xlu2 %v8150_v15, %s6887_s6 }
 0x374   : > { %5005 = vrot.lane.b32.xlu1 %v7956_v30, %s6887_s6 }
 0x375   : > { %5003 = vrot.lane.b32.xlu0 %v7959_v36, %s6887_s6  ;;  %v8155_v13 = vpop.permute.xlu2 %4844 }
 0x376   : > { %9421 = vst [vmem:[#allocation39_spill] sm:$0xff] %v8155_v13  ;;  %v8157_v21 = vpop.permute.xlu1 %4813  ;;  %v5018_v13 = vrot.slane %v8150_v15, 1 }
 0x377   : > { %9422 = vst [vmem:[#allocation40_spill] sm:$0xff] %v8157_v21  ;;  %v8159_v44 = vpop.permute.xlu0 %4811 }
 0x37b   : > { %5025 = vrot.lane.b32.xlu2 %v8036_v20, %s6888_s7 }
 0x37c   : > { %5023 = vrot.lane.b32.xlu1 %v7991_v53, %s6888_s7 }
 0x37d   : > { %5021 = vrot.lane.b32.xlu0 %v7994_v39, %s6888_s7  ;;  %v8164_v22 = vpop.permute.xlu2 %4866  ;;  %v9369_v39 = vrot.slane %v8171_v14, 1 }
 0x37e   : > { %v8166_v27 = vpop.permute.xlu1 %4819 }
 0x37f   : > { %v8168_v49 = vpop.permute.xlu0 %4817 }
 0x380   : > { %9423 = vst [vmem:[#allocation41_spill] sm:$0xff] %v8168_v49  ;;  %v8187_v49 = vsel %vm4598_vm9, %v5018_v13, %v9369_v39 }
 0x381   : > { %9426 = vst [vmem:[#allocation44_spill] sm:$0xff] %v8187_v49 }
 0x383   : > { %5031 = vrot.lane.b32.xlu2 %v8070_v9, %s6888_s7 }
 0x384   : > { %5029 = vrot.lane.b32.xlu1 %v8026_v12, %s6888_s7 }
 0x385   : > { %5027 = vrot.lane.b32.xlu0 %v8031_v54, %s6888_s7  ;;  %v8176_v21 = vpop.permute.xlu2 %4872 }
 0x386   : > { %9424 = vst [vmem:[#allocation42_spill] sm:$0xff] %v8176_v21  ;;  %v8180_v23 = vpop.permute.xlu1 %4836 }
 0x387   : > { %9425 = vst [vmem:[#allocation43_spill] sm:$0xff] %v8180_v23  ;;  %v8182_v26 = vpop.permute.xlu0 %4834 }
 0x38b   : > { %5048 = vrot.lane.b32.xlu2 %v8096_v61, %s6889_s8 }
 0x38c   : > { %5035 = vrot.lane.b32.xlu1 %v8187_v49, %s6888_s7 }
 0x38d   : > { %5033 = vrot.lane.b32.xlu0 %v8065_v40, %s6888_s7  ;;  %v8192_v21 = vpop.permute.xlu2 %4878 }
 0x38e   : > { %v8194_v2 = vpop.permute.xlu1 %4842 }
 0x38f   : > { %v8196_v10 = vpop.permute.xlu0 %4840 }
 0x390   : > { %9427 = vst [vmem:[#allocation45_spill] sm:$0xff] %v8196_v10  ;;  %v5045_v10 = vrot.slane %v8150_v15, 2 }
 0x393   : > { %5054 = vrot.lane.b32.xlu2 %v4958_v42, %s6889_s8  ;;  %v5046_v42 = vrot.slane %v8171_v14, 2 }
 0x394   : > { %5052 = vrot.lane.b32.xlu1 %v8090_v38, %s6889_s8 }
 0x395   : > { %5050 = vrot.lane.b32.xlu0 %v8093_v45, %s6889_s8  ;;  %v8200_v13 = vpop.permute.xlu2 %4924  ;;  %v5047_v45 = vsel %vm4647_vm10, %v5045_v10, %v5046_v42  ;;  %vm9382_vm10 = vcmask 490496  }
 0x396   : > { %9428 = vst [vmem:[#allocation46_spill] sm:$0xff] %v8200_v13  ;;  %v8202_v39 = vpop.permute.xlu1 %4864 }
 0x397   : > { %9429 = vst [vmem:[#allocation47_spill] sm:$0xff] %v8202_v39  ;;  %v8204_v61 = vpop.permute.xlu0 %4846 }
 0x39b   : > { %5060 = vrot.lane.b32.xlu2 %v4967_v34, %s6889_s8 }
 0x39c   : > { %5058 = vrot.lane.b32.xlu1 %v4964_v48, %s6889_s8 }
 0x39d   : > { %5056 = vrot.lane.b32.xlu0 %v4961_v31, %s6889_s8  ;;  %v8206_v23 = vpop.permute.xlu2 %4930 }
 0x39e   : > { %v8208_v49 = vpop.permute.xlu1 %4870 }
 0x39f   : > { %v8212_v38 = vpop.permute.xlu0 %4868 }
 0x3a0   : > { %9430 = vst [vmem:[#allocation48_spill] sm:$0xff] %v8212_v38  ;;  %v8231_v38 = vld [vmem:[%s7659_s15 + $0x130] sm:$0xff] }
 0x3a3   : > { %5075 = vrot.lane.b32.xlu2 %v7938_v0, %s6890_s9 }
 0x3a4   : > { %5073 = vrot.lane.b32.xlu1 %v7941_v29, %s6890_s9 }
 0x3a5   : > { %5062 = vrot.lane.b32.xlu0 %v5047_v45, %s6889_s8  ;;  %v8217_v48 = vpop.permute.xlu2 %4968 }
 0x3a6   : > { %9431 = vst [vmem:[#allocation49_spill] sm:$0xff] %v8217_v48  ;;  %v8219_v31 = vpop.permute.xlu1 %4876 }
 0x3a7   : > { %v8221_v34 = vpop.permute.xlu0 %4874 }
 0x3ab   : > { %5081 = vrot.lane.b32.xlu2 %v7959_v36, %s6890_s9 }
 0x3ac   : > { %5079 = vrot.lane.b32.xlu1 %v7965_v33, %s6890_s9 }
 0x3ad   : > { %5077 = vrot.lane.b32.xlu0 %v7935_v28, %s6890_s9  ;;  %v8226_v13 = vpop.permute.xlu2 %4974  ;;  %v5099_v28 = vsel %vm5097_vm11, %v7693_v56, %v7855_v37 }
 0x3ae   : > { %v4923_v10 = vpop.permute.xlu1 %4922 }
 0x3af   : > { %v8228_v42 = vpop.permute.xlu0 %4920 }
 0x3b0   : > { %9432 = vst [vmem:[#allocation50_spill] sm:$0xff] %v8228_v42  ;;  %v5108_v42 = vsel %vm5106_vm12, %v5099_v28, %v7880_v7 }
 0x3b3   : > { %5087 = vrot.lane.b32.xlu2 %v8231_v38, %s6890_s9 }
 0x3b4   : > { %5085 = vrot.lane.b32.xlu1 %v8150_v15, %s6890_s9 }
 0x3b5   : > { %5083 = vrot.lane.b32.xlu0 %v7956_v30, %s6890_s9  ;;  %v8236_v45 = vpop.permute.xlu2 %4980  ;;  %v5117_v30 = vsel %vm5115_vm13, %v5108_v42, %v7863_v58 }
 0x3b6   : > { %v8238_v48 = vpop.permute.xlu1 %4928  ;;  %v5126_v15 = vsel %vm5124_vm14, %v5117_v30, %v7951_v32  ;;  %v9435_v30 = vrot.slane %v8001_v55, 1 }
 0x3b7   : > { %9433 = vst [vmem:[#allocation51_spill] sm:$0xff] %v8238_v48  ;;  %v8240_v39 = vpop.permute.xlu0 %4926  ;;  %v9434_v48 = vrot.slane %v7962_v35, 1  ;;  %v5135_v37 = vsel %vm5133_vm15, %v5126_v15, %v8059_v17 }
 0x3b8   : > { %v5144_v58 = vsel %vm5142_vm0, %v5135_v37, %v8013_v24 }
 0x3b9   : > { %v5153_v28 = vsel %vm5151_vm1, %v5144_v58, %v8145_v41  ;;  %v8321_v58 = vld [vmem:[%s7659_s15 + $0x138] sm:$0x3] }
 0x3ba   : > { %v5162_v32 = vsel %vm5160_vm2, %v5153_v28, %v8182_v26 }
 0x3bb   : > { %5240 = vrot.lane.b32.xlu2 %v8036_v20, %s6876_s16  ;;  %v5171_v17 = vsel %vm5169_vm3, %v5162_v32, %v8164_v22  ;;  %v5101_v22 = vsel %vm5097_vm11, %v7684_v52, %v7853_v6  ;;  %v9442_v32 = vrot.slane %v8044_v57, 1 }
 0x3bc   : > { %5238 = vrot.lane.b32.xlu1 %v9434_v48, %s6876_s16  ;;  %v5180_v26 = vsel %vm5178_vm4, %v5171_v17, %v4923_v10  ;;  %v5110_v52 = vsel %vm5106_vm12, %v5101_v22, %v7840_v5  ;;  %v9441_v5 = vrot.slane %v8039_v3, 1  ;;  %v9448_v22 = vld [vmem:[#allocation18_spill] sm:$0xff] }
 0x3bd   : > { %5236 = vrot.lane.b32.xlu0 %v7991_v53, %s6876_s16  ;;  %v4996_v56 = vpop.permute.xlu2 %4995  ;;  %v9436_v53 = vrot.slane %v8006_v11, 1 }
 0x3be   : > { %v4935_v7 = vpop.permute.xlu1 %4934 }
 0x3bf   : > { %v8260_v20 = vpop.permute.xlu0 %4932 }
 0x3c3   : > { %5246 = vrot.lane.b32.xlu2 %v9435_v30, %s6876_s16 }
 0x3c4   : > { %5244 = vrot.lane.b32.xlu1 %v8031_v54, %s6876_s16  ;;  %v5105_v54 = vsel %vm5097_vm11, %v7711_v63, %v7865_v60  ;;  %v9439_v63 = vrot.slane %v7997_v62, 1 }
 0x3c5   : > { %5242 = vrot.lane.b32.xlu0 %v9436_v53, %s6876_s16  ;;  %v8276_v24 = vpop.permute.xlu2 %5001  ;;  %v5114_v42 = vsel %vm5106_vm12, %v5105_v54, %v7903_v16  ;;  %v9445_v53 = vld [vmem:[#allocation7_spill] sm:$0xff] }
 0x3c6   : > { %9437 = vst [vmem:[#allocation52_spill] sm:$0xff] %v8276_v24  ;;  %v8280_v41 = vpop.permute.xlu1 %4972  ;;  %v5123_v10 = vsel %vm5115_vm13, %v5114_v42, %v7887_v8  ;;  %v5119_v8 = vsel %vm5115_vm13, %v5110_v52, %v7912_v18  ;;  %v5104_v18 = vsel %vm5097_vm11, %v7717_v4, %v7867_v1 }
 0x3c7   : > { %9438 = vst [vmem:[#allocation53_spill] sm:$0xff] %v8280_v41  ;;  %v4971_v15 = vpop.permute.xlu0 %4970  ;;  %v5132_v60 = vsel %vm5124_vm14, %v5123_v10, %v8017_v43  ;;  %v5128_v43 = vsel %vm5124_vm14, %v5119_v8, %v7986_v50  ;;  %v9451_v8 = vld [vmem:[#allocation14_spill] sm:$0xff] }
 0x3c8   : > { %v5189_v48 = vsel %vm9383_vm6, %v5180_v26, %v4971_v15  ;;  %v5137_v50 = vsel %vm5133_vm15, %v5128_v43, %v7949_v25  ;;  %v9446_v15 = vld [vmem:[#allocation10_spill] sm:$0xff] }
 0x3c9   : > { %v8290_v37 = vsel %vm9384_vm5, %v5189_v48, %v4996_v56 }
 0x3cb   : > { %5252 = vrot.lane.b32.xlu2 %v8070_v9, %s6876_s16  ;;  %v5141_v9 = vsel %vm5133_vm15, %v5132_v60, %v8114_v59 }
 0x3cc   : > { %5250 = vrot.lane.b32.xlu1 %v9439_v63, %s6876_s16 }
 0x3cd   : > { %5248 = vrot.lane.b32.xlu0 %v8026_v12, %s6876_s16  ;;  %v5008_v16 = vpop.permute.xlu2 %5007  ;;  %v5150_v12 = vsel %vm5142_vm0, %v5141_v9, %v8079_v19  ;;  %v5233_v19 = vrot.slane %v8231_v38, 1 }
 0x3ce   : > { %v8308_v56 = vpop.permute.xlu1 %4978  ;;  %v5159_v59 = vsel %vm5151_vm1, %v5150_v12, %v8166_v27  ;;  %v5234_v27 = vrot.slane %v8321_v58, 1  ;;  %v9452_v12 = vld [vmem:[#allocation22_spill] sm:$0xff] }
 0x3cf   : > { %v8312_v6 = vpop.permute.xlu0 %4976  ;;  %v5168_v28 = vsel %vm5160_vm2, %v5159_v59, %v8204_v61  ;;  %v5146_v61 = vsel %vm5142_vm0, %v5137_v50, %v8124_v46  ;;  %v5113_v46 = vsel %vm5106_vm12, %v5104_v18, %v9445_v53  ;;  %v9455_v18 = vld [vmem:[#allocation34_spill] sm:$0xff]  ;;  %v9456_v50 = vld [vmem:[#allocation44_spill] sm:$0xff] }
 0x3d0   : > { %9440 = vst [vmem:[#allocation54_spill] sm:$0xff] %v8312_v6  ;;  %v5155_v4 = vsel %vm5151_vm1, %v5146_v61, %v8159_v44  ;;  %v5177_v1 = vsel %vm5169_vm3, %v5168_v28, %v8192_v21  ;;  %v9447_v44 = vld [vmem:[#allocation17_spill] sm:$0xff]  ;;  %v5235_v42 = vsel %vm4598_vm9, %v5233_v19, %v5234_v27  ;;  %v9453_v28 = vrot.slane %v8171_v14, 1  ;;  %v8395_v61 = vld [vmem:[%s7659_s15 + $0x140] sm:$0xff] }
 0x3d1   : > { %v5186_v17 = vsel %vm5178_vm4, %v5177_v1, %v4935_v7  ;;  %v5122_v48 = vsel %vm5115_vm13, %v5113_v46, %v9447_v44  ;;  %v9450_v7 = vld [vmem:[#allocation36_spill] sm:$0xff]  ;;  %v9458_v1 = vld [vmem:[#allocation41_spill] sm:$0xff]  ;;  %v9460_v44 = vld [vmem:[#allocation31_spill] sm:$0xff] }
 0x3d2   : > { %v5164_v63 = vsel %vm5160_vm2, %v5155_v4, %v9450_v7  ;;  %v8431_v7 = vld [vmem:[%s7659_s15 + $0x170] sm:$0xff] }
 0x3d3   : > { %5258 = vrot.lane.b32.xlu2 %v9441_v5, %s6876_s16  ;;  %v5173_v9 = vsel %vm5169_vm3, %v5164_v63, %v8208_v49  ;;  %v9454_v5 = vld [vmem:[#allocation27_spill] sm:$0xff] }
 0x3d4   : > { %5256 = vrot.lane.b32.xlu1 %v8065_v40, %s6876_s16  ;;  %v5103_v40 = vsel %vm5097_vm11, %v7677_v51, %v7824_v47  ;;  %v9449_v47 = vld [vmem:[#allocation24_spill] sm:$0xff]  ;;  %v5182_v52 = vsel %vm5178_vm4, %v5173_v9, %v8240_v39  ;;  %v8438_v63 = vld [vmem:[%s7659_s15 + $0x160] sm:$0xff] }
 0x3d5   : > { %5254 = vrot.lane.b32.xlu0 %v9442_v32, %s6876_s16  ;;  %v8344_v30 = vpop.permute.xlu2 %5025  ;;  %v5112_v54 = vsel %vm5106_vm12, %v5103_v40, %v9446_v15  ;;  %v5131_v10 = vsel %vm5124_vm14, %v5122_v48, %v9449_v47  ;;  %v9457_v32 = vld [vmem:[#allocation35_spill] sm:$0xff]  ;;  %v5191_v46 = vsel %vm9383_vm6, %v5182_v52, %v8226_v13 }
 0x3d6   : > { %9443 = vst [vmem:[#allocation55_spill] sm:$0xff] %v8344_v30  ;;  %v8350_v25 = vpop.permute.xlu1 %4993  ;;  %v5121_v51 = vsel %vm5115_vm13, %v5112_v54, %v9448_v22  ;;  %v5140_v59 = vsel %vm5133_vm15, %v5131_v10, %v9452_v12  ;;  %v5292_v54 = vrot.slane %v8395_v61, 7  ;;  %v8425_v10 = vld [vmem:[%s7659_s15 + $0x180] sm:$0xff] }
 0x3d7   : > { %9444 = vst [vmem:[#allocation56_spill] sm:$0xff] %v8350_v25  ;;  %v4983_v26 = vpop.permute.xlu0 %4982  ;;  %v5130_v43 = vsel %vm5124_vm14, %v5121_v51, %v9451_v8  ;;  %v5149_v39 = vsel %vm5142_vm0, %v5140_v59, %v9455_v18  ;;  %v8444_v8 = vrot.slane %v8425_v10, 7 }
 0x3d8   : > { %v5195_v21 = vsel %vm9383_vm6, %v5186_v17, %v4983_v26  ;;  %v5139_v49 = vsel %vm5133_vm15, %v5130_v43, %v9454_v5  ;;  %v5158_v40 = vsel %vm5151_vm1, %v5149_v39, %v9458_v1 }
 0x3d9   : > { %v8371_v60 = vsel %vm9384_vm5, %v5195_v21, %v5008_v16  ;;  %v8386_v16 = vld [vmem:[%s7659_s15 + $0x150] sm:$0xff]  ;;  %v5148_v4 = vsel %vm5142_vm0, %v5139_v49, %v9457_v32  ;;  %v9461_v21 = vld [vmem:[#allocation39_spill] sm:$0xff] }
 0x3da   : > { %v9374_v15 = vrot.slane %v8386_v16, 7  ;;  %v5157_v48 = vsel %vm5151_vm1, %v5148_v4, %v9460_v44  ;;  %v8467_v49 = vld [vmem:[%s7659_s15 + $0x190] sm:$0xff] }
 0x3db   : > { %5264 = vrot.lane.b32.xlu2 %v5235_v42, %s6876_s16  ;;  %v5167_v42 = vsel %vm5160_vm2, %v5158_v40, %v9461_v21  ;;  %v5166_v22 = vsel %vm5160_vm2, %v5157_v48, %v8194_v2  ;;  %v8480_v32 = vrot.slane %v8467_v49, 7 }
 0x3dc   : > { %5262 = vrot.lane.b32.xlu1 %v9453_v28, %s6876_s16  ;;  %v5176_v13 = vsel %vm5169_vm3, %v5167_v42, %v8219_v31  ;;  %v5175_v51 = vsel %vm5169_vm3, %v5166_v22, %v8221_v34  ;;  %v8464_v28 = vld [vmem:[%s7659_s15 + $0x1a0] sm:$0xff]  ;;  %v8502_v42 = vld [vmem:[%s7659_s15 + $0x168] sm:$0x3] }
 0x3dd   : > { %5260 = vrot.lane.b32.xlu0 %v9456_v50, %s6876_s16  ;;  %v5032_v19 = vpop.permute.xlu2 %5031  ;;  %v5185_v47 = vsel %vm5178_vm4, %v5176_v13, %v8260_v20  ;;  %v5184_v31 = vsel %vm5178_vm4, %v5175_v51, %v8206_v23  ;;  %v8448_v23 = vrot.slane %v8431_v7, 7  ;;  %v8506_v13 = vld [vmem:[%s7659_s15 + $0x158] sm:$0x3] }
 0x3de   : > { %v5000_v53 = vpop.permute.xlu1 %4999  ;;  %v5194_v20 = vsel %vm9383_vm6, %v5185_v47, %v8236_v45  ;;  %v5193_v9 = vsel %vm9383_vm6, %v5184_v31, %v8308_v56  ;;  %v8451_v45 = vrot.slane %v8438_v63, 7  ;;  %v8459_v56 = vld [vmem:[%s7659_s15 + $0x1b0] sm:$0xff] }
 0x3df   : > { %v5200_v17 = vsel %vm9384_vm5, %v5191_v46, %v5000_v53  ;;  %v8404_v26 = vpop.permute.xlu0 %4997  ;;  %9463 = vst [vmem:[#allocation17_spill] sm:$0xff] %v8448_v23  ;;  %v8474_v50 = vrot.slane %v8459_v56, 7  ;;  %v4563_v53 = vld [vmem:[%s7659_s15 + $0x148] sm:$0x3] }
 0x3e0   : > { %9459 = vst [vmem:[#allocation7_spill] sm:$0xff] %v8404_v26 }
 0x3e3   : > { %5302 = vrot.lane.b32.xlu2 %v9374_v15, %s6877_s17 }
 0x3e4   : > { %5300 = vrot.lane.b32.xlu1 %v5292_v54, %s6877_s17 }
 0x3e5   : > { %5266 = vrot.lane.b32.xlu0 %v5234_v27, %s6876_s16  ;;  %v8428_v2 = vpop.permute.xlu2 %5048 }
 0x3e6   : > { %9462 = vst [vmem:[#allocation10_spill] sm:$0xff] %v8428_v2  ;;  %v5006_v34 = vpop.permute.xlu1 %5005 }
 0x3e7   : > { %v5203_v27 = vsel %vm9384_vm5, %v5194_v20, %v5006_v34  ;;  %v5004_v52 = vpop.permute.xlu0 %5003  ;;  %v8520_v34 = vld [vmem:[%s7659_s15 + $0x178] sm:$0x3] }
 0x3e8   : > { %v5202_v43 = vsel %vm9384_vm5, %v5193_v9, %v5004_v52 }
 0x3e9   : > { %v5211_v12 = vsel %vm5205_vm7, %v5202_v43, %v5032_v19  ;;  %v8477_v19 = vrot.slane %v8464_v28, 7 }
 0x3eb   : > { %5308 = vrot.lane.b32.xlu2 %v8444_v8, %s6877_s17 }
 0x3ec   : > { %5306 = vrot.lane.b32.xlu1 %v8448_v23, %s6877_s17 }
 0x3ed   : > { %5304 = vrot.lane.b32.xlu0 %v8451_v45, %s6877_s17  ;;  %v5055_v59 = vpop.permute.xlu2 %5054 }
 0x3ee   : > { %v5024_v5 = vpop.permute.xlu1 %5023 }
 0x3ef   : > { %v5207_v18 = vsel %vm5205_vm7, %v8290_v37, %v5024_v5  ;;  %v8471_v39 = vpop.permute.xlu0 %5021  ;;  %v8538_v5 = vld [vmem:[%s7659_s15 + $0x188] sm:$0x3] }
 0x3f0   : > { %9464 = vst [vmem:[#allocation18_spill] sm:$0xff] %v8471_v39 }
 0x3f1   : > { %9470 = vst [vmem:[#allocation34_spill] sm:$0xff] %v8538_v5 }
 0x3f3   : > { %5314 = vrot.lane.b32.xlu2 %v8474_v50, %s6877_s17 }
 0x3f4   : > { %5312 = vrot.lane.b32.xlu1 %v8477_v19, %s6877_s17 }
 0x3f5   : > { %5310 = vrot.lane.b32.xlu0 %v8480_v32, %s6877_s17  ;;  %v5061_v37 = vpop.permute.xlu2 %5060 }
 0x3f6   : > { %v8488_v4 = vpop.permute.xlu1 %5029 }
 0x3f7   : > { %9465 = vst [vmem:[#allocation24_spill] sm:$0xff] %v8488_v4  ;;  %v5028_v1 = vpop.permute.xlu0 %5027 }
 0x3f8   : > { %v5209_v40 = vsel %vm5205_vm7, %v5200_v17, %v5028_v1 }
 0x3f9   : > { %v5218_v46 = vsel %vm5214_vm8, %v5209_v40, %v5055_v59  ;;  %v8535_v59 = vld [vmem:[%s7659_s15 + $0x198] sm:$0x3]  ;;  %v8550_v40 = vld [vmem:[%s7659_s15 + $0x1a8] sm:$0x3] }
 0x3fa   : > { %v8646_v2 = vrot.slane %v8550_v40, 1 }
 0x3fb   : > { %5336 = vrot.lane.b32.xlu2 %v8386_v16, %s6878_s19 }
 0x3fc   : > { %5334 = vrot.lane.b32.xlu1 %v4563_v53, %s6878_s19 }
 0x3fd   : > { %5332 = vrot.lane.b32.xlu0 %v8395_v61, %s6878_s19  ;;  %v5076_v54 = vpop.permute.xlu2 %5075 }
 0x3fe   : > { %v5036_v44 = vpop.permute.xlu1 %5035 }
 0x3ff   : > { %v5213_v48 = vsel %vm5205_vm7, %v8371_v60, %v5036_v44  ;;  %v5034_v21 = vpop.permute.xlu0 %5033  ;;  %v5381_v44 = vrot.slane %v4563_v53, 1  ;;  %v8575_v53 = vrot.slane %v8502_v42, 1 }
 0x400   : > { %v5212_v17 = vsel %vm5205_vm7, %v5203_v27, %v5034_v21 }
 0x401   : > { %v5221_v22 = vsel %vm5214_vm8, %v5212_v17, %v5061_v37  ;;  %v5380_v17 = vrot.slane %v8395_v61, 1 }
 0x403   : > { %5342 = vrot.lane.b32.xlu2 %v8502_v42, %s6878_s19 }
 0x404   : > { %5340 = vrot.lane.b32.xlu1 %v8438_v63, %s6878_s19 }
 0x405   : > { %5338 = vrot.lane.b32.xlu0 %v8506_v13, %s6878_s19  ;;  %v8514_v60 = vpop.permute.xlu2 %5081 }
 0x406   : > { %9466 = vst [vmem:[#allocation36_spill] sm:$0xff] %v8514_v60  ;;  %v8516_v51 = vpop.permute.xlu1 %5052 }
 0x407   : > { %9467 = vst [vmem:[#allocation14_spill] sm:$0xff] %v8516_v51  ;;  %v5051_v47 = vpop.permute.xlu0 %5050 }
 0x408   : > { %v5216_v31 = vsel %vm5214_vm8, %v5207_v18, %v5051_v47 }
 0x409   : > { %v8523_v20 = vsel %vm9382_vm10, %v5216_v31, %v5076_v54 }
 0x40a   : > { %9468 = vst [vmem:[#allocation22_spill] sm:$0xff] %v8523_v20 }
 0x40b   : > { %5348 = vrot.lane.b32.xlu2 %v8425_v10, %s6878_s19 }
 0x40c   : > { %5346 = vrot.lane.b32.xlu1 %v8520_v34, %s6878_s19 }
 0x40d   : > { %5344 = vrot.lane.b32.xlu0 %v8431_v7, %s6878_s19  ;;  %v5088_v9 = vpop.permute.xlu2 %5087 }
 0x40e   : > { %v5059_v27 = vpop.permute.xlu1 %5058 }
 0x40f   : > { %v5220_v52 = vsel %vm5214_vm8, %v5211_v12, %v5059_v27  ;;  %v8532_v43 = vpop.permute.xlu0 %5056  ;;  %v8571_v27 = vld [vmem:[%s7659_s15 + $0x1b8] sm:$0x3] }
 0x410   : > { %9469 = vst [vmem:[#allocation27_spill] sm:$0xff] %v8532_v43 }
 0x413   : > { %5354 = vrot.lane.b32.xlu2 %v8535_v59, %s6878_s19 }
 0x414   : > { %5352 = vrot.lane.b32.xlu1 %v8467_v49, %s6878_s19 }
 0x415   : > { %5350 = vrot.lane.b32.xlu0 %v8538_v5, %s6878_s19  ;;  %v5241_v18 = vpop.permute.xlu2 %5240 }
 0x416   : > { %v8546_v37 = vpop.permute.xlu1 %5073 }
 0x417   : > { %9471 = vst [vmem:[#allocation44_spill] sm:$0xff] %v8546_v37  ;;  %v5063_v12 = vpop.permute.xlu0 %5062  ;;  %v5706_v37 = vsel %vm5097_vm11, %v7938_v0, %v5241_v18 }
 0x418   : > { %v5222_v1 = vsel %vm5214_vm8, %v5213_v48, %v5063_v12  ;;  %v5386_v12 = vrot.slane %v8438_v63, 1 }
 0x419   : > { %v8553_v54 = vsel %vm9382_vm10, %v5222_v1, %v5088_v9  ;;  %v5382_v9 = vsel %vm4598_vm9, %v5380_v17, %v5381_v44  ;;  %v5383_v17 = vrot.slane %v8386_v16, 1 }
 0x41a   : > { %9472 = vst [vmem:[#allocation35_spill] sm:$0xff] %v8553_v54  ;;  %v8618_v54 = vrot.slane %v8535_v59, 1 }
 0x41b   : > { %5360 = vrot.lane.b32.xlu2 %v8459_v56, %s6878_s19 }
 0x41c   : > { %5358 = vrot.lane.b32.xlu1 %v8550_v40, %s6878_s19 }
 0x41d   : > { %5356 = vrot.lane.b32.xlu0 %v8464_v28, %s6878_s19  ;;  %v8561_v21 = vpop.permute.xlu2 %5246 }
 0x41e   : > { %v5080_v48 = vpop.permute.xlu1 %5079 }
 0x41f   : > { %v8565_v47 = vsel %vm9382_vm10, %v5218_v46, %v5080_v48  ;;  %v8567_v31 = vpop.permute.xlu0 %5077  ;;  %v8582_v46 = vrot.slane %v8506_v13, 1 }
 0x420   : > { %9473 = vst [vmem:[#allocation41_spill] sm:$0xff] %v8565_v47 }
 0x421   : > { %9474 = vst [vmem:[#allocation31_spill] sm:$0xff] %v8567_v31  ;;  %v8597_v47 = vsel %vm4598_vm9, %v5383_v17, %v8582_v46  ;;  %v8626_v31 = vrot.slane %v8538_v5, 1 }
 0x423   : > { %5406 = vrot.lane.b32.xlu2 %v5381_v44, %s6879_s23  ;;  %9477 = vst [vmem:[#allocation58_spill] sm:$0xff] %v8626_v31 }
 0x424   : > { %5404 = vrot.lane.b32.xlu1 %v5382_v9, %s6879_s23  ;;  %v8593_v9 = vsel %vm4598_vm9, %v5386_v12, %v8575_v53  ;;  %v5389_v12 = vrot.slane %v8431_v7, 1 }
 0x425   : > { %5362 = vrot.lane.b32.xlu0 %v8571_v27, %s6878_s19  ;;  %v5253_v61 = vpop.permute.xlu2 %5252 }
 0x426   : > { %v5086_v1 = vpop.permute.xlu1 %5085  ;;  %v5712_v0 = vsel %vm5097_vm11, %v7959_v36, %v5253_v61 }
 0x427   : > { %v8586_v48 = vsel %vm9382_vm10, %v5221_v22, %v5086_v1  ;;  %v5084_v44 = vpop.permute.xlu0 %5083  ;;  %v8604_v22 = vrot.slane %v8520_v34, 1 }
 0x428   : > { %9475 = vst [vmem:[#allocation39_spill] sm:$0xff] %v8586_v48  ;;  %v8589_v15 = vsel %vm9382_vm10, %v5220_v52, %v5084_v44  ;;  %vm5976_vm10 = vcmask 1043456  }
 0x429   : > { %9476 = vst [vmem:[#allocation57_spill] sm:$0xff] %v8589_v15  ;;  %v8613_v17 = vsel %vm4598_vm9, %v5389_v12, %v8604_v22  ;;  %v5395_v15 = vrot.slane %v8467_v49, 1  ;;  %v5392_v12 = vrot.slane %v8425_v10, 1 }
 0x42b   : > { %5412 = vrot.lane.b32.xlu2 %v8593_v9, %s6879_s23  ;;  %v8631_v30 = vsel %vm4598_vm9, %v5395_v15, %v8618_v54  ;;  %v8635_v26 = vsel %vm4598_vm9, %v5392_v12, %v8626_v31  ;;  %v5398_v12 = vrot.slane %v8464_v28, 1 }
 0x42c   : > { %5410 = vrot.lane.b32.xlu1 %v8582_v46, %s6879_s23  ;;  %9478 = vst [vmem:[#allocation59_spill] sm:$0xff] %v8635_v26 }
 0x42d   : > { %5408 = vrot.lane.b32.xlu0 %v8597_v47, %s6879_s23  ;;  %v8608_v52 = vpop.permute.xlu2 %5258  ;;  %v8657_v60 = vsel %vm4598_vm9, %v5398_v12, %v8646_v2  ;;  %v5401_v12 = vrot.slane %v8459_v56, 1 }
 0x42e   : > { %v5239_v1 = vpop.permute.xlu1 %5238 }
 0x42f   : > { %v5237_v44 = vpop.permute.xlu0 %5236 }
 0x433   : > { %5418 = vrot.lane.b32.xlu2 %v8604_v22, %s6879_s23 }
 0x434   : > { %5416 = vrot.lane.b32.xlu1 %v8613_v17, %s6879_s23 }
 0x435   : > { %5414 = vrot.lane.b32.xlu0 %v8575_v53, %s6879_s23  ;;  %v5265_v48 = vpop.permute.xlu2 %5264 }
 0x436   : > { %v5245_v20 = vpop.permute.xlu1 %5244  ;;  %v5718_v61 = vsel %vm5097_vm11, %v8231_v38, %v5265_v48  ;;  %v5705_v48 = vsel %vm5097_vm11, %v7962_v35, %v5239_v1 }
 0x437   : > { %v5243_v51 = vpop.permute.xlu0 %5242 }
 0x438   : > { %v5707_v41 = vsel %vm5097_vm11, %v8006_v11, %v5243_v51 }
 0x43b   : > { %5424 = vrot.lane.b32.xlu2 %v8631_v30, %s6879_s23 }
 0x43c   : > { %5422 = vrot.lane.b32.xlu1 %v8626_v31, %s6879_s23 }
 0x43d   : > { %5420 = vrot.lane.b32.xlu0 %v8635_v26, %s6879_s23  ;;  %v5303_v15 = vpop.permute.xlu2 %5302 }
 0x43e   : > { %v5251_v39 = vpop.permute.xlu1 %5250  ;;  %v5722_v11 = vsel %vm5106_vm12, %v5706_v37, %v5303_v15  ;;  %v8653_v51 = vsel %vm5106_vm12, %v5707_v41, %v5303_v15  ;;  %v8669_v15 = vrot.slane %v8571_v27, 1 }
 0x43f   : > { %v5249_v25 = vpop.permute.xlu0 %5248  ;;  %v5711_v35 = vsel %vm5097_vm11, %v7997_v62, %v5251_v39 }
 0x440   : > { %v8679_v36 = vsel %vm4598_vm9, %v5401_v12, %v8669_v15  ;;  %v5704_v12 = vsel %vm5097_vm11, %v7941_v29, %v5237_v44  ;;  %v5710_v1 = vsel %vm5097_vm11, %v7965_v33, %v5249_v25  ;;  %v9481_v25 = vld [vmem:[#allocation38_spill] sm:$0xff] }
 0x443   : > { %5430 = vrot.lane.b32.xlu2 %v8646_v2, %s6879_s23 }
 0x444   : > { %5428 = vrot.lane.b32.xlu1 %v8657_v60, %s6879_s23 }
 0x445   : > { %5426 = vrot.lane.b32.xlu0 %v8618_v54, %s6879_s23  ;;  %v5309_v18 = vpop.permute.xlu2 %5308 }
 0x446   : > { %v5257_v41 = vpop.permute.xlu1 %5256  ;;  %v5728_v37 = vsel %vm5106_vm12, %v5712_v0, %v5309_v18  ;;  %v9479_v0 = vrot.slane %v8386_v16, 7 }
 0x447   : > { %v5255_v43 = vpop.permute.xlu0 %5254 }
 0x448   : > { %v5713_v4 = vsel %vm5097_vm11, %v8044_v57, %v5255_v43 }
 0x449   : > { %v8675_v24 = vsel %vm5106_vm12, %v5713_v4, %v5309_v18 }
 0x44b   : > { %5454 = vrot.lane.b32.xlu2 %v9479_v0, %s6880_s24 }
 0x44c   : > { %5434 = vrot.lane.b32.xlu1 %v8669_v15, %s6879_s23 }
 0x44d   : > { %5432 = vrot.lane.b32.xlu0 %v8679_v36, %s6879_s23  ;;  %v5315_v57 = vpop.permute.xlu2 %5314 }
 0x44e   : > { %v5263_v4 = vpop.permute.xlu1 %5262  ;;  %v5734_v43 = vsel %vm5106_vm12, %v5718_v61, %v5315_v57 }
 0x44f   : > { %v5261_v18 = vpop.permute.xlu0 %5260 }
 0x453   : > { %5460 = vrot.lane.b32.xlu2 %v8444_v8, %s6880_s24 }
 0x454   : > { %5458 = vrot.lane.b32.xlu1 %v8448_v23, %s6880_s24 }
 0x455   : > { %5456 = vrot.lane.b32.xlu0 %v8451_v45, %s6880_s24  ;;  %v5337_v38 = vpop.permute.xlu2 %5336 }
 0x456   : > { %v5301_v0 = vpop.permute.xlu1 %5300  ;;  %v8702_v61 = vsel %vm5115_vm13, %v5722_v11, %v5337_v38 }
 0x457   : > { %v5720_v6 = vsel %vm5106_vm12, %v5704_v12, %v5301_v0  ;;  %v5721_v26 = vsel %vm5106_vm12, %v5705_v48, %v5301_v0  ;;  %v5267_v31 = vpop.permute.xlu0 %5266  ;;  %v5715_v48 = vsel %vm5097_vm11, %v8039_v3, %v8608_v52  ;;  %v9482_v12 = vld [vmem:[#allocation21_spill] sm:$0xff] }
 0x458   : > { %v5719_v23 = vsel %vm5097_vm11, %v8321_v58, %v5267_v31  ;;  %v9480_v31 = vld [vmem:[#allocation19_spill] sm:$0xff] }
 0x459   : > { %v8709_v5 = vsel %vm5106_vm12, %v5719_v23, %v5315_v57  ;;  %v5709_v23 = vsel %vm5097_vm11, %v8001_v55, %v8561_v21  ;;  %v5717_v55 = vsel %vm5097_vm11, %v8171_v14, %v5263_v4 }
 0x45b   : > { %5481 = vrot.lane.b32.xlu2 %v8506_v13, %s6881_s25  ;;  %v5708_v13 = vsel %vm5097_vm11, %v9480_v31, %v5245_v20  ;;  %v5716_v20 = vsel %vm5097_vm11, %v9481_v25, %v5261_v18 }
 0x45c   : > { %5479 = vrot.lane.b32.xlu1 %v8386_v16, %s6881_s25 }
 0x45d   : > { %5462 = vrot.lane.b32.xlu0 %v8480_v32, %s6880_s24  ;;  %v5343_v29 = vpop.permute.xlu2 %5342 }
 0x45e   : > { %v5307_v58 = vpop.permute.xlu1 %5306 }
 0x45f   : > { %v5726_v16 = vsel %vm5106_vm12, %v5710_v1, %v5307_v58  ;;  %v5727_v44 = vsel %vm5106_vm12, %v5711_v35, %v5307_v58  ;;  %v5305_v11 = vpop.permute.xlu0 %5304 }
 0x460   : > { %v5724_v57 = vsel %vm5106_vm12, %v5708_v13, %v5305_v11  ;;  %v5725_v62 = vsel %vm5106_vm12, %v5709_v23, %v5305_v11 }
 0x461   : > { %v8731_v39 = vsel %vm5115_vm13, %v5725_v62, %v5343_v29 }
 0x463   : > { %5495 = vrot.lane.b32.xlu2 %v8467_v49, %s6881_s25 }
 0x464   : > { %5532 = vrot.lane.b32.xlu1 %v8582_v46, %s6882_s26  ;;  %v5714_v46 = vsel %vm5097_vm11, %v9482_v12, %v5257_v41 }
 0x465   : > { %5530 = vrot.lane.b32.xlu0 %v8597_v47, %s6882_s26  ;;  %v5349_v33 = vpop.permute.xlu2 %5348 }
 0x466   : > { %v5313_v21 = vpop.permute.xlu1 %5312  ;;  %v8744_v38 = vsel %vm5115_vm13, %v5728_v37, %v5349_v33 }
 0x467   : > { %v5732_v47 = vsel %vm5106_vm12, %v5716_v20, %v5313_v21  ;;  %v5733_v0 = vsel %vm5106_vm12, %v5717_v55, %v5313_v21  ;;  %v5311_v29 = vpop.permute.xlu0 %5310 }
 0x468   : > { %v5730_v14 = vsel %vm5106_vm12, %v5714_v46, %v5311_v29  ;;  %v5731_v4 = vsel %vm5106_vm12, %v5715_v48, %v5311_v29 }
 0x46b   : > { %5546 = vrot.lane.b32.xlu2 %v8631_v30, %s6882_s26 }
 0x46c   : > { %5580 = vrot.lane.b32.xlu1 %v8451_v45, %s6883_s27 }
 0x46d   : > { %5497 = vrot.lane.b32.xlu0 %v8535_v59, %s6881_s25  ;;  %v5355_v3 = vpop.permute.xlu2 %5354 }
 0x46e   : > { %v5335_v52 = vpop.permute.xlu1 %5334  ;;  %v8762_v41 = vsel %vm5115_vm13, %v5731_v4, %v5355_v3 }
 0x46f   : > { %v5737_v37 = vsel %vm5115_vm13, %v5721_v26, %v5335_v52  ;;  %v5333_v18 = vpop.permute.xlu0 %5332 }
 0x470   : > { %v5736_v35 = vsel %vm5115_vm13, %v5720_v6, %v5333_v18 }
 0x473   : > { %5607 = vrot.lane.b32.xlu2 %v8502_v42, %s6884_s28 }
 0x474   : > { %5605 = vrot.lane.b32.xlu1 %v8438_v63, %s6884_s28 }
 0x475   : > { %5548 = vrot.lane.b32.xlu0 %v8618_v54, %s6882_s26  ;;  %v5361_v45 = vpop.permute.xlu2 %5360 }
 0x476   : > { %v5341_v1 = vpop.permute.xlu1 %5340  ;;  %v8773_v58 = vsel %vm5115_vm13, %v5734_v43, %v5361_v45 }
 0x477   : > { %v5740_v23 = vsel %vm5115_vm13, %v5724_v57, %v5341_v1  ;;  %v5339_v26 = vpop.permute.xlu0 %5338 }
 0x478   : > { %v5739_v6 = vsel %vm5115_vm13, %v8653_v51, %v5339_v26 }
 0x47b   : > { %5588 = vrot.lane.b32.xlu2 %v8477_v19, %s6883_s27 }
 0x47c   : > { %5489 = vrot.lane.b32.xlu1 %v8520_v34, %s6881_s25 }
 0x47d   : > { %5487 = vrot.lane.b32.xlu0 %v8431_v7, %s6881_s25  ;;  %v5407_v31 = vpop.permute.xlu2 %5406 }
 0x47e   : > { %v5347_v13 = vpop.permute.xlu1 %5346  ;;  %v5753_v43 = vsel %vm5124_vm14, %v5737_v37, %v5407_v31 }
 0x47f   : > { %v5743_v11 = vsel %vm5115_vm13, %v5727_v44, %v5347_v13  ;;  %v5345_v57 = vpop.permute.xlu0 %5344  ;;  %v9483_v13 = vld [vmem:[#allocation34_spill] sm:$0xff] }
 0x480   : > { %v5742_v62 = vsel %vm5115_vm13, %v5726_v16, %v5345_v57 }
 0x483   : > { %5466 = vrot.lane.b32.xlu2 %v8474_v50, %s6880_s24 }
 0x484   : > { %5658 = vrot.lane.b32.xlu1 %v8575_v53, %s6885_s29 }
 0x485   : > { %5656 = vrot.lane.b32.xlu0 %v8593_v9, %s6885_s29  ;;  %v5413_v51 = vpop.permute.xlu2 %5412 }
 0x486   : > { %v5353_v33 = vpop.permute.xlu1 %5352  ;;  %v8794_v55 = vsel %vm5124_vm14, %v5740_v23, %v5413_v51 }
 0x487   : > { %v5746_v25 = vsel %vm5115_vm13, %v5730_v14, %v5353_v33  ;;  %v5351_v44 = vpop.permute.xlu0 %5350 }
 0x488   : > { %v5745_v16 = vsel %vm5115_vm13, %v8675_v24, %v5351_v44  ;;  %v9485_v44 = vld [vmem:[#allocation59_spill] sm:$0xff] }
 0x48b   : > { %5621 = vrot.lane.b32.xlu2 %v8464_v28, %s6884_s28 }
 0x48c   : > { %5540 = vrot.lane.b32.xlu1 %v8604_v22, %s6882_s26 }
 0x48d   : > { %5538 = vrot.lane.b32.xlu0 %v8613_v17, %s6882_s26  ;;  %v5419_v20 = vpop.permute.xlu2 %5418 }
 0x48e   : > { %v5359_v21 = vpop.permute.xlu1 %5358  ;;  %v5759_v48 = vsel %vm5124_vm14, %v5743_v11, %v5419_v20 }
 0x48f   : > { %v5749_v12 = vsel %vm5115_vm13, %v5733_v0, %v5359_v21  ;;  %v5357_v46 = vpop.permute.xlu0 %5356 }
 0x490   : > { %v5748_v29 = vsel %vm5115_vm13, %v5732_v47, %v5357_v46 }
 0x493   : > { %5505 = vrot.lane.b32.xlu2 %v8571_v27, %s6881_s25 }
 0x494   : > { %5503 = vrot.lane.b32.xlu1 %v8459_v56, %s6881_s25 }
 0x495   : > { %5623 = vrot.lane.b32.xlu0 %v8550_v40, %s6884_s28  ;;  %v5425_v24 = vpop.permute.xlu2 %5424 }
 0x496   : > { %v5405_v14 = vpop.permute.xlu1 %5404  ;;  %v8815_v4 = vsel %vm5124_vm14, %v5746_v25, %v5425_v24  ;;  %v9484_v25 = vld [vmem:[#allocation58_spill] sm:$0xff] }
 0x497   : > { %v5752_v3 = vsel %vm5124_vm14, %v5736_v35, %v5405_v14  ;;  %v5363_v0 = vpop.permute.xlu0 %5362 }
 0x498   : > { %v5751_v47 = vsel %vm5115_vm13, %v8709_v5, %v5363_v0 }
 0x49b   : > { %5674 = vrot.lane.b32.xlu2 %v8646_v2, %s6885_s29 }
 0x49c   : > { %5672 = vrot.lane.b32.xlu1 %v8657_v60, %s6885_s29 }
 0x49d   : > { %5584 = vrot.lane.b32.xlu0 %v8444_v8, %s6883_s27  ;;  %v5431_v52 = vpop.permute.xlu2 %5430 }
 0x49e   : > { %v5411_v37 = vpop.permute.xlu1 %5410  ;;  %v8827_v18 = vsel %vm5124_vm14, %v5749_v12, %v5431_v52 }
 0x49f   : > { %v5755_v35 = vsel %vm5124_vm14, %v5739_v6, %v5411_v37  ;;  %v5409_v45 = vpop.permute.xlu0 %5408 }
 0x4a0   : > { %v5754_v5 = vsel %vm5124_vm14, %v8702_v61, %v5409_v45 }
 0x4a3   : > { %5613 = vrot.lane.b32.xlu2 %v8425_v10, %s6884_s28 }
 0x4a4   : > { %5556 = vrot.lane.b32.xlu1 %v8669_v15, %s6882_s26 }
 0x4a5   : > { %5554 = vrot.lane.b32.xlu0 %v8679_v36, %s6882_s26  ;;  %v5455_v8 = vpop.permute.xlu2 %5454 }
 0x4a6   : > { %v5417_v1 = vpop.permute.xlu1 %5416  ;;  %v5768_v23 = vsel %vm5133_vm15, %v5752_v3, %v5455_v8  ;;  %v5769_v26 = vsel %vm5133_vm15, %v5753_v43, %v5455_v8 }
 0x4a7   : > { %v5758_v6 = vsel %vm5124_vm14, %v5742_v62, %v5417_v1  ;;  %v5415_v31 = vpop.permute.xlu0 %5414  ;;  %v8856_v62 = vld [vmem:[%s7659_s15 + $0x1c0] sm:$0xff] }
 0x4a8   : > { %v5757_v61 = vsel %vm5124_vm14, %v8731_v39, %v5415_v31 }
 0x4ab   : > { %5485 = vrot.lane.b32.xlu2 %v8502_v42, %s6881_s25 }
 0x4ac   : > { %5483 = vrot.lane.b32.xlu1 %v8438_v63, %s6881_s25  ;;  %v5453_v63 = vrot.slane %v8856_v62, 7 }
 0x4ad   : > { %5615 = vrot.lane.b32.xlu0 %v9483_v13, %s6884_s28  ;;  %v5461_v11 = vpop.permute.xlu2 %5460 }
 0x4ae   : > { %v5423_v57 = vpop.permute.xlu1 %5422  ;;  %v8850_v51 = vsel %vm5133_vm15, %v5758_v6, %v5461_v11  ;;  %v8853_v43 = vsel %vm5133_vm15, %v5759_v48, %v5461_v11 }
 0x4af   : > { %v5761_v39 = vsel %vm5124_vm14, %v5745_v16, %v5423_v57  ;;  %v5421_v33 = vpop.permute.xlu0 %5420 }
 0x4b0   : > { %v5760_v42 = vsel %vm5124_vm14, %v8744_v38, %v5421_v33 }
 0x4b3   : > { %5666 = vrot.lane.b32.xlu2 %v9484_v25, %s6885_s29 }
 0x4b4   : > { %5664 = vrot.lane.b32.xlu1 %v9485_v44, %s6885_s29 }
 0x4b5   : > { %5592 = vrot.lane.b32.xlu0 %v5453_v63, %s6883_s27  ;;  %v5482_v20 = vpop.permute.xlu2 %5481 }
 0x4b6   : > { %v5429_v21 = vpop.permute.xlu1 %5428  ;;  %v5785_v16 = vsel %vm5142_vm0, %v5769_v26, %v5482_v20 }
 0x4b7   : > { %v5764_v48 = vsel %vm5124_vm14, %v5748_v29, %v5429_v21  ;;  %v5427_v38 = vpop.permute.xlu0 %5426 }
 0x4b8   : > { %v8873_v12 = vsel %vm5124_vm14, %v8762_v41, %v5427_v38  ;;  %v8889_v41 = vld [vmem:[%s7659_s15 + $0x1c8] sm:$0x3] }
 0x4bb   : > { %5536 = vrot.lane.b32.xlu2 %v8575_v53, %s6882_s26  ;;  %v8894_v53 = vrot.slane %v8889_v41, 1 }
 0x4bc   : > { %5534 = vrot.lane.b32.xlu1 %v8593_v9, %s6882_s26 }
 0x4bd   : > { %5464 = vrot.lane.b32.xlu0 %v8477_v19, %s6880_s24  ;;  %v5496_v46 = vpop.permute.xlu2 %5495  ;;  %v5527_v19 = vrot.slane %v8856_v62, 1 }
 0x4be   : > { %v5435_v24 = vpop.permute.xlu1 %5434 }
 0x4bf   : > { %v8882_v14 = vsel %vm5124_vm14, %v5751_v47, %v5435_v24  ;;  %v5433_v29 = vpop.permute.xlu0 %5432  ;;  %v8916_v45 = vsel %vm4598_vm9, %v5527_v19, %v8894_v53 }
 0x4c0   : > { %v8886_v3 = vsel %vm5124_vm14, %v8773_v58, %v5433_v29 }
 0x4c3   : > { %5499 = vrot.lane.b32.xlu2 %v8464_v28, %s6881_s25 }
 0x4c4   : > { %5631 = vrot.lane.b32.xlu1 %v8889_v41, %s6884_s28 }
 0x4c5   : > { %5629 = vrot.lane.b32.xlu0 %v8856_v62, %s6884_s28  ;;  %v5547_v9 = vpop.permute.xlu2 %5546 }
 0x4c6   : > { %v5459_v0 = vpop.permute.xlu1 %5458 }
 0x4c7   : > { %v8903_v58 = vsel %vm5133_vm15, %v8794_v55, %v5459_v0  ;;  %v8906_v47 = vsel %vm5133_vm15, %v5757_v61, %v5459_v0  ;;  %v5457_v28 = vpop.permute.xlu0 %5456  ;;  %v9486_v55 = vld [vmem:[#allocation17_spill] sm:$0xff] }
 0x4c8   : > { %v8909_v52 = vsel %vm5133_vm15, %v5754_v5, %v5457_v28  ;;  %v8912_v37 = vsel %vm5133_vm15, %v5755_v35, %v5457_v28 }
 0x4cb   : > { %5680 = vrot.lane.b32.xlu2 %v8916_v45, %s6885_s29 }
 0x4cc   : > { %5582 = vrot.lane.b32.xlu1 %v9486_v55, %s6883_s27 }
 0x4cd   : > { %5501 = vrot.lane.b32.xlu0 %v8550_v40, %s6881_s25  ;;  %v5608_v8 = vpop.permute.xlu2 %5607 }
 0x4ce   : > { %v5480_v1 = vpop.permute.xlu1 %5479 }
 0x4cf   : > { %v5784_v5 = vsel %vm5142_vm0, %v5768_v23, %v5480_v1  ;;  %v5463_v26 = vpop.permute.xlu0 %5462 }
 0x4d0   : > { %v5776_v35 = vsel %vm5133_vm15, %v5760_v42, %v5463_v26  ;;  %v5777_v6 = vsel %vm5133_vm15, %v5761_v39, %v5463_v26  ;;  %v4580_v26 = vld [vmem:[%s7659_s15 + $0x1d0] sm:$0xff] }
 0x4d1   : > { %v5792_v31 = vsel %vm5142_vm0, %v5776_v35, %v5496_v46 }
 0x4d2   : > { %v5808_v61 = vsel %vm5151_vm1, %v5792_v31, %v5547_v9 }
 0x4d3   : > { %5552 = vrot.lane.b32.xlu2 %v8646_v2, %s6882_s26 }
 0x4d4   : > { %5550 = vrot.lane.b32.xlu1 %v8657_v60, %s6882_s26 }
 0x4d5   : > { %5682 = vrot.lane.b32.xlu0 %v8894_v53, %s6885_s29  ;;  %v5589_v40 = vpop.permute.xlu2 %5588 }
 0x4d6   : > { %v5533_v23 = vpop.permute.xlu1 %5532  ;;  %v8936_v11 = vsel %vm5160_vm2, %v5808_v61, %v5589_v40 }
 0x4d7   : > { %v5801_v57 = vsel %vm5151_vm1, %v5785_v16, %v5533_v23  ;;  %v5531_v39 = vpop.permute.xlu0 %5530  ;;  %v5653_v23 = vrot.slane %v4580_v26, 1 }
 0x4d8   : > { %v5800_v33 = vsel %vm5151_vm1, %v5784_v5, %v5531_v39 }
 0x4db   : > { %5491 = vrot.lane.b32.xlu2 %v8425_v10, %s6881_s25 }
 0x4dc   : > { %5611 = vrot.lane.b32.xlu1 %v8520_v34, %s6884_s28 }
 0x4dd   : > { %5609 = vrot.lane.b32.xlu0 %v8431_v7, %s6884_s28  ;;  %v5467_v2 = vpop.permute.xlu2 %5466 }
 0x4de   : > { %v5581_v60 = vpop.permute.xlu1 %5580  ;;  %v8947_v42 = vsel %vm5133_vm15, %v5764_v48, %v5467_v2  ;;  %v5781_v20 = vsel %vm5133_vm15, %v8827_v18, %v5467_v2 }
 0x4df   : > { %v5817_v21 = vsel %vm5160_vm2, %v5801_v57, %v5581_v60  ;;  %v5498_v16 = vpop.permute.xlu0 %5497 }
 0x4e0   : > { %v5833_v38 = vsel %vm5169_vm3, %v5817_v21, %v5608_v8  ;;  %v5793_v34 = vsel %vm5142_vm0, %v5777_v6, %v5498_v16 }
 0x4e3   : > { %5660 = vrot.lane.b32.xlu2 %v8613_v17, %s6885_s29 }
 0x4e4   : > { %5590 = vrot.lane.b32.xlu1 %v8474_v50, %s6883_s27 }
 0x4e5   : > { %5493 = vrot.lane.b32.xlu0 %v9483_v13, %s6881_s25  ;;  %v5622_v10 = vpop.permute.xlu2 %5621 }
 0x4e6   : > { %v5606_v7 = vpop.permute.xlu1 %5605 }
 0x4e7   : > { %v5549_v48 = vpop.permute.xlu0 %5548 }
 0x4e8   : > { %v5809_v18 = vsel %vm5151_vm1, %v5793_v34, %v5549_v48 }
 0x4e9   : > { %v5825_v46 = vsel %vm5160_vm2, %v5809_v18, %v5589_v40  ;;  %v4581_v40 = vld [vmem:[%s7659_s15 + $0x1d8] sm:$0x3] }
 0x4eb   : > { %5542 = vrot.lane.b32.xlu2 %v9485_v44, %s6882_s26 }
 0x4ec   : > { %5468 = vrot.lane.b32.xlu1 %v5453_v63, %s6880_s24  ;;  %v5816_v63 = vsel %vm5160_vm2, %v5800_v33, %v5581_v60 }
 0x4ed   : > { %5662 = vrot.lane.b32.xlu0 %v8604_v22, %s6885_s29  ;;  %v5506_v50 = vpop.permute.xlu2 %5505  ;;  %v5832_v22 = vsel %vm5169_vm3, %v5816_v63, %v5606_v7 }
 0x4ee   : > { %v5490_v17 = vpop.permute.xlu1 %5489  ;;  %v8970_v13 = vsel %vm5142_vm0, %v5781_v20, %v5506_v50 }
 0x4ef   : > { %v5488_v24 = vpop.permute.xlu0 %5487  ;;  %v5789_v60 = vsel %vm5142_vm0, %v8906_v47, %v5490_v17 }
 0x4f0   : > { %v5788_v16 = vsel %vm5142_vm0, %v8903_v58, %v5488_v24 }
 0x4f3   : > { %5627 = vrot.lane.b32.xlu2 %v8571_v27, %s6884_s28 }
 0x4f4   : > { %5625 = vrot.lane.b32.xlu1 %v8459_v56, %s6884_s28 }
 0x4f5   : > { %5544 = vrot.lane.b32.xlu0 %v9484_v25, %s6882_s26  ;;  %v5675_v44 = vpop.permute.xlu2 %5674 }
 0x4f6   : > { %v5659_v29 = vpop.permute.xlu1 %5658 }
 0x4f7   : > { %v5849_v19 = vsel %vm5178_vm4, %v5833_v38, %v5659_v29  ;;  %v5657_v9 = vpop.permute.xlu0 %5656 }
 0x4f8   : > { %v5881_v0 = vrot.slane %v5849_v19, 1  ;;  %v5848_v28 = vsel %vm5178_vm4, %v5832_v22, %v5657_v9 }
 0x4f9   : > { %v5880_v55 = vrot.slane %v5848_v28, 1 }
 0x4fb   : > { %5586 = vrot.lane.b32.xlu2 %v8480_v32, %s6883_s27  ;;  %v5882_v56 = vsel %vm4598_vm9, %v5880_v55, %v5881_v0 }
 0x4fc   : > { %5509 = vrot.lane.b32.xlu1 %v8889_v41, %s6881_s25 }
 0x4fd   : > { %5507 = vrot.lane.b32.xlu0 %v8856_v62, %s6881_s25  ;;  %v5614_v27 = vpop.permute.xlu2 %5613 }
 0x4fe   : > { %v5541_v25 = vpop.permute.xlu1 %5540 }
 0x4ff   : > { %v5539_v8 = vpop.permute.xlu0 %5538  ;;  %v5805_v21 = vsel %vm5151_vm1, %v5789_v60, %v5541_v25  ;;  %v5942_v60 = vld [vmem:[%s9358_s1 + $0x28] sm:$0xff] }
 0x503   : > { %5558 = vrot.lane.b32.xlu2 %v8916_v45, %s6882_s26  ;;  %v5840_v45 = vsel %vm5169_vm3, %v8936_v11, %v5622_v10  ;;  %v5804_v10 = vsel %vm5151_vm1, %v5788_v16, %v5539_v8 }
 0x504   : > { %5678 = vrot.lane.b32.xlu1 %v8669_v15, %s6885_s29 }
 0x505   : > { %5676 = vrot.lane.b32.xlu0 %v8679_v36, %s6885_s29  ;;  %v5486_v32 = vpop.permute.xlu2 %5485 }
 0x506   : > { %v8995_v1 = vpop.permute.xlu1 %5503  ;;  %v5787_v41 = vsel %vm5142_vm0, %v8912_v37, %v5486_v32 }
 0x507   : > { %v5624_v62 = vpop.permute.xlu0 %5623 }
 0x508   : > { %v5841_v5 = vsel %vm5169_vm3, %v5825_v46, %v5624_v62 }
 0x509   : > { %v5857_v15 = vsel %vm5178_vm4, %v5841_v5, %v5675_v44 }
 0x50a   : > { %v5893_v31 = vrot.slane %v5857_v15, 1  ;;  %v5950_v15 = vld [vmem:[%s9358_s1 + $0x68] sm:$0xf] }
 0x50b   : > { %5619 = vrot.lane.b32.xlu2 %v8535_v59, %s6884_s28  ;;  %v5579_v59 = vrot.slane %v4580_v26, 7  ;;  %6734 = vmatpush.msk.msra.mxu2 %vm5976_vm10, %v5950_v15 }
 0x50c   : > { %5617 = vrot.lane.b32.xlu1 %v8467_v49, %s6884_s28  ;;  %6719 = vmatpush.msk.msra.mxu0 %vm5976_vm10, %v5950_v15 }
 0x50d   : > { %5560 = vrot.lane.b32.xlu0 %v8894_v53, %s6882_s26  ;;  %v5667_v36 = vpop.permute.xlu2 %5666  ;;  %v5654_v53 = vrot.slane %v4581_v40, 1  ;;  %6733 = vmatpush.msk.msra.mxu1 %vm5976_vm10, %v5950_v15 }
 0x50e   : > { %v5673_v37 = vpop.permute.xlu1 %5672  ;;  %6735 = vmatpush.msk.msra.mxu3 %vm5976_vm10, %v5950_v15  ;;  %vm5928_vm10 = vcmask 523264  }
 0x50f   : > { %v5856_v35 = vsel %vm5178_vm4, %v5840_v45, %v5673_v37  ;;  %v5585_v6 = vpop.permute.xlu0 %5584  ;;  %v5655_v2 = vsel %vm4598_vm9, %v5653_v23, %v5654_v53 }
 0x510   : > { %v5892_v61 = vrot.slane %v5856_v35, 1  ;;  %v5821_v38 = vsel %vm5160_vm2, %v5805_v21, %v5585_v6  ;;  %v5820_v34 = vsel %vm5160_vm2, %v5804_v10, %v5585_v6  ;;  %v5949_v6 = vld [vmem:[%s9358_s1 + $0x60] sm:$0xff] }
 0x511   : > { %v5836_v58 = vsel %vm5169_vm3, %v5820_v34, %v5614_v27  ;;  %6737 = vmatpush.msra.mxu2 %v5949_v6  ;;  %5983 = vmatpush.msra.mxu0 %v5949_v6  ;;  %v5940_v34 = vld [vmem:[%s9358_s1 + $0x18] sm:$0xff] }
 0x512   : > { %v5894_v49 = vsel %vm4598_vm9, %v5892_v61, %v5893_v31  ;;  %6736 = vmatpush.msra.mxu1 %v5949_v6  ;;  %6738 = vmatpush.msra.mxu3 %v5949_v6 }
 0x513   : > { %5670 = vrot.lane.b32.xlu2 %v8618_v54, %s6885_s29 }
 0x514   : > { %5668 = vrot.lane.b32.xlu1 %v8631_v30, %s6885_s29 }
 0x515   : > { %5594 = vrot.lane.b32.xlu0 %v5579_v59, %s6883_s27  ;;  %v5537_v11 = vpop.permute.xlu2 %5536  ;;  %v5948_v59 = vld [vmem:[%s9358_s1 + $0x58] sm:$0xff] }
 0x516   : > { %v5557_v57 = vpop.permute.xlu1 %5556  ;;  %v9019_v39 = vsel %vm5151_vm1, %v5787_v41, %v5537_v11  ;;  %6740 = vmatpush.msra.mxu2 %v5948_v59  ;;  %5984 = vmatpush.msra.mxu0 %v5948_v59 }
 0x517   : > { %v5555_v33 = vpop.permute.xlu0 %5554  ;;  %6739 = vmatpush.msra.mxu1 %v5948_v59  ;;  %6741 = vmatpush.msra.mxu3 %v5948_v59  ;;  %v9495_v59 = vld [vmem:[#allocation42_spill] sm:$0xff] }
 0x51b   : > { %5684 = vrot.lane.b32.xlu2 %v5655_v2, %s6885_s29  ;;  %v5944_v2 = vld [vmem:[%s9358_s1 + $0x38] sm:$0xff] }
 0x51c   : > { %5635 = vrot.lane.b32.xlu1 %v4581_v40, %s6884_s28  ;;  %v5947_v40 = vld [vmem:[%s9358_s1 + $0x50] sm:$0xff] }
 0x51d   : > { %5633 = vrot.lane.b32.xlu0 %v4580_v26, %s6884_s28  ;;  %v5500_v54 = vpop.permute.xlu2 %5499  ;;  %6743 = vmatpush.msra.mxu2 %v5947_v40 }
 0x51e   : > { %v9025_v30 = vpop.permute.xlu1 %5483  ;;  %5985 = vmatpush.msra.mxu0 %v5947_v40  ;;  %6742 = vmatpush.msra.mxu1 %v5947_v40 }
 0x51f   : > { %v5616_v20 = vpop.permute.xlu0 %5615  ;;  %6744 = vmatpush.msra.mxu3 %v5947_v40  ;;  %v5786_v10 = vsel %vm5142_vm0, %v8909_v52, %v9025_v30  ;;  %v5938_v30 = vld [vmem:[%s9358_s1 + $0x8] sm:$0xff] }
 0x520   : > { %v5837_v7 = vsel %vm5169_vm3, %v5821_v38, %v5616_v20  ;;  %v5941_v38 = vld [vmem:[%s9358_s1 + $0x20] sm:$0xff] }
 0x521   : > { %v5853_v47 = vsel %vm5178_vm4, %v5837_v7, %v5667_v36  ;;  %v5813_v36 = vsel %vm5151_vm1, %v8970_v13, %v5557_v57 }
 0x522   : > { %v5887_v17 = vrot.slane %v5853_v47, 1  ;;  %v5939_v47 = vld [vmem:[%s9358_s1 + $0x10] sm:$0xff] }
 0x523   : > { %5912 = vrot.lane.b32.xlu2 %v5894_v49, %s6891_s11 }
 0x524   : > { %5904 = vrot.lane.b32.xlu1 %v5882_v56, %s6891_s11 }
 0x525   : > { %5686 = vrot.lane.b32.xlu0 %v5654_v53, %s6885_s29  ;;  %v5681_v48 = vpop.permute.xlu2 %5680  ;;  %v5946_v53 = vld [vmem:[%s9358_s1 + $0x48] sm:$0xff] }
 0x526   : > { %v5665_v18 = vpop.permute.xlu1 %5664  ;;  %6746 = vmatpush.msra.mxu2 %v5946_v53  ;;  %5986 = vmatpush.msra.mxu0 %v5946_v53 }
 0x527   : > { %v5852_v46 = vsel %vm5178_vm4, %v5836_v58, %v5665_v18  ;;  %v5593_v50 = vpop.permute.xlu0 %5592  ;;  %6745 = vmatpush.msra.mxu1 %v5946_v53  ;;  %6747 = vmatpush.msra.mxu3 %v5946_v53  ;;  %v9496_v53 = vld [vmem:[#allocation51_spill] sm:$0xff] }
 0x528   : > { %v5886_v24 = vrot.slane %v5852_v46, 1 }
 0x52a   : > { %v5888_v44 = vsel %vm4598_vm9, %v5886_v24, %v5887_v17 }
 0x52d   : > { %5908 = vrot.lane.b32.xlu0 %v5888_v44, %s6891_s11  ;;  %v5553_v63 = vpop.permute.xlu2 %5552  ;;  %v5937_v44 = vld [vmem:[%s9358_s1] sm:$0xff] }
 0x52e   : > { %v9044_v29 = vpop.permute.xlu1 %5534 }
 0x52f   : > { %v5465_v22 = vpop.permute.xlu0 %5464  ;;  %v5802_v7 = vsel %vm5151_vm1, %v5786_v10, %v9044_v29 }
 0x530   : > { %v5778_v19 = vsel %vm5133_vm15, %v8815_v4, %v5465_v22  ;;  %v5779_v9 = vsel %vm5133_vm15, %v8873_v12, %v5465_v22  ;;  %v5796_v4 = vsel %vm5142_vm0, %v8947_v42, %v8995_v1  ;;  %v5829_v1 = vsel %vm5160_vm2, %v5813_v36, %v5593_v50 }
 0x531   : > { %v9051_v0 = vsel %vm5142_vm0, %v5778_v19, %v5500_v54  ;;  %v5812_v41 = vsel %vm5151_vm1, %v5796_v4, %v5555_v33  ;;  %v5945_v33 = vld [vmem:[%s9358_s1 + $0x40] sm:$0xff]  ;;  %v5943_v54 = vld [vmem:[%s9358_s1 + $0x30] sm:$0xff]  ;;  %v9489_v4 = vld [vmem:[#allocation8_spill] sm:$0xff] }
 0x532   : > { %6749 = vmatpush.msra.mxu2 %v5945_v33  ;;  %5987 = vmatpush.msra.mxu0 %v5945_v33  ;;  %v6832_v19 = vld [vmem:[%s7659_s15 + $0x40] sm:$0xff] }
 0x533   : > { %6748 = vmatpush.msra.mxu1 %v5945_v33  ;;  %6750 = vmatpush.msra.mxu3 %v5945_v33 }
 0x534   : > { %6752 = vmatpush.msra.mxu2 %v5944_v2  ;;  %5988 = vmatpush.msra.mxu0 %v5944_v2 }
 0x535   : > { %v5492_v28 = vpop.permute.xlu2 %5491  ;;  %6751 = vmatpush.msra.mxu1 %v5944_v2  ;;  %6753 = vmatpush.msra.mxu3 %v5944_v2 }
 0x536   : > { %v5632_v55 = vpop.permute.xlu1 %5631  ;;  %v9055_v56 = vsel %vm5142_vm0, %v8850_v51, %v5492_v28  ;;  %v5828_v51 = vsel %vm5160_vm2, %v5812_v41, %v5593_v50  ;;  %6755 = vmatpush.msra.mxu2 %v5943_v54  ;;  %5989 = vmatpush.msra.mxu0 %v5943_v54  ;;  %v9490_v41 = vld [vmem:[#allocation23_spill] sm:$0xff] }
 0x537   : > { %v5630_v27 = vpop.permute.xlu0 %5629  ;;  %v5845_v26 = vsel %vm5169_vm3, %v5829_v1, %v5632_v55  ;;  %6754 = vmatpush.msra.mxu1 %v5943_v54  ;;  %6756 = vmatpush.msra.mxu3 %v5943_v54  ;;  %v9492_v1 = vld [vmem:[#allocation25_spill] sm:$0xff] }
 0x538   : > { %v5844_v5 = vsel %vm5169_vm3, %v5828_v51, %v5630_v27  ;;  %6758 = vmatpush.msra.mxu2 %v5942_v60  ;;  %5990 = vmatpush.msra.mxu0 %v5942_v60  ;;  %v9488_v27 = vld [vmem:[#allocation11_spill] sm:$0xff] }
 0x539   : > { %v5860_v45 = vsel %vm5178_vm4, %v5844_v5, %v5681_v48  ;;  %6757 = vmatpush.msra.mxu1 %v5942_v60  ;;  %6759 = vmatpush.msra.mxu3 %v5942_v60  ;;  %v9491_v5 = vld [vmem:[#allocation28_spill] sm:$0xff] }
 0x53a   : > { %v5898_v31 = vrot.slane %v5860_v45, 1  ;;  %6761 = vmatpush.msra.mxu2 %v5941_v38  ;;  %5991 = vmatpush.msra.mxu0 %v5941_v38 }
 0x53b   : > { %6760 = vmatpush.msra.mxu1 %v5941_v38  ;;  %6762 = vmatpush.msra.mxu3 %v5941_v38 }
 0x53c   : > { %6764 = vmatpush.msra.mxu2 %v5940_v34  ;;  %5992 = vmatpush.msra.mxu0 %v5940_v34 }
 0x53d   : > { %v9057_v25 = vpop.permute.xlu2 %5660  ;;  %6763 = vmatpush.msra.mxu1 %v5940_v34  ;;  %6765 = vmatpush.msra.mxu3 %v5940_v34 }
 0x53e   : > { %v9059_v8 = vpop.permute.xlu1 %5582  ;;  %6767 = vmatpush.msra.mxu2 %v5939_v47  ;;  %5993 = vmatpush.msra.mxu0 %v5939_v47 }
 0x53f   : > { %v5502_v32 = vpop.permute.xlu0 %5501  ;;  %v5818_v48 = vsel %vm5160_vm2, %v5802_v7, %v9059_v8  ;;  %6766 = vmatpush.msra.mxu1 %v5939_v47  ;;  %v5819_v58 = vsel %vm5160_vm2, %v9019_v39, %v9059_v8  ;;  %6768 = vmatpush.msra.mxu3 %v5939_v47  ;;  %v9498_v47 = vld [vmem:[#allocation52_spill] sm:$0xff] }
 0x540   : > { %v5795_v12 = vsel %vm5142_vm0, %v5779_v9, %v5502_v32  ;;  %6770 = vmatpush.msra.mxu2 %v5938_v30  ;;  %5994 = vmatpush.msra.mxu0 %v5938_v30  ;;  %v9487_v9 = vld [vmem:[#allocation3_spill] sm:$0xff] }
 0x541   : > { %v9067_v62 = vsel %vm5151_vm1, %v5795_v12, %v5553_v63  ;;  %6769 = vmatpush.msra.mxu1 %v5938_v30  ;;  %6771 = vmatpush.msra.mxu3 %v5938_v30  ;;  %v5102_v28 = vsel %vm5097_vm11, %v6832_v19, %v9487_v9 }
 0x542   : > { %6773 = vmatpush.msra.mxu2 %v5937_v44  ;;  %5995 = vmatpush.msra.mxu0 %v5937_v44 }
 0x543   : > { %6772 = vmatpush.msra.mxu1 %v5937_v44  ;;  %6774 = vmatpush.msra.mxu3 %v5937_v44  ;;  %v9501_v44 = vld [vmem:[#allocation36_spill] sm:$0xff] }
 0x545   : > { %v9076_v42 = vpop.permute.xlu2 %5542 }
 0x546   : > { %v9080_v37 = vpop.permute.xlu1 %5550 }
 0x547   : > { %v5683_v35 = vpop.permute.xlu0 %5682  ;;  %v5810_v2 = vsel %vm5151_vm1, %v9051_v0, %v9080_v37  ;;  %v9499_v37 = vld [vmem:[#allocation24_spill] sm:$0xff] }
 0x548   : > { %v5861_v13 = vsel %vm5178_vm4, %v5845_v26, %v5683_v35  ;;  %v9493_v35 = vld [vmem:[#allocation40_spill] sm:$0xff] }
 0x549   : > { %v5899_v61 = vrot.slane %v5861_v13, 1 }
 0x54b   : > { %v5900_v49 = vsel %vm4598_vm9, %v5898_v31, %v5899_v61  ;;  %v9494_v31 = vld [vmem:[#allocation45_spill] sm:$0xff] }
 0x54c   : > { %5916 = vrot.lane.b32.xlu1 %v5900_v49, %s6891_s11 }
 0x54d   : > { %v9098_v23 = vpop.permute.xlu2 %5627 }
 0x54e   : > { %v5612_v11 = vpop.permute.xlu1 %5611 }
 0x54f   : > { %v5610_v57 = vpop.permute.xlu0 %5609  ;;  %v5835_v17 = vsel %vm5169_vm3, %v5819_v58, %v5612_v11  ;;  %v9500_v58 = vld [vmem:[#allocation27_spill] sm:$0xff] }
 0x550   : > { %v5834_v52 = vsel %vm5169_vm3, %v5818_v48, %v5610_v57  ;;  %v9497_v57 = vld [vmem:[#allocation54_spill] sm:$0xff] }
 0x551   : > { %v5850_v46 = vsel %vm5178_vm4, %v5834_v52, %v9057_v25  ;;  %v5111_v25 = vsel %vm5106_vm12, %v5102_v28, %v9488_v27 }
 0x552   : > { %v5883_v39 = vrot.slane %v5850_v46, 1  ;;  %v5120_v12 = vsel %vm5115_vm13, %v5111_v25, %v9489_v4  ;;  %v9504_v25 = vld [vmem:[#allocation4_spill] sm:$0xff] }
 0x553   : > { %v5129_v51 = vsel %vm5124_vm14, %v5120_v12, %v9490_v41  ;;  %v9506_v12 = vld [vmem:[#allocation20_spill] sm:$0xff] }
 0x554   : > { %v5138_v15 = vsel %vm5133_vm15, %v5129_v51, %v9491_v5 }
 0x555   : > { %v9112_v20 = vpop.permute.xlu2 %5586  ;;  %v5147_v45 = vsel %vm5142_vm0, %v5138_v15, %v9492_v1  ;;  %v9507_v1 = vld [vmem:[#allocation16_spill] sm:$0xff] }
 0x556   : > { %v9114_v21 = vpop.permute.xlu1 %5590  ;;  %v5156_v6 = vsel %vm5151_vm1, %v5147_v45, %v9493_v35 }
 0x557   : > { %v9116_v16 = vpop.permute.xlu0 %5493  ;;  %v5165_v61 = vsel %vm5160_vm2, %v5156_v6, %v9494_v31  ;;  %v5827_v49 = vsel %vm5160_vm2, %v9067_v62, %v9114_v21  ;;  %v5826_v60 = vsel %vm5160_vm2, %v5810_v2, %v9114_v21  ;;  %v9508_v31 = vld [vmem:[#allocation30_spill] sm:$0xff]  ;;  %v9512_v2 = vld [vmem:[#allocation15_spill] sm:$0xff] }
 0x558   : > { %v5174_v40 = vsel %vm5169_vm3, %v5165_v61, %v9495_v59  ;;  %v5843_v10 = vsel %vm5169_vm3, %v5827_v49, %v9098_v23 }
 0x559   : > { %v5183_v11 = vsel %vm5178_vm4, %v5174_v40, %v9496_v53  ;;  %v9510_v53 = vld [vmem:[#allocation5_spill] sm:$0xff] }
 0x55a   : > { %v5192_v33 = vsel %vm9383_vm6, %v5183_v11, %v9497_v57  ;;  %vm5951_vm6 = vcmask 883712   ;;  %v9511_v11 = vld [vmem:[#allocation9_spill] sm:$0xff] }
 0x55b   : > { %v5201_v48 = vsel %vm9384_vm5, %v5192_v33, %v9498_v47  ;;  %vm9502_vm5 = vcmask 490496  }
 0x55c   : > { %v5210_v30 = vsel %vm5205_vm7, %v5201_v48, %v9499_v37 }
 0x55d   : > { %v9138_v18 = vpop.permute.xlu2 %5558  ;;  %v5219_v46 = vsel %vm5214_vm8, %v5210_v30, %v9500_v58 }
 0x55e   : > { %v9145_v50 = vpop.permute.xlu1 %5468 }
 0x55f   : > { %v5663_v24 = vpop.permute.xlu0 %5662  ;;  %v5782_v48 = vsel %vm5133_vm15, %v8886_v3, %v9145_v50 }
 0x560   : > { %v5851_v63 = vsel %vm5178_vm4, %v5835_v17, %v5663_v24  ;;  %v5791_v17 = vsel %vm5142_vm0, %v8853_v43, %v9116_v16  ;;  %v9505_v16 = vld [vmem:[#allocation13_spill] sm:$0xff] }
 0x561   : > { %v5884_v29 = vrot.slane %v5851_v63, 1  ;;  %v5228_v63 = vsel %vm9502_vm5, %v5219_v46, %v9501_v44 }
 0x563   : > { %v5885_v22 = vsel %vm4598_vm9, %v5883_v39, %v5884_v29  ;;  %v6833_v39 = vld [vmem:[%s7659_s15] sm:$0xff]  ;;  %v9503_v29 = vld [vmem:[#allocation6_spill] sm:$0xff] }
 0x564   : > { %5906 = vrot.lane.b32.xlu2 %v5885_v22, %s6891_s11  ;;  %v5098_v22 = vsel %vm5097_vm11, %v6833_v39, %v9503_v29  ;;  %v9523_v29 = vld [vmem:[#allocation18_spill] sm:$0xff] }
 0x565   : > { %v5620_v55 = vpop.permute.xlu2 %5619 }
 0x566   : > { %v5626_v8 = vpop.permute.xlu1 %5625 }
 0x567   : > { %v5545_v32 = vpop.permute.xlu0 %5544  ;;  %v5842_v62 = vsel %vm5169_vm3, %v5826_v60, %v5626_v8  ;;  %v5107_v8 = vsel %vm5106_vm12, %v5098_v22, %v9504_v25 }
 0x568   : > { %v5807_v19 = vsel %vm5151_vm1, %v5791_v17, %v5545_v32  ;;  %v5116_v4 = vsel %vm5115_vm13, %v5107_v8, %v9505_v16  ;;  %v5806_v32 = vsel %vm5151_vm1, %v9055_v56, %v9076_v42  ;;  %v9509_v56 = vld [vmem:[#allocation37_spill] sm:$0xff]  ;;  %v9525_v8 = vld [vmem:[#allocation43_spill] sm:$0xff]  ;;  %v9526_v16 = vld [vmem:[#allocation48_spill] sm:$0xff] }
 0x569   : > { %v5823_v43 = vsel %vm5160_vm2, %v5807_v19, %v9112_v20  ;;  %v5125_v41 = vsel %vm5124_vm14, %v5116_v4, %v9506_v12  ;;  %v5822_v5 = vsel %vm5160_vm2, %v5806_v32, %v9112_v20  ;;  %v6834_v20 = vld [vmem:[%s7659_s15 + $0x20] sm:$0xff]  ;;  %v9524_v19 = vld [vmem:[#allocation29_spill] sm:$0xff]  ;;  %v9527_v12 = vld [vmem:[#allocation10_spill] sm:$0xff] }
 0x56a   : > { %v5839_v51 = vsel %vm5169_vm3, %v5823_v43, %v5620_v55  ;;  %v5134_v45 = vsel %vm5133_vm15, %v5125_v41, %v9507_v1 }
 0x56b   : > { %v5143_v61 = vsel %vm5142_vm0, %v5134_v45, %v9508_v31 }
 0x56c   : > { %v5152_v42 = vsel %vm5151_vm1, %v5143_v61, %v9509_v56  ;;  %v9533_v56 = vld [vmem:[#allocation7_spill] sm:$0xff] }
 0x56d   : > { %v5671_v36 = vpop.permute.xlu2 %5670 }
 0x56e   : > { %v9167_v26 = vpop.permute.xlu1 %5509  ;;  %v5855_v15 = vsel %vm5178_vm4, %v5839_v51, %v5671_v36  ;;  %v5100_v36 = vsel %vm5097_vm11, %v6834_v20, %v9510_v53  ;;  %vm9520_vm11 = vcmask 359424   ;;  %v9528_v51 = vld [vmem:[#allocation44_spill] sm:$0xff]  ;;  %v9536_v20 = vld [vmem:[#allocation14_spill] sm:$0xff] }
 0x56f   : > { %v9171_v13 = vpop.permute.xlu0 %5507  ;;  %v5890_v55 = vrot.slane %v5855_v15, 1  ;;  %v5109_v57 = vsel %vm5106_vm12, %v5100_v36, %v9511_v11  ;;  %vm9522_vm12 = vcmask 392192   ;;  %v9537_v36 = vld [vmem:[#allocation31_spill] sm:$0xff] }
 0x570   : > { %v5118_v60 = vsel %vm5115_vm13, %v5109_v57, %v9512_v2  ;;  %v5798_v37 = vsel %vm5142_vm0, %v5782_v48, %v9171_v13  ;;  %vm9529_vm13 = vmmov %vm9502_vm5 }
 0x571   : > { %v5814_v39 = vsel %vm5151_vm1, %v5798_v37, %v9138_v18 }
 0x575   : > { %v9187_v54 = vpop.permute.xlu2 %5684 }
 0x576   : > { %v5679_v38 = vpop.permute.xlu1 %5678 }
 0x577   : > { %v5859_v7 = vsel %vm5178_vm4, %v5843_v10, %v5679_v38  ;;  %v5677_v34 = vpop.permute.xlu0 %5676  ;;  %v9513_v38 = vld [vmem:[#allocation33_spill] sm:$0xff] }
 0x578   : > { %v5896_v52 = vrot.slane %v5859_v7, 1  ;;  %v5858_v0 = vsel %vm5178_vm4, %v5842_v62, %v5677_v34  ;;  %v5161_v10 = vsel %vm5160_vm2, %v5152_v42, %v9513_v38  ;;  %v9514_v62 = vld [vmem:[#allocation47_spill] sm:$0xff]  ;;  %v9515_v34 = vld [vmem:[#allocation50_spill] sm:$0xff] }
 0x579   : > { %v5895_v21 = vrot.slane %v5858_v0, 1  ;;  %v5170_v7 = vsel %vm5169_vm3, %v5161_v10, %v9514_v62  ;;  %v9539_v38 = vld [vmem:[#allocation22_spill] sm:$0xff]  ;;  %v9540_v62 = vld [vmem:[#allocation39_spill] sm:$0xff] }
 0x57a   : > { %v5179_v47 = vsel %vm5178_vm4, %v5170_v7, %v9515_v34 }
 0x57b   : > { %v5897_v23 = vsel %vm4598_vm9, %v5895_v21, %v5896_v52  ;;  %v9516_v52 = vld [vmem:[#allocation12_spill] sm:$0xff]  ;;  %v9517_v21 = vld [vmem:[#allocation26_spill] sm:$0xff] }
 0x57c   : > { %5914 = vrot.lane.b32.xlu0 %v5897_v23, %s6891_s11  ;;  %v5127_v0 = vsel %vm5124_vm14, %v5118_v60, %v9516_v52  ;;  %v9518_v23 = vld [vmem:[#allocation32_spill] sm:$0xff]  ;;  %vm9532_vm14 = vmmov %vm9520_vm11 }
 0x57d   : > { %v5913_v24 = vpop.permute.xlu2 %5912  ;;  %v5136_v58 = vsel %vm5133_vm15, %v5127_v0, %v9517_v21  ;;  %v9542_v0 = vld [vmem:[#allocation35_spill] sm:$0xff]  ;;  %v9543_v21 = vld [vmem:[#allocation41_spill] sm:$0xff] }
 0x57e   : > { %v5618_v9 = vpop.permute.xlu1 %5617  ;;  %v5933_v28 = vsel %vm5928_vm10, %v5228_v63, %v5913_v24  ;;  %v5145_v17 = vsel %vm5142_vm0, %v5136_v58, %v9518_v23  ;;  %v9519_v24 = vld [vmem:[#allocation49_spill] sm:$0xff]  ;;  %v9521_v63 = vld [vmem:[#allocation56_spill] sm:$0xff] }
 0x57f   : > { %v5561_v27 = vpop.permute.xlu0 %5560  ;;  %6724 = vmatmul.msk.f32.vlgmr.msra.gmra.mxu2 %vm5951_vm6, %v5933_v28  ;;  %v5838_v35 = vsel %vm5169_vm3, %v5822_v5, %v5618_v9  ;;  %v5188_v44 = vsel %vm9520_vm11, %v5179_v47, %v9519_v24  ;;  %v5154_v9 = vsel %vm5151_vm1, %v5145_v17, %v9524_v19  ;;  %v5783_v28 = vsel %vm5133_vm15, %v8882_v14, %v9145_v50  ;;  %vm9534_vm15 = vmmov %vm9522_vm12  ;;  %v9541_v47 = vld [vmem:[#allocation57_spill] sm:$0xff] }
 0x580   : > { %v5197_v3 = vsel %vm9522_vm12, %v5188_v44, %v9521_v63  ;;  %v5163_v43 = vsel %vm5160_vm2, %v5154_v9, %v9525_v8  ;;  %v5799_v18 = vsel %vm5142_vm0, %v5783_v28, %v9167_v26  ;;  %vm9538_vm0 = vmmov %vm9502_vm5 }
 0x581   : > { %v5206_v13 = vsel %vm5205_vm7, %v5197_v3, %v9523_v29  ;;  %v5172_v4 = vsel %vm5169_vm3, %v5163_v43, %v9526_v16  ;;  %v5815_v32 = vsel %vm5151_vm1, %v5799_v18, %v5561_v27  ;;  %v9531_v27 = vld [vmem:[#allocation53_spill] sm:$0xff] }
 0x582   : > { %v5215_v41 = vsel %vm5214_vm8, %v5206_v13, %v9527_v12 }
 0x583   : > { %v5224_v5 = vsel %vm9529_vm13, %v5215_v41, %v9528_v51 }
 0x586   : > { %v5669_v6 = vpop.permute.xlu1 %5668 }
 0x587   : > { %v5854_v59 = vsel %vm5178_vm4, %v5838_v35, %v5669_v6  ;;  %v5595_v40 = vpop.permute.xlu0 %5594  ;;  %v9530_v35 = vld [vmem:[#allocation46_spill] sm:$0xff] }
 0x588   : > { %v5889_v49 = vrot.slane %v5854_v59, 1  ;;  %v5830_v22 = vsel %vm5160_vm2, %v5814_v39, %v5595_v40  ;;  %v5831_v14 = vsel %vm5160_vm2, %v5815_v32, %v5595_v40  ;;  %v5181_v6 = vsel %vm5178_vm4, %v5172_v4, %v9530_v35 }
 0x589   : > { %v5190_v61 = vsel %vm9532_vm14, %v5181_v6, %v9531_v27 }
 0x58a   : > { %v5891_v33 = vsel %vm4598_vm9, %v5889_v49, %v5890_v55  ;;  %v9535_v55 = vld [vmem:[#allocation55_spill] sm:$0xff] }
 0x58b   : > { %5910 = vrot.lane.b32.xlu1 %v5891_v33, %s6891_s11 }
 0x58e   : > { %v5636_v30 = vpop.permute.xlu1 %5635 }
 0x58f   : > { %v5634_v46 = vpop.permute.xlu0 %5633  ;;  %v5847_v1 = vsel %vm5169_vm3, %v5831_v14, %v5636_v30 }
 0x590   : > { %v5846_v25 = vsel %vm5169_vm3, %v5830_v22, %v5634_v46 }
 0x591   : > { %v5862_v50 = vsel %vm5178_vm4, %v5846_v25, %v9187_v54  ;;  %v5199_v54 = vsel %vm9534_vm15, %v5190_v61, %v9533_v56 }
 0x592   : > { %v5901_v59 = vrot.slane %v5862_v50, 1  ;;  %v5208_v49 = vsel %vm5205_vm7, %v5199_v54, %v9535_v55 }
 0x593   : > { %v5217_v53 = vsel %vm5214_vm8, %v5208_v49, %v9536_v20 }
 0x594   : > { %v5226_v11 = vsel %vm9538_vm0, %v5217_v53, %v9537_v36 }
 0x596   : > { %v5905_v15 = vpop.permute.xlu1 %5904 }
 0x597   : > { %v5687_v26 = vpop.permute.xlu0 %5686  ;;  %v5929_v45 = vsel %vm5928_vm10, %v5224_v5, %v5905_v15 }
 0x598   : > { %v5863_v31 = vsel %vm5178_vm4, %v5847_v1, %v5687_v26  ;;  %6720 = vmatmul.msk.f32.vlgmr.msra.gmra.mxu0 %vm5951_vm6, %v5929_v45 }
 0x599   : > { %v5902_v40 = vrot.slane %v5863_v31, 1 }
 0x59b   : > { %v5903_v42 = vsel %vm4598_vm9, %v5901_v59, %v5902_v40  ;;  %vm6063_vm9 = vcmask 1040384  }
 0x59c   : > { %5918 = vrot.lane.b32.xlu2 %v5903_v42, %s6891_s11 }
 0x59f   : > { %v5909_v57 = vpop.permute.xlu0 %5908 }
 0x5a0   : > { %v5931_v33 = vsel %vm5928_vm10, %v5226_v11, %v5909_v57 }
 0x5a1   : > { %6722 = vmatmul.msk.f32.vlgmr.msra.gmra.mxu1 %vm5951_vm6, %v5931_v33 }
 0x5be   : > { %v5917_v2 = vpop.permute.xlu1 %5916  ;;  %v5907_v60 = vpop.permute.xlu2 %5906 }
 0x5bf   : > { %v5930_v10 = vsel %vm5928_vm10, %v9539_v38, %v5907_v60  ;;  %v5935_v7 = vsel %vm5928_vm10, %v9540_v62, %v5917_v2 }
 0x5c0   : > { %6721 = vmatmul.msk.f32.gmra.mxu0 %vm5951_vm6, %v5930_v10  ;;  %6726 = vmatmul.msk.f32.vlgmr.msra.gmra.mxu3 %vm5951_vm6, %v5935_v7 }
 0x5ee   : > { %v5915_v34 = vpop.permute.xlu0 %5914 }
 0x5ef   : > { %v5934_v48 = vsel %vm5928_vm10, %v9541_v47, %v5915_v34 }
 0x5f0   : > { %6725 = vmatmul.msk.f32.gmra.mxu2 %vm5951_vm6, %v5934_v48 }
 0x5f6   : > { %v5919_v52 = vpop.permute.xlu2 %5918 }
 0x5f7   : > { %v5936_v37 = vsel %vm5928_vm10, %v9542_v0, %v5919_v52 }
 0x5f8   : > { %6727 = vmatmul.msk.f32.gmra.mxu3 %vm5951_vm6, %v5936_v37 }
 0x5fd   : > { %v5911_v30 = vpop.permute.xlu1 %5910 }
 0x5fe   : > { %v5932_v58 = vsel %vm5928_vm10, %v9543_v21, %v5911_v30 }
 0x5ff   : > { %6723 = vmatmul.msk.f32.gmra.mxu1 %vm5951_vm6, %v5932_v58 }
 0x602   : > { %v6009_v46 = vpop.f32.mrf.mxu2 }
 0x603   : > { %6025 = vst [vmem:[%s6969_s13 + $0x20] sm:$0xff] %v6009_v46  ;;  %v6046_v18 = vmul.f32 %v6009_v46, %v6009_v46 }
 0x615   : > { %v5997_v23 = vpop.f32.mrf.mxu0 }
 0x616   : > { %6021 = vst [vmem:[%s6969_s13] sm:$0xff] %v5997_v23  ;;  %v6042_v39 = vmul.f32 %v5997_v23, %v5997_v23 }
 0x61e   : > { %v6003_v17 = vpop.f32.mrf.mxu1 }
 0x61f   : > { %6023 = vst [vmem:[%s6969_s13 + $0x10] sm:$0xff] %v6003_v17  ;;  %v6044_v22 = vmul.f32 %v6003_v17, %v6003_v17 }
 0x63d   : > { %v6000_v24 = vpop.f32.mrf.mxu0 }
 0x63e   : > { %6022 = vst [vmem:[%s6969_s13 + $0x8] sm:$0xff] %v6000_v24  ;;  %v6043_v3 = vmul.f32 %v6000_v24, %v6000_v24  ;;  %v6029_v29 = vadd.f32 %v6000_v24, %v5997_v23 }
 0x640   : > { %v6050_v13 = vadd.f32 %v6043_v3, %v6042_v39  ;;  %v6030_v9 = vadd.f32 %v6029_v29, %v6003_v17 }
 0x642   : > { %v6051_v43 = vadd.f32 %v6050_v13, %v6044_v22 }
 0x643   : > { %v6015_v44 = vpop.f32.mrf.mxu3 }
 0x644   : > { %6027 = vst [vmem:[%s6969_s13 + $0x30] sm:$0xff] %v6015_v44  ;;  %v6048_v51 = vmul.f32 %v6015_v44, %v6015_v44 }
 0x673   : > { %v6012_v63 = vpop.f32.mrf.mxu2 }
 0x674   : > { %6026 = vst [vmem:[%s6969_s13 + $0x28] sm:$0xff] %v6012_v63  ;;  %v6047_v12 = vmul.f32 %v6012_v63, %v6012_v63 }
 0x67b   : > { %v6018_v19 = vpop.f32.mrf.mxu3 }
 0x67c   : > { %6028 = vst [vmem:[%s6969_s13 + $0x38] sm:$0xff] %v6018_v19  ;;  %v6006_v28 = vpop.f32.mrf.mxu1  ;;  %v6049_v50 = vmul.f32 %v6018_v19, %v6018_v19 }
 0x67d   : > { %6024 = vst [vmem:[%s6969_s13 + $0x18] sm:$0xff] %v6006_v28  ;;  %v6031_v25 = vadd.f32 %v6030_v9, %v6006_v28  ;;  %v6045_v8 = vmul.f32 %v6006_v28, %v6006_v28 }
 0x67f   : > { %v6032_v16 = vadd.f32 %v6031_v25, %v6009_v46  ;;  %v6052_v4 = vadd.f32 %v6051_v43, %v6045_v8 }
 0x681   : > { %v6033_v41 = vadd.f32 %v6032_v16, %v6012_v63  ;;  %v6053_v32 = vadd.f32 %v6052_v4, %v6046_v18 }
 0x683   : > { %v6034_v5 = vadd.f32 %v6033_v41, %v6015_v44  ;;  %v6054_v14 = vadd.f32 %v6053_v32, %v6047_v12 }
 0x685   : > { %v6035_v15 = vadd.f32 %v6034_v5, %v6018_v19  ;;  %v6055_v1 = vadd.f32 %v6054_v14, %v6048_v51 }
 0x687   : > { %v6036_v26 = vrot.slane %v6035_v15, 4  ;;  %v6056_v45 = vadd.f32 %v6055_v1, %v6049_v50 }
 0x689   : > { %v6037_v35 = vadd.f32 %v6036_v26, %v6035_v15  ;;  %v6057_v6 = vrot.slane %v6056_v45, 4 }
 0x68b   : > { %v6038_v31 = vrot.slane %v6037_v35, 2  ;;  %v6058_v27 = vadd.f32 %v6057_v6, %v6056_v45 }
 0x68d   : > { %v6039_v61 = vadd.f32 %v6038_v31, %v6037_v35  ;;  %v6059_v59 = vrot.slane %v6058_v27, 2 }
 0x68f   : > { %v6040_v40 = vrot.slane %v6039_v61, 1  ;;  %v6060_v56 = vadd.f32 %v6059_v59, %v6058_v27 }
 0x691   : > { %v6061_v54 = vrot.slane %v6060_v56, 1  ;;  %v6041_v42 = vadd.f32 %v6040_v40, %v6039_v61  ;;  %6067 = sbr.rel (%p6206_p7) target bundleno = 1687 (0x697), region = 44 }
 0x693   : > { %v6062_v55 = vadd.f32 %v6061_v54, %v6060_v56 }
 0x695   : > { %v6064_v49 = vsel %vm6063_vm9, %v6041_v42, %v6062_v55 }
 0x696   : > { %6068 = vst [vmem:[%s6964_s10] sm:$0x3] %v6064_v49 }
 0x697 PF: > { %p6729_p8 = scmp.eq.s32.totalorder %s6857_s18, 0 }
 0x699   : > { %6072 = sbr.rel (%p6729_p8) target bundleno = 1698 (0x6a2), region = 48 }
 0x69e   : > { %v6073_v20 = vld [vmem:[%s6964_s10] sm:$0x3] }
 0x69f   : > { %v6074_v53 = vadd.f32 %v6073_v20, %v6064_v49 }
 0x6a1   : > { %6075 = vst [vmem:[%s6964_s10] sm:$0x3] %v6074_v53 }
 0x6a2 PF: > { %s16_s22 = sadd.s32 1, %s6873_s22   ;;  %s9544_s18 = smov %s6865_s20 }
 0x6a3   : > { %p13_p9 = scmp.ge.s32.totalorder %s16_s22, 10   ;;  %s9545_s19 = smov %s6869_s21 }
 0x6a4   : > { %s9546_s20 = smov %s9549_s2  ;;  %s9547_s21 = smov %s9553_s3 }
 0x6a5   :  { %15 = sbr.rel (!%p13_p9) target bundleno = 3 (0x3), region = 92 }

</bundles_post_ra>
